<compile_context>
chip_gen: v6e
topology: v6e:2x2x1
jax: 0.10.0
libtpu: 0.0.40
codegen_flags: <defaults>
</compile_context>

<pallas_src>
import jax
import jax.numpy as jnp
import numpy as np
from jax.experimental import pallas as pl
from jax.experimental.pallas import tpu as pltpu

N_CLASSES = 2
W_IN = 1004            # input signal width (H = 1)
C1, C2 = 64, 32        # conv channel counts
K = 3                  # kernel width (1, 3)
W1 = W_IN - 2          # 1002 : width after conv1 (valid conv)
P1 = W1 // 2 + 1       # 502  : width after maxpool(k=2, s=2, pad=1)
W2 = P1 - 2            # 500  : width after conv2
P2 = W2 // 2 + 1       # 251  : width after maxpool2
FC_IN = C2 * P2        # 8032 : torch.flatten size -> matches Linear(8032, 100)
FC_H = 100
assert FC_IN == 8032

# FC pipelining layout: each channel's 251 pooled values are padded to 256 lanes,
# 4 channels (1024 padded values) per grid step / per FC-weight chunk.
P2_PAD = 256
FC_PAD = C2 * P2_PAD   # 8192 rows of the padded, flattened FC weight
CCH = 4                # channels per FC chunk
KCH = CCH * P2_PAD     # 1024 contraction rows per chunk
NCHUNK = C2 // CCH     # 8 grid steps


def cnn_kernel(x_ref, w1_ref, b1_ref, w2_ref, b2_ref, wfc_ref, bfc_ref,
               wfc1_ref, bfc1_ref, out_ref, p2f_ref, acc_ref):
    i = pl.program_id(0)

    # ---- grid step 0: conv1 -> pool1 -> conv2 -> pool2, flatten into scratch.
    @pl.when(i == 0)
    def _front():
        x = x_ref[...]                                           # (1, W_IN)

        # conv1 (1 -> 64, kernel (1,3)) + ReLU: 3 shifted broadcast mul-adds (VPU).
        h1 = (w1_ref[:, 0:1] * x[:, 0:W1]
              + w1_ref[:, 1:2] * x[:, 1:W1 + 1]
              + w1_ref[:, 2:3] * x[:, 2:W1 + 2])                 # (C1, W1)
        h1 = jnp.maximum(h1 + b1_ref[...], 0.0)

        # maxpool1 (k=2, s=2, pad=1): pairwise max of the zero-padded row (zero
        # padding == -inf padding because values are post-ReLU), then stride-2
        # column selection as a matmul against an in-kernel 0/1 iota matrix.
        z1 = jnp.zeros((C1, 1), jnp.float32)
        m1 = jnp.maximum(jnp.concatenate([z1, h1], axis=1),
                         jnp.concatenate([h1, z1], axis=1))      # (C1, W1+1)
        r1 = jax.lax.broadcasted_iota(jnp.int32, (W1 + 1, P1), 0)
        c1i = jax.lax.broadcasted_iota(jnp.int32, (W1 + 1, P1), 1)
        s1 = jnp.where(r1 == 2 * c1i, 1.0, 0.0).astype(jnp.float32)
        p1 = jnp.dot(m1, s1, preferred_element_type=jnp.float32)   # (C1, P1)

        # conv2 (64 -> 32, kernel (1,3)) + ReLU: one fused K=192 MXU matmul over
        # the three shifted views stacked along the sublane (contraction) axis.
        p1cat = jnp.concatenate(
            [p1[:, 0:W2], p1[:, 1:W2 + 1], p1[:, 2:W2 + 2]], axis=0)  # (3*C1, W2)
        h2 = jnp.dot(w2_ref[...], p1cat, preferred_element_type=jnp.float32)
        h2 = jnp.maximum(h2 + b2_ref[...], 0.0)                  # (C2, W2)

        # maxpool2 (same scheme)
        z2 = jnp.zeros((C2, 1), jnp.float32)
        m2 = jnp.maximum(jnp.concatenate([z2, h2], axis=1),
                         jnp.concatenate([h2, z2], axis=1))      # (C2, W2+1)
        r2 = jax.lax.broadcasted_iota(jnp.int32, (W2 + 1, P2), 0)
        c2i = jax.lax.broadcasted_iota(jnp.int32, (W2 + 1, P2), 1)
        s2 = jnp.where(r2 == 2 * c2i, 1.0, 0.0).astype(jnp.float32)
        p2 = jnp.dot(m2, s2, preferred_element_type=jnp.float32)   # (C2, P2)

        # Flatten in torch order (c * P2 + w) into the lane-padded scratch rows
        # matching the pre-permuted FC weight: scratch row g holds channels
        # 4g..4g+3, channel slot cl at lanes [cl*256, cl*256 + 251).  Padding
        # lanes are zeroed so the matching zero weight rows contribute nothing.
        p2f_ref[...] = jnp.zeros_like(p2f_ref)
        for c in range(C2):
            g, cl = divmod(c, CCH)
            p2f_ref[g:g + 1, cl * P2_PAD:cl * P2_PAD + P2] = p2[c:c + 1, :]
        acc_ref[...] = jnp.zeros_like(acc_ref)

    # ---- every grid step: one fused (1, 1024) @ (1024, 100) bf16 FC chunk.
    # The wfc chunk for step i+1 is DMA-prefetched while step i computes.
    lhs = p2f_ref[pl.ds(i, 1), :].astype(jnp.bfloat16)            # (1, KCH)
    acc_ref[...] += jnp.dot(lhs, wfc_ref[...],
                            preferred_element_type=jnp.float32)   # (1, FC_H)

    # ---- last grid step: fc bias + ReLU, fc1, sigmoid.
    @pl.when(i == pl.num_programs(0) - 1)
    def _back():
        h3 = jnp.maximum(acc_ref[...] + bfc_ref[...], 0.0)        # (1, FC_H)
        logits = jnp.dot(h3, wfc1_ref[...],
                         preferred_element_type=jnp.float32) + bfc1_ref[...]
        out_ref[...] = jax.nn.sigmoid(logits)                     # (1, N_CLASSES)


def prepare_params(params):
    """One-time rearrangement of torch-shaped parameters into kernel layouts.

    Hoisted out of the per-call jitted path (perf review item): call once at
    parameter-load time and reuse the result for every forward.
    """
    (w1_t, b1, w2_t, b2, wfc_t, bfc, wfc1_t, bfc1) = params
    w1k = w1_t[:, 0, 0, :].astype(jnp.float32)                      # (64, 3)
    b1k = b1[:, None].astype(jnp.float32)                           # (64, 1)
    # conv2 taps stacked along the contraction axis: column index = k*64 + ci
    w2k = jnp.transpose(w2_t[:, :, 0, :], (0, 2, 1)).reshape(C2, K * C1)
    w2k = w2k.astype(jnp.float32)                                   # (32, 192)
    b2k = b2[:, None].astype(jnp.float32)                           # (32, 1)
    # fc weight: (100, 8032) -> (32, 251, 100) -> pad P2 to 256 -> (8192, 100) bf16
    wfc3 = jnp.transpose(wfc_t.reshape(FC_H, C2, P2), (1, 2, 0))    # (32, 251, 100)
    wfc_pad = jnp.pad(wfc3, ((0, 0), (0, P2_PAD - P2), (0, 0)))     # (32, 256, 100)
    wfck = wfc_pad.reshape(FC_PAD, FC_H).astype(jnp.bfloat16)       # (8192, 100)
    bfck = bfc[None, :].astype(jnp.float32)                         # (1, 100)
    wfc1k = wfc1_t.T.astype(jnp.float32)                            # (100, 2)
    bfc1k = bfc1[None, :].astype(jnp.float32)                       # (1, 2)
    return (w1k, b1k, w2k, b2k, wfck, bfck, wfc1k, bfc1k)


@jax.jit
def cnn_forward(x, kparams):
    (w1k, b1k, w2k, b2k, wfck, bfck, wfc1k, bfc1k) = kparams
    grid_spec = pltpu.PrefetchScalarGridSpec(
        num_scalar_prefetch=0,
        grid=(NCHUNK,),
        in_specs=[
            pl.BlockSpec((1, W_IN), lambda i: (0, 0)),          # x
            pl.BlockSpec((C1, K), lambda i: (0, 0)),            # conv1 weight
            pl.BlockSpec((C1, 1), lambda i: (0, 0)),            # conv1 bias
            pl.BlockSpec((C2, K * C1), lambda i: (0, 0)),       # conv2 weight (fused taps)
            pl.BlockSpec((C2, 1), lambda i: (0, 0)),            # conv2 bias
            pl.BlockSpec((KCH, FC_H), lambda i: (i, 0)),        # fc weight chunk (bf16)
            pl.BlockSpec((1, FC_H), lambda i: (0, 0)),          # fc bias
            pl.BlockSpec((FC_H, N_CLASSES), lambda i: (0, 0)),  # fc1 weight
            pl.BlockSpec((1, N_CLASSES), lambda i: (0, 0)),     # fc1 bias
        ],
        out_specs=pl.BlockSpec((1, N_CLASSES), lambda i: (0, 0)),
        scratch_shapes=[
            pltpu.VMEM((NCHUNK, KCH), jnp.float32),   # flattened pooled activations
            pltpu.VMEM((1, FC_H), jnp.float32),       # fc accumulator
        ],
    )
    out = pl.pallas_call(
        cnn_kernel,
        out_shape=jax.ShapeDtypeStruct((1, N_CLASSES), jnp.float32),
        grid_spec=grid_spec,
        compiler_params=pltpu.CompilerParams(
            dimension_semantics=("arbitrary",),
            vmem_limit_bytes=16 * 1024 * 1024),
    )(x, w1k, b1k, w2k, b2k, wfck, bfck, wfc1k, bfc1k)
    return out[0]                                               # (N_CLASSES,) like torch


def ref_forward(x, params):
    """Pure-JAX reference mirroring the PyTorch semantics (for validation)."""
    (w1_t, b1, w2_t, b2, wfc_t, bfc, wfc1_t, bfc1) = params
    hi = jax.lax.Precision.HIGHEST
    xr = x[0]
    xp = jnp.stack([xr[0:W1], xr[1:W1 + 1], xr[2:W1 + 2]], axis=0)        # (3, W1)
    h1 = jnp.maximum(jnp.dot(w1_t[:, 0, 0, :], xp, precision=hi) + b1[:, None], 0.0)
    h1p = jnp.pad(h1, ((0, 0), (1, 1)))                                   # zero pad ok (>=0)
    p1 = jnp.maximum(h1p[:, 0::2], h1p[:, 1::2])                          # (C1, P1)
    h2 = sum(jnp.dot(w2_t[:, :, 0, k], p1[:, k:k + W2], precision=hi) for k in range(K))
    h2 = jnp.maximum(h2 + b2[:, None], 0.0)
    h2p = jnp.pad(h2, ((0, 0), (1, 1)))
    p2 = jnp.maximum(h2p[:, 0::2], h2p[:, 1::2])                          # (C2, P2)
    flat = p2.reshape(-1)                                                 # torch.flatten order
    h3 = jnp.maximum(jnp.dot(wfc_t, flat, precision=hi) + bfc, 0.0)
    return jax.nn.sigmoid(jnp.dot(wfc1_t, h3, precision=hi) + bfc1)


if __name__ == "__main__":
    key = jax.random.PRNGKey(0)
    ks = jax.random.split(key, 9)

    def uinit(k, shape, fan_in):
        bound = 1.0 / np.sqrt(fan_in)
        return jax.random.uniform(k, shape, jnp.float32, -bound, bound)

    # Deterministic parameters in the torch module's shapes.
    params = (
        uinit(ks[0], (C1, 1, 1, K), 1 * 1 * K),        # conv1.weight (64,1,1,3)
        uinit(ks[1], (C1,), 1 * 1 * K),                # conv1.bias   (64,)
        uinit(ks[2], (C2, C1, 1, K), C1 * 1 * K),      # conv2.weight (32,64,1,3)
        uinit(ks[3], (C2,), C1 * 1 * K),               # conv2.bias   (32,)
        uinit(ks[4], (FC_H, FC_IN), FC_IN),            # fc.weight    (100,8032)
        uinit(ks[5], (FC_H,), FC_IN),                  # fc.bias      (100,)
        uinit(ks[6], (N_CLASSES, FC_H), FC_H),         # fc1.weight   (2,100)
        uinit(ks[7], (N_CLASSES,), FC_H),              # fc1.bias     (2,)
    )
    x = jax.random.normal(ks[8], (1, W_IN), jnp.float32)   # 2-D input, as the forward implies

    # One-time parameter preparation (outside the per-call jitted path).
    kparams = jax.block_until_ready(prepare_params(params))

    out = jax.block_until_ready(cnn_forward(x, kparams))
    ref = jax.block_until_ready(ref_forward(x, params))

    assert out.shape == (N_CLASSES,), out.shape
    assert np.allclose(np.asarray(out), np.asarray(ref), atol=2e-3, rtol=2e-3), (out, ref)
    print("KERNEL_OK")
</pallas_src>

<mosaic_0001>
module attributes {stable_mosaic.version = 11 : i64} {
  func.func @cnn_kernel(%arg0: i32, %arg1: memref<1x1004xf32, #tpu.memory_space<vmem>>, %arg2: memref<64x3xf32, #tpu.memory_space<vmem>>, %arg3: memref<64x1xf32, #tpu.memory_space<vmem>>, %arg4: memref<32x192xf32, #tpu.memory_space<vmem>>, %arg5: memref<32x1xf32, #tpu.memory_space<vmem>>, %arg6: memref<1024x100xbf16, #tpu.memory_space<vmem>>, %arg7: memref<1x100xf32, #tpu.memory_space<vmem>>, %arg8: memref<100x2xf32, #tpu.memory_space<vmem>>, %arg9: memref<1x2xf32, #tpu.memory_space<vmem>>, %arg10: memref<1x2xf32, #tpu.memory_space<vmem>>, %arg11: memref<8x1024xf32, #tpu.memory_space<vmem>>, %arg12: memref<1x100xf32, #tpu.memory_space<vmem>>) attributes {dimension_semantics = [#tpu.dimension_semantics<arbitrary>], iteration_bounds = array<i64: 8>, scalar_prefetch = 0 : i64, scratch_operands = 2 : i64, tpu.core_type = #tpu.core_type<tc>, window_params = [{pipeline_mode = #tpu.pipeline_mode<synchronous>, transform_indices = @transform_0, window_bounds = array<i64: 1, 1004>}, {pipeline_mode = #tpu.pipeline_mode<synchronous>, transform_indices = @transform_1, window_bounds = array<i64: 64, 3>}, {pipeline_mode = #tpu.pipeline_mode<synchronous>, transform_indices = @transform_2, window_bounds = array<i64: 64, 1>}, {pipeline_mode = #tpu.pipeline_mode<synchronous>, transform_indices = @transform_3, window_bounds = array<i64: 32, 192>}, {pipeline_mode = #tpu.pipeline_mode<synchronous>, transform_indices = @transform_4, window_bounds = array<i64: 32, 1>}, {transform_indices = @transform_5, window_bounds = array<i64: 1024, 100>}, {pipeline_mode = #tpu.pipeline_mode<synchronous>, transform_indices = @transform_6, window_bounds = array<i64: 1, 100>}, {pipeline_mode = #tpu.pipeline_mode<synchronous>, transform_indices = @transform_7, window_bounds = array<i64: 100, 2>}, {pipeline_mode = #tpu.pipeline_mode<synchronous>, transform_indices = @transform_8, window_bounds = array<i64: 1, 2>}, {pipeline_mode = #tpu.pipeline_mode<synchronous>, transform_indices = @transform_9, window_bounds = array<i64: 1, 2>}]} {
    %c0_i32 = arith.constant 0 : i32
    %0 = arith.cmpi eq, %arg0, %c0_i32 : i32
    %1 = arith.extui %0 : i1 to i32
    %c0_i32_0 = arith.constant 0 : i32
    %2 = arith.cmpi ne, %1, %c0_i32_0 : i32
    scf.if %2 {
      %c0_8 = arith.constant 0 : index
      %c0_9 = arith.constant 0 : index
      %14 = vector.load %arg1[%c0_8, %c0_9] : memref<1x1004xf32, #tpu.memory_space<vmem>>, vector<1x1004xf32>
      %c0_10 = arith.constant 0 : index
      %c0_11 = arith.constant 0 : index
      %15 = vector.load %arg2[%c0_10, %c0_11] : memref<64x3xf32, #tpu.memory_space<vmem>>, vector<64x1xf32>
      %16 = vector.extract_strided_slice %14 {offsets = [0, 0], sizes = [1, 1002], strides = [1, 1]} : vector<1x1004xf32> to vector<1x1002xf32>
      %17 = vector.broadcast %15 : vector<64x1xf32> to vector<64x1002xf32>
      %18 = vector.broadcast %16 : vector<1x1002xf32> to vector<64x1002xf32>
      %19 = arith.mulf %17, %18 : vector<64x1002xf32>
      %c0_12 = arith.constant 0 : index
      %c1 = arith.constant 1 : index
      %20 = vector.load %arg2[%c0_12, %c1] : memref<64x3xf32, #tpu.memory_space<vmem>>, vector<64x1xf32>
      %21 = vector.extract_strided_slice %14 {offsets = [0, 1], sizes = [1, 1002], strides = [1, 1]} : vector<1x1004xf32> to vector<1x1002xf32>
      %22 = vector.broadcast %20 : vector<64x1xf32> to vector<64x1002xf32>
      %23 = vector.broadcast %21 : vector<1x1002xf32> to vector<64x1002xf32>
      %24 = arith.mulf %22, %23 : vector<64x1002xf32>
      %25 = arith.addf %19, %24 : vector<64x1002xf32>
      %c0_13 = arith.constant 0 : index
      %c2 = arith.constant 2 : index
      %26 = vector.load %arg2[%c0_13, %c2] : memref<64x3xf32, #tpu.memory_space<vmem>>, vector<64x1xf32>
      %27 = vector.extract_strided_slice %14 {offsets = [0, 2], sizes = [1, 1002], strides = [1, 1]} : vector<1x1004xf32> to vector<1x1002xf32>
      %28 = vector.broadcast %26 : vector<64x1xf32> to vector<64x1002xf32>
      %29 = vector.broadcast %27 : vector<1x1002xf32> to vector<64x1002xf32>
      %30 = arith.mulf %28, %29 : vector<64x1002xf32>
      %31 = arith.addf %25, %30 : vector<64x1002xf32>
      %c0_14 = arith.constant 0 : index
      %c0_15 = arith.constant 0 : index
      %32 = vector.load %arg3[%c0_14, %c0_15] : memref<64x1xf32, #tpu.memory_space<vmem>>, vector<64x1xf32>
      %33 = vector.broadcast %32 : vector<64x1xf32> to vector<64x1002xf32>
      %34 = arith.addf %31, %33 : vector<64x1002xf32>
      %cst_16 = arith.constant 0.000000e+00 : f32
      %35 = vector.broadcast %cst_16 : f32 to vector<64x1002xf32>
      %36 = arith.maximumf %34, %35 : vector<64x1002xf32>
      %cst_17 = arith.constant 0.000000e+00 : f32
      %37 = vector.broadcast %cst_17 : f32 to vector<64x1xf32>
      %38 = tpu.concatenate %37, %36 in 1 : vector<64x1xf32>, vector<64x1002xf32> -> vector<64x1003xf32>
      %39 = tpu.concatenate %36, %37 in 1 : vector<64x1002xf32>, vector<64x1xf32> -> vector<64x1003xf32>
      %40 = arith.maximumf %38, %39 : vector<64x1003xf32>
      %41 = tpu.iota {dimensions = array<i32: 0>} : vector<1003x502xi32>
      %42 = tpu.iota {dimensions = array<i32: 1>} : vector<1003x502xi32>
      %c2_i32 = arith.constant 2 : i32
      %43 = vector.broadcast %c2_i32 : i32 to vector<1003x502xi32>
      %44 = arith.muli %43, %42 : vector<1003x502xi32>
      %45 = arith.cmpi eq, %41, %44 : vector<1003x502xi32>
      %cst_18 = arith.constant 1.000000e+00 : f32
      %cst_19 = arith.constant 0.000000e+00 : f32
      %46 = vector.broadcast %cst_18 : f32 to vector<1003x502xf32>
      %47 = vector.broadcast %cst_19 : f32 to vector<1003x502xf32>
      %48 = arith.select %45, %46, %47 : vector<1003x502xi1>, vector<1003x502xf32>
      %cst_20 = arith.constant dense<0.000000e+00> : vector<64x502xf32>
      %49 = tpu.matmul %40, %48, %cst_20 {dimension_numbers = #tpu.dot_dimension_numbers<[1], [0], [0], [1], [0, 0, 1, 1], [], []>} : vector<64x1003xf32>, vector<1003x502xf32>, vector<64x502xf32> -> vector<64x502xf32>
      %50 = vector.extract_strided_slice %49 {offsets = [0, 0], sizes = [64, 500], strides = [1, 1]} : vector<64x502xf32> to vector<64x500xf32>
      %51 = vector.extract_strided_slice %49 {offsets = [0, 1], sizes = [64, 500], strides = [1, 1]} : vector<64x502xf32> to vector<64x500xf32>
      %52 = vector.extract_strided_slice %49 {offsets = [0, 2], sizes = [64, 500], strides = [1, 1]} : vector<64x502xf32> to vector<64x500xf32>
      %53 = tpu.concatenate %50, %51, %52 in 0 : vector<64x500xf32>, vector<64x500xf32>, vector<64x500xf32> -> vector<192x500xf32>
      %c0_21 = arith.constant 0 : index
      %c0_22 = arith.constant 0 : index
      %54 = vector.load %arg4[%c0_21, %c0_22] : memref<32x192xf32, #tpu.memory_space<vmem>>, vector<32x192xf32>
      %cst_23 = arith.constant dense<0.000000e+00> : vector<32x500xf32>
      %55 = tpu.matmul %54, %53, %cst_23 {dimension_numbers = #tpu.dot_dimension_numbers<[1], [0], [0], [1], [0, 0, 1, 1], [], []>} : vector<32x192xf32>, vector<192x500xf32>, vector<32x500xf32> -> vector<32x500xf32>
      %c0_24 = arith.constant 0 : index
      %c0_25 = arith.constant 0 : index
      %56 = vector.load %arg5[%c0_24, %c0_25] : memref<32x1xf32, #tpu.memory_space<vmem>>, vector<32x1xf32>
      %57 = vector.broadcast %56 : vector<32x1xf32> to vector<32x500xf32>
      %58 = arith.addf %55, %57 : vector<32x500xf32>
      %cst_26 = arith.constant 0.000000e+00 : f32
      %59 = vector.broadcast %cst_26 : f32 to vector<32x500xf32>
      %60 = arith.maximumf %58, %59 : vector<32x500xf32>
      %cst_27 = arith.constant 0.000000e+00 : f32
      %61 = vector.broadcast %cst_27 : f32 to vector<32x1xf32>
      %62 = tpu.concatenate %61, %60 in 1 : vector<32x1xf32>, vector<32x500xf32> -> vector<32x501xf32>
      %63 = tpu.concatenate %60, %61 in 1 : vector<32x500xf32>, vector<32x1xf32> -> vector<32x501xf32>
      %64 = arith.maximumf %62, %63 : vector<32x501xf32>
      %65 = tpu.iota {dimensions = array<i32: 0>} : vector<501x251xi32>
      %66 = tpu.iota {dimensions = array<i32: 1>} : vector<501x251xi32>
      %c2_i32_28 = arith.constant 2 : i32
      %67 = vector.broadcast %c2_i32_28 : i32 to vector<501x251xi32>
      %68 = arith.muli %67, %66 : vector<501x251xi32>
      %69 = arith.cmpi eq, %65, %68 : vector<501x251xi32>
      %cst_29 = arith.constant 1.000000e+00 : f32
      %cst_30 = arith.constant 0.000000e+00 : f32
      %70 = vector.broadcast %cst_29 : f32 to vector<501x251xf32>
      %71 = vector.broadcast %cst_30 : f32 to vector<501x251xf32>
      %72 = arith.select %69, %70, %71 : vector<501x251xi1>, vector<501x251xf32>
      %cst_31 = arith.constant dense<0.000000e+00> : vector<32x251xf32>
      %73 = tpu.matmul %64, %72, %cst_31 {dimension_numbers = #tpu.dot_dimension_numbers<[1], [0], [0], [1], [0, 0, 1, 1], [], []>} : vector<32x501xf32>, vector<501x251xf32>, vector<32x251xf32> -> vector<32x251xf32>
      %cst_32 = arith.constant 0.000000e+00 : f32
      %74 = vector.broadcast %cst_32 : f32 to vector<8x1024xf32>
      %c0_33 = arith.constant 0 : index
      %c0_34 = arith.constant 0 : index
      %75 = vector.load %arg11[%c0_33, %c0_34] : memref<8x1024xf32, #tpu.memory_space<vmem>>, vector<8x1024xf32>
      tpu.vector_store %arg11[%c0_33, %c0_34], %74 {strides = array<i32>} : memref<8x1024xf32, #tpu.memory_space<vmem>>, vector<8x1024xf32>,
      %76 = vector.extract_strided_slice %73 {offsets = [0, 0], sizes = [1, 251], strides = [1, 1]} : vector<32x251xf32> to vector<1x251xf32>
      %c0_35 = arith.constant 0 : index
      %c0_36 = arith.constant 0 : index
      %77 = vector.load %arg11[%c0_35, %c0_36] : memref<8x1024xf32, #tpu.memory_space<vmem>>, vector<1x251xf32>
      tpu.vector_store %arg11[%c0_35, %c0_36], %76 {strides = array<i32>} : memref<8x1024xf32, #tpu.memory_space<vmem>>, vector<1x251xf32>,
      %78 = vector.extract_strided_slice %73 {offsets = [1, 0], sizes = [1, 251], strides = [1, 1]} : vector<32x251xf32> to vector<1x251xf32>
      %c0_37 = arith.constant 0 : index
      %c256 = arith.constant 256 : index
      %79 = vector.load %arg11[%c0_37, %c256] : memref<8x1024xf32, #tpu.memory_space<vmem>>, vector<1x251xf32>
      tpu.vector_store %arg11[%c0_37, %c256], %78 {strides = array<i32>} : memref<8x1024xf32, #tpu.memory_space<vmem>>, vector<1x251xf32>,
      %80 = vector.extract_strided_slice %73 {offsets = [2, 0], sizes = [1, 251], strides = [1, 1]} : vector<32x251xf32> to vector<1x251xf32>
      %c0_38 = arith.constant 0 : index
      %c512 = arith.constant 512 : index
      %81 = vector.load %arg11[%c0_38, %c512] : memref<8x1024xf32, #tpu.memory_space<vmem>>, vector<1x251xf32>
      tpu.vector_store %arg11[%c0_38, %c512], %80 {strides = array<i32>} : memref<8x1024xf32, #tpu.memory_space<vmem>>, vector<1x251xf32>,
      %82 = vector.extract_strided_slice %73 {offsets = [3, 0], sizes = [1, 251], strides = [1, 1]} : vector<32x251xf32> to vector<1x251xf32>
      %c0_39 = arith.constant 0 : index
      %c768 = arith.constant 768 : index
      %83 = vector.load %arg11[%c0_39, %c768] : memref<8x1024xf32, #tpu.memory_space<vmem>>, vector<1x251xf32>
      tpu.vector_store %arg11[%c0_39, %c768], %82 {strides = array<i32>} : memref<8x1024xf32, #tpu.memory_space<vmem>>, vector<1x251xf32>,
      %84 = vector.extract_strided_slice %73 {offsets = [4, 0], sizes = [1, 251], strides = [1, 1]} : vector<32x251xf32> to vector<1x251xf32>
      %c1_40 = arith.constant 1 : index
      %c0_41 = arith.constant 0 : index
      %85 = vector.load %arg11[%c1_40, %c0_41] : memref<8x1024xf32, #tpu.memory_space<vmem>>, vector<1x251xf32>
      tpu.vector_store %arg11[%c1_40, %c0_41], %84 {strides = array<i32>} : memref<8x1024xf32, #tpu.memory_space<vmem>>, vector<1x251xf32>,
      %86 = vector.extract_strided_slice %73 {offsets = [5, 0], sizes = [1, 251], strides = [1, 1]} : vector<32x251xf32> to vector<1x251xf32>
      %c1_42 = arith.constant 1 : index
      %c256_43 = arith.constant 256 : index
      %87 = vector.load %arg11[%c1_42, %c256_43] : memref<8x1024xf32, #tpu.memory_space<vmem>>, vector<1x251xf32>
      tpu.vector_store %arg11[%c1_42, %c256_43], %86 {strides = array<i32>} : memref<8x1024xf32, #tpu.memory_space<vmem>>, vector<1x251xf32>,
      %88 = vector.extract_strided_slice %73 {offsets = [6, 0], sizes = [1, 251], strides = [1, 1]} : vector<32x251xf32> to vector<1x251xf32>
      %c1_44 = arith.constant 1 : index
      %c512_45 = arith.constant 512 : index
      %89 = vector.load %arg11[%c1_44, %c512_45] : memref<8x1024xf32, #tpu.memory_space<vmem>>, vector<1x251xf32>
      tpu.vector_store %arg11[%c1_44, %c512_45], %88 {strides = array<i32>} : memref<8x1024xf32, #tpu.memory_space<vmem>>, vector<1x251xf32>,
      %90 = vector.extract_strided_slice %73 {offsets = [7, 0], sizes = [1, 251], strides = [1, 1]} : vector<32x251xf32> to vector<1x251xf32>
      %c1_46 = arith.constant 1 : index
      %c768_47 = arith.constant 768 : index
      %91 = vector.load %arg11[%c1_46, %c768_47] : memref<8x1024xf32, #tpu.memory_space<vmem>>, vector<1x251xf32>
      tpu.vector_store %arg11[%c1_46, %c768_47], %90 {strides = array<i32>} : memref<8x1024xf32, #tpu.memory_space<vmem>>, vector<1x251xf32>,
      %92 = vector.extract_strided_slice %73 {offsets = [8, 0], sizes = [1, 251], strides = [1, 1]} : vector<32x251xf32> to vector<1x251xf32>
      %c2_48 = arith.constant 2 : index
      %c0_49 = arith.constant 0 : index
      %93 = vector.load %arg11[%c2_48, %c0_49] : memref<8x1024xf32, #tpu.memory_space<vmem>>, vector<1x251xf32>
      tpu.vector_store %arg11[%c2_48, %c0_49], %92 {strides = array<i32>} : memref<8x1024xf32, #tpu.memory_space<vmem>>, vector<1x251xf32>,
      %94 = vector.extract_strided_slice %73 {offsets = [9, 0], sizes = [1, 251], strides = [1, 1]} : vector<32x251xf32> to vector<1x251xf32>
      %c2_50 = arith.constant 2 : index
      %c256_51 = arith.constant 256 : index
      %95 = vector.load %arg11[%c2_50, %c256_51] : memref<8x1024xf32, #tpu.memory_space<vmem>>, vector<1x251xf32>
      tpu.vector_store %arg11[%c2_50, %c256_51], %94 {strides = array<i32>} : memref<8x1024xf32, #tpu.memory_space<vmem>>, vector<1x251xf32>,
      %96 = vector.extract_strided_slice %73 {offsets = [10, 0], sizes = [1, 251], strides = [1, 1]} : vector<32x251xf32> to vector<1x251xf32>
      %c2_52 = arith.constant 2 : index
      %c512_53 = arith.constant 512 : index
      %97 = vector.load %arg11[%c2_52, %c512_53] : memref<8x1024xf32, #tpu.memory_space<vmem>>, vector<1x251xf32>
      tpu.vector_store %arg11[%c2_52, %c512_53], %96 {strides = array<i32>} : memref<8x1024xf32, #tpu.memory_space<vmem>>, vector<1x251xf32>,
      %98 = vector.extract_strided_slice %73 {offsets = [11, 0], sizes = [1, 251], strides = [1, 1]} : vector<32x251xf32> to vector<1x251xf32>
      %c2_54 = arith.constant 2 : index
      %c768_55 = arith.constant 768 : index
      %99 = vector.load %arg11[%c2_54, %c768_55] : memref<8x1024xf32, #tpu.memory_space<vmem>>, vector<1x251xf32>
      tpu.vector_store %arg11[%c2_54, %c768_55], %98 {strides = array<i32>} : memref<8x1024xf32, #tpu.memory_space<vmem>>, vector<1x251xf32>,
      %100 = vector.extract_strided_slice %73 {offsets = [12, 0], sizes = [1, 251], strides = [1, 1]} : vector<32x251xf32> to vector<1x251xf32>
      %c3 = arith.constant 3 : index
      %c0_56 = arith.constant 0 : index
      %101 = vector.load %arg11[%c3, %c0_56] : memref<8x1024xf32, #tpu.memory_space<vmem>>, vector<1x251xf32>
      tpu.vector_store %arg11[%c3, %c0_56], %100 {strides = array<i32>} : memref<8x1024xf32, #tpu.memory_space<vmem>>, vector<1x251xf32>,
      %102 = vector.extract_strided_slice %73 {offsets = [13, 0], sizes = [1, 251], strides = [1, 1]} : vector<32x251xf32> to vector<1x251xf32>
      %c3_57 = arith.constant 3 : index
      %c256_58 = arith.constant 256 : index
      %103 = vector.load %arg11[%c3_57, %c256_58] : memref<8x1024xf32, #tpu.memory_space<vmem>>, vector<1x251xf32>
      tpu.vector_store %arg11[%c3_57, %c256_58], %102 {strides = array<i32>} : memref<8x1024xf32, #tpu.memory_space<vmem>>, vector<1x251xf32>,
      %104 = vector.extract_strided_slice %73 {offsets = [14, 0], sizes = [1, 251], strides = [1, 1]} : vector<32x251xf32> to vector<1x251xf32>
      %c3_59 = arith.constant 3 : index
      %c512_60 = arith.constant 512 : index
      %105 = vector.load %arg11[%c3_59, %c512_60] : memref<8x1024xf32, #tpu.memory_space<vmem>>, vector<1x251xf32>
      tpu.vector_store %arg11[%c3_59, %c512_60], %104 {strides = array<i32>} : memref<8x1024xf32, #tpu.memory_space<vmem>>, vector<1x251xf32>,
      %106 = vector.extract_strided_slice %73 {offsets = [15, 0], sizes = [1, 251], strides = [1, 1]} : vector<32x251xf32> to vector<1x251xf32>
      %c3_61 = arith.constant 3 : index
      %c768_62 = arith.constant 768 : index
      %107 = vector.load %arg11[%c3_61, %c768_62] : memref<8x1024xf32, #tpu.memory_space<vmem>>, vector<1x251xf32>
      tpu.vector_store %arg11[%c3_61, %c768_62], %106 {strides = array<i32>} : memref<8x1024xf32, #tpu.memory_space<vmem>>, vector<1x251xf32>,
      %108 = vector.extract_strided_slice %73 {offsets = [16, 0], sizes = [1, 251], strides = [1, 1]} : vector<32x251xf32> to vector<1x251xf32>
      %c4 = arith.constant 4 : index
      %c0_63 = arith.constant 0 : index
      %109 = vector.load %arg11[%c4, %c0_63] : memref<8x1024xf32, #tpu.memory_space<vmem>>, vector<1x251xf32>
      tpu.vector_store %arg11[%c4, %c0_63], %108 {strides = array<i32>} : memref<8x1024xf32, #tpu.memory_space<vmem>>, vector<1x251xf32>,
      %110 = vector.extract_strided_slice %73 {offsets = [17, 0], sizes = [1, 251], strides = [1, 1]} : vector<32x251xf32> to vector<1x251xf32>
      %c4_64 = arith.constant 4 : index
      %c256_65 = arith.constant 256 : index
      %111 = vector.load %arg11[%c4_64, %c256_65] : memref<8x1024xf32, #tpu.memory_space<vmem>>, vector<1x251xf32>
      tpu.vector_store %arg11[%c4_64, %c256_65], %110 {strides = array<i32>} : memref<8x1024xf32, #tpu.memory_space<vmem>>, vector<1x251xf32>,
      %112 = vector.extract_strided_slice %73 {offsets = [18, 0], sizes = [1, 251], strides = [1, 1]} : vector<32x251xf32> to vector<1x251xf32>
      %c4_66 = arith.constant 4 : index
      %c512_67 = arith.constant 512 : index
      %113 = vector.load %arg11[%c4_66, %c512_67] : memref<8x1024xf32, #tpu.memory_space<vmem>>, vector<1x251xf32>
      tpu.vector_store %arg11[%c4_66, %c512_67], %112 {strides = array<i32>} : memref<8x1024xf32, #tpu.memory_space<vmem>>, vector<1x251xf32>,
      %114 = vector.extract_strided_slice %73 {offsets = [19, 0], sizes = [1, 251], strides = [1, 1]} : vector<32x251xf32> to vector<1x251xf32>
      %c4_68 = arith.constant 4 : index
      %c768_69 = arith.constant 768 : index
      %115 = vector.load %arg11[%c4_68, %c768_69] : memref<8x1024xf32, #tpu.memory_space<vmem>>, vector<1x251xf32>
      tpu.vector_store %arg11[%c4_68, %c768_69], %114 {strides = array<i32>} : memref<8x1024xf32, #tpu.memory_space<vmem>>, vector<1x251xf32>,
      %116 = vector.extract_strided_slice %73 {offsets = [20, 0], sizes = [1, 251], strides = [1, 1]} : vector<32x251xf32> to vector<1x251xf32>
      %c5 = arith.constant 5 : index
      %c0_70 = arith.constant 0 : index
      %117 = vector.load %arg11[%c5, %c0_70] : memref<8x1024xf32, #tpu.memory_space<vmem>>, vector<1x251xf32>
      tpu.vector_store %arg11[%c5, %c0_70], %116 {strides = array<i32>} : memref<8x1024xf32, #tpu.memory_space<vmem>>, vector<1x251xf32>,
      %118 = vector.extract_strided_slice %73 {offsets = [21, 0], sizes = [1, 251], strides = [1, 1]} : vector<32x251xf32> to vector<1x251xf32>
      %c5_71 = arith.constant 5 : index
      %c256_72 = arith.constant 256 : index
      %119 = vector.load %arg11[%c5_71, %c256_72] : memref<8x1024xf32, #tpu.memory_space<vmem>>, vector<1x251xf32>
      tpu.vector_store %arg11[%c5_71, %c256_72], %118 {strides = array<i32>} : memref<8x1024xf32, #tpu.memory_space<vmem>>, vector<1x251xf32>,
      %120 = vector.extract_strided_slice %73 {offsets = [22, 0], sizes = [1, 251], strides = [1, 1]} : vector<32x251xf32> to vector<1x251xf32>
      %c5_73 = arith.constant 5 : index
      %c512_74 = arith.constant 512 : index
      %121 = vector.load %arg11[%c5_73, %c512_74] : memref<8x1024xf32, #tpu.memory_space<vmem>>, vector<1x251xf32>
      tpu.vector_store %arg11[%c5_73, %c512_74], %120 {strides = array<i32>} : memref<8x1024xf32, #tpu.memory_space<vmem>>, vector<1x251xf32>,
      %122 = vector.extract_strided_slice %73 {offsets = [23, 0], sizes = [1, 251], strides = [1, 1]} : vector<32x251xf32> to vector<1x251xf32>
      %c5_75 = arith.constant 5 : index
      %c768_76 = arith.constant 768 : index
      %123 = vector.load %arg11[%c5_75, %c768_76] : memref<8x1024xf32, #tpu.memory_space<vmem>>, vector<1x251xf32>
      tpu.vector_store %arg11[%c5_75, %c768_76], %122 {strides = array<i32>} : memref<8x1024xf32, #tpu.memory_space<vmem>>, vector<1x251xf32>,
      %124 = vector.extract_strided_slice %73 {offsets = [24, 0], sizes = [1, 251], strides = [1, 1]} : vector<32x251xf32> to vector<1x251xf32>
      %c6 = arith.constant 6 : index
      %c0_77 = arith.constant 0 : index
      %125 = vector.load %arg11[%c6, %c0_77] : memref<8x1024xf32, #tpu.memory_space<vmem>>, vector<1x251xf32>
      tpu.vector_store %arg11[%c6, %c0_77], %124 {strides = array<i32>} : memref<8x1024xf32, #tpu.memory_space<vmem>>, vector<1x251xf32>,
      %126 = vector.extract_strided_slice %73 {offsets = [25, 0], sizes = [1, 251], strides = [1, 1]} : vector<32x251xf32> to vector<1x251xf32>
      %c6_78 = arith.constant 6 : index
      %c256_79 = arith.constant 256 : index
      %127 = vector.load %arg11[%c6_78, %c256_79] : memref<8x1024xf32, #tpu.memory_space<vmem>>, vector<1x251xf32>
      tpu.vector_store %arg11[%c6_78, %c256_79], %126 {strides = array<i32>} : memref<8x1024xf32, #tpu.memory_space<vmem>>, vector<1x251xf32>,
      %128 = vector.extract_strided_slice %73 {offsets = [26, 0], sizes = [1, 251], strides = [1, 1]} : vector<32x251xf32> to vector<1x251xf32>
      %c6_80 = arith.constant 6 : index
      %c512_81 = arith.constant 512 : index
      %129 = vector.load %arg11[%c6_80, %c512_81] : memref<8x1024xf32, #tpu.memory_space<vmem>>, vector<1x251xf32>
      tpu.vector_store %arg11[%c6_80, %c512_81], %128 {strides = array<i32>} : memref<8x1024xf32, #tpu.memory_space<vmem>>, vector<1x251xf32>,
      %130 = vector.extract_strided_slice %73 {offsets = [27, 0], sizes = [1, 251], strides = [1, 1]} : vector<32x251xf32> to vector<1x251xf32>
      %c6_82 = arith.constant 6 : index
      %c768_83 = arith.constant 768 : index
      %131 = vector.load %arg11[%c6_82, %c768_83] : memref<8x1024xf32, #tpu.memory_space<vmem>>, vector<1x251xf32>
      tpu.vector_store %arg11[%c6_82, %c768_83], %130 {strides = array<i32>} : memref<8x1024xf32, #tpu.memory_space<vmem>>, vector<1x251xf32>,
      %132 = vector.extract_strided_slice %73 {offsets = [28, 0], sizes = [1, 251], strides = [1, 1]} : vector<32x251xf32> to vector<1x251xf32>
      %c7 = arith.constant 7 : index
      %c0_84 = arith.constant 0 : index
      %133 = vector.load %arg11[%c7, %c0_84] : memref<8x1024xf32, #tpu.memory_space<vmem>>, vector<1x251xf32>
      tpu.vector_store %arg11[%c7, %c0_84], %132 {strides = array<i32>} : memref<8x1024xf32, #tpu.memory_space<vmem>>, vector<1x251xf32>,
      %134 = vector.extract_strided_slice %73 {offsets = [29, 0], sizes = [1, 251], strides = [1, 1]} : vector<32x251xf32> to vector<1x251xf32>
      %c7_85 = arith.constant 7 : index
      %c256_86 = arith.constant 256 : index
      %135 = vector.load %arg11[%c7_85, %c256_86] : memref<8x1024xf32, #tpu.memory_space<vmem>>, vector<1x251xf32>
      tpu.vector_store %arg11[%c7_85, %c256_86], %134 {strides = array<i32>} : memref<8x1024xf32, #tpu.memory_space<vmem>>, vector<1x251xf32>,
      %136 = vector.extract_strided_slice %73 {offsets = [30, 0], sizes = [1, 251], strides = [1, 1]} : vector<32x251xf32> to vector<1x251xf32>
      %c7_87 = arith.constant 7 : index
      %c512_88 = arith.constant 512 : index
      %137 = vector.load %arg11[%c7_87, %c512_88] : memref<8x1024xf32, #tpu.memory_space<vmem>>, vector<1x251xf32>
      tpu.vector_store %arg11[%c7_87, %c512_88], %136 {strides = array<i32>} : memref<8x1024xf32, #tpu.memory_space<vmem>>, vector<1x251xf32>,
      %138 = vector.extract_strided_slice %73 {offsets = [31, 0], sizes = [1, 251], strides = [1, 1]} : vector<32x251xf32> to vector<1x251xf32>
      %c7_89 = arith.constant 7 : index
      %c768_90 = arith.constant 768 : index
      %139 = vector.load %arg11[%c7_89, %c768_90] : memref<8x1024xf32, #tpu.memory_space<vmem>>, vector<1x251xf32>
      tpu.vector_store %arg11[%c7_89, %c768_90], %138 {strides = array<i32>} : memref<8x1024xf32, #tpu.memory_space<vmem>>, vector<1x251xf32>,
      %cst_91 = arith.constant 0.000000e+00 : f32
      %140 = vector.broadcast %cst_91 : f32 to vector<1x100xf32>
      %c0_92 = arith.constant 0 : index
      %c0_93 = arith.constant 0 : index
      %141 = vector.load %arg12[%c0_92, %c0_93] : memref<1x100xf32, #tpu.memory_space<vmem>>, vector<1x100xf32>
      tpu.vector_store %arg12[%c0_92, %c0_93], %140 {strides = array<i32>} : memref<1x100xf32, #tpu.memory_space<vmem>>, vector<1x100xf32>,
    } else {
    }
    %3 = arith.index_cast %arg0 : i32 to index
    %c0 = arith.constant 0 : index
    %4 = vector.load %arg11[%3, %c0] : memref<8x1024xf32, #tpu.memory_space<vmem>>, vector<1x1024xf32>
    %5 = arith.truncf %4 : vector<1x1024xf32> to vector<1x1024xbf16>
    %c0_1 = arith.constant 0 : index
    %c0_2 = arith.constant 0 : index
    %6 = vector.load %arg12[%c0_1, %c0_2] : memref<1x100xf32, #tpu.memory_space<vmem>>, vector<1x100xf32>
    %c0_3 = arith.constant 0 : index
    %c0_4 = arith.constant 0 : index
    %7 = vector.load %arg6[%c0_3, %c0_4] : memref<1024x100xbf16, #tpu.memory_space<vmem>>, vector<1024x100xbf16>
    %cst = arith.constant dense<0.000000e+00> : vector<1x100xf32>
    %8 = tpu.matmul %5, %7, %cst {dimension_numbers = #tpu.dot_dimension_numbers<[1], [0], [0], [1], [0, 0, 1, 1], [], []>} : vector<1x1024xbf16>, vector<1024x100xbf16>, vector<1x100xf32> -> vector<1x100xf32>
    %9 = arith.addf %6, %8 : vector<1x100xf32>
    %c0_5 = arith.constant 0 : index
    %c0_6 = arith.constant 0 : index
    %10 = vector.load %arg12[%c0_5, %c0_6] : memref<1x100xf32, #tpu.memory_space<vmem>>, vector<1x100xf32>
    tpu.vector_store %arg12[%c0_5, %c0_6], %9 {strides = array<i32>} : memref<1x100xf32, #tpu.memory_space<vmem>>, vector<1x100xf32>,
    %c7_i32 = arith.constant 7 : i32
    %11 = arith.cmpi eq, %arg0, %c7_i32 : i32
    %12 = arith.extui %11 : i1 to i32
    %c0_i32_7 = arith.constant 0 : i32
    %13 = arith.cmpi ne, %12, %c0_i32_7 : i32
    scf.if %13 {
      %c0_8 = arith.constant 0 : index
      %c0_9 = arith.constant 0 : index
      %14 = vector.load %arg12[%c0_8, %c0_9] : memref<1x100xf32, #tpu.memory_space<vmem>>, vector<1x100xf32>
      %c0_10 = arith.constant 0 : index
      %c0_11 = arith.constant 0 : index
      %15 = vector.load %arg7[%c0_10, %c0_11] : memref<1x100xf32, #tpu.memory_space<vmem>>, vector<1x100xf32>
      %16 = arith.addf %14, %15 : vector<1x100xf32>
      %cst_12 = arith.constant 0.000000e+00 : f32
      %17 = vector.broadcast %cst_12 : f32 to vector<1x100xf32>
      %18 = arith.maximumf %16, %17 : vector<1x100xf32>
      %c0_13 = arith.constant 0 : index
      %c0_14 = arith.constant 0 : index
      %19 = vector.load %arg8[%c0_13, %c0_14] : memref<100x2xf32, #tpu.memory_space<vmem>>, vector<100x2xf32>
      %cst_15 = arith.constant dense<0.000000e+00> : vector<1x2xf32>
      %20 = tpu.matmul %18, %19, %cst_15 {dimension_numbers = #tpu.dot_dimension_numbers<[1], [0], [0], [1], [0, 0, 1, 1], [], []>} : vector<1x100xf32>, vector<100x2xf32>, vector<1x2xf32> -> vector<1x2xf32>
      %c0_16 = arith.constant 0 : index
      %c0_17 = arith.constant 0 : index
      %21 = vector.load %arg9[%c0_16, %c0_17] : memref<1x2xf32, #tpu.memory_space<vmem>>, vector<1x2xf32>
      %22 = arith.addf %20, %21 : vector<1x2xf32>
      %23 = arith.negf %22 : vector<1x2xf32>
      %24 = math.exp %23 : vector<1x2xf32>
      %cst_18 = arith.constant 1.000000e+00 : f32
      %25 = vector.broadcast %cst_18 : f32 to vector<1x2xf32>
      %26 = arith.addf %25, %24 : vector<1x2xf32>
      %27 = arith.divf %25, %26 : vector<1x2xf32>
      %c0_19 = arith.constant 0 : index
      %c0_20 = arith.constant 0 : index
      %28 = vector.load %arg10[%c0_19, %c0_20] : memref<1x2xf32, #tpu.memory_space<vmem>>, vector<1x2xf32>
      tpu.vector_store %arg10[%c0_19, %c0_20], %27 {strides = array<i32>} : memref<1x2xf32, #tpu.memory_space<vmem>>, vector<1x2xf32>,
    } else {
    }
    return
  }
  func.func @transform_0(%arg0: i32) -> (i32, i32) {
    %c0_i32 = arith.constant 0 : i32
    %c0_i32_0 = arith.constant 0 : i32
    %c0_i32_1 = arith.constant 0 : i32
    return %c0_i32, %c0_i32_0 : i32, i32
  }
  func.func @transform_1(%arg0: i32) -> (i32, i32) {
    %c0_i32 = arith.constant 0 : i32
    %c0_i32_0 = arith.constant 0 : i32
    %c0_i32_1 = arith.constant 0 : i32
    return %c0_i32, %c0_i32_0 : i32, i32
  }
  func.func @transform_2(%arg0: i32) -> (i32, i32) {
    %c0_i32 = arith.constant 0 : i32
    %c0_i32_0 = arith.constant 0 : i32
    %c0_i32_1 = arith.constant 0 : i32
    return %c0_i32, %c0_i32_0 : i32, i32
  }
  func.func @transform_3(%arg0: i32) -> (i32, i32) {
    %c0_i32 = arith.constant 0 : i32
    %c0_i32_0 = arith.constant 0 : i32
    %c0_i32_1 = arith.constant 0 : i32
    return %c0_i32, %c0_i32_0 : i32, i32
  }
  func.func @transform_4(%arg0: i32) -> (i32, i32) {
    %c0_i32 = arith.constant 0 : i32
    %c0_i32_0 = arith.constant 0 : i32
    %c0_i32_1 = arith.constant 0 : i32
    return %c0_i32, %c0_i32_0 : i32, i32
  }
  func.func @transform_5(%arg0: i32) -> (i32, i32) {
    %c0_i32 = arith.constant 0 : i32
    %c0_i32_0 = arith.constant 0 : i32
    return %arg0, %c0_i32 : i32, i32
  }
  func.func @transform_6(%arg0: i32) -> (i32, i32) {
    %c0_i32 = arith.constant 0 : i32
    %c0_i32_0 = arith.constant 0 : i32
    %c0_i32_1 = arith.constant 0 : i32
    return %c0_i32, %c0_i32_0 : i32, i32
  }
  func.func @transform_7(%arg0: i32) -> (i32, i32) {
    %c0_i32 = arith.constant 0 : i32
    %c0_i32_0 = arith.constant 0 : i32
    %c0_i32_1 = arith.constant 0 : i32
    return %c0_i32, %c0_i32_0 : i32, i32
  }
  func.func @transform_8(%arg0: i32) -> (i32, i32) {
    %c0_i32 = arith.constant 0 : i32
    %c0_i32_0 = arith.constant 0 : i32
    %c0_i32_1 = arith.constant 0 : i32
    return %c0_i32, %c0_i32_0 : i32, i32
  }
  func.func @transform_9(%arg0: i32) -> (i32, i32) {
    %c0_i32 = arith.constant 0 : i32
    %c0_i32_0 = arith.constant 0 : i32
    %c0_i32_1 = arith.constant 0 : i32
    return %c0_i32, %c0_i32_0 : i32, i32
  }
}

</mosaic_0001>

<bundles_post_ra>
// kernel: cnn_forward.1
= control target key start
LH: loop header
LB: loop body
LE: loop exit
PB: predicated region body
PF: predicated region fallthrough
CT: control target
= control target key end

     0   :  { %14 = vsyncpa [#allocation5], 0  ;;  %s7337_s30 = smov 0   ;;  %s13822_s0 = inlined_call_operand.vmem [shape: f32[1,1004], index: 0, kind: input, shape index: {}]   ;;  %s13823_s1 = inlined_call_operand.vmem [shape: f32[64,3], index: 1, kind: input, shape index: {}]   ;;  %s13824_s2 = inlined_call_operand.vmem [shape: f32[64,1], index: 2, kind: input, shape index: {}]   ;;  %s13825_s3 = inlined_call_operand.vmem [shape: f32[32,192], index: 3, kind: input, shape index: {}]   ;;  %s13826_s4 = inlined_call_operand.vmem [shape: f32[32,1], index: 4, kind: input, shape index: {}]   ;;  %s13827_s5 = inlined_call_operand.vmem [shape: bf16[8192,100], index: 5, kind: input, shape index: {}]   ;;  %s13828_s6 = inlined_call_operand.vmem [shape: f32[1,100], index: 6, kind: input, shape index: {}]   ;;  %s13829_s7 = inlined_call_operand.vmem [shape: f32[100,2], index: 7, kind: input, shape index: {}]   ;;  %s13830_s8 = inlined_call_operand.vmem [shape: f32[1,2], index: 8, kind: input, shape index: {}]   ;;  %s13831_s9 = inlined_call_operand.hbm [shape: f32[1,2], index: 9, kind: output, shape index: {}]  }
   0x1 LB: > { %s7343_s10 = sadd.s32 4294967295, %s7273_s30   ;;  %p6137_p0 = scmp.ge.s32.totalorder %s7273_s30, 1  ;;  %s7273_s30 = sphi %s7337_s30, %s20_s30  }
   0x2   : > { %p284_p1 = scmp.lt.s32.totalorder %s7273_s30, 9 }
   0x4   : > { %p285_p2 = pnand %p6137_p0, %p284_p1 }
   0x5   : > { %s6138_s11 = sshll.u32 (!%p285_p2), %s7343_s10, 7  ;;  %p6140_p4 = scmp.ne.s32.totalorder (!%p285_p2), %s7343_s10, 0 }
   0x6   : > { %288 = sbr.rel (%p285_p2) target bundleno = 2321 (0x911), region = 56  ;;  %p316_p3 = scmp.lt.s32.totalorder (!%p285_p2), %s6138_s11, 1023 }
   0xb   : > { %s15429_s11 = smov (!%p316_p3, %s6138_s11), 1023  ;;  %325 = sbr.rel (%p6140_p4) target bundleno = 1781 (0x6f5), region = 60 }
   0xc   : > { %s6139_s12 = sshll.u32 %s15429_s11, 2 }
   0xd   : > { %s7351_s15 = scalar_lea.vmem %s13827_s5, %s6139_s12 }
  0x10   : > { %v327_v0 = vld [vmem:[%s13823_s1] sm:$0xff]  ;;  %v328_v1 = vld [vmem:[%s13823_s1 + $0x8] sm:$0xff]  ;;  %v7275_v2 = vmov 1   ;;  %v7276_v3 = vmov 2   ;;  %v329_v4 = vld [vmem:[%s13823_s1 + $0x10] sm:$0xff]  ;;  %v7277_v10 = vmov 0   ;;  %v13832_v15 = vlaneseq }
  0x11   : > { %7031 = vset.pattern.permute.xlu0 %v7275_v2  ;;  %7033 = vset.pattern.permute.xlu1 %v7275_v2  ;;  %v330_v5 = vld [vmem:[%s13823_s1 + $0x18] sm:$0xff]  ;;  %v331_v6 = vld [vmem:[%s13823_s1 + $0x20] sm:$0xff]  ;;  %v332_v7 = vld [vmem:[%s13823_s1 + $0x28] sm:$0xff]  ;;  %s7278_s24 = smov 127   ;;  %s7279_s25 = smov 126  }
  0x12   : > { %481 = vperm.xlu0 %7031, %v327_v0   ;;  %485 = vperm.xlu1 %7033, %v328_v1   ;;  %v7375_v8 = vld [vmem:[%s13823_s1 + $0x30] sm:$0xff]  ;;  %v7381_v9 = vld [vmem:[%s13823_s1 + $0x38] sm:$0xff]  ;;  %v1426_v11 = vld [vmem:[%s13824_s2] sm:$0xff]  ;;  %v7399_v16 = vshrl.u32 %v13832_v15, 7  ;;  %s7281_s16 = smov 1  }
  0x13   : > { %v1427_v12 = vld [vmem:[%s13824_s2 + $0x8] sm:$0xff]  ;;  %v1428_v13 = vld [vmem:[%s13824_s2 + $0x10] sm:$0xff]  ;;  %v1429_v14 = vld [vmem:[%s13824_s2 + $0x18] sm:$0xff] }
  0x14   : > { %14483 = vst [vmem:[#allocation7_spill] sm:$0xff] %v7399_v16  ;;  %v390_v17 = vsub.s32 3, %v7399_v16  ;;  %v386_v18 = vsub.s32 2, %v7399_v16  ;;  %v7406_v19 = vld [vmem:[%s13822_s0] sm:$0xff]  ;;  %v394_v22 = vsub.s32 4, %v7399_v16  ;;  %v378_v23 = vsub.s32 0, %v7399_v16 }
  0x15   : > { %v382_v25 = vsub.s32 1, %v7399_v16 }
  0x16   : > { %7032 = vset.pattern.permute.xlu0 %v7276_v3  ;;  %7034 = vset.pattern.permute.xlu1 %v7276_v3  ;;  %v7409_v20 = vrot.slane %v7406_v19, %v390_v17  ;;  %v7412_v21 = vrot.slane %v7406_v19, %v386_v18  ;;  %v7424_v28 = vrot.slane %v7406_v19, %v394_v22 }
  0x17   : > { %954 = vperm.xlu0 %7032, %v327_v0   ;;  %958 = vperm.xlu1 %7034, %v328_v1   ;;  %v7427_v29 = vrot.slane %v7406_v19, %v378_v23  ;;  %v7436_v32 = vrot.slane %v7406_v19, %v382_v25 }
  0x18   : > { %14484 = vst [vmem:[#allocation8_spill] sm:$0xff] %v7424_v28 }
  0x19   : > { %14485 = vst [vmem:[#allocation9_spill] sm:$0xff] %v7427_v29 }
  0x1b   : > { %962 = vperm.xlu0 %7032, %v329_v4   ;;  %7035 = vset.pattern.permute.xlu1 %v7275_v2 }
  0x1c   : > { %489 = vperm.xlu1 %7035, %v329_v4  }
  0x1f   : > { %966 = vperm.xlu0 %7032, %v330_v5  }
  0x20   : > { %493 = vperm.xlu1 %7035, %v330_v5  }
  0x23   : > { %970 = vperm.xlu0 %7032, %v331_v6  }
  0x24   : > { %497 = vperm.xlu1 %7035, %v331_v6  }
  0x27   : > { %974 = vperm.xlu0 %7032, %v332_v7  }
  0x28   : > { %501 = vperm.xlu1 %7035, %v332_v7  }
  0x2b   : > { %978 = vperm.xlu0 %7032, %v7375_v8  }
  0x2c   : > { %505 = vperm.xlu1 %7035, %v7375_v8  }
  0x2f   : > { %982 = vperm.xlu0 %7032, %v7381_v9  }
  0x30   : > { %509 = vperm.xlu1 %7035, %v7381_v9  }
  0x33   : > { %7037 = vset.pattern.permute.xlu0 %v7277_v10 }
  0x34   : > { %7036 = vset.pattern.permute.xlu1 %v7277_v10  ;;  %347 = vperm.xlu0 %7037, %v329_v4  }
  0x35   : > { %337 = vperm.xlu1 %7036, %v327_v0  }
  0x39   : > { %1436 = vperm.xlu1 %7036, %v1426_v11  }
  0x3d   : > { %342 = vperm.xlu1 %7036, %v328_v1  }
  0x41   : > { %1441 = vperm.xlu1 %7036, %v1427_v12  }
  0x45   : > { %352 = vperm.xlu1 %7036, %v330_v5  }
  0x49   : > { %1446 = vperm.xlu1 %7036, %v1428_v13   ;;  %v1430_v13 = vld [vmem:[%s13824_s2 + $0x20] sm:$0xff] }
  0x4d   : > { %357 = vperm.xlu1 %7036, %v331_v6  }
  0x51   : > { %1451 = vperm.xlu1 %7036, %v1429_v14  }
  0x55   : > { %362 = vperm.xlu1 %7036, %v332_v7  }
  0x8d   : > { %v7416_v24 = vpop.permute.xlu0 %481  ;;  %v7452_v38 = vpop.permute.xlu1 %485 }
  0x8e   : > { %v515_v26 = vmul.f32 %v7416_v24, %v7409_v20  ;;  %v514_v27 = vmul.f32 %v7416_v24, %v7412_v21  ;;  %v516_v30 = vmul.f32 %v7416_v24, %v7424_v28  ;;  %v512_v31 = vmul.f32 %v7416_v24, %v7427_v29 }
  0x8f   : > { %v513_v35 = vmul.f32 %v7416_v24, %v7436_v32  ;;  %v522_v39 = vmul.f32 %v7452_v38, %v7412_v21  ;;  %v523_v41 = vmul.f32 %v7452_v38, %v7409_v20  ;;  %v524_v44 = vmul.f32 %v7452_v38, %v7424_v28 }
  0x90   : > { %646 = vrot.lane.b32.xlu1 %v515_v26, %s7278_s24  ;;  %644 = vrot.lane.b32.xlu0 %v514_v27, %s7278_s24  ;;  %v521_v48 = vmul.f32 %v7452_v38, %v7436_v32  ;;  %v520_v1 = vmul.f32 %v7452_v38, %v7427_v29 }
  0x92   : > { %v7438_v33 = vpop.permute.xlu0 %954  ;;  %v7466_v43 = vpop.permute.xlu1 %958 }
  0x93   : > { %v988_v34 = vmul.f32 %v7438_v33, %v7409_v20  ;;  %v987_v36 = vmul.f32 %v7438_v33, %v7412_v21  ;;  %v986_v37 = vmul.f32 %v7438_v33, %v7436_v32  ;;  %v989_v40 = vmul.f32 %v7438_v33, %v7424_v28  ;;  %14486 = vst [vmem:[#allocation10_spill] sm:$0xff] %v7466_v43 }
  0x94   : > { %648 = vrot.lane.b32.xlu0 %v516_v30, %s7278_s24  ;;  %640 = vrot.lane.b32.xlu1 %v512_v31, %s7278_s24  ;;  %v985_v42 = vmul.f32 %v7438_v33, %v7427_v29  ;;  %v996_v45 = vmul.f32 %v7466_v43, %v7409_v20  ;;  %v994_v46 = vmul.f32 %v7466_v43, %v7436_v32 }
  0x95   : > { %v995_v49 = vmul.f32 %v7466_v43, %v7412_v21  ;;  %v997_v53 = vmul.f32 %v7466_v43, %v7424_v28  ;;  %v993_v14 = vmul.f32 %v7466_v43, %v7427_v29 }
  0x96   : > { %v7492_v52 = vpop.permute.xlu0 %962 }
  0x97   : > { %v7478_v47 = vpop.permute.xlu1 %489  ;;  %14489 = vst [vmem:[#allocation13_spill] sm:$0xff] %v7492_v52  ;;  %v1003_v54 = vmul.f32 %v7492_v52, %v7412_v21  ;;  %v1005_v57 = vmul.f32 %v7492_v52, %v7424_v28  ;;  %v1004_v3 = vmul.f32 %v7492_v52, %v7409_v20  ;;  %v1002_v6 = vmul.f32 %v7492_v52, %v7436_v32 }
  0x98   : > { %642 = vrot.lane.b32.xlu0 %v513_v35, %s7278_s24  ;;  %1119 = vrot.lane.b32.xlu1 %v988_v34, %s7279_s25  ;;  %14487 = vst [vmem:[#allocation11_spill] sm:$0xff] %v7478_v47  ;;  %v531_v50 = vmul.f32 %v7478_v47, %v7409_v20  ;;  %v530_v55 = vmul.f32 %v7478_v47, %v7412_v21 }
  0x99   : > { %v532_v58 = vmul.f32 %v7478_v47, %v7424_v28  ;;  %v529_v61 = vmul.f32 %v7478_v47, %v7436_v32  ;;  %v528_v25 = vmul.f32 %v7478_v47, %v7427_v29 }
  0x9a   : > { %v7520_v63 = vpop.permute.xlu0 %966 }
  0x9b   : > { %v7488_v51 = vpop.permute.xlu1 %493  ;;  %14492 = vst [vmem:[#allocation16_spill] sm:$0xff] %v7520_v63  ;;  %v1011_v2 = vmul.f32 %v7520_v63, %v7412_v21  ;;  %v1013_v4 = vmul.f32 %v7520_v63, %v7424_v28  ;;  %v1012_v27 = vmul.f32 %v7520_v63, %v7409_v20 }
  0x9c   : > { %1117 = vrot.lane.b32.xlu0 %v987_v36, %s7279_s25  ;;  %1115 = vrot.lane.b32.xlu1 %v986_v37, %s7279_s25  ;;  %14488 = vst [vmem:[#allocation12_spill] sm:$0xff] %v7488_v51  ;;  %v538_v59 = vmul.f32 %v7488_v51, %v7412_v21  ;;  %v540_v62 = vmul.f32 %v7488_v51, %v7424_v28 }
  0x9d   : > { %v539_v11 = vmul.f32 %v7488_v51, %v7409_v20  ;;  %v537_v18 = vmul.f32 %v7488_v51, %v7436_v32 }
  0x9e   : > { %v7564_v22 = vpop.permute.xlu0 %970 }
  0x9f   : > { %v7502_v56 = vpop.permute.xlu1 %497  ;;  %14497 = vst [vmem:[#allocation21_spill] sm:$0xff] %v7564_v22  ;;  %v1019_v26 = vmul.f32 %v7564_v22, %v7412_v21  ;;  %v1021_v30 = vmul.f32 %v7564_v22, %v7424_v28 }
  0xa0   : > { %1121 = vrot.lane.b32.xlu0 %v989_v40, %s7279_s25  ;;  %660 = vrot.lane.b32.xlu1 %v522_v39, %s7278_s24  ;;  %14490 = vst [vmem:[#allocation14_spill] sm:$0xff] %v7502_v56  ;;  %v546_v7 = vmul.f32 %v7502_v56, %v7412_v21  ;;  %v548_v12 = vmul.f32 %v7502_v56, %v7424_v28  ;;  %v1431_v39 = vld [vmem:[%s13824_s2 + $0x28] sm:$0xff] }
  0xa1   : > { %v547_v36 = vmul.f32 %v7502_v56, %v7409_v20  ;;  %v1001_v40 = vmul.f32 %v7492_v52, %v7427_v29 }
  0xa3   : > { %v7512_v60 = vpop.permute.xlu1 %501 }
  0xa4   : > { %1113 = vrot.lane.b32.xlu0 %v985_v42, %s7279_s25  ;;  %662 = vrot.lane.b32.xlu1 %v523_v41, %s7278_s24  ;;  %14491 = vst [vmem:[#allocation15_spill] sm:$0xff] %v7512_v60  ;;  %v554_v34 = vmul.f32 %v7512_v60, %v7412_v21  ;;  %v556_v37 = vmul.f32 %v7512_v60, %v7424_v28  ;;  %v7605_v42 = vpop.permute.xlu0 %974 }
  0xa5   : > { %14500 = vst [vmem:[#allocation24_spill] sm:$0xff] %v7605_v42 }
  0xa7   : > { %v7524_v0 = vpop.permute.xlu1 %505 }
  0xa8   : > { %664 = vrot.lane.b32.xlu0 %v524_v44, %s7278_s24  ;;  %1135 = vrot.lane.b32.xlu1 %v996_v45, %s7279_s25  ;;  %14493 = vst [vmem:[#allocation17_spill] sm:$0xff] %v7524_v0  ;;  %v545_v44 = vmul.f32 %v7502_v56, %v7436_v32 }
  0xab   : > { %v7536_v5 = vpop.permute.xlu1 %509 }
  0xac   : > { %658 = vrot.lane.b32.xlu0 %v521_v48, %s7278_s24  ;;  %1131 = vrot.lane.b32.xlu1 %v994_v46, %s7279_s25  ;;  %14494 = vst [vmem:[#allocation18_spill] sm:$0xff] %v7536_v5  ;;  %v7614_v46 = vpop.permute.xlu0 %978  ;;  %v536_v48 = vmul.f32 %v7488_v51, %v7427_v29  ;;  %v7957_v51 = vadd.s32 360, %v7399_v16 }
  0xad   : > { %14502 = vst [vmem:[#allocation26_spill] sm:$0xff] %v7614_v46 }
  0xae   : > { %14532 = vst [vmem:[#allocation55_spill] sm:$0xff] %v7957_v51 }
  0xb0   : > { %1133 = vrot.lane.b32.xlu0 %v995_v49, %s7279_s25  ;;  %678 = vrot.lane.b32.xlu1 %v531_v50, %s7278_s24  ;;  %v7546_v10 = vpop.permute.xlu1 %337  ;;  %v1027_v49 = vmul.f32 %v7605_v42, %v7412_v21  ;;  %v1020_v50 = vmul.f32 %v7564_v22, %v7409_v20 }
  0xb1   : > { %14495 = vst [vmem:[#allocation19_spill] sm:$0xff] %v7546_v10 }
  0xb4   : > { %1137 = vrot.lane.b32.xlu0 %v997_v53, %s7279_s25  ;;  %1149 = vrot.lane.b32.xlu1 %v1003_v54, %s7279_s25  ;;  %v7559_v17 = vpop.permute.xlu1 %1436  ;;  %v7628_v54 = vpop.permute.xlu0 %982 }
  0xb5   : > { %14496 = vst [vmem:[#allocation20_spill] sm:$0xff] %v7559_v17  ;;  %14504 = vst [vmem:[#allocation28_spill] sm:$0xff] %v7628_v54 }
  0xb8   : > { %676 = vrot.lane.b32.xlu0 %v530_v55, %s7278_s24  ;;  %1153 = vrot.lane.b32.xlu1 %v1005_v57, %s7279_s25  ;;  %v7568_v23 = vpop.permute.xlu1 %342  ;;  %v1018_v55 = vmul.f32 %v7564_v22, %v7436_v32  ;;  %v562_v57 = vmul.f32 %v7524_v0, %v7412_v21 }
  0xbc   : > { %680 = vrot.lane.b32.xlu0 %v532_v58, %s7278_s24  ;;  %692 = vrot.lane.b32.xlu1 %v538_v59, %s7278_s24  ;;  %v7580_v31 = vpop.permute.xlu1 %1441  ;;  %v7640_v59 = vpop.permute.xlu0 %347 }
  0xbd   : > { %14498 = vst [vmem:[#allocation22_spill] sm:$0xff] %v7580_v31  ;;  %14506 = vst [vmem:[#allocation30_spill] sm:$0xff] %v7640_v59 }
  0xc0   : > { %674 = vrot.lane.b32.xlu0 %v529_v61, %s7278_s24  ;;  %696 = vrot.lane.b32.xlu1 %v540_v62, %s7278_s24  ;;  %v7590_v35 = vpop.permute.xlu1 %352  ;;  %v555_v61 = vmul.f32 %v7512_v60, %v7409_v20  ;;  %v564_v62 = vmul.f32 %v7524_v0, %v7424_v28 }
  0xc1   : > { %14499 = vst [vmem:[#allocation23_spill] sm:$0xff] %v7590_v35 }
  0xc4   : > { %656 = vrot.lane.b32.xlu0 %v520_v1, %s7278_s24  ;;  %1165 = vrot.lane.b32.xlu1 %v1011_v2, %s7279_s25  ;;  %v7603_v41 = vpop.permute.xlu1 %1446  ;;  %v1432_v1 = vld [vmem:[%s13824_s2 + $0x30] sm:$0xff] }
  0xc8   : > { %1151 = vrot.lane.b32.xlu0 %v1004_v3, %s7279_s25  ;;  %1169 = vrot.lane.b32.xlu1 %v1013_v4, %s7279_s25  ;;  %v7612_v45 = vpop.permute.xlu1 %357  ;;  %v1009_v4 = vmul.f32 %v7520_v63, %v7427_v29 }
  0xc9   : > { %14501 = vst [vmem:[#allocation25_spill] sm:$0xff] %v7612_v45 }
  0xcc   : > { %1147 = vrot.lane.b32.xlu0 %v1002_v6, %s7279_s25  ;;  %708 = vrot.lane.b32.xlu1 %v546_v7, %s7278_s24  ;;  %v7626_v53 = vpop.permute.xlu1 %1451 }
  0xcd   : > { %14503 = vst [vmem:[#allocation27_spill] sm:$0xff] %v7626_v53 }
  0xd0   : > { %694 = vrot.lane.b32.xlu0 %v539_v11, %s7278_s24  ;;  %712 = vrot.lane.b32.xlu1 %v548_v12, %s7278_s24  ;;  %v7638_v58 = vpop.permute.xlu1 %362  ;;  %v553_v11 = vmul.f32 %v7512_v60, %v7436_v32  ;;  %v552_v12 = vmul.f32 %v7512_v60, %v7427_v29 }
  0xd1   : > { %14505 = vst [vmem:[#allocation29_spill] sm:$0xff] %v7638_v58  ;;  %v1045_v58 = vmul.f32 %v7628_v54, %v7424_v28 }
  0xd4   : > { %1129 = vrot.lane.b32.xlu0 %v993_v14, %s7279_s25  ;;  %1456 = vperm.xlu1 %7036, %v1430_v13  }
  0xd8   : > { %690 = vrot.lane.b32.xlu0 %v537_v18, %s7278_s24  ;;  %367 = vperm.xlu1 %7036, %v7375_v8   ;;  %v1010_v8 = vmul.f32 %v7520_v63, %v7436_v32  ;;  %v544_v18 = vmul.f32 %v7502_v56, %v7427_v29  ;;  %v1037_v56 = vmul.f32 %v7614_v46, %v7424_v28  ;;  %v7948_v63 = vadd.s32 40, %v7399_v16 }
  0xda   : > { %14531 = vst [vmem:[#allocation54_spill] sm:$0xff] %v7948_v63 }
  0xdc   : > { %672 = vrot.lane.b32.xlu0 %v528_v25, %s7278_s24  ;;  %1181 = vrot.lane.b32.xlu1 %v1019_v26, %s7279_s25  ;;  %v1036_v25 = vmul.f32 %v7614_v46, %v7409_v20  ;;  %v7679_v26 = vand.u32 127, %v13832_v15 }
  0xde   : > { %14508 = vst [vmem:[#allocation32_spill] sm:$0xff] %v7679_v26 }
  0xe0   : > { %1167 = vrot.lane.b32.xlu0 %v1012_v27, %s7279_s25  ;;  %1185 = vrot.lane.b32.xlu1 %v1021_v30, %s7279_s25  ;;  %v1028_v27 = vmul.f32 %v7605_v42, %v7409_v20 }
  0xe4   : > { %1163 = vrot.lane.b32.xlu0 %v1010_v8, %s7279_s25  ;;  %724 = vrot.lane.b32.xlu1 %v554_v34, %s7278_s24  ;;  %v1034_v34 = vmul.f32 %v7614_v46, %v7436_v32 }
  0xe8   : > { %710 = vrot.lane.b32.xlu0 %v547_v36, %s7278_s24  ;;  %728 = vrot.lane.b32.xlu1 %v556_v37, %s7278_s24  ;;  %v7690_v36 = vadd.s32 120, %v7399_v16  ;;  %v2125_v37 = vadd.s32 128, %v7679_v26 }
  0xea   : > { %14509 = vst [vmem:[#allocation33_spill] sm:$0xff] %v7690_v36 }
  0xec   : > { %1145 = vrot.lane.b32.xlu0 %v1001_v40, %s7279_s25  ;;  %1461 = vperm.xlu1 %7036, %v1431_v39   ;;  %v7694_v39 = vmul.u32 2, %v7679_v26  ;;  %v7697_v40 = vadd.s32 112, %v7399_v16  ;;  %v1035_v26 = vmul.f32 %v7614_v46, %v7412_v21 }
  0xee   : > { %14510 = vst [vmem:[#allocation34_spill] sm:$0xff] %v7694_v39  ;;  %14511 = vst [vmem:[#allocation35_spill] sm:$0xff] %v7697_v40  ;;  %vm14235_vm1 = vcmp.eq.s32.totalorder %v7690_v36, %v7694_v39  ;;  %vm14226_vm3 = vcmp.eq.s32.totalorder %v7697_v40, %v7694_v39 }
  0xf0   : > { %706 = vrot.lane.b32.xlu0 %v545_v44, %s7278_s24  ;;  %372 = vperm.xlu1 %7036, %v7381_v9   ;;  %v1029_v9 = vmul.f32 %v7605_v42, %v7424_v28  ;;  %v7701_v44 = vmul.u32 2, %v2125_v37  ;;  %v1017_v37 = vmul.f32 %v7564_v22, %v7427_v29 }
  0xf2   : > { %14512 = vst [vmem:[#allocation36_spill] sm:$0xff] %v7701_v44  ;;  %vm14243_vm0 = vcmp.eq.s32.totalorder %v7690_v36, %v7701_v44  ;;  %vm14230_vm2 = vcmp.eq.s32.totalorder %v7697_v40, %v7701_v44  ;;  %v561_v40 = vmul.f32 %v7524_v0, %v7436_v32  ;;  %v1043_v36 = vmul.f32 %v7628_v54, %v7412_v21 }
  0xf4   : > { %688 = vrot.lane.b32.xlu0 %v536_v48, %s7278_s24  ;;  %1197 = vrot.lane.b32.xlu1 %v1027_v49, %s7279_s25  ;;  %v1026_v48 = vmul.f32 %v7605_v42, %v7436_v32 }
  0xf8   : > { %1183 = vrot.lane.b32.xlu0 %v1020_v50, %s7279_s25  ;;  %1201 = vrot.lane.b32.xlu1 %v1029_v9, %s7279_s25  ;;  %v571_v9 = vmul.f32 %v7536_v5, %v7409_v20 }
  0xfc   : > { %1179 = vrot.lane.b32.xlu0 %v1018_v55, %s7279_s25  ;;  %740 = vrot.lane.b32.xlu1 %v562_v57, %s7278_s24  ;;  %v7716_v55 = vadd.s32 104, %v7399_v16  ;;  %v13839_v57 = vmov 1.0  }
  0xfd   : > { %6141 = vmatprep.subr.msk.mxu0 %vm14243_vm0, %v13839_v57 }
  0xfe   : > { %14514 = vst [vmem:[#allocation38_spill] sm:$0xff] %v7716_v55  ;;  %6142 = vmatpush1.msk.msra.mxu0 %vm14235_vm1, %v13839_v57  ;;  %vm14223_vm4 = vcmp.eq.s32.totalorder %v7716_v55, %v7701_v44  ;;  %vm14219_vm5 = vcmp.eq.s32.totalorder %v7716_v55, %v7694_v39 }
  0xff   : > { %6143 = vmatprep.subr.msk.mxu0 %vm14230_vm2, %v13839_v57 }
 0x100   : > { %726 = vrot.lane.b32.xlu0 %v555_v61, %s7278_s24  ;;  %744 = vrot.lane.b32.xlu1 %v564_v62, %s7278_s24  ;;  %v7733_v61 = vadd.s32 96, %v7399_v16 }
 0x101   : > { %6144 = vmatpush1.msk.msra.mxu0 %vm14226_vm3, %v13839_v57 }
 0x102   : > { %v7651_v2 = vpop.permute.xlu1 %646  ;;  %v7653_v3 = vpop.permute.xlu0 %644  ;;  %14515 = vst [vmem:[#allocation39_spill] sm:$0xff] %v7733_v61  ;;  %vm13922_vm6 = vcmp.eq.s32.totalorder %v7733_v61, %v7701_v44  ;;  %6145 = vmatprep.subr.msk.mxu0 %vm14223_vm4, %v13839_v57  ;;  %vm13885_vm7 = vcmp.eq.s32.totalorder %v7733_v61, %v7694_v39 }
 0x103   : > { %6146 = vmatpush1.msk.msra.mxu0 %vm14219_vm5, %v13839_v57 }
 0x104   : > { %1161 = vrot.lane.b32.xlu0 %v1009_v4, %s7279_s25  ;;  %1466 = vperm.xlu1 %7036, %v1432_v1   ;;  %v563_v4 = vmul.f32 %v7524_v0, %v7409_v20 }
 0x105   : > { %6147 = vmatprep.subr.msk.mxu0 %vm13922_vm6, %v13839_v57 }
 0x106   : > { %v7658_v6 = vpop.permute.xlu0 %648  ;;  %v7660_v7 = vpop.permute.xlu1 %640  ;;  %6148 = vmatpush1.msk.msra.mxu0 %vm13885_vm7, %v13839_v57  ;;  %vm13905_vm7 = vcmp.eq.s32.totalorder %v7957_v51, %v7694_v39 }
 0x107   : > { %14507 = vst [vmem:[#allocation31_spill] sm:$0xff] %v7658_v6 }
 0x108   : > { %722 = vrot.lane.b32.xlu0 %v553_v11, %s7278_s24  ;;  %720 = vrot.lane.b32.xlu1 %v552_v12, %s7278_s24  ;;  %v1025_v11 = vmul.f32 %v7605_v42, %v7427_v29  ;;  %v7756_v12 = vadd.s32 88, %v7399_v16  ;;  %v7871_v42 = vadd.s32 56, %v7399_v16 }
 0x10a   : > { %v7668_v13 = vpop.permute.xlu0 %642  ;;  %v7670_v14 = vpop.permute.xlu1 %1119  ;;  %14516 = vst [vmem:[#allocation40_spill] sm:$0xff] %v7756_v12  ;;  %vm13879_vm8 = vcmp.eq.s32.totalorder %v7756_v12, %v7701_v44  ;;  %vm13875_vm9 = vcmp.eq.s32.totalorder %v7756_v12, %v7694_v39  ;;  %v14525_v12 = vmov 1.0   ;;  %14527 = vst [vmem:[#allocation50_spill] sm:$0xff] %v7871_v42 }
 0x10b   : > { %6149 = vmatprep.subr.msk.mxu0 %vm13879_vm8, %v13839_v57  ;;  %vm13896_vm8 = vcmp.eq.s32.totalorder %v7957_v51, %v7701_v44  ;;  %v8087_v51 = vadd.s32 16, %v7399_v16 }
 0x10c   : > { %704 = vrot.lane.b32.xlu0 %v544_v18, %s7278_s24  ;;  %1215 = vrot.lane.b32.xlu1 %v1036_v25, %s7279_s25  ;;  %v402_v18 = vsub.s32 6, %v7399_v16  ;;  %v406_v25 = vsub.s32 7, %v7399_v16 }
 0x10d   : > { %6150 = vmatpush1.msk.msra.mxu0 %vm13875_vm9, %v13839_v57  ;;  %14541 = vst [vmem:[#allocation64_spill] sm:$0xff] %v8087_v51 }
 0x10e   : > { %v7683_v30 = vpop.permute.xlu0 %1117  ;;  %v7685_v8 = vpop.permute.xlu1 %1115  ;;  %v7800_v15 = vrot.slane %v7406_v19, %v402_v18  ;;  %v7803_v55 = vrot.slane %v7406_v19, %v406_v25  ;;  %v7833_v25 = vadd.s32 64, %v7399_v16 }
 0x110   : > { %1199 = vrot.lane.b32.xlu0 %v1028_v27, %s7279_s25  ;;  %1211 = vrot.lane.b32.xlu1 %v1034_v34, %s7279_s25  ;;  %14520 = vst [vmem:[#allocation44_spill] sm:$0xff] %v7800_v15  ;;  %14521 = vst [vmem:[#allocation45_spill] sm:$0xff] %v7803_v55  ;;  %v7847_v57 = vmul.f32 %v7416_v24, %v7803_v55  ;;  %v7879_v45 = vmul.f32 %v7452_v38, %v7800_v15 }
 0x111   : > { %14524 = vst [vmem:[#allocation48_spill] sm:$0xff] %v7833_v25  ;;  %vm13869_vm14 = vcmp.eq.s32.totalorder %v7833_v25, %v7701_v44  ;;  %vm13874_vm15 = vcmp.eq.s32.totalorder %v7833_v25, %v7694_v39 }
 0x112   : > { %v7705_v49 = vpop.permute.xlu0 %1121  ;;  %v7707_v50 = vpop.permute.xlu1 %660 }
 0x113   : > { %14513 = vst [vmem:[#allocation37_spill] sm:$0xff] %v7705_v49 }
 0x114   : > { %1195 = vrot.lane.b32.xlu0 %v1026_v48, %s7279_s25  ;;  %758 = vrot.lane.b32.xlu1 %v571_v9, %s7278_s24  ;;  %v569_v48 = vmul.f32 %v7536_v5, %v7436_v32  ;;  %v7783_v9 = vadd.s32 80, %v7399_v16 }
 0x116   : > { %v7735_v62 = vpop.permute.xlu0 %1113  ;;  %v7737_v1 = vpop.permute.xlu1 %662  ;;  %14518 = vst [vmem:[#allocation42_spill] sm:$0xff] %v7783_v9  ;;  %vm13866_vm10 = vcmp.eq.s32.totalorder %v7783_v9, %v7701_v44  ;;  %vm13859_vm11 = vcmp.eq.s32.totalorder %v7783_v9, %v7694_v39  ;;  %v7904_v9 = vadd.s32 48, %v7399_v16 }
 0x117   : > { %6151 = vmatprep.subr.msk.mxu0 %vm13866_vm10, %v14525_v12  ;;  %vm13887_vm10 = vcmp.eq.s32.totalorder %v7871_v42, %v7694_v39 }
 0x118   : > { %742 = vrot.lane.b32.xlu0 %v563_v4, %s7278_s24  ;;  %1193 = vrot.lane.b32.xlu1 %v1025_v11, %s7279_s25  ;;  %v398_v4 = vsub.s32 5, %v7399_v16  ;;  %v7797_v11 = vadd.s32 72, %v7399_v16  ;;  %14528 = vst [vmem:[#allocation51_spill] sm:$0xff] %v7904_v9 }
 0x119   : > { %6152 = vmatpush1.msk.msra.mxu0 %vm13859_vm11, %v14525_v12 }
 0x11a   : > { %v7768_v27 = vpop.permute.xlu0 %664  ;;  %v7770_v34 = vpop.permute.xlu1 %1135  ;;  %14519 = vst [vmem:[#allocation43_spill] sm:$0xff] %v7797_v11  ;;  %v7824_v18 = vrot.slane %v7406_v19, %v398_v4  ;;  %vm13858_vm12 = vcmp.eq.s32.totalorder %v7797_v11, %v7701_v44  ;;  %v518_v19 = vmul.f32 %v7416_v24, %v7800_v15  ;;  %v7843_v4 = vmul.f32 %v7452_v38, %v7803_v55 }
 0x11b   : > { %14517 = vst [vmem:[#allocation41_spill] sm:$0xff] %v7768_v27  ;;  %vm13865_vm13 = vcmp.eq.s32.totalorder %v7797_v11, %v7694_v39  ;;  %6153 = vmatprep.subr.msk.mxu0 %vm13858_vm12, %v14525_v12  ;;  %v7929_v11 = vmul.f32 %v7438_v33, %v7800_v15 }
 0x11c   : > { %1177 = vrot.lane.b32.xlu0 %v1017_v37, %s7279_s25  ;;  %754 = vrot.lane.b32.xlu1 %v569_v48, %s7278_s24  ;;  %14523 = vst [vmem:[#allocation47_spill] sm:$0xff] %v7824_v18  ;;  %v7875_v60 = vmul.f32 %v7416_v24, %v7824_v18  ;;  %v7883_v53 = vmul.f32 %v7452_v38, %v7824_v18 }
 0x11d   : > { %v7895_v24 = vmul.f32 %v7438_v33, %v7803_v55  ;;  %v7899_v38 = vmul.f32 %v7466_v43, %v7800_v15  ;;  %v7908_v22 = vmul.f32 %v7466_v43, %v7824_v18  ;;  %6154 = vmatpush1.msk.msra.mxu0 %vm13865_vm13, %v14525_v12  ;;  %vm13882_vm13 = vcmp.eq.s32.totalorder %v7871_v42, %v7701_v44 }
 0x11e   : > { %v7809_v37 = vpop.permute.xlu0 %658  ;;  %v7811_v48 = vpop.permute.xlu1 %1131  ;;  %6155 = vmatprep.subr.msk.mxu0 %vm13869_vm14, %v14525_v12  ;;  %v7963_v25 = vmul.f32 %v7438_v33, %v7824_v18  ;;  %v7973_v43 = vmul.f32 %v7478_v47, %v7800_v15  ;;  %v7986_v33 = vadd.s32 352, %v7399_v16  ;;  %v8001_v47 = vadd.s32 32, %v7399_v16 }
 0x11f   : > { %14522 = vst [vmem:[#allocation46_spill] sm:$0xff] %v7811_v48  ;;  %6156 = vmatpush1.msk.msra.mxu0 %vm13874_vm15, %v14525_v12  ;;  %vm13893_vm15 = vcmp.eq.s32.totalorder %v7904_v9, %v7701_v44  ;;  %v8026_v42 = vadd.s32 344, %v7399_v16  ;;  %v572_v55 = vmul.f32 %v7536_v5, %v7424_v28 }
 0x120   : > { %738 = vrot.lane.b32.xlu0 %v561_v40, %s7278_s24  ;;  %1229 = vrot.lane.b32.xlu1 %v1043_v36, %s7279_s25  ;;  %v7854_v36 = vadd.s32 376, %v7399_v16  ;;  %14533 = vst [vmem:[#allocation56_spill] sm:$0xff] %v7986_v33  ;;  %14535 = vst [vmem:[#allocation58_spill] sm:$0xff] %v8001_v47 }
 0x121   : > { %6157 = vmatprep.subr.msk.mxu0 %vm13882_vm13, %v14525_v12  ;;  %vm13904_vm13 = vcmp.eq.s32.totalorder %v7904_v9, %v7694_v39  ;;  %14536 = vst [vmem:[#allocation59_spill] sm:$0xff] %v8026_v42  ;;  %v8078_v9 = vadd.s32 336, %v7399_v16 }
 0x122   : > { %14526 = vst [vmem:[#allocation49_spill] sm:$0xff] %v7854_v36  ;;  %v7856_v40 = vpop.permute.xlu0 %1133  ;;  %v7858_v61 = vpop.permute.xlu1 %678  ;;  %vm14222_vm12 = vcmp.eq.s32.totalorder %v7854_v36, %v7701_v44  ;;  %vm13936_vm11 = vcmp.eq.s32.totalorder %v7854_v36, %v7694_v39  ;;  %v1033_v36 = vmul.f32 %v7614_v46, %v7427_v29  ;;  %v570_v46 = vmul.f32 %v7536_v5, %v7412_v21 }
 0x123   : > { %6205 = vmatprep.subr.msk.mxu1 %vm14222_vm12, %v14525_v12  ;;  %6158 = vmatpush1.msk.msra.mxu0 %vm13887_vm10, %v14525_v12  ;;  %vm13908_vm10 = vcmp.eq.s32.totalorder %v7948_v63, %v7701_v44  ;;  %14540 = vst [vmem:[#allocation63_spill] sm:$0xff] %v8078_v9 }
 0x124   : > { %1213 = vrot.lane.b32.xlu0 %v1035_v26, %s7279_s25  ;;  %1233 = vrot.lane.b32.xlu1 %v1045_v58, %s7279_s25  ;;  %v7919_v58 = vadd.s32 368, %v7399_v16 }
 0x125   : > { %6206 = vmatpush1.msk.msra.mxu1 %vm13936_vm11, %v14525_v12  ;;  %6159 = vmatprep.subr.msk.mxu0 %vm13893_vm15, %v14525_v12  ;;  %vm13917_vm15 = vcmp.eq.s32.totalorder %v7948_v63, %v7694_v39  ;;  %v8102_v63 = vmul.f32 %v7628_v54, %v7409_v20 }
 0x126   : > { %14529 = vst [vmem:[#allocation52_spill] sm:$0xff] %v7919_v58  ;;  %v7921_v26 = vpop.permute.xlu0 %1137  ;;  %v7923_v35 = vpop.permute.xlu1 %1149  ;;  %vm13914_vm14 = vcmp.eq.s32.totalorder %v7919_v58, %v7701_v44  ;;  %vm13888_vm9 = vcmp.eq.s32.totalorder %v7919_v58, %v7694_v39  ;;  %v8032_v58 = vmul.f32 %v7492_v52, %v7824_v18  ;;  %6160 = vmatpush1.msk.msra.mxu0 %vm13904_vm13, %v14525_v12 }
 0x127   : > { %14530 = vst [vmem:[#allocation53_spill] sm:$0xff] %v7921_v26  ;;  %6207 = vmatprep.subr.msk.mxu1 %vm13914_vm14, %v14525_v12  ;;  %6161 = vmatprep.subr.msk.mxu0 %vm13908_vm10, %v14525_v12  ;;  %vm13925_vm13 = vcmp.eq.s32.totalorder %v8001_v47, %v7701_v44  ;;  %vm13929_vm10 = vcmp.eq.s32.totalorder %v8001_v47, %v7694_v39  ;;  %vm14319_vm14 = vcmask 1039360  }
 0x128   : > { %1217 = vrot.lane.b32.xlu0 %v1037_v56, %s7279_s25  ;;  %652 = vrot.lane.b32.xlu1 %v518_v19, %s7278_s24  ;;  %v416_v47 = vmul.f32 %v7427_v29, %v7546_v10 }
 0x129   : > { %6208 = vmatpush1.msk.msra.mxu1 %vm13888_vm9, %v14525_v12  ;;  %vm13911_vm9 = vcmp.eq.s32.totalorder %v7986_v33, %v7701_v44  ;;  %6162 = vmatpush1.msk.msra.mxu0 %vm13917_vm15, %v14525_v12 }
 0x12a   : > { %v7988_v56 = vpop.permute.xlu0 %676  ;;  %v7990_v19 = vpop.permute.xlu1 %1153  ;;  %6209 = vmatprep.subr.msk.mxu1 %vm13896_vm8, %v14525_v12  ;;  %vm13918_vm8 = vcmp.eq.s32.totalorder %v7986_v33, %v7694_v39  ;;  %v769_v33 = vsel %vm14319_vm14, %v7660_v7, %v7668_v13  ;;  %6163 = vmatprep.subr.msk.mxu0 %vm13925_vm13, %v14525_v12  ;;  %vm13947_vm13 = vcmp.eq.s32.totalorder %v8078_v9, %v7694_v39 }
 0x12b   : > { %14534 = vst [vmem:[#allocation57_spill] sm:$0xff] %v7990_v19  ;;  %v8011_v19 = vmul.f32 %v7492_v52, %v7800_v15  ;;  %v8037_v15 = vadd.s32 24, %v7399_v16  ;;  %6210 = vmatpush1.msk.msra.mxu1 %vm13905_vm7, %v14525_v12  ;;  %vm13932_vm7 = vcmp.eq.s32.totalorder %v8026_v42, %v7701_v44  ;;  %6164 = vmatpush1.msk.msra.mxu0 %vm13929_vm10, %v14525_v12  ;;  %vm1241_vm10 = vcmask 1031168  }
 0x12c   : > { %756 = vrot.lane.b32.xlu0 %v570_v46, %s7278_s24  ;;  %1209 = vrot.lane.b32.xlu1 %v1033_v36, %s7279_s25  ;;  %v8045_v46 = vmul.f32 %v7524_v0, %v7427_v29  ;;  %v8049_v36 = vmul.f32 %v7628_v54, %v7427_v29  ;;  %v568_v0 = vmul.f32 %v7536_v5, %v7427_v29  ;;  %v8096_v5 = vadd.s32 328, %v7399_v16 }
 0x12d   : > { %14537 = vst [vmem:[#allocation60_spill] sm:$0xff] %v8037_v15  ;;  %6211 = vmatprep.subr.msk.mxu1 %vm13911_vm9, %v14525_v12  ;;  %vm13931_vm9 = vcmp.eq.s32.totalorder %v8026_v42, %v7694_v39  ;;  %vm13935_vm15 = vcmp.eq.s32.totalorder %v8037_v15, %v7701_v44  ;;  %vm13943_vm6 = vcmp.eq.s32.totalorder %v8037_v15, %v7694_v39  ;;  %v8299_v15 = vadd.s32 232, %v7399_v16 }
 0x12e   : > { %v8059_v52 = vpop.permute.xlu0 %680  ;;  %v8061_v28 = vpop.permute.xlu1 %692  ;;  %6212 = vmatpush1.msk.msra.mxu1 %vm13918_vm8, %v14525_v12  ;;  %14542 = vst [vmem:[#allocation65_spill] sm:$0xff] %v8096_v5  ;;  %vm13942_vm8 = vcmp.eq.s32.totalorder %v8078_v9, %v7701_v44  ;;  %6165 = vmatprep.subr.msk.mxu0 %vm13935_vm15, %v14525_v12  ;;  %v770_v42 = vsel %vm14319_vm14, %v7668_v13, %v7653_v3 }
 0x12f   : > { %14538 = vst [vmem:[#allocation61_spill] sm:$0xff] %v8059_v52  ;;  %14539 = vst [vmem:[#allocation62_spill] sm:$0xff] %v8061_v28  ;;  %v8113_v28 = vmul.f32 %v7412_v21, %v7640_v59  ;;  %6213 = vmatprep.subr.msk.mxu1 %vm13932_vm7, %v14525_v12  ;;  %v8148_v52 = vadd.s32 320, %v7399_v16  ;;  %vm13945_vm7 = vcmp.eq.s32.totalorder %v8096_v5, %v7701_v44  ;;  %6166 = vmatpush1.msk.msra.mxu0 %vm13943_vm6, %v14525_v12 }
 0x130   : > { %760 = vrot.lane.b32.xlu0 %v572_v55, %s7278_s24  ;;  %752 = vrot.lane.b32.xlu1 %v568_v0, %s7278_s24  ;;  %v1433_v0 = vld [vmem:[%s13824_s2 + $0x38] sm:$0xff]  ;;  %v8120_v55 = vmul.f32 %v7628_v54, %v7436_v32  ;;  %v8139_v54 = vadd.s32 8, %v7399_v16  ;;  %vm13946_vm15 = vcmp.eq.s32.totalorder %v8087_v51, %v7694_v39  ;;  %vm13948_vm11 = vcmp.eq.s32.totalorder %v8096_v5, %v7694_v39 }
 0x131   : > { %6214 = vmatpush1.msk.msra.mxu1 %vm13931_vm9, %v14525_v12  ;;  %14545 = vst [vmem:[#allocation68_spill] sm:$0xff] %v8148_v52  ;;  %vm13944_vm9 = vcmp.eq.s32.totalorder %v8087_v51, %v7701_v44  ;;  %v417_v29 = vmul.f32 %v7436_v32, %v7546_v10  ;;  %v889_v59 = vadd.f32 %v769_v33, %v416_v47  ;;  %14553 = vst [vmem:[#allocation76_spill] sm:$0xff] %v8299_v15 }
 0x132   : > { %v8130_v7 = vpop.permute.xlu0 %674  ;;  %14544 = vst [vmem:[#allocation67_spill] sm:$0xff] %v8139_v54  ;;  %6215 = vmatprep.subr.msk.mxu1 %vm13942_vm8, %v14525_v12  ;;  %v1242_v13 = vsel %vm1241_vm10, %v7735_v62, %v7685_v8  ;;  %6167 = vmatprep.subr.msk.mxu0 %vm13944_vm9, %v14525_v12  ;;  %vm13949_vm8 = vcmp.eq.s32.totalorder %v8139_v54, %v7701_v44 }
 0x133   : > { %14543 = vst [vmem:[#allocation66_spill] sm:$0xff] %v8130_v7  ;;  %v8152_v7 = vpop.permute.xlu1 %696  ;;  %6216 = vmatpush1.msk.msra.mxu1 %vm13947_vm13, %v14525_v12  ;;  %vm13998_vm6 = vcmp.eq.s32.totalorder %v8148_v52, %v7701_v44  ;;  %v890_v47 = vadd.f32 %v770_v42, %v417_v29  ;;  %6168 = vmatpush1.msk.msra.mxu0 %vm13946_vm15, %v14525_v12 }
 0x134   : > { %14546 = vst [vmem:[#allocation69_spill] sm:$0xff] %v8152_v7  ;;  %1471 = vperm.xlu0 %7037, %v1433_v0   ;;  %1127 = vrot.lane.b32.xlu1 %v7895_v24, %s7279_s25  ;;  %v8176_v7 = vadd.s32 312, %v7399_v16  ;;  %v1243_v24 = vsel %vm1241_vm10, %v7685_v8, %v7683_v30  ;;  %vm13950_vm9 = vcmp.eq.s32.totalorder %v8139_v54, %v7694_v39  ;;  %v8215_v8 = vadd.s32 248, %v7399_v16 }
 0x135   : > { %6217 = vmatprep.subr.msk.mxu1 %vm13945_vm7, %v14525_v12  ;;  %vm13981_vm7 = vcmp.eq.s32.totalorder %v8148_v52, %v7694_v39  ;;  %v1362_v29 = vadd.f32 %v1242_v13, %v889_v59  ;;  %vm13955_vm15 = vcmp.eq.s32.totalorder %v7399_v16, %v7701_v44  ;;  %v8233_v42 = vmul.f32 %v7412_v21, %v7546_v10 }
 0x136   : > { %14547 = vst [vmem:[#allocation70_spill] sm:$0xff] %v8176_v7  ;;  %v8194_v0 = vpop.permute.xlu0 %656  ;;  %14548 = vst [vmem:[#allocation71_spill] sm:$0xff] %v8215_v8  ;;  %6218 = vmatpush1.msk.msra.mxu1 %vm13948_vm11, %v14525_v12  ;;  %vm13962_vm13 = vcmp.eq.s32.totalorder %v8176_v7, %v7701_v44  ;;  %v8237_v62 = vmul.f32 %v7409_v20, %v7546_v10  ;;  %v1363_v59 = vadd.f32 %v1243_v24, %v890_v47 }
 0x137   : > { %v8239_v33 = vpop.permute.xlu1 %1165  ;;  %6169 = vmatprep.subr.msk.mxu0 %vm13949_vm8, %v14525_v12  ;;  %6219 = vmatprep.subr.msk.mxu1 %vm13998_vm6, %v14525_v12  ;;  %vm13963_vm11 = vcmp.eq.s32.totalorder %v7399_v16, %v7694_v39  ;;  %v8262_v13 = vadd.s32 240, %v7399_v16  ;;  %vm13964_vm8 = vcmp.eq.s32.totalorder %v8176_v7, %v7694_v39  ;;  %v8272_v24 = vmul.f32 %v7409_v20, %v7568_v23 }
 0x138   : > { %736 = vrot.lane.b32.xlu0 %v8045_v46, %s7278_s24  ;;  %1225 = vrot.lane.b32.xlu1 %v8049_v36, %s7279_s25  ;;  %14549 = vst [vmem:[#allocation72_spill] sm:$0xff] %v8239_v33  ;;  %v8251_v46 = vmul.f32 %v7412_v21, %v7568_v23  ;;  %v425_v47 = vmul.f32 %v7436_v32, %v7568_v23  ;;  %v8287_v54 = vadd.s32 304, %v7399_v16  ;;  %v8302_v52 = vadd.s32 296, %v7399_v16 }
 0x139   : > { %6170 = vmatpush1.msk.msra.mxu0 %vm13950_vm9, %v14525_v12  ;;  %14550 = vst [vmem:[#allocation73_spill] sm:$0xff] %v8262_v13  ;;  %6220 = vmatpush1.msk.msra.mxu1 %vm13981_vm7, %v14525_v12  ;;  %vm13969_vm9 = vcmp.eq.s32.totalorder %v8215_v8, %v7701_v44  ;;  %v8290_v51 = vadd.f32 %v7559_v17, %v1362_v29  ;;  %v8352_v10 = vadd.s32 224, %v7399_v16 }
 0x13a   : > { %v8253_v36 = vpop.permute.xlu0 %1151  ;;  %6171 = vmatprep.subr.msk.mxu0 %vm13955_vm15, %v14525_v12  ;;  %6221 = vmatprep.subr.msk.mxu1 %vm13962_vm13, %v14525_v12  ;;  %14551 = vst [vmem:[#allocation74_spill] sm:$0xff] %v8287_v54  ;;  %vm13977_vm15 = vcmp.eq.s32.totalorder %v8215_v8, %v7694_v39  ;;  %14554 = vst [vmem:[#allocation77_spill] sm:$0xff] %v8302_v52  ;;  %v8305_v5 = vadd.f32 %v7559_v17, %v1363_v59  ;;  %v8338_v59 = vadd.s32 288, %v7399_v16 }
 0x13b   : > { %14552 = vst [vmem:[#allocation75_spill] sm:$0xff] %v8290_v51  ;;  %v785_v29 = vsel %vm14319_vm14, %v7988_v56, %v7858_v61  ;;  %6172 = vmatpush1.msk.msra.mxu0 %vm13963_vm11, %v14525_v12  ;;  %6222 = vmatpush1.msk.msra.mxu1 %vm13964_vm8, %v14525_v12  ;;  %vm13972_vm13 = vcmp.eq.s32.totalorder %v8287_v54, %v7701_v44  ;;  %v8343_v9 = vpop.permute.xlu1 %1169  ;;  %14558 = vst [vmem:[#allocation81_spill] sm:$0xff] %v8352_v10  ;;  %v8428_v8 = vadd.s32 208, %v7399_v16 }
 0x13c   : > { %1231 = vrot.lane.b32.xlu0 %v8102_v63, %s7279_s25  ;;  %670 = vrot.lane.b32.xlu1 %v7843_v4, %s7278_s24  ;;  %14555 = vst [vmem:[#allocation78_spill] sm:$0xff] %v8305_v5  ;;  %v777_v63 = vsel %vm14319_vm14, %v7809_v37, %v7707_v50  ;;  %vm13982_vm11 = vcmp.eq.s32.totalorder %v8262_v13, %v7701_v44  ;;  %14556 = vst [vmem:[#allocation79_spill] sm:$0xff] %v8338_v59 }
 0x13d   : > { %6173 = vmatprep.subr.msk.mxu0 %vm13969_vm9, %v14525_v12  ;;  %6223 = vmatprep.subr.msk.mxu1 %vm13972_vm13, %v14525_v12  ;;  %vm13980_vm8 = vcmp.eq.s32.totalorder %v8287_v54, %v7694_v39  ;;  %v1258_v7 = vsel %vm1241_vm10, %v7923_v35, %v8253_v36  ;;  %14557 = vst [vmem:[#allocation80_spill] sm:$0xff] %v8343_v9  ;;  %14562 = vst [vmem:[#allocation85_spill] sm:$0xff] %v8428_v8 }
 0x13e   : > { %v8323_v4 = vpop.permute.xlu0 %1147  ;;  %6174 = vmatpush2.msk.msra.mxu0 %vm13977_vm15, %v14525_v12  ;;  %vm13983_vm9 = vcmp.eq.s32.totalorder %v8262_v13, %v7694_v39  ;;  %6224 = vmatpush1.msk.msra.mxu1 %vm13980_vm8, %v14525_v12  ;;  %vm13984_vm13 = vcmp.eq.s32.totalorder %v8302_v52, %v7701_v44  ;;  %v771_v9 = vsel %vm14319_vm14, %v7653_v3, %v7651_v2  ;;  %v14563_v13 = vmax.f32 %v8290_v51, 0.0 }
 0x13f   : > { %v907_v33 = vadd.f32 %v785_v29, %v8113_v28  ;;  %vm13985_vm15 = vcmp.eq.s32.totalorder %v8299_v15, %v7701_v44  ;;  %v1250_v54 = vsel %vm1241_vm10, %v7811_v48, %v7856_v40  ;;  %6175 = vmatprep.subr.msk.mxu0 %vm13982_vm11, %v14525_v12  ;;  %6225 = vmatprep.subr.msk.mxu1 %vm13984_vm13, %v14525_v12  ;;  %v8387_v28 = vadd.s32 280, %v7399_v16  ;;  %v8434_v48 = vpop.permute.xlu1 %708 }
 0x140   : > { %1227 = vrot.lane.b32.xlu0 %v8120_v55, %s7279_s25  ;;  %1141 = vrot.lane.b32.xlu1 %v7899_v38, %s7279_s25  ;;  %vm13992_vm8 = vcmp.eq.s32.totalorder %v8302_v52, %v7694_v39  ;;  %vm13991_vm7 = vcmp.eq.s32.totalorder %v8338_v59, %v7701_v44  ;;  %v898_v3 = vadd.f32 %v777_v63, %v425_v47  ;;  %v8398_v29 = vadd.s32 216, %v7399_v16 }
 0x141   : > { %14559 = vst [vmem:[#allocation82_spill] sm:$0xff] %v8387_v28  ;;  %v1380_v38 = vadd.f32 %v1258_v7, %v907_v33  ;;  %6176 = vmatpush2.msk.msra.mxu0 %vm13983_vm9, %v14525_v12  ;;  %vm13993_vm11 = vcmp.eq.s32.totalorder %v8299_v15, %v7694_v39  ;;  %6226 = vmatpush1.msk.msra.mxu1 %vm13992_vm8, %v14525_v12  ;;  %v14001_v7 = vmax.f32 %v8305_v5, 0.0  ;;  %v8418_v33 = vadd.s32 272, %v7399_v16 }
 0x142   : > { %v8389_v55 = vpop.permute.xlu0 %694  ;;  %14560 = vst [vmem:[#allocation83_spill] sm:$0xff] %v8398_v29  ;;  %6177 = vmatprep.subr.msk.mxu0 %vm13985_vm15, %v14525_v12  ;;  %vm13995_vm9 = vcmp.eq.s32.totalorder %v8352_v10, %v7701_v44  ;;  %6227 = vmatprep.subr.msk.mxu1 %vm13991_vm7, %v14525_v12  ;;  %vm13994_vm13 = vcmp.eq.s32.totalorder %v8338_v59, %v7694_v39 }
 0x143   : > { %14561 = vst [vmem:[#allocation84_spill] sm:$0xff] %v8418_v33  ;;  %v891_v47 = vadd.f32 %v771_v9, %v8233_v42  ;;  %v1371_v63 = vadd.f32 %v1250_v54, %v898_v3  ;;  %vm13997_vm15 = vcmp.eq.s32.totalorder %v8352_v10, %v7694_v39  ;;  %v7043_v52 = vpack.i.bf16 %v14563_v13, %v14001_v7  ;;  %v8535_v7 = vpop.permute.xlu1 %712 }
 0x144   : > { %654 = vrot.lane.b32.xlu0 %v7847_v57, %s7278_s24  ;;  %1139 = vrot.lane.b32.xlu1 %v7908_v22, %s7279_s25  ;;  %vm13996_vm7 = vcmp.eq.s32.totalorder %v8387_v28, %v7701_v44  ;;  %vm13999_vm8 = vcmp.eq.s32.totalorder %v8387_v28, %v7694_v39  ;;  %v8449_v22 = vadd.f32 %v7603_v41, %v1380_v38  ;;  %v8466_v57 = vadd.s32 264, %v7399_v16 }
 0x145   : > { %6178 = vmatpush2.msk.msra.mxu0 %vm13993_vm11, %v14525_v12  ;;  %6228 = vmatpush1.msk.msra.mxu1 %vm13994_vm13, %v14525_v12  ;;  %vm14000_vm11 = vcmp.eq.s32.totalorder %v8398_v29, %v7701_v44  ;;  %vm14018_vm13 = vcmp.eq.s32.totalorder %v8418_v33, %v7701_v44  ;;  %v772_v9 = vsel %vm14319_vm14, %v7651_v2, %v7658_v6  ;;  %v8478_v42 = vadd.s32 200, %v7399_v16  ;;  %v14625_v6 = vld [vmem:[#allocation13_spill] sm:$0xff] }
 0x146   : > { %14564 = vst [vmem:[#allocation86_spill] sm:$0xff] %v8449_v22  ;;  %v8451_v54 = vpop.permute.xlu0 %1129  ;;  %6179 = vmatprep.subr.msk.mxu0 %vm13995_vm9, %v14525_v12  ;;  %6229 = vmatprep.subr.msk.mxu1 %vm13996_vm7, %v14525_v12  ;;  %14565 = vst [vmem:[#allocation87_spill] sm:$0xff] %v8466_v57  ;;  %vm14002_vm9 = vcmp.eq.s32.totalorder %v8398_v29, %v7694_v39  ;;  %vm14003_vm7 = vcmp.eq.s32.totalorder %v8418_v33, %v7694_v39  ;;  %v8497_v13 = vadd.s32 256, %v7399_v16 }
 0x147   : > { %6180 = vmatpush2.msk.msra.mxu0 %vm13997_vm15, %v14525_v12  ;;  %14566 = vst [vmem:[#allocation88_spill] sm:$0xff] %v8478_v42  ;;  %6230 = vmatpush1.msk.msra.mxu1 %vm13999_vm8, %v14525_v12  ;;  %v8487_v2 = vadd.f32 %v7580_v31, %v1371_v63  ;;  %vm14004_vm15 = vcmp.eq.s32.totalorder %v8428_v8, %v7701_v44  ;;  %v8532_v38 = vadd.s32 504, %v7399_v16  ;;  %14571 = vst [vmem:[#allocation93_spill] sm:$0xff] %v8535_v7 }
 0x148   : > { %650 = vrot.lane.b32.xlu0 %v7875_v60, %s7278_s24  ;;  %7044 = vrot.lane.b32.xlu1 %v7043_v52, %s7281_s16  ;;  %vm14005_vm6 = vcmp.eq.s32.totalorder %v8466_v57, %v7701_v44  ;;  %14568 = vst [vmem:[#allocation90_spill] sm:$0xff] %v8497_v13  ;;  %v1244_v3 = vsel %vm1241_vm10, %v7683_v30, %v7670_v14 }
 0x149   : > { %14567 = vst [vmem:[#allocation89_spill] sm:$0xff] %v8487_v2  ;;  %v1245_v60 = vsel %vm1241_vm10, %v7670_v14, %v7705_v49  ;;  %6181 = vmatprep.subr.msk.mxu0 %vm14000_vm11, %v14525_v12  ;;  %vm14008_vm8 = vcmp.eq.s32.totalorder %v8428_v8, %v7694_v39  ;;  %6231 = vmatprep.subr.msk.mxu1 %vm14018_vm13, %v14525_v12  ;;  %v8523_v14 = vadd.s32 192, %v7399_v16  ;;  %14570 = vst [vmem:[#allocation92_spill] sm:$0xff] %v8532_v38 }
 0x14a   : > { %v8516_v30 = vpop.permute.xlu0 %690  ;;  %6182 = vmatpush2.msk.msra.mxu0 %vm14002_vm9, %v14525_v12  ;;  %6232 = vmatpush1.msk.msra.mxu1 %vm14003_vm7, %v14525_v12  ;;  %vm14009_vm11 = vcmp.eq.s32.totalorder %v8466_v57, %v7694_v39  ;;  %v892_v63 = vadd.f32 %v772_v9, %v8237_v62  ;;  %vm14010_vm9 = vcmp.eq.s32.totalorder %v8478_v42, %v7701_v44  ;;  %v8557_v9 = vadd.s32 184, %v7399_v16 }
 0x14b   : > { %14569 = vst [vmem:[#allocation91_spill] sm:$0xff] %v8523_v14  ;;  %6183 = vmatprep.subr.msk.mxu0 %vm14004_vm15, %v14525_v12  ;;  %6233 = vmatprep.subr.msk.mxu1 %vm14005_vm6, %v14525_v12  ;;  %vm14011_vm7 = vcmp.eq.s32.totalorder %v8497_v13, %v7701_v44  ;;  %vm14014_vm15 = vcmp.eq.s32.totalorder %v8478_v42, %v7694_v39 }
 0x14c   : > { %1125 = vrot.lane.b32.xlu0 %v7929_v11, %s7279_s25  ;;  %684 = vrot.lane.b32.xlu1 %v7973_v43, %s7278_s24  ;;  %14572 = vst [vmem:[#allocation94_spill] sm:$0xff] %v8557_v9  ;;  %vm14015_vm6 = vcmp.eq.s32.totalorder %v8497_v13, %v7694_v39  ;;  %v1364_v52 = vadd.f32 %v1244_v3, %v891_v47  ;;  %v8573_v43 = vadd.s32 496, %v7399_v16  ;;  %v14574_v47 = vmax.f32 %v8487_v2, 0.0 }
 0x14d   : > { %v1365_v29 = vadd.f32 %v1245_v60, %v892_v63  ;;  %v778_v62 = vsel %vm14319_vm14, %v7707_v50, %v7737_v1  ;;  %6184 = vmatpush2.msk.msra.mxu0 %vm14008_vm8, %v14525_v12  ;;  %6234 = vmatpush1.msk.msra.mxu1 %vm14009_vm11, %v14525_v12  ;;  %v14575_v3 = vmax.f32 %v8449_v22, 0.0  ;;  %vm14021_vm8 = vcmp.eq.s32.totalorder %v8523_v14, %v7701_v44 }
 0x14e   : > { %14573 = vst [vmem:[#allocation95_spill] sm:$0xff] %v8573_v43  ;;  %v8575_v11 = vpop.permute.xlu0 %672  ;;  %6185 = vmatprep.subr.msk.mxu0 %vm14010_vm9, %v14525_v12  ;;  %6235 = vmatprep.subr.msk.mxu1 %vm14011_vm7, %v14525_v12  ;;  %vm2385_vm11 = vcmp.eq.s32.totalorder %v8532_v38, %v7701_v44  ;;  %vm14019_vm9 = vcmp.eq.s32.totalorder %v8523_v14, %v7694_v39  ;;  %v8602_v63 = vadd.s32 176, %v7399_v16 }
 0x14f   : > { %v7053_v50 = vpack.i.bf16 %v14575_v3, %v14574_v47  ;;  %v8593_v60 = vpop.permute.xlu1 %1456  ;;  %6186 = vmatpush2.msk.msra.mxu0 %vm14014_vm15, %v14525_v12  ;;  %6236 = vmatpush1.msk.msra.mxu1 %vm14015_vm6, %v14525_v12  ;;  %vm2384_vm7 = vcmp.eq.s32.totalorder %v8532_v38, %v7694_v39  ;;  %v7282_v47 = vmov 0.0   ;;  %v8611_v3 = vadd.s32 488, %v7399_v16 }
 0x150   : > { %14576 = vst [vmem:[#allocation96_spill] sm:$0xff] %v8602_v63  ;;  %4892 = vst [vmem:[#allocation2] sm:$0xff] %v7282_v47  ;;  %v779_v42 = vsel %vm14319_vm14, %v7737_v1, %v7768_v27  ;;  %1123 = vrot.lane.b32.xlu0 %v7963_v25, %s7279_s25  ;;  %vm14020_vm15 = vcmp.eq.s32.totalorder %v8557_v9, %v7701_v44  ;;  %vm14026_vm6 = vcmp.eq.s32.totalorder %v8573_v43, %v7701_v44  ;;  %v14620_v27 = vld [vmem:[#allocation72_spill] sm:$0xff] }
 0x151   : > { %4893 = vst [vmem:[#allocation2 + $0x8] sm:$0xff] %v7282_v47  ;;  %4894 = vst [vmem:[#allocation2 + $0x10] sm:$0xff] %v7282_v47  ;;  %7054 = vrot.lane.b32.xlu1 %v7053_v50, %s7281_s16  ;;  %v1251_v8 = vsel %vm1241_vm10, %v7856_v40, %v7770_v34  ;;  %v1252_v1 = vsel %vm1241_vm10, %v7770_v34, %v7921_v26  ;;  %6187 = vmatprep.subr.msk.mxu0 %vm14021_vm8, %v14525_v12  ;;  %v8647_v34 = vadd.s32 168, %v7399_v16 }
 0x152   : > { %4895 = vst [vmem:[#allocation2 + $0x18] sm:$0xff] %v7282_v47  ;;  %4896 = vst [vmem:[#allocation2 + $0x20] sm:$0xff] %v7282_v47  ;;  %6237 = vmatprep.subr.msk.mxu1 %vm2385_vm11, %v14525_v12  ;;  %v8638_v25 = vpop.permute.xlu0 %1167  ;;  %6188 = vmatpush2.msk.msra.mxu0 %vm14019_vm9, %v14525_v12  ;;  %vm14040_vm13 = vcmp.eq.s32.totalorder %v8557_v9, %v7694_v39  ;;  %vm14027_vm11 = vcmp.eq.s32.totalorder %v8573_v43, %v7694_v39  ;;  %v8656_v40 = vadd.s32 480, %v7399_v16  ;;  %v14592_v43 = vld [vmem:[#allocation12_spill] sm:$0xff] }
 0x153   : > { %4897 = vst [vmem:[#allocation2 + $0x28] sm:$0xff] %v7282_v47  ;;  %4898 = vst [vmem:[#allocation2 + $0x30] sm:$0xff] %v7282_v47  ;;  %6238 = vmatpush2.msk.msra.mxu1 %vm2384_vm7, %v14525_v12  ;;  %6189 = vmatprep.subr.msk.mxu0 %vm14020_vm15, %v14525_v12  ;;  %vm14028_vm9 = vcmp.eq.s32.totalorder %v8602_v63, %v7701_v44  ;;  %vm14029_vm7 = vcmp.eq.s32.totalorder %v8611_v3, %v7701_v44 }
 0x154   : > { %4899 = vst [vmem:[#allocation2 + $0x38] sm:$0xff] %v7282_v47  ;;  %14577 = vst [vmem:[#allocation97_spill] sm:$0xff] %v8611_v3  ;;  %v899_v47 = vadd.f32 %v778_v62, %v8251_v46  ;;  %v900_v46 = vadd.f32 %v779_v42, %v8272_v24  ;;  %v8659_v62 = vpop.permute.xlu1 %367  ;;  %6239 = vmatprep.subr.msk.mxu1 %vm14026_vm6, %v14525_v12  ;;  %668 = vrot.lane.b32.xlu0 %v7879_v45, %s7278_s24  ;;  %v8680_v24 = vadd.s32 160, %v7399_v16 }
 0x155   : > { %14578 = vst [vmem:[#allocation98_spill] sm:$0xff] %v8647_v34  ;;  %14579 = vst [vmem:[#allocation99_spill] sm:$0xff] %v8656_v40  ;;  %1157 = vrot.lane.b32.xlu1 %v8011_v19, %s7279_s25  ;;  %vm14030_vm15 = vcmp.eq.s32.totalorder %v8602_v63, %v7694_v39  ;;  %vm14031_vm8 = vcmp.eq.s32.totalorder %v8611_v3, %v7694_v39  ;;  %v8685_v42 = vadd.s32 472, %v7399_v16  ;;  %6190 = vmatpush2.msk.msra.mxu0 %vm14040_vm13, %v14525_v12 }
 0x156   : > { %14580 = vst [vmem:[#allocation100_spill] sm:$0xff] %v8659_v62  ;;  %14581 = vst [vmem:[#allocation101_spill] sm:$0xff] %v8680_v24  ;;  %v8688_v50 = vadd.f32 %v7559_v17, %v1365_v29  ;;  %v1372_v14 = vadd.f32 %v1251_v8, %v899_v47  ;;  %v1373_v45 = vadd.f32 %v1252_v1, %v900_v46  ;;  %6240 = vmatpush2.msk.msra.mxu1 %vm14027_vm11, %v14525_v12  ;;  %v8701_v38 = vpop.permute.xlu0 %1163  ;;  %v14587_v47 = vld [vmem:[#allocation45_spill] sm:$0xff]  ;;  %v14588_v1 = vld [vmem:[#allocation10_spill] sm:$0xff] }
 0x157   : > { %14582 = vst [vmem:[#allocation102_spill] sm:$0xff] %v8685_v42  ;;  %v8699_v19 = vadd.f32 %v7559_v17, %v1364_v52  ;;  %6191 = vmatprep.subr.msk.mxu0 %vm14028_vm9, %v14525_v12  ;;  %vm14046_vm6 = vcmp.eq.s32.totalorder %v8647_v34, %v7701_v44  ;;  %6241 = vmatprep.subr.msk.mxu1 %vm14029_vm7, %v14525_v12  ;;  %v8724_v29 = vadd.s32 152, %v7399_v16  ;;  %v8733_v52 = vadd.s32 464, %v7399_v16 }
 0x158   : > { %14583 = vst [vmem:[#allocation103_spill] sm:$0xff] %v8688_v50  ;;  %vm14041_vm11 = vcmp.eq.s32.totalorder %v8656_v40, %v7701_v44  ;;  %v8715_v8 = vpop.permute.xlu1 %1181  ;;  %6192 = vmatpush2.msk.msra.mxu0 %vm14030_vm15, %v14525_v12  ;;  %vm14044_vm9 = vcmp.eq.s32.totalorder %v8647_v34, %v7694_v39  ;;  %6242 = vmatpush2.msk.msra.mxu1 %vm14031_vm8, %v14525_v12  ;;  %v8802_v63 = vadd.s32 136, %v7399_v16  ;;  %v14600_v33 = vmax.f32 %v8688_v50, 0.0 }
 0x159   : > { %14584 = vst [vmem:[#allocation104_spill] sm:$0xff] %v8699_v19  ;;  %14585 = vst [vmem:[#allocation105_spill] sm:$0xff] %v8724_v29  ;;  %vm14045_vm7 = vcmp.eq.s32.totalorder %v8656_v40, %v7694_v39  ;;  %666 = vrot.lane.b32.xlu0 %v7883_v53, %s7278_s24  ;;  %1155 = vrot.lane.b32.xlu1 %v8032_v58, %s7279_s25  ;;  %v1000_v46 = vmul.f32 %v14588_v1, %v14587_v47  ;;  %v14591_v53 = vld [vmem:[#allocation44_spill] sm:$0xff]  ;;  %v8807_v40 = vadd.s32 448, %v7399_v16 }
 0x15a   : > { %14586 = vst [vmem:[#allocation106_spill] sm:$0xff] %v8733_v52  ;;  %vm14047_vm15 = vcmp.eq.s32.totalorder %v8680_v24, %v7701_v44  ;;  %vm14062_vm8 = vcmp.eq.s32.totalorder %v8685_v42, %v7701_v44  ;;  %v8747_v9 = vadd.f32 %v7580_v31, %v1372_v14  ;;  %v8750_v3 = vadd.f32 %v7580_v31, %v1373_v45  ;;  %v8762_v1 = vpop.permute.xlu0 %710 }
 0x15b   : > { %v542_v58 = vmul.f32 %v14592_v43, %v14591_v53  ;;  %6193 = vmatprep.subr.msk.mxu0 %vm14046_vm6, %v14525_v12  ;;  %6243 = vmatprep.subr.msk.mxu1 %vm14041_vm11, %v14525_v12  ;;  %vm14071_vm13 = vcmp.eq.s32.totalorder %v8680_v24, %v7694_v39  ;;  %v8771_v14 = vadd.s32 144, %v7399_v16  ;;  %vm14063_vm11 = vcmp.eq.s32.totalorder %v8685_v42, %v7694_v39  ;;  %v14603_v24 = vld [vmem:[#allocation30_spill] sm:$0xff] }
 0x15c   : > { %14589 = vst [vmem:[#allocation10_spill] sm:$0xff] %v8747_v9  ;;  %14590 = vst [vmem:[#allocation107_spill] sm:$0xff] %v8750_v3  ;;  %6194 = vmatpush2.msk.msra.mxu0 %vm14044_vm9, %v14525_v12  ;;  %6244 = vmatpush2.msk.msra.mxu1 %vm14045_vm7, %v14525_v12  ;;  %v8780_v45 = vadd.s32 456, %v7399_v16  ;;  %v8783_v34 = vpop.permute.xlu1 %1185  ;;  %vm14064_vm9 = vcmp.eq.s32.totalorder %v8724_v29, %v7701_v44  ;;  %vm14065_vm7 = vcmp.eq.s32.totalorder %v8733_v52, %v7701_v44  ;;  %v14604_v42 = vld [vmem:[#allocation66_spill] sm:$0xff] }
 0x15d   : > { %14593 = vst [vmem:[#allocation12_spill] sm:$0xff] %v8771_v14  ;;  %14595 = vst [vmem:[#allocation109_spill] sm:$0xff] %v8783_v34  ;;  %6195 = vmatprep.subr.msk.mxu0 %vm14047_vm15, %v14525_v12  ;;  %6245 = vmatprep.subr.msk.mxu1 %vm14062_vm8, %v14525_v12  ;;  %vm14070_vm6 = vcmp.eq.s32.totalorder %v8724_v29, %v7694_v39  ;;  %vm14081_vm15 = vcmp.eq.s32.totalorder %v8733_v52, %v7694_v39  ;;  %v14599_v10 = vmax.f32 %v8699_v19, 0.0 }
 0x15e   : > { %14594 = vst [vmem:[#allocation108_spill] sm:$0xff] %v8780_v45  ;;  %1143 = vrot.lane.b32.xlu0 %v1000_v46, %s7279_s25  ;;  %700 = vrot.lane.b32.xlu1 %v542_v58, %s7278_s24  ;;  %14596 = vst [vmem:[#allocation110_spill] sm:$0xff] %v8802_v63  ;;  %v541_v13 = vmul.f32 %v14592_v43, %v7824_v18  ;;  %v14598_v46 = vld [vmem:[#allocation16_spill] sm:$0xff]  ;;  %v8823_v57 = vpop.permute.xlu0 %1145  ;;  %vm14087_vm8 = vcmp.eq.s32.totalorder %v8771_v14, %v7701_v44  ;;  %v14605_v2 = vmax.f32 %v8747_v9, 0.0  ;;  %v14612_v9 = vld [vmem:[#allocation11_spill] sm:$0xff] }
 0x15f   : > { %14597 = vst [vmem:[#allocation111_spill] sm:$0xff] %v8807_v40  ;;  %v1015_v58 = vmul.f32 %v14598_v46, %v14591_v53  ;;  %6196 = vmatpush2.msk.msra.mxu0 %vm14071_vm13, %v14525_v12  ;;  %6246 = vmatpush2.msk.msra.mxu1 %vm14063_vm11, %v14525_v12  ;;  %v7038_v28 = vpack.i.bf16 %v14600_v33, %v14599_v10  ;;  %v8850_v10 = vadd.s32 128, %v7399_v16  ;;  %v8859_v33 = vadd.s32 440, %v7399_v16 }
 0x160   : > { %6197 = vmatprep.subr.msk.mxu0 %vm14064_vm9, %v14525_v12  ;;  %6247 = vmatprep.subr.msk.mxu1 %vm14065_vm7, %v14525_v12  ;;  %vm14082_vm11 = vcmp.eq.s32.totalorder %v8780_v45, %v7701_v44  ;;  %v8841_v15 = vpop.permute.xlu1 %724  ;;  %vm14084_vm9 = vcmp.eq.s32.totalorder %v8771_v14, %v7694_v39  ;;  %vm14083_vm7 = vcmp.eq.s32.totalorder %v8780_v45, %v7694_v39  ;;  %v14606_v22 = vmax.f32 %v8750_v3, 0.0  ;;  %v14611_v45 = vld [vmem:[#allocation57_spill] sm:$0xff] }
 0x161   : > { %6198 = vmatpush2.msk.msra.mxu0 %vm14070_vm6, %v14525_v12  ;;  %14601 = vst [vmem:[#allocation16_spill] sm:$0xff] %v8850_v10  ;;  %6248 = vmatpush2.msk.msra.mxu1 %vm14081_vm15, %v14525_v12  ;;  %14602 = vst [vmem:[#allocation112_spill] sm:$0xff] %v8859_v33  ;;  %v435_v29 = vmul.f32 %v7409_v20, %v14603_v24  ;;  %vm14088_vm6 = vcmp.eq.s32.totalorder %v8802_v63, %v7701_v44 }
 0x162   : > { %7039 = vrot.lane.b32.xlu0 %v7038_v28, %s7281_s16  ;;  %698 = vrot.lane.b32.xlu1 %v541_v13, %s7278_s24  ;;  %vm14093_vm13 = vcmp.eq.s32.totalorder %v8807_v40, %v7701_v44  ;;  %v433_v52 = vmul.f32 %v7436_v32, %v14603_v24  ;;  %v784_v59 = vsel %vm14319_vm14, %v14604_v42, %v7988_v56  ;;  %v14607_v13 = vld [vmem:[#allocation61_spill] sm:$0xff]  ;;  %v8889_v56 = vpop.permute.xlu0 %706 }
 0x163   : > { %v7048_v28 = vpack.i.bf16 %v14606_v22, %v14605_v2  ;;  %6199 = vmatprep.subr.msk.mxu0 %vm14087_vm8, %v14525_v12  ;;  %6249 = vmatprep.subr.msk.mxu1 %vm14082_vm11, %v14525_v12  ;;  %v786_v26 = vsel %vm14319_vm14, %v7858_v61, %v14607_v13  ;;  %vm14216_vm15 = vcmp.eq.s32.totalorder %v8802_v63, %v7694_v39  ;;  %v8904_v61 = vadd.s32 432, %v7399_v16  ;;  %v14615_v63 = vld [vmem:[#allocation14_spill] sm:$0xff] }
 0x164   : > { %6200 = vmatpush2.msk.msra.mxu0 %vm14084_vm9, %v14525_v12  ;;  %6250 = vmatpush2.msk.msra.mxu1 %vm14083_vm7, %v14525_v12  ;;  %vm14094_vm11 = vcmp.eq.s32.totalorder %v8807_v40, %v7694_v39  ;;  %v1257_v22 = vsel %vm1241_vm10, %v8323_v4, %v7923_v35  ;;  %v8909_v2 = vpop.permute.xlu1 %728  ;;  %vm14195_vm7 = vcmp.eq.s32.totalorder %v8850_v10, %v7701_v44  ;;  %v8930_v35 = vadd.s32 424, %v7399_v16  ;;  %v14619_v40 = vld [vmem:[#allocation9_spill] sm:$0xff] }
 0x165   : > { %14608 = vst [vmem:[#allocation30_spill] sm:$0xff] %v8904_v61  ;;  %14609 = vst [vmem:[#allocation66_spill] sm:$0xff] %v8909_v2  ;;  %6201 = vmatprep.subr.msk.mxu0 %vm14088_vm6, %v14525_v12  ;;  %6251 = vmatprep.subr.msk.mxu1 %vm14093_vm13, %v14525_v12  ;;  %vm14095_vm9 = vcmp.eq.s32.totalorder %v8859_v33, %v7701_v44  ;;  %v906_v14 = vadd.f32 %v784_v59, %v433_v52 }
 0x166   : > { %7049 = vrot.lane.b32.xlu0 %v7048_v28, %s7281_s16  ;;  %1173 = vrot.lane.b32.xlu1 %v1015_v58, %s7279_s25  ;;  %vm14194_vm8 = vcmp.eq.s32.totalorder %v8850_v10, %v7694_v39  ;;  %vm14102_vm6 = vcmp.eq.s32.totalorder %v8859_v33, %v7694_v39  ;;  %14610 = vst [vmem:[#allocation113_spill] sm:$0xff] %v8930_v35  ;;  %v8947_v3 = vpop.permute.xlu0 %688 }
 0x167   : > { %v1259_v13 = vsel %vm1241_vm10, %v8253_v36, %v14611_v45  ;;  %v535_v59 = vmul.f32 %v14612_v9, %v14587_v47  ;;  %v1014_v52 = vmul.f32 %v14598_v46, %v7824_v18  ;;  %6202 = vmatpush2.msk.msra.mxu0 %vm14216_vm15, %v14525_v12  ;;  %6252 = vmatpush2.msk.msra.mxu1 %vm14094_vm11, %v14525_v12 }
 0x168   : > { %v908_v58 = vadd.f32 %v786_v26, %v435_v29  ;;  %v1379_v28 = vadd.f32 %v1257_v22, %v906_v14  ;;  %6203 = vmatprep.subr.msk.mxu0 %vm14195_vm7, %v14525_v12  ;;  %6253 = vmatprep.subr.msk.mxu1 %vm14095_vm9, %v14525_v12  ;;  %vm14112_vm13 = vcmp.eq.s32.totalorder %v8904_v61, %v7701_v44  ;;  %v8959_v36 = vpop.permute.xlu1 %1461  ;;  %v8972_v26 = vadd.s32 416, %v7399_v16  ;;  %v14614_v14 = vld [vmem:[#allocation62_spill] sm:$0xff] }
 0x169   : > { %6204 = vmatpush2.msk.msra.mxu0 %vm14194_vm8, %v14525_v12  ;;  %6254 = vmatpush2.msk.msra.mxu1 %vm14102_vm6, %v14525_v12  ;;  %vm14108_vm11 = vcmp.eq.s32.totalorder %v8904_v61, %v7694_v39  ;;  %vm14116_vm9 = vcmp.eq.s32.totalorder %v8930_v35, %v7701_v44  ;;  %v792_v22 = vsel %vm14319_vm14, %v14614_v14, %v8389_v55 }
 0x16a   : > { %14613 = vst [vmem:[#allocation11_spill] sm:$0xff] %v8972_v26  ;;  %v1381_v29 = vadd.f32 %v1259_v13, %v908_v58  ;;  %686 = vrot.lane.b32.xlu0 %v535_v59, %s7278_s24  ;;  %1171 = vrot.lane.b32.xlu1 %v1014_v52, %s7279_s25  ;;  %v533_v10 = vmul.f32 %v14612_v9, %v7824_v18  ;;  %v14617_v59 = vld [vmem:[#allocation23_spill] sm:$0xff]  ;;  %v8994_v58 = vpop.permute.xlu0 %1183  ;;  %v9003_v9 = vadd.s32 408, %v7399_v16 }
 0x16b   : > { %v550_v33 = vmul.f32 %v14615_v63, %v14591_v53  ;;  %6255 = vmatprep.subr.msk.mxu1 %vm14112_vm13, %v14525_v12  ;;  %v8990_v13 = vadd.f32 %v7603_v41, %v1379_v28  ;;  %v442_v52 = vmul.f32 %v7412_v21, %v14617_v59  ;;  %vm14117_vm6 = vcmp.eq.s32.totalorder %v8930_v35, %v7694_v39  ;;  %v14632_v35 = vld [vmem:[#allocation69_spill] sm:$0xff] }
 0x16c   : > { %6256 = vmatpush2.msk.msra.mxu1 %vm14108_vm11, %v14525_v12  ;;  %14618 = vst [vmem:[#allocation14_spill] sm:$0xff] %v9003_v9  ;;  %v424_v28 = vmul.f32 %v14619_v40, %v7568_v23  ;;  %v776_v45 = vsel %vm14319_vm14, %v8194_v0, %v7809_v37  ;;  %v1265_v19 = vsel %vm1241_vm10, %v14620_v27, %v8638_v25  ;;  %v9013_v50 = vpop.permute.xlu1 %372  ;;  %v9029_v37 = vadd.s32 400, %v7399_v16  ;;  %v14624_v0 = vld [vmem:[#allocation46_spill] sm:$0xff] }
 0x16d   : > { %14616 = vst [vmem:[#allocation62_spill] sm:$0xff] %v8990_v13  ;;  %14621 = vst [vmem:[#allocation23_spill] sm:$0xff] %v9013_v50  ;;  %6257 = vmatprep.subr.msk.mxu1 %vm14116_vm9, %v14525_v12  ;;  %vm14118_vm11 = vcmp.eq.s32.totalorder %v8972_v26, %v7701_v44  ;;  %v9022_v61 = vadd.f32 %v7603_v41, %v1381_v29  ;;  %v915_v49 = vadd.f32 %v792_v22, %v442_v52 }
 0x16e   : > { %682 = vrot.lane.b32.xlu0 %v533_v10, %s7278_s24  ;;  %716 = vrot.lane.b32.xlu1 %v550_v33, %s7278_s24  ;;  %vm14121_vm13 = vcmp.eq.s32.totalorder %v8972_v26, %v7694_v39  ;;  %14623 = vst [vmem:[#allocation72_spill] sm:$0xff] %v9029_v37  ;;  %v1249_v5 = vsel %vm1241_vm10, %v8451_v54, %v14624_v0  ;;  %v9043_v52 = vpop.permute.xlu0 %1179  ;;  %v14627_v0 = vld [vmem:[#allocation21_spill] sm:$0xff] }
 0x16f   : > { %14622 = vst [vmem:[#allocation9_spill] sm:$0xff] %v9022_v61  ;;  %v1008_v51 = vmul.f32 %v14625_v6, %v14587_v47  ;;  %v549_v29 = vmul.f32 %v14615_v63, %v7824_v18  ;;  %6258 = vmatpush2.msk.msra.mxu1 %vm14117_vm6, %v14525_v12  ;;  %v897_v10 = vadd.f32 %v776_v45, %v424_v28  ;;  %v14125_v54 = vmax.f32 %v9022_v61, 0.0 }
 0x170   : > { %v1388_v22 = vadd.f32 %v1265_v19, %v915_v49  ;;  %6259 = vmatprep.subr.msk.mxu1 %vm14118_vm11, %v14525_v12  ;;  %vm14130_vm9 = vcmp.eq.s32.totalorder %v9003_v9, %v7701_v44  ;;  %v9051_v6 = vpop.permute.xlu1 %1197  ;;  %vm14126_vm6 = vcmp.eq.s32.totalorder %v9003_v9, %v7694_v39  ;;  %v9060_v49 = vadd.s32 392, %v7399_v16 }
 0x171   : > { %6260 = vmatpush2.msk.msra.mxu1 %vm14121_vm13, %v14525_v12  ;;  %v1370_v19 = vadd.f32 %v1249_v5, %v897_v10  ;;  %vm14133_vm11 = vcmp.eq.s32.totalorder %v9029_v37, %v7701_v44  ;;  %v441_v45 = vmul.f32 %v7436_v32, %v14617_v59  ;;  %v791_v28 = vsel %vm14319_vm14, %v8516_v30, %v14614_v14 }
 0x172   : > { %14626 = vst [vmem:[#allocation46_spill] sm:$0xff] %v9060_v49  ;;  %1159 = vrot.lane.b32.xlu0 %v1008_v51, %s7279_s25  ;;  %714 = vrot.lane.b32.xlu1 %v549_v29, %s7278_s24  ;;  %v1023_v33 = vmul.f32 %v14627_v0, %v14591_v53  ;;  %v14628_v51 = vld [vmem:[#allocation27_spill] sm:$0xff]  ;;  %v9081_v29 = vpop.permute.xlu0 %726  ;;  %v14630_v10 = vmax.f32 %v8990_v13, 0.0  ;;  %vm14134_vm13 = vcmp.eq.s32.totalorder %v9029_v37, %v7694_v39  ;;  %v9094_v14 = vadd.s32 384, %v7399_v16 }
 0x173   : > { %6261 = vmatprep.subr.msk.mxu1 %vm14130_vm9, %v14525_v12  ;;  %v9079_v5 = vadd.f32 %v14628_v51, %v1388_v22  ;;  %v443_v22 = vmul.f32 %v7409_v20, %v14617_v59  ;;  %v793_v61 = vsel %vm14319_vm14, %v8389_v55, %v14632_v35  ;;  %v9113_v9 = vadd.f32 %v7580_v31, %v1370_v19 }
 0x174   : > { %v7058_v26 = vpack.i.bf16 %v14630_v10, %v14125_v54  ;;  %6262 = vmatpush2.msk.msra.mxu1 %vm14126_vm6, %v14525_v12  ;;  %14631 = vst [vmem:[#allocation21_spill] sm:$0xff] %v9094_v14  ;;  %v1264_v10 = vsel %vm1241_vm10, %v8701_v38, %v14620_v27  ;;  %v9104_v54 = vpop.permute.xlu1 %1201  ;;  %vm14193_vm6 = vcmp.eq.s32.totalorder %v9060_v49, %v7701_v44  ;;  %v14635_v27 = vld [vmem:[#allocation80_spill] sm:$0xff] }
 0x175   : > { %14629 = vst [vmem:[#allocation13_spill] sm:$0xff] %v9079_v5  ;;  %14633 = vst [vmem:[#allocation27_spill] sm:$0xff] %v9104_v54  ;;  %6263 = vmatprep.subr.msk.mxu1 %vm14133_vm11, %v14525_v12  ;;  %v914_v13 = vadd.f32 %v791_v28, %v441_v45  ;;  %vm14192_vm9 = vcmp.eq.s32.totalorder %v9060_v49, %v7694_v39  ;;  %v1266_v55 = vsel %vm1241_vm10, %v8638_v25, %v14635_v27 }
 0x176   : > { %14634 = vst [vmem:[#allocation114_spill] sm:$0xff] %v9113_v9  ;;  %7059 = vrot.lane.b32.xlu0 %v7058_v26, %s7281_s16  ;;  %1189 = vrot.lane.b32.xlu1 %v1023_v33, %s7279_s25  ;;  %v543_v35 = vmul.f32 %v14592_v43, %v14587_v47  ;;  %v1022_v17 = vmul.f32 %v14627_v0, %v7824_v18  ;;  %v14139_v33 = vmax.f32 %v9079_v5, 0.0  ;;  %v9131_v45 = vpop.permute.xlu0 %1161  ;;  %v14140_v25 = vmax.f32 %v9113_v9, 0.0 }
 0x177   : > { %6264 = vmatpush2.msk.msra.mxu1 %vm14134_vm13, %v14525_v12  ;;  %v916_v26 = vadd.f32 %v793_v61, %v443_v22  ;;  %v1387_v19 = vadd.f32 %v1264_v10, %v914_v13  ;;  %vm14157_vm11 = vcmp.eq.s32.totalorder %v9094_v14, %v7701_v44  ;;  %vm14156_vm13 = vcmp.eq.s32.totalorder %v9094_v14, %v7694_v39  ;;  %v14637_v22 = vld [vmem:[#allocation25_spill] sm:$0xff] }
 0x178   : > { %6265 = vmatprep.subr.msk.mxu1 %vm14193_vm6, %v14525_v12  ;;  %v9139_v43 = vpop.permute.xlu1 %740  ;;  %v799_v13 = vsel %vm14319_vm14, %v8434_v48, %v8762_v1  ;;  %v450_v10 = vmul.f32 %v7412_v21, %v14637_v22  ;;  %v1272_v49 = vsel %vm1241_vm10, %v8715_v8, %v8994_v58 }
 0x179   : > { %6266 = vmatpush2.msk.msra.mxu1 %vm14192_vm9, %v14525_v12  ;;  %v1389_v61 = vadd.f32 %v1266_v55, %v916_v26  ;;  %v9158_v28 = vadd.f32 %v14628_v51, %v1387_v19  ;;  %v783_v19 = vsel %vm14319_vm14, %v8575_v11, %v14604_v42  ;;  %v1256_v11 = vsel %vm1241_vm10, %v8823_v57, %v8323_v4 }
 0x17a   : > { %702 = vrot.lane.b32.xlu0 %v543_v35, %s7278_s24  ;;  %1187 = vrot.lane.b32.xlu1 %v1022_v17, %s7279_s25  ;;  %v9162_v55 = vpop.permute.xlu0 %722  ;;  %v7063_v17 = vpack.i.bf16 %v14139_v33, %v14140_v25  ;;  %v14638_v35 = vld [vmem:[#allocation15_spill] sm:$0xff]  ;;  %v432_v33 = vmul.f32 %v14619_v40, %v14603_v24  ;;  %v923_v27 = vadd.f32 %v799_v13, %v450_v10 }
 0x17b   : > { %6267 = vmatprep.subr.msk.mxu1 %vm14157_vm11, %v14525_v12  ;;  %14636 = vst [vmem:[#allocation115_spill] sm:$0xff] %v9158_v28  ;;  %v558_v26 = vmul.f32 %v14638_v35, %v14591_v53  ;;  %v9185_v25 = vadd.f32 %v14628_v51, %v1389_v61  ;;  %v1016_v42 = vmul.f32 %v14598_v46, %v14587_v47  ;;  %v14147_v5 = vmax.f32 %v9158_v28, 0.0 }
 0x17c   : > { %6268 = vmatpush2.msk.msra.mxu1 %vm14156_vm13, %v14525_v12  ;;  %v9180_v37 = vpop.permute.xlu1 %744  ;;  %v905_v14 = vadd.f32 %v783_v19, %v432_v33  ;;  %v1396_v9 = vadd.f32 %v1272_v49, %v923_v27  ;;  %v557_v61 = vmul.f32 %v14638_v35, %v7824_v18  ;;  %v798_v4 = vsel %vm14319_vm14, %v8889_v56, %v8434_v48  ;;  %v14641_v27 = vld [vmem:[#allocation24_spill] sm:$0xff] }
 0x17d   : > { %14639 = vst [vmem:[#allocation25_spill] sm:$0xff] %v9180_v37  ;;  %v14148_v10 = vmax.f32 %v9185_v25, 0.0  ;;  %v449_v57 = vmul.f32 %v7436_v32, %v14637_v22  ;;  %v1031_v33 = vmul.f32 %v14641_v27, %v14591_v53  ;;  %v800_v48 = vsel %vm14319_vm14, %v8762_v1, %v8535_v7 }
 0x17e   : > { %7064 = vrot.lane.b32.xlu0 %v7063_v17, %s7281_s16  ;;  %732 = vrot.lane.b32.xlu1 %v558_v26, %s7278_s24  ;;  %v9195_v31 = vpop.permute.xlu0 %704  ;;  %v1378_v17 = vadd.f32 %v1256_v11, %v905_v14  ;;  %v9210_v46 = vadd.f32 %v8593_v60, %v1396_v9  ;;  %v1271_v26 = vsel %vm1241_vm10, %v9043_v52, %v8715_v8 }
 0x17f   : > { %v7068_v14 = vpack.i.bf16 %v14147_v5, %v14148_v10  ;;  %v451_v19 = vmul.f32 %v7409_v20, %v14637_v22  ;;  %v1273_v1 = vsel %vm1241_vm10, %v8994_v58, %v8783_v34  ;;  %v551_v8 = vmul.f32 %v14615_v63, %v14587_v47 }
 0x180   : > { %v9199_v13 = vpop.permute.xlu1 %1466  ;;  %14640 = vst [vmem:[#allocation15_spill] sm:$0xff] %v9210_v46  ;;  %v9231_v11 = vadd.f32 %v7603_v41, %v1378_v17  ;;  %v14151_v5 = vmax.f32 %v9210_v46, 0.0  ;;  %v1030_v17 = vmul.f32 %v14641_v27, %v7824_v18  ;;  %v806_v63 = vsel %vm14319_vm14, %v8841_v15, %v9081_v29 }
 0x182   : > { %1175 = vrot.lane.b32.xlu0 %v1016_v42, %s7279_s25  ;;  %730 = vrot.lane.b32.xlu1 %v557_v61, %s7278_s24  ;;  %v9212_v49 = vpop.permute.xlu0 %1199  ;;  %14642 = vst [vmem:[#allocation24_spill] sm:$0xff] %v9231_v11  ;;  %v922_v42 = vadd.f32 %v798_v4, %v449_v57  ;;  %v924_v61 = vadd.f32 %v800_v48, %v451_v19  ;;  %v14152_v57 = vmax.f32 %v9231_v11, 0.0 }
 0x184   : > { %v9226_v9 = vpop.permute.xlu1 %720  ;;  %v1395_v10 = vadd.f32 %v1271_v26, %v922_v42  ;;  %v7073_v19 = vpack.i.bf16 %v14151_v5, %v14152_v57  ;;  %v14645_v42 = vld [vmem:[#allocation17_spill] sm:$0xff] }
 0x186   : > { %7069 = vrot.lane.b32.xlu0 %v7068_v14, %s7281_s16  ;;  %1205 = vrot.lane.b32.xlu1 %v1031_v33, %s7279_s25  ;;  %v9241_v28 = vpop.permute.xlu0 %1195  ;;  %v1397_v14 = vadd.f32 %v1273_v1, %v924_v61  ;;  %v9254_v58 = vadd.f32 %v8593_v60, %v1395_v10  ;;  %v14644_v33 = vld [vmem:[#allocation29_spill] sm:$0xff]  ;;  %v566_v1 = vmul.f32 %v14645_v42, %v14591_v53 }
 0x187   : > { %v458_v48 = vmul.f32 %v7412_v21, %v14644_v33  ;;  %v1279_v10 = vsel %vm1241_vm10, %v9051_v6, %v9212_v49 }
 0x188   : > { %v9245_v4 = vpop.permute.xlu1 %1215  ;;  %14643 = vst [vmem:[#allocation116_spill] sm:$0xff] %v9254_v58  ;;  %v9277_v34 = vadd.f32 %v8593_v60, %v1397_v14  ;;  %v14158_v7 = vmax.f32 %v9254_v58, 0.0  ;;  %v565_v14 = vmul.f32 %v14645_v42, %v7824_v18 }
 0x189   : > { %v931_v5 = vadd.f32 %v806_v63, %v458_v48 }
 0x18a   : > { %718 = vrot.lane.b32.xlu0 %v551_v8, %s7278_s24  ;;  %1203 = vrot.lane.b32.xlu1 %v1030_v17, %s7279_s25  ;;  %v9258_v26 = vpop.permute.xlu0 %742  ;;  %v790_v8 = vsel %vm14319_vm14, %v8947_v3, %v8516_v30  ;;  %v440_v17 = vmul.f32 %v14619_v40, %v14617_v59  ;;  %v1263_v30 = vsel %vm1241_vm10, %v9131_v45, %v8701_v38  ;;  %v14159_v48 = vmax.f32 %v9277_v34, 0.0 }
 0x18b   : > { %v1024_v3 = vmul.f32 %v14627_v0, %v14587_v47  ;;  %v1404_v46 = vadd.f32 %v1279_v10, %v931_v5  ;;  %v805_v38 = vsel %vm14319_vm14, %v9162_v55, %v8841_v15  ;;  %v9298_v0 = vadd.s32 888, %v7399_v16  ;;  %v14649_v15 = vld [vmem:[#allocation26_spill] sm:$0xff] }
 0x18c   : > { %v9272_v61 = vpop.permute.xlu1 %1211  ;;  %v913_v57 = vadd.f32 %v790_v8, %v440_v17  ;;  %v9301_v5 = vadd.s32 632, %v7399_v16  ;;  %v457_v45 = vmul.f32 %v7436_v32, %v14644_v33  ;;  %v7078_v8 = vpack.i.bf16 %v14158_v7, %v14159_v48 }
 0x18d   : > { %14646 = vst [vmem:[#allocation17_spill] sm:$0xff] %v9298_v0  ;;  %v1039_v10 = vmul.f32 %v14649_v15, %v14591_v53  ;;  %v807_v17 = vsel %vm14319_vm14, %v9081_v29, %v8909_v2  ;;  %vm2577_vm13 = vcmp.eq.s32.totalorder %v9298_v0, %v7701_v44  ;;  %v559_v29 = vmul.f32 %v14638_v35, %v14587_v47 }
 0x18e   : > { %7074 = vrot.lane.b32.xlu0 %v7073_v19, %s7281_s16  ;;  %748 = vrot.lane.b32.xlu1 %v566_v1, %s7278_s24  ;;  %v1178_v11 = vpop.permute.xlu0 %1177  ;;  %v1386_v19 = vadd.f32 %v1263_v30, %v913_v57  ;;  %14647 = vst [vmem:[#allocation117_spill] sm:$0xff] %v9301_v5  ;;  %v9306_v1 = vadd.f32 %v8959_v36, %v1404_v46 }
 0x18f   : > { %v1278_v30 = vsel %vm1241_vm10, %v9241_v28, %v9051_v6  ;;  %vm2449_vm11 = vcmp.eq.s32.totalorder %v9301_v5, %v7701_v44  ;;  %v930_v7 = vadd.f32 %v805_v38, %v457_v45  ;;  %v1280_v6 = vsel %vm1241_vm10, %v9212_v49, %v9104_v54  ;;  %6333 = vmatprep.subr.msk.mxu1 %vm2577_vm13, %v14525_v12 }
 0x190   : > { %v9289_v63 = vpop.permute.xlu1 %758  ;;  %14648 = vst [vmem:[#allocation118_spill] sm:$0xff] %v9306_v1  ;;  %6269 = vmatprep.subr.msk.mxu0 %vm2449_vm11, %v14525_v12  ;;  %v1038_v38 = vmul.f32 %v14649_v15, %v7824_v18  ;;  %v813_v35 = vsel %vm14319_vm14, %v9139_v43, %v9258_v26  ;;  %vm14255_vm13 = vcmask 7168   ;;  %vm2448_vm11 = vcmp.eq.s32.totalorder %v9301_v5, %v7694_v39 }
 0x191   : > { %v1403_v58 = vadd.f32 %v1278_v30, %v930_v7  ;;  %v466_v7 = vmul.f32 %v7412_v21, %v8659_v62  ;;  %v14652_v30 = vld [vmem:[#allocation18_spill] sm:$0xff] }
 0x192   : > { %1191 = vrot.lane.b32.xlu0 %v1024_v3, %s7279_s25  ;;  %746 = vrot.lane.b32.xlu1 %v565_v14, %s7278_s24  ;;  %v9308_v57 = vpop.permute.xlu0 %738  ;;  %v459_v3 = vmul.f32 %v7409_v20, %v14644_v33  ;;  %v9331_v14 = vadd.f32 %v14628_v51, %v1386_v19  ;;  %v14163_v19 = vmax.f32 %v9306_v1, 0.0 }
 0x193   : > { %v939_v2 = vadd.f32 %v813_v35, %v466_v7 }
 0x194   : > { %v9322_v46 = vpop.permute.xlu1 %1193  ;;  %14650 = vst [vmem:[#allocation26_spill] sm:$0xff] %v9331_v14  ;;  %v932_v48 = vadd.f32 %v807_v17, %v459_v3  ;;  %v9354_v17 = vadd.f32 %v8959_v36, %v1403_v58  ;;  %v574_v3 = vmul.f32 %v14652_v30, %v14591_v53 }
 0x196   : > { %7079 = vrot.lane.b32.xlu0 %v7078_v8, %s7281_s16  ;;  %1221 = vrot.lane.b32.xlu1 %v1039_v10, %s7279_s25  ;;  %v14164_v8 = vmax.f32 %v9331_v14, 0.0  ;;  %v1405_v10 = vadd.f32 %v1280_v6, %v932_v48  ;;  %v1214_v49 = vpop.permute.xlu0 %1213  ;;  %14651 = vst [vmem:[#allocation119_spill] sm:$0xff] %v9354_v17  ;;  %v797_v6 = vsel %vm14319_vm14, %v9195_v31, %v8889_v56 }
 0x197   : > { %v1032_v31 = vmul.f32 %v14641_v27, %v14587_v47  ;;  %v573_v14 = vmul.f32 %v14652_v30, %v7824_v18 }
 0x198   : > { %v9345_v45 = vpop.permute.xlu1 %754  ;;  %v7083_v48 = vpack.i.bf16 %v14163_v19, %v14164_v8  ;;  %v9374_v54 = vadd.f32 %v8959_v36, %v1405_v10  ;;  %v1270_v19 = vsel %vm1241_vm10, %v1178_v11, %v9043_v52  ;;  %v14167_v8 = vmax.f32 %v9354_v17, 0.0 }
 0x199   : > { %v814_v52 = vsel %vm14319_vm14, %v9258_v26, %v9180_v37 }
 0x19a   : > { %734 = vrot.lane.b32.xlu0 %v559_v29, %s7278_s24  ;;  %1219 = vrot.lane.b32.xlu1 %v1038_v38, %s7279_s25  ;;  %v1286_v29 = vsel %vm1241_vm10, %v1214_v49, %v9245_v4  ;;  %v448_v38 = vmul.f32 %v14619_v40, %v14637_v22  ;;  %14653 = vst [vmem:[#allocation18_spill] sm:$0xff] %v9374_v54  ;;  %v9385_v10 = vpop.permute.xlu0 %1217  ;;  %v14168_v7 = vmax.f32 %v9374_v54, 0.0 }
 0x19b   : > { %v1412_v1 = vadd.f32 %v1286_v29, %v939_v2  ;;  %14654 = vst [vmem:[#allocation120_spill] sm:$0xff] %v9385_v10  ;;  %v467_v2 = vmul.f32 %v7409_v20, %v8659_v62  ;;  %v1287_v26 = vsel %vm1241_vm10, %v9245_v4, %v9385_v10  ;;  %v567_v4 = vmul.f32 %v14645_v42, %v14587_v47 }
 0x19c   : > { %v9369_v58 = vpop.permute.xlu1 %1229  ;;  %v921_v56 = vadd.f32 %v797_v6, %v448_v38  ;;  %v7088_v11 = vpack.i.bf16 %v14167_v8, %v14168_v7  ;;  %v465_v38 = vmul.f32 %v7436_v32, %v8659_v62 }
 0x19d   : > { %v9398_v27 = vadd.f32 %v9199_v13, %v1412_v1  ;;  %v940_v1 = vadd.f32 %v814_v52, %v467_v2 }
 0x19e   : > { %7084 = vrot.lane.b32.xlu0 %v7083_v48, %s7281_s16  ;;  %764 = vrot.lane.b32.xlu1 %v574_v3, %s7278_s24  ;;  %v1394_v48 = vadd.f32 %v1270_v19, %v921_v56  ;;  %v14657_v19 = vld [vmem:[#allocation28_spill] sm:$0xff] }
 0x19f   : > { %14656 = vst [vmem:[#allocation122_spill] sm:$0xff] %v9398_v27  ;;  %v1047_v3 = vmul.f32 %v14657_v19, %v14591_v53  ;;  %v14169_v52 = vmax.f32 %v9398_v27, 0.0  ;;  %v1413_v2 = vadd.f32 %v1287_v26, %v940_v1 }
 0x1a0   : > { %v9387_v35 = vpop.permute.xlu1 %1233  ;;  %v9415_v29 = vadd.f32 %v8593_v60, %v1394_v48  ;;  %v1046_v48 = vmul.f32 %v14657_v19, %v7824_v18 }
 0x1a1   : > { %14655 = vst [vmem:[#allocation121_spill] sm:$0xff] %v9387_v35 }
 0x1a2   : > { %1207 = vrot.lane.b32.xlu0 %v1032_v31, %s7279_s25  ;;  %762 = vrot.lane.b32.xlu1 %v573_v14, %s7278_s24  ;;  %v812_v14 = vsel %vm14319_vm14, %v9308_v57, %v9139_v43  ;;  %14658 = vst [vmem:[#allocation28_spill] sm:$0xff] %v9415_v29  ;;  %v1285_v43 = vsel %vm1241_vm10, %v9272_v61, %v1214_v49  ;;  %v757_v31 = vpop.permute.xlu0 %756  ;;  %v14170_v7 = vmax.f32 %v9415_v29, 0.0 }
 0x1a3   : > { %v938_v56 = vadd.f32 %v812_v14, %v465_v38  ;;  %v9432_v49 = vadd.f32 %v9199_v13, %v1413_v2  ;;  %v1040_v38 = vmul.f32 %v14649_v15, %v14587_v47 }
 0x1a4   : > { %v9412_v6 = vpop.permute.xlu1 %652  ;;  %v7093_v42 = vpack.i.bf16 %v14169_v52, %v14170_v7 }
 0x1a5   : > { %14659 = vst [vmem:[#allocation123_spill] sm:$0xff] %v9432_v49  ;;  %v14172_v1 = vmax.f32 %v9432_v49, 0.0 }
 0x1a6   : > { %7089 = vrot.lane.b32.xlu0 %v7088_v11, %s7281_s16  ;;  %1237 = vrot.lane.b32.xlu1 %v1047_v3, %s7279_s25  ;;  %v1411_v11 = vadd.f32 %v1285_v43, %v938_v56  ;;  %v9438_v3 = vpop.permute.xlu0 %760  ;;  %v804_v56 = vsel %vm14319_vm14, %v9226_v9, %v9162_v55  ;;  %v464_v55 = vmul.f32 %v14619_v40, %v8659_v62 }
 0x1a7   : > { %14660 = vst [vmem:[#allocation124_spill] sm:$0xff] %v9438_v3 }
 0x1a8   : > { %v1210_v8 = vpop.permute.xlu1 %1209  ;;  %v9443_v26 = vadd.f32 %v9199_v13, %v1411_v11  ;;  %v1277_v11 = vsel %vm1241_vm10, %v9322_v46, %v9241_v28  ;;  %v474_v46 = vmul.f32 %v7412_v21, %v9013_v50  ;;  %v821_v21 = vsel %vm14319_vm14, %v9289_v63, %v9438_v3 }
 0x1a9   : > { %v9594_v3 = vadd.s32 616, %v7399_v16 }
 0x1aa   : > { %750 = vrot.lane.b32.xlu0 %v567_v4, %s7278_s24  ;;  %1235 = vrot.lane.b32.xlu1 %v1046_v48, %s7279_s25  ;;  %14661 = vst [vmem:[#allocation125_spill] sm:$0xff] %v9443_v26  ;;  %v14171_v2 = vmax.f32 %v9443_v26, 0.0  ;;  %v456_v48 = vmul.f32 %v14619_v40, %v14644_v33 }
 0x1ab   : > { %14673 = vst [vmem:[#allocation132_spill] sm:$0xff] %v9594_v3  ;;  %vm2441_vm8 = vcmp.eq.s32.totalorder %v9594_v3, %v7701_v44  ;;  %vm2440_vm7 = vcmp.eq.s32.totalorder %v9594_v3, %v7694_v39  ;;  %v9759_v3 = vmul.f32 %v7824_v18, %v14644_v33 }
 0x1ac   : > { %v9440_v14 = vpop.permute.xlu1 %752  ;;  %v7098_v15 = vpack.i.bf16 %v14171_v2, %v14172_v1 }
 0x1ae   : > { %7094 = vrot.lane.b32.xlu0 %v7093_v42, %s7281_s16  ;;  %v929_v42 = vadd.f32 %v804_v56, %v456_v48  ;;  %v1284_v56 = vsel %vm1241_vm10, %v1210_v8, %v9272_v61  ;;  %v575_v48 = vmul.f32 %v14652_v30, %v14587_v47  ;;  %v475_v30 = vmul.f32 %v7409_v20, %v9013_v50 }
 0x1af   : > { %v9449_v43 = vpop.permute.xlu0 %1471 }
 0x1b0   : > { %14662 = vst [vmem:[#allocation126_spill] sm:$0xff] %v9449_v43  ;;  %v9451_v4 = vpop.permute.xlu1 %1127  ;;  %v1402_v28 = vadd.f32 %v1277_v11, %v929_v42 }
 0x1b2   : > { %1223 = vrot.lane.b32.xlu0 %v1040_v38, %s7279_s25  ;;  %v820_v38 = vsel %vm14319_vm14, %v757_v31, %v9289_v63  ;;  %v9495_v8 = vadd.f32 %v8959_v36, %v1402_v28  ;;  %v948_v63 = vadd.f32 %v821_v21, %v475_v30  ;;  %v14668_v21 = vld [vmem:[#allocation8_spill] sm:$0xff] }
 0x1b3   : > { %v737_v52 = vpop.permute.xlu0 %736  ;;  %v947_v1 = vadd.f32 %v820_v38, %v474_v46 }
 0x1b4   : > { %v9469_v9 = vpop.permute.xlu1 %1225  ;;  %v811_v7 = vsel %vm14319_vm14, %v737_v52, %v9308_v57  ;;  %v473_v57 = vmul.f32 %v7436_v32, %v9013_v50  ;;  %v819_v52 = vsel %vm14319_vm14, %v9345_v45, %v757_v31  ;;  %14663 = vst [vmem:[#allocation127_spill] sm:$0xff] %v9495_v8 }
 0x1b5   : > { %v937_v2 = vadd.f32 %v811_v7, %v464_v55 }
 0x1b6   : > { %7099 = vrot.lane.b32.xlu0 %v7098_v15, %s7281_s16 }
 0x1b7   : > { %v1410_v26 = vadd.f32 %v1284_v56, %v937_v2  ;;  %v1232_v17 = vpop.permute.xlu0 %1231  ;;  %v946_v2 = vadd.f32 %v819_v52, %v473_v57 }
 0x1b8   : > { %v9482_v10 = vpop.permute.xlu1 %670  ;;  %v1293_v61 = vsel %vm1241_vm10, %v9369_v58, %v1232_v17  ;;  %v1294_v31 = vsel %vm1241_vm10, %v1232_v17, %v9387_v35  ;;  %v14666_v17 = vld [vmem:[#allocation19_spill] sm:$0xff] }
 0x1b9   : > { %v9500_v32 = vadd.f32 %v9199_v13, %v1410_v26  ;;  %v1420_v7 = vadd.f32 %v1293_v61, %v947_v1  ;;  %v14178_v26 = vmax.f32 %v9495_v8, 0.0  ;;  %v1421_v38 = vadd.f32 %v1294_v31, %v948_v63  ;;  %v14670_v8 = vld [vmem:[#allocation20_spill] sm:$0xff] }
 0x1ba   : > { %766 = vrot.lane.b32.xlu0 %v575_v48, %s7278_s24  ;;  %v423_v46 = vmul.f32 %v14587_v47, %v14666_v17  ;;  %v422_v48 = vmul.f32 %v14591_v53, %v14666_v17  ;;  %v420_v61 = vmul.f32 %v14668_v21, %v14666_v17  ;;  %v1048_v31 = vmul.f32 %v14657_v19, %v14587_v47 }
 0x1bb   : > { %14664 = vst [vmem:[#allocation128_spill] sm:$0xff] %v9500_v32  ;;  %v14177_v11 = vmax.f32 %v9500_v32, 0.0  ;;  %v9506_v15 = vadd.f32 %v9449_v43, %v1420_v7  ;;  %v1228_v42 = vpop.permute.xlu0 %1227  ;;  %v421_v7 = vmul.f32 %v7824_v18, %v14666_v17  ;;  %v9541_v63 = vadd.f32 %v9449_v43, %v1421_v38 }
 0x1bc   : > { %v9508_v55 = vpop.permute.xlu1 %1141  ;;  %v1292_v20 = vsel %vm1241_vm10, %v1228_v42, %v9369_v58  ;;  %v9554_v19 = vmul.f32 %v7824_v18, %v14603_v24  ;;  %v9558_v17 = vmul.f32 %v14587_v47, %v7568_v23 }
 0x1bd   : > { %14665 = vst [vmem:[#allocation129_spill] sm:$0xff] %v9506_v15  ;;  %v14176_v1 = vmax.f32 %v9506_v15, 0.0  ;;  %v1419_v28 = vadd.f32 %v1292_v20, %v946_v2  ;;  %1762 = vrot.lane.b32.xlu1 %v14177_v11, %s7281_s16  ;;  %v9538_v2 = vmul.f32 %v14591_v53, %v14603_v24  ;;  %14669 = vst [vmem:[#allocation130_spill] sm:$0xff] %v9541_v63 }
 0x1be   : > { %v9546_v20 = vmul.f32 %v14587_v47, %v14603_v24  ;;  %v472_v15 = vmul.f32 %v14619_v40, %v9013_v50 }
 0x1bf   : > { %v9520_v56 = vadd.f32 %v9449_v43, %v1419_v28  ;;  %v655_v58 = vpop.permute.xlu0 %654  ;;  %v7103_v52 = vpack.i.bf16 %v14176_v1, %v14178_v26  ;;  %v9550_v28 = vmul.f32 %v14668_v21, %v14603_v24  ;;  %v818_v1 = vsel %vm14319_vm14, %v9440_v14, %v9345_v45 }
 0x1c0   : > { %v9524_v57 = vpop.permute.xlu1 %1139  ;;  %v896_v30 = vadd.f32 %v655_v58, %v423_v46  ;;  %v9563_v46 = vmul.f32 %v14591_v53, %v7568_v23  ;;  %v775_v32 = vsel %vm14319_vm14, %v9412_v6, %v655_v58  ;;  %v945_v40 = vadd.f32 %v818_v1, %v472_v15  ;;  %v14677_v1 = vld [vmem:[#allocation75_spill] sm:$0xff] }
 0x1c1   : > { %14667 = vst [vmem:[#allocation19_spill] sm:$0xff] %v9520_v56  ;;  %7104 = vrot.lane.b32.xlu0 %v7103_v52, %s7281_s16  ;;  %v9567_v52 = vmul.f32 %v14668_v21, %v7568_v23  ;;  %v1291_v58 = vsel %vm1241_vm10, %v9469_v9, %v1228_v42  ;;  %v895_v37 = vadd.f32 %v775_v32, %v422_v48  ;;  %v14675_v24 = vmax.f32 %v9520_v56, 0.0  ;;  %v14680_v42 = vld [vmem:[#allocation31_spill] sm:$0xff] }
 0x1c2   : > { %v1369_v38 = vadd.f32 %v9451_v4, %v896_v30  ;;  %v9577_v30 = vmul.f32 %v7824_v18, %v7568_v23  ;;  %v9591_v23 = vadd.s32 624, %v7399_v16  ;;  %v14678_v54 = vmax.f32 %v14677_v1, 0.0 }
 0x1c3   : > { %v651_v11 = vpop.permute.xlu0 %650 }
 0x1c4   : > { %v9573_v26 = vpop.permute.xlu1 %7044  ;;  %v9584_v35 = vadd.f32 %v14670_v8, %v1369_v38  ;;  %14672 = vst [vmem:[#allocation131_spill] sm:$0xff] %v9591_v23  ;;  %v773_v38 = vsel %vm14319_vm14, %v14680_v42, %v651_v11  ;;  %v774_v32 = vsel %vm14319_vm14, %v651_v11, %v9412_v6  ;;  %v9636_v6 = vmul.f32 %v7824_v18, %v14617_v59 }
 0x1c5   : > { %v7047_v45 = vunpack.i.h.bf16 %v9573_v26  ;;  %1239 = vrot.lane.b32.xlu0 %v1048_v31, %s7279_s25  ;;  %v14674_v31 = vmax.f32 %v9541_v63, 0.0  ;;  %v14676_v29 = vunpack.i.l.bf16 %v9573_v26  ;;  %vm2445_vm9 = vcmp.eq.s32.totalorder %v9591_v23, %v7701_v44 }
 0x1c6   : > { %14671 = vst [vmem:[#allocation20_spill] sm:$0xff] %v9584_v35  ;;  %vm2444_vm6 = vcmp.eq.s32.totalorder %v9591_v23, %v7694_v39  ;;  %v904_v23 = vadd.f32 %v9482_v10, %v9558_v17  ;;  %v9883_v63 = vadd.s32 536, %v7399_v16 }
 0x1c7   : > { %v1915_v50 = vsel %vm14255_vm13, 0.0, %v7047_v45  ;;  %v1126_v14 = vpop.permute.xlu0 %1125  ;;  %v7108_v49 = vpack.i.bf16 %v14675_v24, %v14674_v31  ;;  %v1795_v15 = vsel %vm14255_vm13, %v7047_v45, %v14676_v29  ;;  %v14681_v24 = vmax.f32 %v9584_v35, 0.0  ;;  %v14682_v31 = vld [vmem:[#allocation78_spill] sm:$0xff] }
 0x1c8   : > { %v9600_v27 = vpop.permute.xlu1 %684  ;;  %v9611_v9 = vmax.f32 %v1915_v50, %v14678_v54  ;;  %v1248_v48 = vsel %vm1241_vm10, %v1126_v14, %v9451_v4  ;;  %v14683_v56 = vmax.f32 %v14682_v31, 0.0  ;;  %v1418_v45 = vadd.f32 %v1291_v58, %v945_v40  ;;  %v14687_v58 = vld [vmem:[#allocation37_spill] sm:$0xff]  ;;  %14708 = vst [vmem:[#allocation150_spill] sm:$0xff] %v9883_v63 }
 0x1c9   : > { %1680 = vrot.lane.b32.xlu1 %v14681_v24, %s7281_s16  ;;  %v1368_v50 = vadd.f32 %v1248_v48, %v895_v37  ;;  %7109 = vrot.lane.b32.xlu0 %v7108_v49, %s7281_s16  ;;  %v9629_v54 = vmul.f32 %v14668_v21, %v14617_v59  ;;  %v9643_v37 = vadd.s32 608, %v7399_v16  ;;  %v893_v49 = vadd.f32 %v773_v38, %v420_v61 }
 0x1ca   : > { %14679 = vst [vmem:[#allocation75_spill] sm:$0xff] %v9611_v9  ;;  %v9624_v29 = vmax.f32 %v1795_v15, %v14683_v56  ;;  %v894_v4 = vadd.f32 %v774_v32, %v421_v7  ;;  %v9660_v61 = vadd.s32 600, %v7399_v16  ;;  %v9663_v7 = vadd.f32 %v9449_v43, %v1418_v45 }
 0x1cb   : > { %14685 = vst [vmem:[#allocation78_spill] sm:$0xff] %v9643_v37  ;;  %v9646_v11 = vadd.f32 %v14670_v8, %v1368_v50  ;;  %v1124_v56 = vpop.permute.xlu0 %1123  ;;  %v9676_v48 = vmul.f32 %v14587_v47, %v14617_v59  ;;  %v9685_v24 = vadd.s32 592, %v7399_v16  ;;  %vm2401_vm0 = vcmp.eq.s32.totalorder %v9883_v63, %v7701_v44 }
 0x1cc   : > { %14684 = vst [vmem:[#allocation31_spill] sm:$0xff] %v9624_v29  ;;  %3242 = vmatprep.mubr.f32.mxu0 %v9624_v29  ;;  %v9649_v40 = vpop.permute.xlu1 %7054  ;;  %v1246_v15 = vsel %vm1241_vm10, %v14687_v58, %v1124_v56  ;;  %v1247_v1 = vsel %vm1241_vm10, %v1124_v56, %v1126_v14  ;;  %14688 = vst [vmem:[#allocation37_spill] sm:$0xff] %v9660_v61  ;;  %v9672_v14 = vmul.f32 %v14591_v53, %v14617_v59 }
 0x1cd   : > { %14686 = vst [vmem:[#allocation133_spill] sm:$0xff] %v9646_v11  ;;  %3243 = vmatmul.mubr.f32.vlgmr.msra.gmra.mxu0 %v9611_v9  ;;  %14689 = vst [vmem:[#allocation134_spill] sm:$0xff] %v9663_v7  ;;  %v14196_v38 = vmax.f32 %v9646_v11, 0.0  ;;  %v1366_v42 = vadd.f32 %v1246_v15, %v893_v49  ;;  %v1367_v32 = vadd.f32 %v1247_v1, %v894_v4  ;;  %v9721_v4 = vadd.s32 584, %v7399_v16 }
 0x1ce   : > { %6270 = vmatpush1.msk.msra.mxu0 %vm2448_vm11, %v14525_v12  ;;  %vm2437_vm11 = vcmp.eq.s32.totalorder %v9643_v37, %v7701_v44  ;;  %14690 = vst [vmem:[#allocation135_spill] sm:$0xff] %v9685_v24  ;;  %v9712_v49 = vmul.f32 %v7824_v18, %v14637_v22  ;;  %v9734_v1 = vmul.f32 %v14591_v53, %v14637_v22  ;;  %v9804_v29 = vadd.s32 560, %v7399_v16 }
 0x1cf   : > { %6271 = vmatprep.subr.msk.mxu0 %vm2445_vm9, %v14525_v12  ;;  %v9688_v31 = vadd.f32 %v14670_v8, %v1366_v42  ;;  %v9691_v45 = vadd.f32 %v14670_v8, %v1367_v32  ;;  %v9693_v50 = vpop.permute.xlu0 %668  ;;  %1678 = vrot.lane.b32.xlu0 %v14196_v38, %s7281_s16  ;;  %v9708_v8 = vmul.f32 %v14668_v21, %v14637_v22  ;;  %v9744_v32 = vadd.s32 576, %v7399_v16 }
 0x1d0   : > { %6272 = vmatpush1.msk.msra.mxu0 %vm2444_vm6, %v14525_v12  ;;  %v9698_v59 = vpop.permute.xlu1 %1157  ;;  %vm2436_vm6 = vcmp.eq.s32.totalorder %v9643_v37, %v7694_v39  ;;  %vm2433_vm9 = vcmp.eq.s32.totalorder %v9660_v61, %v7701_v44  ;;  %14693 = vst [vmem:[#allocation138_spill] sm:$0xff] %v9721_v4  ;;  %v9738_v42 = vmul.f32 %v14587_v47, %v14637_v22  ;;  %v14695_v22 = vmax.f32 %v9663_v7, 0.0 }
 0x1d1   : > { %14691 = vst [vmem:[#allocation136_spill] sm:$0xff] %v9688_v31  ;;  %14692 = vst [vmem:[#allocation137_spill] sm:$0xff] %v9691_v45  ;;  %6273 = vmatprep.subr.msk.mxu0 %vm2441_vm8, %v14525_v12  ;;  %v14201_v58 = vmax.f32 %v9688_v31, 0.0  ;;  %v14203_v15 = vmax.f32 %v9691_v45, 0.0  ;;  %vm2432_vm8 = vcmp.eq.s32.totalorder %v9660_v61, %v7694_v39  ;;  %v9772_v9 = vmul.f32 %v14591_v53, %v14644_v33 }
 0x1d2   : > { %6274 = vmatpush1.msk.msra.mxu0 %vm2440_vm7, %v14525_v12  ;;  %vm2429_vm7 = vcmp.eq.s32.totalorder %v9685_v24, %v7701_v44  ;;  %14694 = vst [vmem:[#allocation139_spill] sm:$0xff] %v9744_v32  ;;  %v9787_v61 = vmul.f32 %v14587_v47, %v14644_v33  ;;  %14698 = vst [vmem:[#allocation142_spill] sm:$0xff] %v9804_v29  ;;  %v9810_v45 = vadd.s32 872, %v7399_v16  ;;  %v9832_v7 = vadd.s32 864, %v7399_v16 }
 0x1d3   : > { %6275 = vmatprep.subr.msk.mxu0 %vm2437_vm11, %v14525_v12  ;;  %v9746_v38 = vpop.permute.xlu0 %666  ;;  %1674 = vrot.lane.b32.xlu1 %v14201_v58, %s7281_s16  ;;  %v7113_v37 = vpack.i.bf16 %v14695_v22, %v14203_v15  ;;  %vm2428_vm11 = vcmp.eq.s32.totalorder %v9685_v24, %v7694_v39  ;;  %v782_v58 = vsel %vm14319_vm14, %v9693_v50, %v9482_v10  ;;  %v9778_v22 = vadd.s32 568, %v7399_v16 }
 0x1d4   : > { %6276 = vmatpush1.msk.msra.mxu0 %vm2436_vm6, %v14525_v12  ;;  %v9751_v56 = vpop.permute.xlu1 %1155  ;;  %vm2425_vm6 = vcmp.eq.s32.totalorder %v9721_v4, %v7701_v44  ;;  %v9783_v15 = vmul.f32 %v7824_v18, %v8659_v62  ;;  %v903_v24 = vadd.f32 %v782_v58, %v9563_v46  ;;  %14699 = vst [vmem:[#allocation143_spill] sm:$0xff] %v9810_v45  ;;  %v9819_v10 = vadd.s32 552, %v7399_v16 }
 0x1d5   : > { %6277 = vmatprep.subr.msk.mxu0 %vm2433_vm9, %v14525_v12  ;;  %14696 = vst [vmem:[#allocation140_spill] sm:$0xff] %v9778_v22  ;;  %7114 = vrot.lane.b32.xlu0 %v7113_v37, %s7281_s16  ;;  %vm2424_vm9 = vcmp.eq.s32.totalorder %v9721_v4, %v7694_v39  ;;  %v9798_v37 = vadd.s32 880, %v7399_v16  ;;  %14701 = vst [vmem:[#allocation145_spill] sm:$0xff] %v9832_v7  ;;  %vm2416_vm15 = vcmp.eq.s32.totalorder %v9778_v22, %v7694_v39 }
 0x1d6   : > { %6278 = vmatpush1.msk.msra.mxu0 %vm2432_vm8, %v14525_v12  ;;  %vm2421_vm8 = vcmp.eq.s32.totalorder %v9744_v32, %v7701_v44  ;;  %14700 = vst [vmem:[#allocation144_spill] sm:$0xff] %v9819_v10  ;;  %vm2569_vm12 = vcmp.eq.s32.totalorder %v9810_v45, %v7701_v44  ;;  %vm2409_vm4 = vcmp.eq.s32.totalorder %v9819_v10, %v7701_v44  ;;  %v9889_v11 = vadd.s32 848, %v7399_v16 }
 0x1d7   : > { %6279 = vmatprep.subr.msk.mxu0 %vm2429_vm7, %v14525_v12  ;;  %14697 = vst [vmem:[#allocation141_spill] sm:$0xff] %v9798_v37  ;;  %v1144_v5 = vpop.permute.xlu0 %1143  ;;  %vm2420_vm7 = vcmp.eq.s32.totalorder %v9744_v32, %v7694_v39  ;;  %vm2572_vm5 = vcmp.eq.s32.totalorder %v9798_v37, %v7694_v39  ;;  %vm2568_vm3 = vcmp.eq.s32.totalorder %v9810_v45, %v7694_v39  ;;  %v14711_v18 = vunpack.i.l.bf16 %v9573_v26  ;;  %v14714_v26 = vld [vmem:[#allocation103_spill] sm:$0xff] }
 0x1d8   : > { %6280 = vmatpush1.msk.msra.mxu0 %vm2428_vm11, %v14525_v12  ;;  %v9807_v31 = vpop.permute.xlu1 %700  ;;  %v1255_v17 = vsel %vm1241_vm10, %v9508_v55, %v1144_v5  ;;  %v1377_v46 = vadd.f32 %v1144_v5, %v904_v23  ;;  %vm2576_vm11 = vcmp.eq.s32.totalorder %v9298_v0, %v7694_v39  ;;  %v9841_v5 = vadd.s32 544, %v7399_v16  ;;  %v14703_v23 = vld [vmem:[#allocation22_spill] sm:$0xff]  ;;  %14709 = vst [vmem:[#allocation151_spill] sm:$0xff] %v9889_v11 }
 0x1d9   : > { %6281 = vmatprep.subr.msk.mxu0 %vm2425_vm6, %v14525_v12  ;;  %vm2417_vm6 = vcmp.eq.s32.totalorder %v9778_v22, %v7701_v44  ;;  %v1376_v58 = vadd.f32 %v1255_v17, %v903_v24  ;;  %vm2408_vm2 = vcmp.eq.s32.totalorder %v9819_v10, %v7694_v39  ;;  %v10103_v45 = vadd.s32 800, %v7399_v16  ;;  %v14760_v0 = vld [vmem:[#allocation86_spill] sm:$0xff] }
 0x1da   : > { %6282 = vmatpush1.msk.msra.mxu0 %vm2424_vm9, %v14525_v12  ;;  %14702 = vst [vmem:[#allocation146_spill] sm:$0xff] %v9841_v5  ;;  %v9844_v4 = vadd.f32 %v14703_v23, %v1377_v46  ;;  %vm2573_vm9 = vcmp.eq.s32.totalorder %v9798_v37, %v7701_v44  ;;  %v9863_v46 = vadd.s32 856, %v7399_v16  ;;  %vm2404_vm1 = vcmp.eq.s32.totalorder %v9841_v5, %v7694_v39 }
 0x1db   : > { %6283 = vmatprep.subr.msk.mxu0 %vm2421_vm8, %v14525_v12  ;;  %vm2413_vm8 = vcmp.eq.s32.totalorder %v9804_v29, %v7701_v44  ;;  %v9854_v24 = vadd.f32 %v14703_v23, %v1376_v58  ;;  %v9856_v17 = vpop.permute.xlu0 %7039 }
 0x1dc   : > { %14704 = vst [vmem:[#allocation22_spill] sm:$0xff] %v9844_v4  ;;  %6284 = vmatpush1.msk.msra.mxu0 %vm2420_vm7, %v14525_v12  ;;  %14706 = vst [vmem:[#allocation148_spill] sm:$0xff] %v9856_v17  ;;  %v9858_v32 = vpop.permute.xlu1 %698  ;;  %vm2412_vm7 = vcmp.eq.s32.totalorder %v9804_v29, %v7694_v39  ;;  %v14236_v58 = vmax.f32 %v9844_v4, 0.0  ;;  %v7041_v35 = vunpack.i.l.bf16 %v9856_v17  ;;  %v14710_v43 = vunpack.i.h.bf16 %v9856_v17  ;;  %v14717_v29 = vld [vmem:[#allocation104_spill] sm:$0xff] }
 0x1dd   : > { %14705 = vst [vmem:[#allocation147_spill] sm:$0xff] %v9854_v24  ;;  %14707 = vst [vmem:[#allocation149_spill] sm:$0xff] %v9863_v46  ;;  %6285 = vmatprep.subr.msk.mxu0 %vm2417_vm6, %v14525_v12  ;;  %vm2565_vm6 = vcmp.eq.s32.totalorder %v9832_v7, %v7701_v44  ;;  %v14715_v4 = vmax.f32 %v14714_v26, 0.0  ;;  %v14718_v21 = vmax.f32 %v14717_v29, 0.0 }
 0x1de   : > { %6286 = vmatpush1.msk.msra.mxu0 %vm2416_vm15, %v14525_v12  ;;  %vm2405_vm15 = vcmp.eq.s32.totalorder %v9841_v5, %v7701_v44  ;;  %1696 = vrot.lane.b32.xlu1 %v14236_v58, %s7281_s16  ;;  %v1797_v22 = vsel %vm14255_vm13, %v7041_v35, %v14710_v43  ;;  %v1796_v53 = vsel %vm14255_vm13, %v14711_v18, %v7041_v35  ;;  %v14713_v18 = vmax.f32 %v9854_v24, 0.0  ;;  %v14728_v24 = vld [vmem:[#allocation10_spill] sm:$0xff] }
 0x1df   : > { %6287 = vmatprep.subr.msk.mxu0 %vm2413_vm8, %v14525_v12  ;;  %vm2564_vm8 = vcmp.eq.s32.totalorder %v9832_v7, %v7694_v39  ;;  %v781_v58 = vsel %vm14319_vm14, %v9746_v38, %v9693_v50  ;;  %v9919_v43 = vpop.permute.xlu0 %7049  ;;  %v9928_v17 = vmax.f32 %v1797_v22, %v14715_v4  ;;  %v9932_v33 = vmax.f32 %v1796_v53, %v14718_v21  ;;  %v14757_v7 = vld [vmem:[#allocation9_spill] sm:$0xff] }
 0x1e0   : > { %6288 = vmatpush1.msk.msra.mxu0 %vm2412_vm7, %v14525_v12  ;;  %14712 = vst [vmem:[#allocation152_spill] sm:$0xff] %v9919_v43  ;;  %1694 = vrot.lane.b32.xlu0 %v14713_v18, %s7281_s16  ;;  %v9924_v35 = vpop.permute.xlu1 %1173  ;;  %v9937_v50 = vadd.s32 840, %v7399_v16  ;;  %v14250_v18 = vunpack.i.l.bf16 %v9649_v40  ;;  %v14247_v4 = vunpack.i.h.bf16 %v9919_v43  ;;  %v7051_v22 = vunpack.i.l.bf16 %v9919_v43  ;;  %v14725_v43 = vld [vmem:[#allocation107_spill] sm:$0xff] }
 0x1e1   : > { %14716 = vst [vmem:[#allocation103_spill] sm:$0xff] %v9928_v17  ;;  %14719 = vst [vmem:[#allocation104_spill] sm:$0xff] %v9932_v33  ;;  %6289 = vmatprep.subr.msk.mxu0 %vm2409_vm4, %v14525_v12  ;;  %3355 = vmatprep.mubr.f32.mxu1 %v9928_v17  ;;  %vm2560_vm7 = vcmp.eq.s32.totalorder %v9863_v46, %v7694_v39  ;;  %vm2557_vm4 = vcmp.eq.s32.totalorder %v9889_v11, %v7701_v44  ;;  %v9958_v53 = vadd.s32 832, %v7399_v16 }
 0x1e2   : > { %14720 = vst [vmem:[#allocation153_spill] sm:$0xff] %v9937_v50  ;;  %6290 = vmatpush1.msk.msra.mxu0 %vm2408_vm2, %v14525_v12  ;;  %v9965_v21 = vadd.s32 528, %v7399_v16  ;;  %v902_v29 = vadd.f32 %v781_v58, %v9577_v30  ;;  %3356 = vmatmul.mubr.f32.vlgmr.msra.gmra.mxu1 %v9932_v33  ;;  %v1804_v26 = vsel %vm14255_vm13, %v7051_v22, %v14247_v4  ;;  %v9978_v17 = vadd.s32 824, %v7399_v16  ;;  %v14724_v30 = vld [vmem:[#allocation41_spill] sm:$0xff] }
 0x1e3   : > { %14721 = vst [vmem:[#allocation154_spill] sm:$0xff] %v9958_v53  ;;  %6291 = vmatprep.subr.msk.mxu0 %vm2405_vm15, %v14525_v12  ;;  %v1803_v10 = vsel %vm14255_vm13, %v14250_v18, %v7051_v22  ;;  %vm2556_vm2 = vcmp.eq.s32.totalorder %v9889_v11, %v7694_v39  ;;  %v780_v58 = vsel %vm14319_vm14, %v14724_v30, %v9746_v38  ;;  %v687_v4 = vpop.permute.xlu0 %686  ;;  %v14726_v22 = vmax.f32 %v14725_v43, 0.0 }
 0x1e4   : > { %14722 = vst [vmem:[#allocation155_spill] sm:$0xff] %v9965_v21  ;;  %14723 = vst [vmem:[#allocation156_spill] sm:$0xff] %v9978_v17  ;;  %6292 = vmatpush1.msk.msra.mxu0 %vm2404_vm1, %v14525_v12  ;;  %v9987_v33 = vpop.permute.xlu1 %1171  ;;  %v14729_v47 = vmax.f32 %v14728_v24, 0.0  ;;  %6334 = vmatpush1.msk.msra.mxu1 %vm2576_vm11, %v14525_v12  ;;  %vm2553_vm1 = vcmp.eq.s32.totalorder %v9937_v50, %v7701_v44  ;;  %v10008_v38 = vadd.s32 520, %v7399_v16  ;;  %v10050_v30 = vadd.s32 816, %v7399_v16 }
 0x1e5   : > { %v9991_v18 = vmax.f32 %v1804_v26, %v14726_v22  ;;  %6293 = vmatprep.subr.msk.mxu0 %vm2401_vm0, %v14525_v12  ;;  %6335 = vmatprep.subr.msk.mxu1 %vm2573_vm9, %v14525_v12  ;;  %vm2552_vm11 = vcmp.eq.s32.totalorder %v9937_v50, %v7694_v39  ;;  %vm2400_vm15 = vcmp.eq.s32.totalorder %v9883_v63, %v7694_v39  ;;  %v10064_v22 = vadd.s32 808, %v7399_v16  ;;  %v14736_v63 = vld [vmem:[#allocation53_spill] sm:$0xff] }
 0x1e6   : > { %v9995_v62 = vmax.f32 %v1803_v10, %v14729_v47  ;;  %14731 = vst [vmem:[#allocation10_spill] sm:$0xff] %v10008_v38  ;;  %v795_v47 = vsel %vm14319_vm14, %v9858_v32, %v9807_v31  ;;  %v10022_v10 = vadd.s32 512, %v7399_v16  ;;  %v1254_v24 = vsel %vm1241_vm10, %v9524_v57, %v9508_v55  ;;  %6336 = vmatpush1.msk.msra.mxu1 %vm2572_vm5, %v14525_v12 }
 0x1e7   : > { %14727 = vst [vmem:[#allocation41_spill] sm:$0xff] %v9991_v18  ;;  %3361 = vmatprep.mubr.f32.mxu1 %v9991_v18  ;;  %vm2397_vm9 = vcmp.eq.s32.totalorder %v9965_v21, %v7701_v44  ;;  %vm2396_vm13 = vcmp.eq.s32.totalorder %v9965_v21, %v7694_v39  ;;  %v901_v43 = vadd.f32 %v780_v58, %v9567_v52  ;;  %14733 = vst [vmem:[#allocation158_spill] sm:$0xff] %v10050_v30 }
 0x1e8   : > { %14730 = vst [vmem:[#allocation107_spill] sm:$0xff] %v9995_v62  ;;  %14732 = vst [vmem:[#allocation157_spill] sm:$0xff] %v10022_v10  ;;  %v1375_v26 = vadd.f32 %v1254_v24, %v902_v29  ;;  %v1268_v55 = vsel %vm1241_vm10, %v9987_v33, %v9924_v35  ;;  %3362 = vmatmul.mubr.f32.gmra.mxu1 %v9995_v62  ;;  %6337 = vmatprep.subr.msk.mxu1 %vm2569_vm12, %v14525_v12  ;;  %v10053_v29 = vpop.permute.xlu0 %682  ;;  %v10055_v58 = vpop.permute.xlu1 %716  ;;  %v10090_v24 = vadd.s32 760, %v7399_v16 }
 0x1e9   : > { %v918_v52 = vadd.f32 %v795_v47, %v9636_v6  ;;  %6338 = vmatpush1.msk.msra.mxu1 %vm2568_vm3, %v14525_v12  ;;  %vm2545_vm12 = vcmp.eq.s32.totalorder %v9978_v17, %v7701_v44  ;;  %14734 = vst [vmem:[#allocation159_spill] sm:$0xff] %v10064_v22  ;;  %6294 = vmatpush1.msk.msra.mxu0 %vm2400_vm15, %v14525_v12  ;;  %14737 = vst [vmem:[#allocation53_spill] sm:$0xff] %v10103_v45  ;;  %v10137_v21 = vadd.s32 792, %v7399_v16 }
 0x1ea   : > { %vm2393_vm5 = vcmp.eq.s32.totalorder %v10008_v38, %v7701_v44  ;;  %vm2392_vm0 = vcmp.eq.s32.totalorder %v10008_v38, %v7694_v39  ;;  %v789_v6 = vsel %vm14319_vm14, %v9600_v27, %v687_v4  ;;  %v788_v47 = vsel %vm14319_vm14, %v10053_v29, %v9600_v27  ;;  %6339 = vmatprep.subr.msk.mxu1 %vm2565_vm6, %v14525_v12 }
 0x1eb   : > { %6295 = vmatprep.subr.msk.mxu0 %vm2397_vm9, %v14525_v12  ;;  %vm2389_vm3 = vcmp.eq.s32.totalorder %v10022_v10, %v7701_v44  ;;  %14735 = vst [vmem:[#allocation160_spill] sm:$0xff] %v10090_v24  ;;  %v1253_v27 = vsel %vm1241_vm10, %v14736_v63, %v9524_v57  ;;  %v1391_v5 = vadd.f32 %v1268_v55, %v918_v52  ;;  %14740 = vst [vmem:[#allocation162_spill] sm:$0xff] %v10137_v21 }
 0x1ec   : > { %v910_v62 = vadd.f32 %v788_v47, %v9554_v19  ;;  %6340 = vmatpush1.msk.msra.mxu1 %vm2564_vm8, %v14525_v12  ;;  %vm2544_vm6 = vcmp.eq.s32.totalorder %v9978_v17, %v7694_v39  ;;  %6296 = vmatpush1.msk.msra.mxu0 %vm2396_vm13, %v14525_v12  ;;  %v1374_v57 = vadd.f32 %v1253_v27, %v901_v43  ;;  %v10126_v43 = vadd.s32 752, %v7399_v16  ;;  %v1160_v47 = vpop.permute.xlu0 %1159  ;;  %v10130_v27 = vpop.permute.xlu1 %714 }
 0x1ed   : > { %v10110_v63 = vadd.f32 %v14703_v23, %v1375_v26  ;;  %v1261_v19 = vsel %vm1241_vm10, %v9751_v56, %v9698_v59  ;;  %vm14738_vm8 = vcmp.eq.s32.totalorder %v9863_v46, %v7701_v44  ;;  %vm2541_vm15 = vcmp.eq.s32.totalorder %v10050_v30, %v7701_v44  ;;  %6297 = vmatprep.subr.msk.mxu0 %vm2393_vm5, %v14525_v12 }
 0x1ee   : > { %6341 = vmatprep.subr.msk.mxu1 %vm14738_vm8, %v14525_v12  ;;  %14739 = vst [vmem:[#allocation161_spill] sm:$0xff] %v10126_v43  ;;  %v911_v26 = vadd.f32 %v789_v6, %v9538_v2  ;;  %v912_v55 = vadd.f32 %v687_v4, %v9546_v20  ;;  %v1383_v52 = vadd.f32 %v1261_v19, %v910_v62  ;;  %v10150_v62 = vadd.s32 784, %v7399_v16 }
 0x1ef   : > { %6342 = vmatpush1.msk.msra.mxu1 %vm2560_vm7, %v14525_v12  ;;  %6298 = vmatpush1.msk.msra.mxu0 %vm2392_vm0, %v14525_v12  ;;  %v1262_v2 = vsel %vm1241_vm10, %v9698_v59, %v1160_v47  ;;  %vm2388_vm13 = vcmp.eq.s32.totalorder %v10022_v10, %v7694_v39  ;;  %vm2513_vm7 = vcmp.eq.s32.totalorder %v10090_v24, %v7701_v44  ;;  %v10182_v19 = vadd.s32 1000, %v7399_v16 }
 0x1f0   : > { %6343 = vmatprep.subr.msk.mxu1 %vm2557_vm4, %v14525_v12  ;;  %14741 = vst [vmem:[#allocation163_spill] sm:$0xff] %v10150_v62  ;;  %v10157_v20 = vadd.f32 %v14628_v51, %v1391_v5  ;;  %v10160_v4 = vadd.f32 %v7603_v41, %v1383_v52  ;;  %v1384_v59 = vadd.f32 %v1262_v2, %v911_v26  ;;  %v10175_v5 = vadd.s32 776, %v7399_v16  ;;  %v10196_v2 = vpop.permute.xlu0 %7059  ;;  %v10198_v38 = vpop.permute.xlu1 %1189 }
 0x1f1   : > { %v1385_v6 = vadd.f32 %v1160_v47, %v912_v55  ;;  %6344 = vmatpush1.msk.msra.mxu1 %vm2556_vm2, %v14525_v12  ;;  %vm2540_vm4 = vcmp.eq.s32.totalorder %v10050_v30, %v7694_v39  ;;  %vm2537_vm0 = vcmp.eq.s32.totalorder %v10064_v22, %v7701_v44  ;;  %6299 = vmatprep.subr.msk.mxu0 %vm2389_vm3, %v14525_v12  ;;  %v10224_v52 = vadd.s32 744, %v7399_v16 }
 0x1f2   : > { %14742 = vst [vmem:[#allocation164_spill] sm:$0xff] %v10160_v4  ;;  %6345 = vmatprep.subr.msk.mxu1 %vm2553_vm1, %v14525_v12  ;;  %14743 = vst [vmem:[#allocation165_spill] sm:$0xff] %v10175_v5  ;;  %vm2512_vm2 = vcmp.eq.s32.totalorder %v10090_v24, %v7694_v39  ;;  %vm2509_vm1 = vcmp.eq.s32.totalorder %v10126_v43, %v7701_v44  ;;  %v10189_v26 = vadd.f32 %v14703_v23, %v1374_v57 }
 0x1f3   : > { %14744 = vst [vmem:[#allocation166_spill] sm:$0xff] %v10182_v19  ;;  %v10194_v47 = vadd.f32 %v7603_v41, %v1384_v59  ;;  %6346 = vmatpush1.msk.msra.mxu1 %vm2552_vm11, %v14525_v12  ;;  %vm2536_vm9 = vcmp.eq.s32.totalorder %v10064_v22, %v7694_v39  ;;  %6300 = vmatpush1.msk.msra.mxu0 %vm2388_vm13, %v14525_v12  ;;  %v7057_v23 = vunpack.i.h.bf16 %v9649_v40  ;;  %14746 = vst [vmem:[#allocation167_spill] sm:$0xff] %v10224_v52  ;;  %vm14751_vm13 = vcmask 7168  }
 0x1f4   : > { %vm14745_vm5 = vcmp.eq.s32.totalorder %v9958_v53, %v7701_v44  ;;  %vm2533_vm11 = vcmp.eq.s32.totalorder %v10103_v45, %v7701_v44  ;;  %6301 = vmatprep.subr.msk.mxu0 %vm2513_vm7, %v14525_v12  ;;  %v10228_v59 = vadd.f32 %v7603_v41, %v1385_v6  ;;  %v14747_v10 = vmax.f32 %v10110_v63, 0.0  ;;  %vm14753_vm7 = vmmov %vm14751_vm13  ;;  %v703_v24 = vpop.permute.xlu0 %702  ;;  %v10274_v46 = vpop.permute.xlu1 %1187 }
 0x1f5   : > { %6347 = vmatprep.subr.msk.mxu1 %vm14745_vm5, %v14525_v12  ;;  %v14748_v50 = vmax.f32 %v10160_v4, 0.0  ;;  %vm14749_vm3 = vcmp.eq.s32.totalorder %v9958_v53, %v7694_v39  ;;  %vm2532_vm8 = vcmp.eq.s32.totalorder %v10103_v45, %v7694_v39  ;;  %6302 = vmatpush2.msk.msra.mxu0 %vm2512_vm2, %v14525_v12  ;;  %v14750_v6 = vunpack.i.l.bf16 %v10196_v2 }
 0x1f6   : > { %6348 = vmatpush1.msk.msra.mxu1 %vm14749_vm3, %v14525_v12  ;;  %v14752_v55 = vunpack.i.h.bf16 %v10196_v2  ;;  %vm2529_vm5 = vcmp.eq.s32.totalorder %v10137_v21, %v7701_v44  ;;  %6303 = vmatprep.subr.msk.mxu0 %vm2509_vm1, %v14525_v12  ;;  %vm2508_vm2 = vcmp.eq.s32.totalorder %v10126_v43, %v7694_v39  ;;  %v14756_v53 = vmax.f32 %v10194_v47, 0.0 }
 0x1f7   : > { %v7118_v11 = vpack.i.bf16 %v14748_v50, %v14747_v10  ;;  %v1811_v57 = vsel %vm14751_vm13, %v7057_v23, %v14750_v6  ;;  %6349 = vmatprep.subr.msk.mxu1 %vm2545_vm12, %v14525_v12  ;;  %v10264_v10 = vadd.s32 736, %v7399_v16  ;;  %v14758_v18 = vmax.f32 %v14757_v7, 0.0  ;;  %6304 = vmatpush2.msk.msra.mxu0 %vm2508_vm2, %v14525_v12 }
 0x1f8   : > { %v1810_v50 = vsel %vm14753_vm7, %v14752_v55, %v7057_v23  ;;  %v14755_v23 = vld [vmem:[#allocation61_spill] sm:$0xff]  ;;  %1710 = vrot.lane.b32.xlu1 %v14756_v53, %s7281_s16  ;;  %v14761_v4 = vmax.f32 %v14760_v0, 0.0  ;;  %6350 = vmatpush1.msk.msra.mxu1 %vm2544_vm6, %v14525_v12  ;;  %vm2528_vm12 = vcmp.eq.s32.totalorder %v10137_v21, %v7694_v39  ;;  %v14287_v0 = vmax.f32 %v10228_v59, 0.0 }
 0x1f9   : > { %14754 = vst [vmem:[#allocation168_spill] sm:$0xff] %v10264_v10  ;;  %v787_v6 = vsel %vm14319_vm14, %v14755_v23, %v10053_v29  ;;  %7119 = vrot.lane.b32.xlu0 %v7118_v11, %s7281_s16  ;;  %v10278_v37 = vmax.f32 %v1811_v57, %v14758_v18  ;;  %v802_v29 = vsel %vm14319_vm14, %v10130_v27, %v10055_v58  ;;  %v10296_v11 = vadd.s32 768, %v7399_v16  ;;  %v10334_v23 = vpop.permute.xlu1 %732 }
 0x1fa   : > { %v10282_v55 = vmax.f32 %v1810_v50, %v14761_v4  ;;  %v14764_v7 = vmax.f32 %v10189_v26, 0.0  ;;  %v14765_v18 = vmax.f32 %v10157_v20, 0.0  ;;  %6351 = vmatprep.subr.msk.mxu1 %vm2541_vm15, %v14525_v12  ;;  %vm2633_vm3 = vcmp.eq.s32.totalorder %v10182_v19, %v7701_v44 }
 0x1fb   : > { %14759 = vst [vmem:[#allocation61_spill] sm:$0xff] %v10278_v37  ;;  %14763 = vst [vmem:[#allocation86_spill] sm:$0xff] %v10296_v11  ;;  %3367 = vmatprep.mubr.f32.mxu1 %v10278_v37  ;;  %vm2505_vm13 = vcmp.eq.s32.totalorder %v10224_v52, %v7701_v44  ;;  %v909_v4 = vadd.f32 %v787_v6, %v9550_v28  ;;  %v1275_v57 = vsel %vm1241_vm10, %v10274_v46, %v10198_v38  ;;  %v10328_v28 = vpop.permute.xlu0 %7064 }
 0x1fc   : > { %14762 = vst [vmem:[#allocation9_spill] sm:$0xff] %v10282_v55  ;;  %v7123_v53 = vpack.i.bf16 %v14765_v18, %v14764_v7  ;;  %3368 = vmatmul.mubr.f32.gmra.mxu1 %v10282_v55  ;;  %vm2504_vm7 = vcmp.eq.s32.totalorder %v10224_v52, %v7694_v39  ;;  %v926_v50 = vadd.f32 %v802_v29, %v9712_v49  ;;  %v7066_v6 = vunpack.i.l.bf16 %v10328_v28  ;;  %v14767_v29 = vld [vmem:[#allocation57_spill] sm:$0xff] }
 0x1fd   : > { %1712 = vrot.lane.b32.xlu0 %v14287_v0, %s7281_s16  ;;  %vm2632_vm2 = vcmp.eq.s32.totalorder %v10182_v19, %v7694_v39  ;;  %vm2501_vm6 = vcmp.eq.s32.totalorder %v10264_v10, %v7701_v44  ;;  %v796_v49 = vsel %vm14319_vm14, %v9807_v31, %v703_v24  ;;  %6352 = vmatpush1.msk.msra.mxu1 %vm2540_vm4, %v14525_v12  ;;  %v10358_v31 = vadd.s32 728, %v7399_v16 }
 0x1fe   : > { %7124 = vrot.lane.b32.xlu1 %v7123_v53, %s7281_s16  ;;  %vm2517_vm1 = vcmp.eq.s32.totalorder %v10296_v11, %v7701_v44  ;;  %6305 = vmatprep.subr.msk.mxu0 %vm2505_vm13, %v14525_v12  ;;  %vm2500_vm15 = vcmp.eq.s32.totalorder %v10264_v10, %v7694_v39  ;;  %v1260_v7 = vsel %vm1241_vm10, %v14767_v29, %v9751_v56  ;;  %v10370_v53 = vadd.s32 992, %v7399_v16 }
 0x1ff   : > { %14766 = vst [vmem:[#allocation169_spill] sm:$0xff] %v10358_v31  ;;  %v1399_v18 = vadd.f32 %v1275_v57, %v926_v50  ;;  %6353 = vmatprep.subr.msk.mxu1 %vm2537_vm0, %v14525_v12  ;;  %6306 = vmatpush2.msk.msra.mxu0 %vm2504_vm7, %v14525_v12  ;;  %v10377_v0 = vadd.s32 720, %v7399_v16  ;;  %v1382_v56 = vadd.f32 %v1260_v7, %v909_v4  ;;  %v14770_v50 = vunpack.i.l.bf16 %v9649_v40  ;;  %v14773_v40 = vld [vmem:[#allocation89_spill] sm:$0xff] }
 0x200   : > { %14768 = vst [vmem:[#allocation57_spill] sm:$0xff] %v10370_v53  ;;  %v920_v57 = vadd.f32 %v703_v24, %v9676_v48  ;;  %vm14771_vm0 = vcmask 7168   ;;  %6354 = vmatpush1.msk.msra.mxu1 %vm2536_vm9, %v14525_v12  ;;  %vm14318_vm4 = vcmask 1042432   ;;  %6307 = vmatprep.subr.msk.mxu0 %vm2501_vm6, %v14525_v12  ;;  %v919_v4 = vadd.f32 %v796_v49, %v9672_v14  ;;  %v1176_v48 = vpop.permute.xlu0 %1175  ;;  %v10393_v24 = vpop.permute.xlu1 %730 }
 0x201   : > { %14769 = vst [vmem:[#allocation170_spill] sm:$0xff] %v10377_v0  ;;  %v1802_v29 = vsel %vm14771_vm0, %v7066_v6, %v14770_v50  ;;  %vm14772_vm13 = vmmov %vm14771_vm0  ;;  %v14774_v7 = vmax.f32 %v14773_v40, 0.0  ;;  %6355 = vmatprep.subr.msk.mxu1 %vm2533_vm11, %v14525_v12  ;;  %v10408_v22 = vadd.s32 984, %v7399_v16  ;;  %6308 = vmatpush2.msk.msra.mxu0 %vm2500_vm15, %v14525_v12  ;;  %v1269_v14 = vsel %vm1241_vm10, %v9924_v35, %v1176_v48 }
 0x202   : > { %v1916_v43 = vsel %vm14772_vm13, 0.0, %v7066_v6  ;;  %v14775_v6 = vld [vmem:[#allocation114_spill] sm:$0xff]  ;;  %v1393_v49 = vadd.f32 %v1176_v48, %v920_v57  ;;  %6356 = vmatpush1.msk.msra.mxu1 %vm2532_vm8, %v14525_v12  ;;  %vm2497_vm9 = vcmp.eq.s32.totalorder %v10358_v31, %v7701_v44  ;;  %v1392_v40 = vadd.f32 %v1269_v14, %v919_v4 }
 0x203   : > { %v10397_v50 = vmax.f32 %v1802_v29, %v14774_v7  ;;  %v14776_v52 = vmax.f32 %v14775_v6, 0.0  ;;  %14777 = vst [vmem:[#allocation89_spill] sm:$0xff] %v10408_v22  ;;  %v10426_v29 = vadd.f32 %v8593_v60, %v1399_v18  ;;  %6357 = vmatprep.subr.msk.mxu1 %vm2529_vm5, %v14525_v12  ;;  %vm2629_vm11 = vcmp.eq.s32.totalorder %v10370_v53, %v7701_v44 }
 0x204   : > { %v10436_v35 = vadd.s32 976, %v7399_v16  ;;  %vm2496_vm8 = vcmp.eq.s32.totalorder %v10358_v31, %v7694_v39  ;;  %v10441_v18 = vadd.f32 %v14628_v51, %v1393_v49  ;;  %6358 = vmatpush1.msk.msra.mxu1 %vm2528_vm12, %v14525_v12  ;;  %vm2628_vm5 = vcmp.eq.s32.totalorder %v10370_v53, %v7694_v39  ;;  %v10461_v7 = vpop.permute.xlu0 %7069  ;;  %v10463_v6 = vpop.permute.xlu1 %1205  ;;  %6309 = vmatprep.subr.msk.mxu0 %vm2497_vm9, %v14525_v12  ;;  %vm14787_vm9 = vmmov %vm14772_vm13 }
 0x205   : > { %v10401_v30 = vmax.f32 %v1916_v43, %v14776_v52  ;;  %v7168_v43 = vld [vmem:[#allocation2] sm:$0xff]  ;;  %3248 = vmatprep.mubr.f32.mxu0 %v10397_v50  ;;  %vm2493_vm6 = vcmp.eq.s32.totalorder %v10377_v0, %v7701_v44  ;;  %v10456_v4 = vadd.f32 %v7603_v41, %v1382_v56  ;;  %v10459_v48 = vadd.f32 %v14628_v51, %v1392_v40 }
 0x206   : > { %v3137_v52 = vsel %vm2633_vm3, 1.0, %v7168_v43  ;;  %14778 = vst [vmem:[#allocation114_spill] sm:$0xff] %v10436_v35  ;;  %v3136_v57 = vsel %vm2632_vm2, 1.0, %v7168_v43  ;;  %vm14779_vm12 = vcmp.eq.s32.totalorder %v10150_v62, %v7701_v44  ;;  %vm2625_vm3 = vcmp.eq.s32.totalorder %v10408_v22, %v7701_v44  ;;  %6310 = vmatpush2.msk.msra.mxu0 %vm2496_vm8, %v14525_v12 }
 0x207   : > { %3249 = vmatmul.mubr.f32.gmra.mxu0 %v10401_v30  ;;  %6359 = vmatprep.subr.msk.mxu1 %vm14779_vm12, %v14525_v12  ;;  %v10472_v14 = vadd.s32 968, %v7399_v16  ;;  %v10479_v41 = vadd.s32 960, %v7399_v16  ;;  %v7067_v56 = vunpack.i.h.bf16 %v10328_v28  ;;  %v14304_v40 = vunpack.i.l.bf16 %v10461_v7 }
 0x208   : > { %vm14782_vm15 = vcmp.eq.s32.totalorder %v10150_v62, %v7694_v39  ;;  %vm2624_vm7 = vcmp.eq.s32.totalorder %v10408_v22, %v7694_v39  ;;  %vm14783_vm2 = vcmp.eq.s32.totalorder %v10175_v5, %v7701_v44  ;;  %vm2621_vm0 = vcmp.eq.s32.totalorder %v10436_v35, %v7701_v44  ;;  %6311 = vmatprep.subr.msk.mxu0 %vm2493_vm6, %v14525_v12  ;;  %v719_v62 = vpop.permute.xlu0 %718  ;;  %v10532_v21 = vpop.permute.xlu1 %1203 }
 0x209   : > { %14780 = vst [vmem:[#allocation171_spill] sm:$0xff] %v10472_v14  ;;  %14781 = vst [vmem:[#allocation172_spill] sm:$0xff] %v10479_v41  ;;  %6360 = vmatpush1.msk.msra.mxu1 %vm14782_vm15, %v14525_v12  ;;  %v10508_v43 = vadd.s32 712, %v7399_v16  ;;  %v14785_v28 = vmax.f32 %v10441_v18, 0.0  ;;  %v1818_v49 = vsel %vm14772_vm13, %v7067_v56, %v14304_v40  ;;  %v14786_v31 = vunpack.i.h.bf16 %v10461_v7 }
 0x20a   : > { %6361 = vmatprep.subr.msk.mxu1 %vm14783_vm2, %v14525_v12  ;;  %vm14788_vm8 = vcmp.eq.s32.totalorder %v10175_v5, %v7694_v39  ;;  %vm2492_vm6 = vcmp.eq.s32.totalorder %v10377_v0, %v7694_v39  ;;  %v10526_v19 = vadd.s32 952, %v7399_v16  ;;  %v14790_v40 = vmax.f32 %v10459_v48, 0.0  ;;  %v14793_v5 = vld [vmem:[#allocation13_spill] sm:$0xff] }
 0x20b   : > { %14784 = vst [vmem:[#allocation173_spill] sm:$0xff] %v10508_v43  ;;  %1728 = vrot.lane.b32.xlu1 %v14785_v28, %s7281_s16  ;;  %v1817_v10 = vsel %vm14787_vm9, %v14786_v31, %v7067_v56  ;;  %6362 = vmatpush1.msk.msra.mxu1 %vm14788_vm8, %v14525_v12  ;;  %v14791_v31 = vmax.f32 %v9185_v25, 0.0  ;;  %v14794_v45 = vmax.f32 %v14793_v5, 0.0  ;;  %v10547_v28 = vadd.s32 704, %v7399_v16  ;;  %v14798_v25 = vld [vmem:[#allocation69_spill] sm:$0xff] }
 0x20c   : > { %14789 = vst [vmem:[#allocation174_spill] sm:$0xff] %v10526_v19  ;;  %1726 = vrot.lane.b32.xlu0 %v14790_v40, %s7281_s16  ;;  %6363 = vmatprep.subr.msk.mxu1 %vm2517_vm1, %v14525_v12  ;;  %v809_v40 = vsel %vm14319_vm14, %v10393_v24, %v10334_v23  ;;  %vm14797_vm12 = vcmp.eq.s32.totalorder %v10296_v11, %v7694_v39  ;;  %v14799_v5 = vmax.f32 %v10456_v4, 0.0  ;;  %v10597_v11 = vpop.permute.xlu0 %7074  ;;  %v10608_v0 = vadd.s32 696, %v7399_v16 }
 0x20d   : > { %v10536_v56 = vmax.f32 %v1818_v49, %v14791_v31  ;;  %v10540_v17 = vmax.f32 %v1817_v10, %v14794_v45  ;;  %14796 = vst [vmem:[#allocation176_spill] sm:$0xff] %v10547_v28  ;;  %6364 = vmatpush1.msk.msra.mxu1 %vm14797_vm12, %v14525_v12  ;;  %vm2620_vm15 = vcmp.eq.s32.totalorder %v10436_v35, %v7694_v39  ;;  %v14800_v10 = vmax.f32 %v10426_v29, 0.0 }
 0x20e   : > { %vm2617_vm2 = vcmp.eq.s32.totalorder %v10472_v14, %v7701_v44  ;;  %vm2616_vm1 = vcmp.eq.s32.totalorder %v10472_v14, %v7694_v39  ;;  %v794_v45 = vsel %vm14319_vm14, %v14798_v25, %v9858_v32  ;;  %6365 = vmatprep.subr.msk.mxu1 %vm14318_vm4, %v3137_v52  ;;  %vm2613_vm13 = vcmp.eq.s32.totalorder %v10479_v41, %v7701_v44  ;;  %v14803_v25 = vld [vmem:[#allocation80_spill] sm:$0xff]  ;;  %v14825_v14 = vld [vmem:[#allocation15_spill] sm:$0xff] }
 0x20f   : > { %14792 = vst [vmem:[#allocation175_spill] sm:$0xff] %v10536_v56  ;;  %14795 = vst [vmem:[#allocation13_spill] sm:$0xff] %v10540_v17  ;;  %3373 = vmatprep.mubr.f32.mxu1 %v10536_v56  ;;  %v7128_v49 = vpack.i.bf16 %v14800_v10, %v14799_v5  ;;  %vm2489_vm9 = vcmp.eq.s32.totalorder %v10508_v43, %v7701_v44  ;;  %v10576_v31 = vadd.s32 944, %v7399_v16  ;;  %6312 = vmatpush2.msk.msra.mxu0 %vm2492_vm6, %v14525_v12 }
 0x210   : > { %v1282_v32 = vsel %vm1241_vm10, %v10532_v21, %v10463_v6  ;;  %3374 = vmatmul.mubr.f32.gmra.mxu1 %v10540_v17  ;;  %vm2488_vm12 = vcmp.eq.s32.totalorder %v10508_v43, %v7694_v39  ;;  %v10591_v52 = vadd.s32 936, %v7399_v16  ;;  %v1267_v5 = vsel %vm1241_vm10, %v14803_v25, %v9987_v33  ;;  %v10600_v17 = vpop.permute.xlu1 %748  ;;  %14804 = vst [vmem:[#allocation80_spill] sm:$0xff] %v10608_v0 }
 0x211   : > { %14801 = vst [vmem:[#allocation69_spill] sm:$0xff] %v10576_v31  ;;  %v934_v10 = vadd.f32 %v809_v40, %v9759_v3  ;;  %7129 = vrot.lane.b32.xlu0 %v7128_v49, %s7281_s16  ;;  %6366 = vmatpush2.msk.msra.mxu1 %vm14318_vm4, %v3136_v57  ;;  %vm2609_vm6 = vcmp.eq.s32.totalorder %v10526_v19, %v7701_v44  ;;  %v7076_v40 = vunpack.i.l.bf16 %v10597_v11  ;;  %v14806_v49 = vunpack.i.h.bf16 %v10196_v2 }
 0x212   : > { %14802 = vst [vmem:[#allocation177_spill] sm:$0xff] %v10591_v52  ;;  %vm2485_vm8 = vcmp.eq.s32.totalorder %v10547_v28, %v7701_v44  ;;  %v917_v33 = vadd.f32 %v794_v45, %v9629_v54  ;;  %v803_v3 = vsel %vm14319_vm14, %v10055_v58, %v719_v62  ;;  %6367 = vmatprep.subr.msk.mxu1 %vm2629_vm11, %v14525_v12  ;;  %v10637_v54 = vadd.s32 688, %v7399_v16 }
 0x213   : > { %6313 = vmatprep.subr.msk.mxu0 %vm2489_vm9, %v14525_v12  ;;  %vm2484_vm4 = vcmp.eq.s32.totalorder %v10547_v28, %v7694_v39  ;;  %v1407_v57 = vadd.f32 %v1282_v32, %v934_v10  ;;  %6368 = vmatpush2.msk.msra.mxu1 %vm2628_vm5, %v14525_v12  ;;  %vm2608_vm14 = vcmp.eq.s32.totalorder %v10526_v19, %v7694_v39  ;;  %vm14807_vm5 = vcmask 7168   ;;  %v14809_v10 = vld [vmem:[#allocation62_spill] sm:$0xff] }
 0x214   : > { %6314 = vmatpush2.msk.msra.mxu0 %vm2488_vm12, %v14525_v12  ;;  %vm2605_vm11 = vcmp.eq.s32.totalorder %v10576_v31, %v7701_v44  ;;  %14805 = vst [vmem:[#allocation178_spill] sm:$0xff] %v10637_v54  ;;  %v1390_v58 = vadd.f32 %v1267_v5, %v917_v33  ;;  %v928_v45 = vadd.f32 %v719_v62, %v9738_v42  ;;  %vm14808_vm9 = vmmov %vm14807_vm5  ;;  %v1192_v62 = vpop.permute.xlu0 %1191  ;;  %v10655_v5 = vpop.permute.xlu1 %746  ;;  %v14810_v33 = vmax.f32 %v14809_v10, 0.0 }
 0x215   : > { %v1809_v32 = vsel %vm14807_vm5, %v7076_v40, %v14806_v49  ;;  %v1917_v25 = vsel %vm14808_vm9, 0.0, %v7076_v40  ;;  %6369 = vmatprep.subr.msk.mxu1 %vm2625_vm3, %v14525_v12  ;;  %6315 = vmatprep.subr.msk.mxu0 %vm2485_vm8, %v14525_v12  ;;  %vm2604_vm12 = vcmp.eq.s32.totalorder %v10576_v31, %v7694_v39  ;;  %v927_v42 = vadd.f32 %v803_v3, %v9734_v1  ;;  %v14812_v49 = vld [vmem:[#allocation24_spill] sm:$0xff]  ;;  %vm14820_vm9 = vmmov %vm14807_vm5 }
 0x216   : > { %v10659_v40 = vmax.f32 %v1809_v32, %v14810_v33  ;;  %v14813_v43 = vmax.f32 %v14812_v49, 0.0  ;;  %6370 = vmatpush2.msk.msra.mxu1 %vm2624_vm7, %v14525_v12  ;;  %6316 = vmatpush2.msk.msra.mxu0 %vm2484_vm4, %v14525_v12  ;;  %vm2601_vm3 = vcmp.eq.s32.totalorder %v10591_v52, %v7701_v44  ;;  %v10676_v1 = vadd.s32 928, %v7399_v16 }
 0x217   : > { %v1401_v3 = vadd.f32 %v1192_v62, %v928_v45  ;;  %6371 = vmatprep.subr.msk.mxu1 %vm2621_vm0, %v14525_v12  ;;  %vm2481_vm7 = vcmp.eq.s32.totalorder %v10608_v0, %v7701_v44  ;;  %vm2600_vm4 = vcmp.eq.s32.totalorder %v10591_v52, %v7694_v39  ;;  %v10689_v32 = vadd.f32 %v8959_v36, %v1407_v57  ;;  %v14870_v52 = vld [vmem:[#allocation44_spill] sm:$0xff] }
 0x218   : > { %14811 = vst [vmem:[#allocation62_spill] sm:$0xff] %v10659_v40  ;;  %v10663_v53 = vmax.f32 %v1917_v25, %v14813_v43  ;;  %14815 = vst [vmem:[#allocation179_spill] sm:$0xff] %v10676_v1  ;;  %v1276_v43 = vsel %vm1241_vm10, %v10198_v38, %v1192_v62  ;;  %3254 = vmatprep.mubr.f32.mxu0 %v10659_v40  ;;  %6372 = vmatpush2.msk.msra.mxu1 %vm2620_vm15, %v14525_v12  ;;  %v10709_v57 = vadd.s32 920, %v7399_v16  ;;  %v10720_v10 = vpop.permute.xlu0 %7079  ;;  %v10722_v33 = vpop.permute.xlu1 %1221 }
 0x219   : > { %v1400_v25 = vadd.f32 %v1276_v43, %v927_v42  ;;  %vm2480_vm0 = vcmp.eq.s32.totalorder %v10608_v0, %v7694_v39  ;;  %v10699_v38 = vadd.f32 %v8593_v60, %v1401_v3  ;;  %6373 = vmatprep.subr.msk.mxu1 %vm2617_vm2, %v14525_v12  ;;  %vm2477_vm8 = vcmp.eq.s32.totalorder %v10637_v54, %v7701_v44 }
 0x21a   : > { %14814 = vst [vmem:[#allocation24_spill] sm:$0xff] %v10663_v53  ;;  %3255 = vmatmul.mubr.f32.gmra.mxu0 %v10663_v53  ;;  %14816 = vst [vmem:[#allocation180_spill] sm:$0xff] %v10709_v57  ;;  %v10712_v45 = vadd.s32 680, %v7399_v16  ;;  %v10715_v42 = vadd.f32 %v14628_v51, %v1390_v58  ;;  %6374 = vmatpush2.msk.msra.mxu1 %vm2616_vm1, %v14525_v12  ;;  %vm2597_vm15 = vcmp.eq.s32.totalorder %v10676_v1, %v7701_v44 }
 0x21b   : > { %v10718_v62 = vadd.f32 %v8593_v60, %v1400_v25  ;;  %6317 = vmatprep.subr.msk.mxu0 %vm2481_vm7, %v14525_v12  ;;  %v10735_v51 = vadd.s32 912, %v7399_v16  ;;  %v7077_v58 = vunpack.i.h.bf16 %v10597_v11  ;;  %v14326_v49 = vmax.f32 %v10699_v38, 0.0  ;;  %6375 = vmatprep.subr.msk.mxu1 %vm2613_vm13, %v14525_v12 }
 0x21c   : > { %14817 = vst [vmem:[#allocation181_spill] sm:$0xff] %v10712_v45  ;;  %v14332_v43 = vunpack.i.h.bf16 %v10720_v10  ;;  %v14329_v3 = vunpack.i.l.bf16 %v10720_v10  ;;  %6318 = vmatpush2.msk.msra.mxu0 %vm2480_vm0, %v14525_v12  ;;  %vm14819_vm2 = vcmp.eq.s32.totalorder %v10479_v41, %v7694_v39  ;;  %vm2596_vm1 = vcmp.eq.s32.totalorder %v10676_v1, %v7694_v39  ;;  %v735_v41 = vpop.permute.xlu0 %734  ;;  %v10785_v28 = vpop.permute.xlu1 %1219 }
 0x21d   : > { %14818 = vst [vmem:[#allocation182_spill] sm:$0xff] %v10735_v51  ;;  %6376 = vmatpush2.msk.msra.mxu1 %vm14819_vm2, %v14525_v12  ;;  %6319 = vmatprep.subr.msk.mxu0 %vm2477_vm8, %v14525_v12  ;;  %vm2476_vm13 = vcmp.eq.s32.totalorder %v10637_v54, %v7694_v39  ;;  %vm2593_vm7 = vcmp.eq.s32.totalorder %v10709_v57, %v7701_v44  ;;  %v10779_v0 = vadd.s32 672, %v7399_v16  ;;  %v14826_v35 = vmax.f32 %v14825_v14, 0.0  ;;  %v14871_v54 = vld [vmem:[#allocation27_spill] sm:$0xff] }
 0x21e   : > { %1744 = vrot.lane.b32.xlu0 %v14326_v49, %s7281_s16  ;;  %v1825_v25 = vsel %vm14807_vm5, %v7077_v58, %v14329_v3  ;;  %v1824_v11 = vsel %vm14820_vm9, %v14332_v43, %v7077_v58  ;;  %6377 = vmatprep.subr.msk.mxu1 %vm2609_vm6, %v14525_v12  ;;  %v14339_v49 = vmax.f32 %v10715_v42, 0.0  ;;  %v14822_v3 = vmax.f32 %v10718_v62, 0.0 }
 0x21f   : > { %14821 = vst [vmem:[#allocation183_spill] sm:$0xff] %v10779_v0  ;;  %v14823_v58 = vmax.f32 %v9277_v34, 0.0  ;;  %v10793_v22 = vmax.f32 %v1824_v11, %v14826_v35  ;;  %6378 = vmatpush2.msk.msra.mxu1 %vm2608_vm14, %v14525_v12  ;;  %vm2473_vm6 = vcmp.eq.s32.totalorder %v10712_v45, %v7701_v44  ;;  %vm14828_vm0 = vcmask 1039360   ;;  %v14830_v35 = vld [vmem:[#allocation93_spill] sm:$0xff]  ;;  %6320 = vmatpush2.msk.msra.mxu0 %vm2476_vm13, %v14525_v12 }
 0x220   : > { %1742 = vrot.lane.b32.xlu1 %v14822_v3, %s7281_s16  ;;  %v816_v3 = vsel %vm14828_vm0, %v10655_v5, %v10600_v17  ;;  %6379 = vmatprep.subr.msk.mxu1 %vm2605_vm11, %v14525_v12  ;;  %vm2592_vm8 = vcmp.eq.s32.totalorder %v10709_v57, %v7694_v39  ;;  %vm2472_vm2 = vcmp.eq.s32.totalorder %v10712_v45, %v7694_v39  ;;  %v10813_v34 = vadd.s32 904, %v7399_v16  ;;  %vm14831_vm14 = vmmov %vm14828_vm0  ;;  %v10848_v31 = vpop.permute.xlu0 %7084 }
 0x221   : > { %v10789_v43 = vmax.f32 %v1825_v25, %v14823_v58  ;;  %14827 = vst [vmem:[#allocation15_spill] sm:$0xff] %v10793_v22  ;;  %v801_v14 = vsel %vm14831_vm14, %v14830_v35, %v10130_v27  ;;  %v14832_v25 = vmax.f32 %v10689_v32, 0.0  ;;  %6380 = vmatpush2.msk.msra.mxu1 %vm2604_vm12, %v14525_v12  ;;  %vm2589_vm11 = vcmp.eq.s32.totalorder %v10735_v51, %v7701_v44  ;;  %v14834_v35 = vld [vmem:[#allocation109_spill] sm:$0xff]  ;;  %vm14836_vm9 = vmmov %vm14828_vm0 }
 0x222   : > { %14829 = vst [vmem:[#allocation185_spill] sm:$0xff] %v10813_v34  ;;  %v10830_v58 = vadd.s32 664, %v7399_v16  ;;  %v1289_v27 = vsel %vm1241_vm10, %v10785_v28, %v10722_v33  ;;  %6381 = vmatprep.subr.msk.mxu1 %vm2601_vm3, %v14525_v12  ;;  %vm2469_vm12 = vcmp.eq.s32.totalorder %v10779_v0, %v7701_v44  ;;  %vm2588_vm5 = vcmp.eq.s32.totalorder %v10735_v51, %v7694_v39 }
 0x223   : > { %14824 = vst [vmem:[#allocation184_spill] sm:$0xff] %v10789_v43  ;;  %3379 = vmatprep.mubr.f32.mxu1 %v10789_v43  ;;  %v7133_v11 = vpack.i.bf16 %v14832_v25, %v14339_v49  ;;  %v1274_v25 = vsel %vm1241_vm10, %v14834_v35, %v10274_v46  ;;  %v942_v49 = vadd.f32 %v816_v3, %v9783_v15  ;;  %v10858_v19 = vadd.s32 896, %v7399_v16 }
 0x224   : > { %14833 = vst [vmem:[#allocation93_spill] sm:$0xff] %v10830_v58  ;;  %3380 = vmatmul.mubr.f32.gmra.mxu1 %v10793_v22  ;;  %vm2468_vm3 = vcmp.eq.s32.totalorder %v10779_v0, %v7694_v39  ;;  %v925_v22 = vadd.f32 %v801_v14, %v9708_v8  ;;  %v810_v15 = vsel %vm14836_vm9, %v10334_v23, %v735_v41  ;;  %v7086_v46 = vunpack.i.l.bf16 %v10848_v31  ;;  %v1208_v35 = vpop.permute.xlu0 %1207  ;;  %v14869_v0 = vld [vmem:[#allocation8_spill] sm:$0xff] }
 0x225   : > { %7134 = vrot.lane.b32.xlu1 %v7133_v11, %s7281_s16  ;;  %6382 = vmatpush2.msk.msra.mxu1 %vm2600_vm4, %v14525_v12  ;;  %14835 = vst [vmem:[#allocation109_spill] sm:$0xff] %v10858_v19  ;;  %vm2585_vm4 = vcmp.eq.s32.totalorder %v10813_v34, %v7701_v44  ;;  %v1415_v3 = vadd.f32 %v1289_v27, %v942_v49  ;;  %v10887_v8 = vadd.s32 656, %v7399_v16  ;;  %v14838_v14 = vunpack.i.h.bf16 %v10461_v7 }
 0x226   : > { %6383 = vmatprep.subr.msk.mxu1 %vm2597_vm15, %v14525_v12  ;;  %6321 = vmatprep.subr.msk.mxu0 %vm2473_vm6, %v14525_v12  ;;  %vm2465_vm15 = vcmp.eq.s32.totalorder %v10830_v58, %v7701_v44  ;;  %vm2584_vm13 = vcmp.eq.s32.totalorder %v10813_v34, %v7694_v39  ;;  %v1398_v23 = vadd.f32 %v1274_v25, %v925_v22 }
 0x227   : > { %6384 = vmatpush2.msk.msra.mxu1 %vm2596_vm1, %v14525_v12  ;;  %14837 = vst [vmem:[#allocation186_spill] sm:$0xff] %v10887_v8  ;;  %v936_v49 = vadd.f32 %v735_v41, %v9787_v61  ;;  %vm14839_vm1 = vcmask 7168   ;;  %6322 = vmatpush2.msk.msra.mxu0 %vm2472_vm2, %v14525_v12  ;;  %v935_v22 = vadd.f32 %v810_v15, %v9772_v9  ;;  %v14841_v61 = vld [vmem:[#allocation115_spill] sm:$0xff] }
 0x228   : > { %v1816_v11 = vsel %vm14839_vm1, %v7086_v46, %v14838_v14  ;;  %vm14840_vm0 = vmmov %vm14839_vm1  ;;  %6385 = vmatprep.subr.msk.mxu1 %vm2593_vm7, %v14525_v12  ;;  %v14842_v41 = vmax.f32 %v14841_v61, 0.0  ;;  %v14844_v14 = vld [vmem:[#allocation26_spill] sm:$0xff]  ;;  %6323 = vmatprep.subr.msk.mxu0 %vm2469_vm12, %v14525_v12  ;;  %v1283_v9 = vsel %vm1241_vm10, %v10463_v6, %v1208_v35  ;;  %vm2464_vm7 = vcmp.eq.s32.totalorder %v10830_v58, %v7694_v39  ;;  %v10959_v61 = vpop.permute.xlu0 %7089 }
 0x229   : > { %v1918_v27 = vsel %vm14840_vm0, 0.0, %v7086_v46  ;;  %v14845_v1 = vmax.f32 %v14844_v14, 0.0  ;;  %6386 = vmatpush2.msk.msra.mxu1 %vm2592_vm8, %v14525_v12  ;;  %v1409_v15 = vadd.f32 %v1208_v35, %v936_v49  ;;  %vm2581_vm6 = vcmp.eq.s32.totalorder %v10858_v19, %v7701_v44  ;;  %v14848_v49 = vld [vmem:[#allocation32_spill] sm:$0xff]  ;;  %6324 = vmatpush2.msk.msra.mxu0 %vm2468_vm3, %v14525_v12  ;;  %vm14850_vm12 = vmmov %vm14840_vm0 }
 0x22a   : > { %v10905_v25 = vmax.f32 %v1816_v11, %v14842_v41  ;;  %6387 = vmatprep.subr.msk.mxu1 %vm2589_vm11, %v14525_v12  ;;  %v1408_v11 = vadd.f32 %v1283_v9, %v935_v22  ;;  %v10938_v6 = vadd.s32 648, %v7399_v16  ;;  %vm2461_vm8 = vcmp.eq.s32.totalorder %v10887_v8, %v7701_v44  ;;  %6325 = vmatprep.subr.msk.mxu0 %vm2465_vm15, %v14525_v12 }
 0x22b   : > { %v10909_v46 = vmax.f32 %v1918_v27, %v14845_v1  ;;  %v10930_v1 = vadd.f32 %v9199_v13, %v1415_v3  ;;  %6388 = vmatpush2.msk.msra.mxu1 %vm2588_vm5, %v14525_v12  ;;  %v2127_v27 = vadd.s32 384, %v14848_v49  ;;  %v10942_v35 = vadd.f32 %v8959_v36, %v1409_v15  ;;  %6326 = vmatpush2.msk.msra.mxu0 %vm2464_vm7, %v14525_v12  ;;  %vm14852_vm5 = vmmov %vm14840_vm0 }
 0x22c   : > { %14843 = vst [vmem:[#allocation115_spill] sm:$0xff] %v10905_v25  ;;  %3260 = vmatprep.mubr.f32.mxu0 %v10905_v25  ;;  %14847 = vst [vmem:[#allocation187_spill] sm:$0xff] %v10938_v6  ;;  %6389 = vmatprep.subr.msk.mxu1 %vm2585_vm4, %v14525_v12  ;;  %vm2580_vm2 = vcmp.eq.s32.totalorder %v10858_v19, %v7694_v39  ;;  %v10954_v3 = vadd.f32 %v8593_v60, %v1398_v23  ;;  %v10972_v60 = vadd.s32 640, %v7399_v16  ;;  %v751_v19 = vpop.permute.xlu0 %750  ;;  %vm14864_vm1 = vcmask 1039360   ;;  %v14878_v25 = vld [vmem:[#allocation28_spill] sm:$0xff] }
 0x22d   : > { %14846 = vst [vmem:[#allocation26_spill] sm:$0xff] %v10909_v46  ;;  %3261 = vmatmul.mubr.f32.gmra.mxu0 %v10909_v46  ;;  %v10957_v22 = vadd.f32 %v8959_v36, %v1408_v11  ;;  %6390 = vmatpush2.msk.msra.mxu1 %vm2584_vm13, %v14525_v12  ;;  %vm2460_vm14 = vcmp.eq.s32.totalorder %v10887_v8, %v7694_v39  ;;  %v7087_v23 = vunpack.i.h.bf16 %v10848_v31  ;;  %v14351_v41 = vmax.f32 %v10942_v35, 0.0  ;;  %v10987_v11 = vpop.permute.xlu1 %764  ;;  %vm14867_vm0 = vmmov %vm14864_vm1  ;;  %v14868_v8 = vld [vmem:[#allocation29_spill] sm:$0xff]  ;;  %v14875_v46 = vld [vmem:[#allocation116_spill] sm:$0xff] }
 0x22e   : > { %14849 = vst [vmem:[#allocation32_spill] sm:$0xff] %v10972_v60  ;;  %v14352_v9 = vunpack.i.l.bf16 %v10959_v61  ;;  %6391 = vmatprep.subr.msk.mxu1 %vm2581_vm6, %v14525_v12  ;;  %vm2457_vm11 = vcmp.eq.s32.totalorder %v10938_v6, %v7701_v44  ;;  %v11000_v14 = vmul.u32 2, %v2127_v27  ;;  %v14851_v31 = vunpack.i.h.bf16 %v10959_v61  ;;  %6327 = vmatprep.subr.msk.mxu0 %vm2461_vm8, %v14525_v12  ;;  %vm14873_vm7 = vmmov %vm14852_vm5 }
 0x22f   : > { %6392 = vmatpush2.msk.msra.mxu1 %vm2580_vm2, %v14525_v12  ;;  %1760 = vrot.lane.b32.xlu1 %v14351_v41, %s7281_s16  ;;  %vm2456_vm3 = vcmp.eq.s32.totalorder %v10938_v6, %v7694_v39  ;;  %v14359_v27 = vmax.f32 %v10954_v3, 0.0  ;;  %v14853_v41 = vmax.f32 %v10957_v22, 0.0  ;;  %vm2453_vm9 = vcmp.eq.s32.totalorder %v10972_v60, %v7701_v44  ;;  %vm14874_vm6 = vmmov %vm14852_vm5 }
 0x230   : > { %v1832_v15 = vsel %vm14850_vm12, %v7087_v23, %v14352_v9  ;;  %v1831_v34 = vsel %vm14852_vm5, %v14851_v31, %v7087_v23  ;;  %v14854_v9 = vld [vmem:[#allocation18_spill] sm:$0xff]  ;;  %6328 = vmatpush2.msk.msra.mxu0 %vm2460_vm14, %v14525_v12  ;;  %vm2452_vm4 = vcmp.eq.s32.totalorder %v10972_v60, %v7694_v39  ;;  %v14866_v39 = vld [vmem:[#allocation45_spill] sm:$0xff]  ;;  %v817_v60 = vsel %vm14867_vm0, %v10600_v17, %v751_v19  ;;  %vm14881_vm8 = vmmov %vm14852_vm5 }
 0x231   : > { %1758 = vrot.lane.b32.xlu0 %v14853_v41, %s7281_s16  ;;  %v14855_v51 = vmax.f32 %v14854_v9, 0.0  ;;  %v14857_v23 = vld [vmem:[#allocation118_spill] sm:$0xff]  ;;  %6329 = vmatprep.subr.msk.mxu0 %vm2457_vm11, %v14525_v12  ;;  %v14861_v41 = vld [vmem:[#allocation33_spill] sm:$0xff]  ;;  %v14876_v37 = vmax.f32 %v14875_v46, 0.0  ;;  %v14879_v53 = vmax.f32 %v14878_v25, 0.0  ;;  %vm14882_vm2 = vmmov %vm14852_vm5 }
 0x232   : > { %v14858_v31 = vmax.f32 %v14857_v23, 0.0  ;;  %6330 = vmatpush2.msk.msra.mxu0 %vm2456_vm3, %v14525_v12  ;;  %vm2195_vm15 = vcmp.eq.s32.totalorder %v14861_v41, %v11000_v14  ;;  %v14862_v9 = vld [vmem:[#allocation49_spill] sm:$0xff]  ;;  %v7095_v23 = vpop.permute.xlu0 %7094  ;;  %vm14890_vm14 = vmmov %vm14867_vm0 }
 0x233   : > { %v11023_v57 = vmax.f32 %v1832_v15, %v14855_v51  ;;  %v14860_v51 = vmax.f32 %v10930_v1, 0.0  ;;  %vm2323_vm13 = vcmp.eq.s32.totalorder %v14862_v9, %v11000_v14  ;;  %6331 = vmatprep.subr.msk.mxu0 %vm2453_vm9, %v14525_v12  ;;  %v763_v15 = vpop.permute.xlu1 %762  ;;  %v7096_v6 = vunpack.i.l.bf16 %v7095_v23  ;;  %6401 = vmatprep.subr.msk.mxu1 %vm2195_vm15, %v14525_v12  ;;  %vm14891_vm11 = vmmov %vm14867_vm0 }
 0x234   : > { %v11027_v58 = vmax.f32 %v1831_v34, %v14858_v31  ;;  %6332 = vmatpush2.msk.msra.mxu0 %vm2452_vm4, %v14525_v12  ;;  %v14863_v31 = vld [vmem:[#allocation66_spill] sm:$0xff]  ;;  %vm14896_vm12 = vmmov %vm14867_vm0 }
 0x235   : > { %14856 = vst [vmem:[#allocation18_spill] sm:$0xff] %v11023_v57  ;;  %3385 = vmatprep.mubr.f32.mxu1 %v11023_v57  ;;  %v7138_v34 = vpack.i.bf16 %v14860_v51, %v14359_v27  ;;  %v808_v51 = vsel %vm14864_vm1, %v14863_v31, %v10393_v24  ;;  %v14865_v27 = vld [vmem:[#allocation100_spill] sm:$0xff]  ;;  %6465 = vmatprep.subr.msk.mxu0 %vm2323_vm13, %v14525_v12  ;;  %v1919_v57 = vsel %vm14874_vm6, 0.0, %v7096_v6  ;;  %vm14898_vm5 = vmmov %vm14867_vm0  ;;  %vm1923_vm13 = vcmask 867328  }
 0x236   : > { %14859 = vst [vmem:[#allocation118_spill] sm:$0xff] %v11027_v58  ;;  %3386 = vmatmul.mubr.f32.gmra.mxu1 %v11027_v58  ;;  %v471_v44 = vmul.f32 %v14866_v39, %v14865_v27  ;;  %v470_v45 = vmul.f32 %v14870_v52, %v14865_v27  ;;  %v1281_v24 = vsel %vm1241_vm10, %v14871_v54, %v10532_v21  ;;  %v14872_v58 = vunpack.i.h.bf16 %v10720_v10  ;;  %v1224_v55 = vpop.permute.xlu0 %1223  ;;  %vm14899_vm3 = vmmov %vm14882_vm2 }
 0x237   : > { %7139 = vrot.lane.b32.xlu0 %v7138_v34, %s7281_s16  ;;  %v460_v34 = vmul.f32 %v14869_v0, %v14868_v8  ;;  %v11078_v40 = vmax.f32 %v1919_v57, %v14879_v53  ;;  %v1238_v54 = vpop.permute.xlu1 %1237  ;;  %v7097_v53 = vunpack.i.h.bf16 %v7095_v23  ;;  %vm14901_vm9 = vmmov %vm14882_vm2  ;;  %vm3140_vm6 = vcmask 875520  }
 0x238   : > { %v944_v31 = vadd.f32 %v751_v19, %v471_v44  ;;  %v1823_v17 = vsel %vm14873_vm7, %v7096_v6, %v14872_v58  ;;  %v943_v56 = vadd.f32 %v817_v60, %v470_v45  ;;  %v1290_v44 = vsel %vm1241_vm10, %v10722_v33, %v1224_v55  ;;  %vm14902_vm4 = vmmov %vm14882_vm2 }
 0x239   : > { %v933_v43 = vadd.f32 %v808_v51, %v460_v34  ;;  %v11074_v8 = vmax.f32 %v1823_v17, %v14876_v37  ;;  %14880 = vst [vmem:[#allocation100_spill] sm:$0xff] %v11078_v40  ;;  %vm14907_vm15 = vmmov %vm14882_vm2 }
 0x23a   : > { %v1417_v21 = vadd.f32 %v1224_v55, %v944_v31  ;;  %v1416_v58 = vadd.f32 %v1290_v44, %v943_v56  ;;  %v11090_v25 = vpop.permute.xlu0 %7099  ;;  %v14889_v44 = vld [vmem:[#allocation25_spill] sm:$0xff]  ;;  %vm14913_vm1 = vmmov %vm14882_vm2 }
 0x23b   : > { %14877 = vst [vmem:[#allocation66_spill] sm:$0xff] %v11074_v8  ;;  %v1406_v19 = vadd.f32 %v1281_v24, %v933_v43  ;;  %3266 = vmatprep.mubr.f32.mxu0 %v11074_v8  ;;  %v7102_v55 = vunpack.i.h.bf16 %v11090_v25  ;;  %v14388_v33 = vunpack.i.l.bf16 %v11090_v25  ;;  %v1236_v60 = vpop.permute.xlu1 %1235  ;;  %v14886_v24 = vld [vmem:[#allocation122_spill] sm:$0xff]  ;;  %v14903_v8 = vld [vmem:[#allocation119_spill] sm:$0xff]  ;;  %vm14914_vm0 = vmmov %vm14913_vm1 }
 0x23c   : > { %v11084_v45 = vadd.f32 %v9199_v13, %v1417_v21  ;;  %3267 = vmatmul.mubr.f32.gmra.mxu0 %v11078_v40  ;;  %v11088_v37 = vadd.f32 %v9199_v13, %v1416_v58  ;;  %v14887_v31 = vmax.f32 %v14886_v24, 0.0  ;;  %v815_v21 = vsel %vm14890_vm14, %v14889_v44, %v10655_v5  ;;  %v14895_v24 = vld [vmem:[#allocation124_spill] sm:$0xff]  ;;  %vm14921_vm7 = vmmov %vm14914_vm0 }
 0x23d   : > { %v11096_v56 = vadd.f32 %v8959_v36, %v1406_v19  ;;  %v1839_v46 = vsel %vm14881_vm8, %v7097_v53, %v14388_v33  ;;  %v1838_v6 = vsel %vm14882_vm2, %v7102_v55, %v7097_v53  ;;  %v14883_v36 = vld [vmem:[#allocation123_spill] sm:$0xff]  ;;  %v823_v19 = vsel %vm14891_vm11, %v763_v15, %v10987_v11  ;;  %vm14922_vm8 = vmmov %vm14914_vm0 }
 0x23e   : > { %v14390_v57 = vmax.f32 %v11084_v45, 0.0  ;;  %v14389_v43 = vmax.f32 %v11088_v37, 0.0  ;;  %v767_v23 = vpop.permute.xlu0 %766  ;;  %v14884_v51 = vmax.f32 %v14883_v36, 0.0  ;;  %v11115_v17 = vmax.f32 %v1838_v6, %v14887_v31  ;;  %v14892_v33 = vld [vmem:[#allocation23_spill] sm:$0xff]  ;;  %v14894_v6 = vld [vmem:[#allocation120_spill] sm:$0xff]  ;;  %vm14923_vm2 = vmmov %vm14914_vm0 }
 0x23f   : > { %v14392_v58 = vmax.f32 %v11096_v56, 0.0  ;;  %v468_v53 = vmul.f32 %v14869_v0, %v14865_v27  ;;  %v14893_v36 = vld [vmem:[#allocation47_spill] sm:$0xff]  ;;  %v822_v5 = vsel %vm14896_vm12, %v14895_v24, %v763_v15  ;;  %v1296_v31 = vsel %vm1241_vm10, %v1236_v60, %v1238_v54  ;;  %vm14924_vm14 = vmmov %vm14914_vm0 }
 0x240   : > { %1776 = vrot.lane.b32.xlu0 %v14390_v57, %s7281_s16  ;;  %1774 = vrot.lane.b32.xlu1 %v14389_v43, %s7281_s16  ;;  %v11111_v34 = vmax.f32 %v1839_v46, %v14884_v51  ;;  %14888 = vst [vmem:[#allocation29_spill] sm:$0xff] %v11115_v17  ;;  %v477_v46 = vmul.f32 %v14893_v36, %v14892_v33  ;;  %v14897_v36 = vld [vmem:[#allocation121_spill] sm:$0xff]  ;;  %vm14925_vm11 = vmmov %vm14914_vm0 }
 0x241   : > { %v1288_v51 = vsel %vm1241_vm10, %v14894_v6, %v10785_v28  ;;  %v941_v44 = vadd.f32 %v815_v21, %v468_v53  ;;  %v476_v27 = vmul.f32 %v14869_v0, %v14892_v33  ;;  %v1295_v28 = vsel %vm1241_vm10, %v14897_v36, %v1236_v60  ;;  %v1763_v0 = vpop.permute.xlu1 %1762 }
 0x242   : > { %14885 = vst [vmem:[#allocation45_spill] sm:$0xff] %v11111_v34  ;;  %3391 = vmatprep.mubr.f32.mxu1 %v11111_v34  ;;  %v950_v43 = vadd.f32 %v823_v19, %v477_v46  ;;  %v7105_v57 = vpop.permute.xlu0 %7104  ;;  %v479_v15 = vmul.f32 %v14866_v39, %v14892_v33  ;;  %v824_v6 = vsel %vm14898_vm5, %v10987_v11, %v767_v23  ;;  %v14900_v34 = vunpack.i.h.bf16 %v10959_v61 }
 0x243   : > { %3392 = vmatmul.mubr.f32.gmra.mxu1 %v11115_v17  ;;  %v7106_v24 = vunpack.i.l.bf16 %v7105_v57  ;;  %v1414_v21 = vadd.f32 %v1288_v51, %v941_v44  ;;  %v949_v53 = vadd.f32 %v822_v5, %v476_v27  ;;  %v478_v19 = vmul.f32 %v14870_v52, %v14892_v33 }
 0x244   : > { %1754 = vrot.lane.b32.xlu1 %v14392_v58, %s7281_s16  ;;  %v1423_v17 = vadd.f32 %v1296_v31, %v950_v43  ;;  %v1837_v46 = vsel %vm14899_vm3, %v1763_v0, %v7102_v55  ;;  %v952_v58 = vadd.f32 %v767_v23, %v479_v15  ;;  %v14904_v51 = vmax.f32 %v14903_v8, 0.0  ;;  %v14905_v43 = vld [vmem:[#allocation127_spill] sm:$0xff]  ;;  %v14908_v23 = vld [vmem:[#allocation126_spill] sm:$0xff]  ;;  %vm14935_vm3 = vmmov %vm14914_vm0 }
 0x245   : > { %v1830_v60 = vsel %vm14901_vm9, %v7106_v24, %v14900_v34  ;;  %v1920_v39 = vsel %vm14902_vm4, 0.0, %v7106_v24  ;;  %v1422_v36 = vadd.f32 %v1295_v28, %v949_v53  ;;  %v951_v40 = vadd.f32 %v824_v6, %v478_v19  ;;  %v14909_v28 = vld [vmem:[#allocation125_spill] sm:$0xff] }
 0x246   : > { %v1240_v11 = vpop.permute.xlu0 %1239  ;;  %v11155_v5 = vmax.f32 %v1830_v60, %v14904_v51  ;;  %v14906_v31 = vmax.f32 %v14905_v43, 0.0  ;;  %v1921_v52 = vsel %vm14907_vm15, 0.0, %v1763_v0  ;;  %v11164_v34 = vadd.f32 %v14908_v23, %v1423_v17  ;;  %v1681_v51 = vpop.permute.xlu1 %1680 }
 0x247   : > { %v1297_v55 = vsel %vm1241_vm10, %v1238_v54, %v1240_v11  ;;  %v1425_v33 = vadd.f32 %v1240_v11, %v952_v58  ;;  %v14910_v15 = vmax.f32 %v14909_v28, 0.0  ;;  %v11176_v24 = vadd.f32 %v9199_v13, %v1414_v21  ;;  %v14911_v58 = vld [vmem:[#allocation128_spill] sm:$0xff] }
 0x248   : > { %v11159_v44 = vmax.f32 %v1920_v39, %v14906_v31  ;;  %v1424_v27 = vadd.f32 %v1297_v55, %v951_v40  ;;  %3272 = vmatprep.mubr.f32.mxu0 %v11155_v5  ;;  %v11179_v54 = vadd.f32 %v14908_v23, %v1422_v36  ;;  %v14912_v53 = vmax.f32 %v14911_v58, 0.0  ;;  %v14915_v31 = vld [vmem:[#allocation130_spill] sm:$0xff]  ;;  %v14919_v58 = vld [vmem:[#allocation20_spill] sm:$0xff] }
 0x249   : > { %v11169_v8 = vmax.f32 %v1837_v46, %v14910_v15  ;;  %v11172_v6 = vadd.f32 %v14908_v23, %v1425_v33  ;;  %v7107_v19 = vunpack.i.h.bf16 %v7105_v57  ;;  %v14399_v60 = vmax.f32 %v11164_v34, 0.0  ;;  %v14917_v33 = vld [vmem:[#allocation129_spill] sm:$0xff] }
 0x24a   : > { %3273 = vmatmul.mubr.f32.gmra.mxu0 %v11159_v44  ;;  %v11182_v17 = vadd.f32 %v14908_v23, %v1424_v27  ;;  %v11184_v40 = vpop.permute.xlu0 %7109  ;;  %v11189_v0 = vmax.f32 %v1921_v52, %v14912_v53  ;;  %v14400_v11 = vmax.f32 %v11176_v24, 0.0  ;;  %v14916_v52 = vmax.f32 %v14915_v31, 0.0  ;;  %v1675_v31 = vpop.permute.xlu1 %1674 }
 0x24b   : > { %3278 = vmatprep.mubr.f32.mxu0 %v11169_v8  ;;  %v14401_v46 = vmax.f32 %v11172_v6, 0.0  ;;  %v7112_v13 = vunpack.i.h.bf16 %v11184_v40  ;;  %v14396_v21 = vunpack.i.l.bf16 %v11184_v40  ;;  %v14918_v23 = vmax.f32 %v14917_v33, 0.0 }
 0x24c   : > { %v14397_v39 = vmax.f32 %v11182_v17, 0.0  ;;  %v2126_v28 = vadd.s32 256, %v14848_v49  ;;  %v14398_v15 = vmax.f32 %v11179_v54, 0.0  ;;  %v14920_v53 = vmax.f32 %v14919_v58, 0.0 }
 0x24d   : > { %1792 = vrot.lane.b32.xlu1 %v14401_v46, %s7281_s16  ;;  %v1846_v57 = vsel %vm14913_vm1, %v7107_v19, %v14396_v21  ;;  %v1845_v36 = vsel %vm14914_vm0, %v7112_v13, %v7107_v19 }
 0x24e   : > { %3279 = vmatmul.mubr.f32.gmra.mxu0 %v11189_v0  ;;  %v1679_v43 = vpop.permute.xlu0 %1678  ;;  %1790 = vrot.lane.b32.xlu0 %v14397_v39, %s7281_s16  ;;  %v11210_v55 = vmax.f32 %v1846_v57, %v14916_v52  ;;  %v11214_v27 = vmax.f32 %v1845_v36, %v14918_v23  ;;  %v1924_v19 = vsel %vm1923_vm13, %v14920_v53, 0.0  ;;  %v7143_v57 = vpack.i.bf16 %v14400_v11, %v14399_v60  ;;  %v14926_v53 = vld [vmem:[#allocation133_spill] sm:$0xff] }
 0x24f   : > { %v1801_v21 = vsel %vm14921_vm7, %v1679_v43, %v1681_v51 }
 0x250   : > { %v11222_v39 = vmax.f32 %v1801_v21, %v1924_v19  ;;  %3397 = vmatprep.mubr.f32.mxu1 %v11210_v55  ;;  %v11236_v21 = vmul.u32 2, %v2126_v28  ;;  %v14927_v19 = vmax.f32 %v14926_v53, 0.0  ;;  %v14930_v28 = vld [vmem:[#allocation134_spill] sm:$0xff]  ;;  %v1697_v53 = vpop.permute.xlu1 %1696 }
 0x251   : > { %1786 = vrot.lane.b32.xlu1 %v14398_v15, %s7281_s16  ;;  %3398 = vmatmul.mubr.f32.gmra.mxu1 %v11214_v27  ;;  %v14931_v46 = vmax.f32 %v14930_v28, 0.0  ;;  %v14942_v28 = vld [vmem:[#allocation52_spill] sm:$0xff] }
 0x252   : > { %v7115_v49 = vpop.permute.xlu0 %7114  ;;  %7144 = vrot.lane.b32.xlu0 %v7143_v57, %s7281_s16  ;;  %6393 = vmatprep.mubr.msk.f32.mxu1 %vm3140_vm6, %v11222_v39  ;;  %v14928_v57 = vld [vmem:[#allocation19_spill] sm:$0xff]  ;;  %vm2194_vm12 = vcmp.eq.s32.totalorder %v14861_v41, %v11236_v21  ;;  %vm2322_vm0 = vcmp.eq.s32.totalorder %v14862_v9, %v11236_v21 }
 0x253   : > { %v7117_v36 = vunpack.i.h.bf16 %v7115_v49  ;;  %v7116_v51 = vunpack.i.l.bf16 %v7115_v49  ;;  %v14929_v60 = vmax.f32 %v14928_v57, 0.0 }
 0x255   : > { %v1800_v52 = vsel %vm14922_vm8, %v7116_v51, %v1679_v43  ;;  %v1844_v33 = vsel %vm14923_vm2, %v7117_v36, %v7112_v13  ;;  %v1922_v23 = vsel %vm14924_vm14, 0.0, %v7117_v36  ;;  %v1799_v58 = vsel %vm14925_vm11, %v1675_v31, %v7116_v51  ;;  %v14932_v13 = vld [vmem:[#allocation35_spill] sm:$0xff]  ;;  %v14933_v43 = vld [vmem:[#allocation148_spill] sm:$0xff] }
 0x256   : > { %v11244_v15 = vmax.f32 %v1800_v52, %v14927_v19  ;;  %v11248_v11 = vmax.f32 %v1844_v33, %v14929_v60  ;;  %v11252_v49 = vmax.f32 %v1922_v23, %v14931_v46  ;;  %vm2191_vm5 = vcmp.eq.s32.totalorder %v14932_v13, %v11000_v14  ;;  %v14936_v60 = vld [vmem:[#allocation137_spill] sm:$0xff]  ;;  %v14938_v46 = vld [vmem:[#allocation38_spill] sm:$0xff]  ;;  %v14941_v19 = vld [vmem:[#allocation39_spill] sm:$0xff]  ;;  %v11286_v57 = vpop.permute.xlu0 %1694 }
 0x257   : > { %v14934_v36 = vunpack.i.h.bf16 %v14933_v43  ;;  %v14937_v52 = vmax.f32 %v14936_v60, 0.0  ;;  %vm2190_vm9 = vcmp.eq.s32.totalorder %v14932_v13, %v11236_v21  ;;  %vm2187_vm4 = vcmp.eq.s32.totalorder %v14938_v46, %v11000_v14  ;;  %v14943_v43 = vld [vmem:[#allocation22_spill] sm:$0xff]  ;;  %v14970_v13 = vld [vmem:[#allocation147_spill] sm:$0xff] }
 0x258   : > { %3284 = vmatprep.mubr.f32.mxu0 %v11248_v11  ;;  %3582 = vmatmul.mubr.f32.vlgmr.msra.gmra.mxu1 %v11244_v15  ;;  %vm2186_vm15 = vcmp.eq.s32.totalorder %v14938_v46, %v11236_v21  ;;  %vm2183_vm1 = vcmp.eq.s32.totalorder %v14941_v19, %v11000_v14  ;;  %vm2182_vm7 = vcmp.eq.s32.totalorder %v14941_v19, %v11236_v21  ;;  %v14971_v41 = vmax.f32 %v14970_v13, 0.0 }
 0x259   : > { %v1798_v51 = vsel %vm14935_vm3, %v14934_v36, %v1675_v31  ;;  %v11265_v33 = vmax.f32 %v1799_v58, %v14937_v52  ;;  %3285 = vmatmul.mubr.f32.gmra.mxu0 %v11252_v49  ;;  %6402 = vmatpush1.msk.msra.mxu1 %vm2194_vm12, %v14525_v12  ;;  %v14939_v31 = vld [vmem:[#allocation136_spill] sm:$0xff]  ;;  %vm2319_vm8 = vcmp.eq.s32.totalorder %v14942_v28, %v11000_v14  ;;  %v14944_v36 = vmax.f32 %v14943_v43, 0.0 }
 0x25a   : > { %6403 = vmatprep.subr.msk.mxu1 %vm2191_vm5, %v14525_v12  ;;  %v14940_v23 = vmax.f32 %v14939_v31, 0.0  ;;  %v1808_v60 = vsel %vm14923_vm2, %v11286_v57, %v1697_v53  ;;  %v14945_v52 = vld [vmem:[#allocation40_spill] sm:$0xff]  ;;  %vm2318_vm11 = vcmp.eq.s32.totalorder %v14942_v28, %v11236_v21  ;;  %v14948_v53 = vld [vmem:[#allocation42_spill] sm:$0xff]  ;;  %v14966_v28 = vld [vmem:[#allocation67_spill] sm:$0xff] }
 0x25b   : > { %3468 = vmatprep.mubr.f32.mxu0 %v11265_v33  ;;  %6404 = vmatpush1.msk.msra.mxu1 %vm2190_vm9, %v14525_v12  ;;  %vm2179_vm14 = vcmp.eq.s32.totalorder %v14945_v52, %v11000_v14  ;;  %vm2178_vm12 = vcmp.eq.s32.totalorder %v14945_v52, %v11236_v21  ;;  %vm2175_vm3 = vcmp.eq.s32.totalorder %v14948_v53, %v11000_v14  ;;  %v14949_v43 = vld [vmem:[#allocation56_spill] sm:$0xff]  ;;  %v14965_v52 = vld [vmem:[#allocation79_spill] sm:$0xff] }
 0x25c   : > { %v11279_v58 = vmax.f32 %v1798_v51, %v14940_v23  ;;  %6405 = vmatprep.subr.msk.mxu1 %vm2187_vm4, %v14525_v12  ;;  %v1925_v51 = vsel %vm1923_vm13, %v14944_v36, 0.0  ;;  %v14947_v23 = vld [vmem:[#allocation55_spill] sm:$0xff]  ;;  %vm2174_vm4 = vcmp.eq.s32.totalorder %v14948_v53, %v11236_v21 }
 0x25d   : > { %6406 = vmatpush1.msk.msra.mxu1 %vm2186_vm15, %v14525_v12  ;;  %v11302_v31 = vmax.f32 %v1808_v60, %v1925_v51  ;;  %vm2315_vm5 = vcmp.eq.s32.totalorder %v14947_v23, %v11000_v14  ;;  %vm2314_vm9 = vcmp.eq.s32.totalorder %v14947_v23, %v11236_v21  ;;  %vm2311_vm15 = vcmp.eq.s32.totalorder %v14949_v43, %v11000_v14  ;;  %v14950_v36 = vld [vmem:[#allocation43_spill] sm:$0xff]  ;;  %v14952_v60 = vld [vmem:[#allocation48_spill] sm:$0xff] }
 0x25e   : > { %3469 = vmatmul.mubr.f32.vlgmr.msra.gmra.mxu0 %v11279_v58  ;;  %6407 = vmatprep.subr.msk.mxu1 %vm2183_vm1, %v14525_v12  ;;  %vm2171_vm1 = vcmp.eq.s32.totalorder %v14950_v36, %v11000_v14  ;;  %v14951_v51 = vld [vmem:[#allocation59_spill] sm:$0xff]  ;;  %vm2167_vm2 = vcmp.eq.s32.totalorder %v14952_v60, %v11000_v14 }
 0x25f   : > { %14946 = vst [vmem:[#allocation8_spill] sm:$0xff] %v11302_v31  ;;  %6466 = vmatpush1.msk.msra.mxu0 %vm2322_vm0, %v14525_v12  ;;  %6408 = vmatpush1.msk.msra.mxu1 %vm2182_vm7, %v14525_v12  ;;  %vm2310_vm0 = vcmp.eq.s32.totalorder %v14949_v43, %v11236_v21  ;;  %vm2170_vm7 = vcmp.eq.s32.totalorder %v14950_v36, %v11236_v21  ;;  %v14953_v36 = vld [vmem:[#allocation63_spill] sm:$0xff]  ;;  %v14954_v43 = vld [vmem:[#allocation50_spill] sm:$0xff] }
 0x260   : > { %6467 = vmatprep.subr.msk.mxu0 %vm2319_vm8, %v14525_v12  ;;  %6394 = vmatprep.mubr.msk.f32.mxu1 %vm3140_vm6, %v11302_v31  ;;  %vm2307_vm8 = vcmp.eq.s32.totalorder %v14951_v51, %v11000_v14 }
 0x261   : > { %6409 = vmatprep.subr.msk.mxu1 %vm2179_vm14, %v14525_v12  ;;  %6468 = vmatpush1.msk.msra.mxu0 %vm2318_vm11, %v14525_v12  ;;  %vm2306_vm14 = vcmp.eq.s32.totalorder %v14951_v51, %v11236_v21  ;;  %vm2166_vm11 = vcmp.eq.s32.totalorder %v14952_v60, %v11236_v21  ;;  %v14955_v60 = vld [vmem:[#allocation65_spill] sm:$0xff]  ;;  %v14956_v51 = vld [vmem:[#allocation51_spill] sm:$0xff] }
 0x262   : > { %6410 = vmatpush1.msk.msra.mxu1 %vm2178_vm12, %v14525_v12  ;;  %6469 = vmatprep.subr.msk.mxu0 %vm2315_vm5, %v14525_v12  ;;  %vm2303_vm12 = vcmp.eq.s32.totalorder %v14953_v36, %v11000_v14  ;;  %vm2163_vm5 = vcmp.eq.s32.totalorder %v14954_v43, %v11000_v14 }
 0x263   : > { %6411 = vmatprep.subr.msk.mxu1 %vm2175_vm3, %v14525_v12  ;;  %6470 = vmatpush1.msk.msra.mxu0 %vm2314_vm9, %v14525_v12  ;;  %vm2302_vm3 = vcmp.eq.s32.totalorder %v14953_v36, %v11236_v21  ;;  %vm2162_vm9 = vcmp.eq.s32.totalorder %v14954_v43, %v11236_v21  ;;  %v14957_v43 = vld [vmem:[#allocation68_spill] sm:$0xff]  ;;  %v14958_v36 = vld [vmem:[#allocation54_spill] sm:$0xff] }
 0x264   : > { %6412 = vmatpush1.msk.msra.mxu1 %vm2174_vm4, %v14525_v12  ;;  %6471 = vmatprep.subr.msk.mxu0 %vm2311_vm15, %v14525_v12  ;;  %vm2299_vm4 = vcmp.eq.s32.totalorder %v14955_v60, %v11000_v14  ;;  %vm2159_vm15 = vcmp.eq.s32.totalorder %v14956_v51, %v11000_v14 }
 0x265   : > { %6413 = vmatprep.subr.msk.mxu1 %vm2171_vm1, %v14525_v12  ;;  %6472 = vmatpush1.msk.msra.mxu0 %vm2310_vm0, %v14525_v12  ;;  %vm2298_vm1 = vcmp.eq.s32.totalorder %v14955_v60, %v11236_v21  ;;  %vm2158_vm0 = vcmp.eq.s32.totalorder %v14956_v51, %v11236_v21  ;;  %v14959_v51 = vld [vmem:[#allocation70_spill] sm:$0xff] }
 0x266   : > { %6414 = vmatpush1.msk.msra.mxu1 %vm2170_vm7, %v14525_v12  ;;  %6473 = vmatprep.subr.msk.mxu0 %vm2307_vm8, %v14525_v12  ;;  %vm2295_vm7 = vcmp.eq.s32.totalorder %v14957_v43, %v11000_v14  ;;  %vm2155_vm8 = vcmp.eq.s32.totalorder %v14958_v36, %v11000_v14  ;;  %v14960_v60 = vld [vmem:[#allocation58_spill] sm:$0xff] }
 0x267   : > { %6415 = vmatprep.subr.msk.mxu1 %vm2167_vm2, %v14525_v12  ;;  %6474 = vmatpush1.msk.msra.mxu0 %vm2306_vm14, %v14525_v12  ;;  %vm2294_vm2 = vcmp.eq.s32.totalorder %v14957_v43, %v11236_v21  ;;  %vm2154_vm14 = vcmp.eq.s32.totalorder %v14958_v36, %v11236_v21  ;;  %v14961_v36 = vld [vmem:[#allocation74_spill] sm:$0xff]  ;;  %v14962_v43 = vld [vmem:[#allocation60_spill] sm:$0xff] }
 0x268   : > { %6416 = vmatpush1.msk.msra.mxu1 %vm2166_vm11, %v14525_v12  ;;  %6475 = vmatprep.subr.msk.mxu0 %vm2303_vm12, %v14525_v12  ;;  %vm2291_vm11 = vcmp.eq.s32.totalorder %v14959_v51, %v11000_v14  ;;  %vm2151_vm12 = vcmp.eq.s32.totalorder %v14960_v60, %v11000_v14 }
 0x269   : > { %6417 = vmatprep.subr.msk.mxu1 %vm2163_vm5, %v14525_v12  ;;  %6476 = vmatpush1.msk.msra.mxu0 %vm2302_vm3, %v14525_v12  ;;  %vm2290_vm5 = vcmp.eq.s32.totalorder %v14959_v51, %v11236_v21  ;;  %vm2150_vm3 = vcmp.eq.s32.totalorder %v14960_v60, %v11236_v21  ;;  %v14963_v60 = vld [vmem:[#allocation77_spill] sm:$0xff]  ;;  %v14964_v51 = vld [vmem:[#allocation64_spill] sm:$0xff] }
 0x26a   : > { %6418 = vmatpush1.msk.msra.mxu1 %vm2162_vm9, %v14525_v12  ;;  %6477 = vmatprep.subr.msk.mxu0 %vm2299_vm4, %v14525_v12  ;;  %vm2287_vm9 = vcmp.eq.s32.totalorder %v14961_v36, %v11000_v14  ;;  %vm2147_vm4 = vcmp.eq.s32.totalorder %v14962_v43, %v11000_v14  ;;  %v1711_v23 = vpop.permute.xlu1 %1710 }
 0x26b   : > { %6419 = vmatprep.subr.msk.mxu1 %vm2159_vm15, %v14525_v12  ;;  %6478 = vmatpush1.msk.msra.mxu0 %vm2298_vm1, %v14525_v12  ;;  %vm2286_vm15 = vcmp.eq.s32.totalorder %v14961_v36, %v11236_v21  ;;  %vm2146_vm1 = vcmp.eq.s32.totalorder %v14962_v43, %v11236_v21  ;;  %v11413_v53 = vpop.permute.xlu0 %7119 }
 0x26c   : > { %6420 = vmatpush1.msk.msra.mxu1 %vm2158_vm0, %v14525_v12  ;;  %6479 = vmatprep.subr.msk.mxu0 %vm2295_vm7, %v14525_v12  ;;  %vm2283_vm0 = vcmp.eq.s32.totalorder %v14963_v60, %v11000_v14  ;;  %vm2143_vm7 = vcmp.eq.s32.totalorder %v14964_v51, %v11000_v14  ;;  %v7121_v36 = vunpack.i.l.bf16 %v11413_v53 }
 0x26d   : > { %6421 = vmatprep.subr.msk.mxu1 %vm2155_vm8, %v14525_v12  ;;  %6480 = vmatpush1.msk.msra.mxu0 %vm2294_vm2, %v14525_v12  ;;  %vm2282_vm8 = vcmp.eq.s32.totalorder %v14963_v60, %v11236_v21  ;;  %vm2142_vm2 = vcmp.eq.s32.totalorder %v14964_v51, %v11236_v21  ;;  %v14968_v51 = vld [vmem:[#allocation82_spill] sm:$0xff]  ;;  %v14969_v60 = vmax.f32 %v10228_v59, 0.0  ;;  %v14972_v59 = vunpack.i.h.bf16 %v11413_v53 }
 0x26e   : > { %6422 = vmatpush1.msk.msra.mxu1 %vm2154_vm14, %v14525_v12  ;;  %6481 = vmatprep.subr.msk.mxu0 %vm2291_vm11, %v14525_v12  ;;  %vm2279_vm14 = vcmp.eq.s32.totalorder %v14965_v52, %v11000_v14  ;;  %vm2139_vm11 = vcmp.eq.s32.totalorder %v14966_v28, %v11000_v14 }
 0x26f   : > { %6423 = vmatprep.subr.msk.mxu1 %vm2151_vm12, %v14525_v12  ;;  %6482 = vmatpush1.msk.msra.mxu0 %vm2290_vm5, %v14525_v12  ;;  %vm2278_vm12 = vcmp.eq.s32.totalorder %v14965_v52, %v11236_v21  ;;  %vm2138_vm5 = vcmp.eq.s32.totalorder %v14966_v28, %v11236_v21  ;;  %v1926_v19 = vsel %vm1923_vm13, %v14969_v60, 0.0  ;;  %v1713_v9 = vpop.permute.xlu0 %1712 }
 0x270   : > { %6424 = vmatpush1.msk.msra.mxu1 %vm2150_vm3, %v14525_v12  ;;  %6483 = vmatprep.subr.msk.mxu0 %vm2287_vm9, %v14525_v12  ;;  %vm14967_vm3 = vcmask 7168   ;;  %vm2275_vm9 = vcmp.eq.s32.totalorder %v14968_v51, %v11000_v14  ;;  %v11444_v46 = vpop.permute.xlu1 %7124 }
 0x271   : > { %6425 = vmatprep.subr.msk.mxu1 %vm2147_vm4, %v14525_v12  ;;  %6484 = vmatpush1.msk.msra.mxu0 %vm2286_vm15, %v14525_v12  ;;  %v1807_v43 = vsel %vm14967_vm3, %v7121_v36, %v11286_v57  ;;  %vm2135_vm4 = vcmp.eq.s32.totalorder %v7399_v16, %v11000_v14  ;;  %vm2274_vm15 = vcmp.eq.s32.totalorder %v14968_v51, %v11236_v21  ;;  %v7126_v13 = vunpack.i.l.bf16 %v11444_v46 }
 0x272   : > { %6426 = vmatpush1.msk.msra.mxu1 %vm2146_vm1, %v14525_v12  ;;  %6485 = vmatprep.subr.msk.mxu0 %vm2283_vm0, %v14525_v12  ;;  %v11448_v31 = vmax.f32 %v1807_v43, %v14971_v41  ;;  %vm14973_vm1 = vmmov %vm14967_vm3 }
 0x273   : > { %6427 = vmatprep.subr.msk.mxu1 %vm2143_vm7, %v14525_v12  ;;  %6486 = vmatpush1.msk.msra.mxu0 %vm2282_vm8, %v14525_v12  ;;  %v1814_v57 = vsel %vm14973_vm1, %v14972_v59, %v1711_v23  ;;  %vm14974_vm0 = vmmov %vm14973_vm1  ;;  %vm2134_vm7 = vcmp.eq.s32.totalorder %v7399_v16, %v11236_v21  ;;  %v14978_v59 = vld [vmem:[#allocation152_spill] sm:$0xff] }
 0x274   : > { %6428 = vmatpush1.msk.msra.mxu1 %vm2142_vm2, %v14525_v12  ;;  %6487 = vmatprep.subr.msk.mxu0 %vm2279_vm14, %v14525_v12  ;;  %v1815_v60 = vsel %vm14974_vm0, %v1711_v23, %v1713_v9  ;;  %v14975_v9 = vld [vmem:[#allocation84_spill] sm:$0xff]  ;;  %v14976_v23 = vld [vmem:[#allocation71_spill] sm:$0xff]  ;;  %vm14977_vm14 = vmmov %vm14974_vm0  ;;  %v14979_v28 = vunpack.i.h.bf16 %v14978_v59 }
 0x275   : > { %6429 = vmatprep.subr.msk.mxu1 %vm2139_vm11, %v14525_v12  ;;  %6488 = vmatpush1.msk.msra.mxu0 %vm2278_vm12, %v14525_v12  ;;  %v11471_v41 = vmax.f32 %v1815_v60, %v1926_v19  ;;  %vm2271_vm8 = vcmp.eq.s32.totalorder %v14975_v9, %v11000_v14  ;;  %vm2259_vm2 = vcmp.eq.s32.totalorder %v14976_v23, %v11000_v14  ;;  %vm14980_vm11 = vmmov %vm14974_vm0  ;;  %v14981_v60 = vmax.f32 %v10110_v63, 0.0  ;;  %v14984_v63 = vld [vmem:[#allocation73_spill] sm:$0xff]  ;;  %v14989_v59 = vld [vmem:[#allocation92_spill] sm:$0xff] }
 0x276   : > { %6430 = vmatpush1.msk.msra.mxu1 %vm2138_vm5, %v14525_v12  ;;  %6489 = vmatprep.subr.msk.mxu0 %vm2275_vm9, %v14525_v12  ;;  %v1806_v43 = vsel %vm14977_vm14, %v7126_v13, %v7121_v36  ;;  %v1805_v19 = vsel %vm14980_vm11, %v14979_v28, %v7126_v13  ;;  %vm2258_vm12 = vcmp.eq.s32.totalorder %v14976_v23, %v11236_v21  ;;  %v14982_v36 = vmax.f32 %v10194_v47, 0.0  ;;  %v14986_v47 = vld [vmem:[#allocation76_spill] sm:$0xff] }
 0x277   : > { %3588 = vmatmul.mubr.f32.gmra.mxu1 %v11448_v31  ;;  %6431 = vmatprep.subr.msk.mxu1 %vm2135_vm4, %v14525_v12  ;;  %v11494_v16 = vmax.f32 %v1806_v43, %v14981_v60  ;;  %v14983_v28 = vmax.f32 %v10189_v26, 0.0  ;;  %vm2270_vm5 = vcmp.eq.s32.totalorder %v14975_v9, %v11236_v21  ;;  %vm2255_vm3 = vcmp.eq.s32.totalorder %v14984_v63, %v11000_v14  ;;  %v14985_v26 = vld [vmem:[#allocation87_spill] sm:$0xff]  ;;  %v14988_v43 = vld [vmem:[#allocation81_spill] sm:$0xff] }
 0x278   : > { %6490 = vmatpush1.msk.msra.mxu0 %vm2274_vm15, %v14525_v12  ;;  %6395 = vmatprep.mubr.msk.f32.mxu1 %vm3140_vm6, %v11471_v41  ;;  %v11498_v51 = vmax.f32 %v1814_v57, %v14982_v36  ;;  %vm2267_vm9 = vcmp.eq.s32.totalorder %v14985_v26, %v11000_v14  ;;  %vm2254_vm4 = vcmp.eq.s32.totalorder %v14984_v63, %v11236_v21  ;;  %v14987_v57 = vld [vmem:[#allocation90_spill] sm:$0xff]  ;;  %v14990_v36 = vld [vmem:[#allocation83_spill] sm:$0xff]  ;;  %v14993_v63 = vunpack.i.h.bf16 %v11444_v46 }
 0x279   : > { %v11502_v13 = vmax.f32 %v1805_v19, %v14983_v28  ;;  %6432 = vmatpush1.msk.msra.mxu1 %vm2134_vm7, %v14525_v12  ;;  %6491 = vmatprep.subr.msk.mxu0 %vm2271_vm8, %v14525_v12  ;;  %vm2266_vm15 = vcmp.eq.s32.totalorder %v14985_v26, %v11236_v21  ;;  %vm2251_vm1 = vcmp.eq.s32.totalorder %v14986_v47, %v11000_v14  ;;  %v14992_v19 = vmax.f32 %v10441_v18, 0.0 }
 0x27a   : > { %6433 = vmatprep.subr.msk.mxu1 %vm2259_vm2, %v14525_v12  ;;  %3474 = vmatprep.mubr.f32.mxu0 %v11494_v16  ;;  %vm2263_vm0 = vcmp.eq.s32.totalorder %v14987_v57, %v11000_v14  ;;  %vm2250_vm7 = vcmp.eq.s32.totalorder %v14986_v47, %v11236_v21  ;;  %vm2262_vm8 = vcmp.eq.s32.totalorder %v14987_v57, %v11236_v21  ;;  %v14991_v47 = vld [vmem:[#allocation95_spill] sm:$0xff]  ;;  %v14996_v18 = vmax.f32 %v10459_v48, 0.0 }
 0x27b   : > { %3594 = vmatmul.mubr.f32.gmra.mxu1 %v11498_v51  ;;  %3475 = vmatmul.mubr.f32.gmra.mxu0 %v11502_v13  ;;  %vm2247_vm2 = vcmp.eq.s32.totalorder %v14988_v43, %v11000_v14  ;;  %vm2387_vm14 = vcmp.eq.s32.totalorder %v14989_v59, %v11000_v14  ;;  %vm2246_vm11 = vcmp.eq.s32.totalorder %v14988_v43, %v11236_v21  ;;  %v1927_v57 = vsel %vm1923_vm13, %v14992_v19, 0.0 }
 0x27c   : > { %6434 = vmatpush2.msk.msra.mxu1 %vm2258_vm12, %v14525_v12  ;;  %6492 = vmatpush1.msk.msra.mxu0 %vm2270_vm5, %v14525_v12  ;;  %vm2386_vm12 = vcmp.eq.s32.totalorder %v14989_v59, %v11236_v21  ;;  %vm2243_vm5 = vcmp.eq.s32.totalorder %v14990_v36, %v11000_v14  ;;  %v14997_v59 = vld [vmem:[#allocation97_spill] sm:$0xff]  ;;  %v15008_v9 = vmax.f32 %v10456_v4, 0.0  ;;  %v15010_v4 = vld [vmem:[#allocation106_spill] sm:$0xff] }
 0x27d   : > { %6435 = vmatprep.subr.msk.mxu1 %vm2255_vm3, %v14525_v12  ;;  %6493 = vmatprep.subr.msk.mxu0 %vm2267_vm9, %v14525_v12  ;;  %v1729_v60 = vpop.permute.xlu1 %1728  ;;  %vm2383_vm3 = vcmp.eq.s32.totalorder %v14991_v47, %v11000_v14  ;;  %vm2242_vm9 = vcmp.eq.s32.totalorder %v14990_v36, %v11236_v21  ;;  %v15006_v36 = vld [vmem:[#allocation164_spill] sm:$0xff] }
 0x27e   : > { %6436 = vmatpush2.msk.msra.mxu1 %vm2254_vm4, %v14525_v12  ;;  %6494 = vmatpush1.msk.msra.mxu0 %vm2266_vm15, %v14525_v12  ;;  %v1727_v28 = vpop.permute.xlu0 %1726  ;;  %vm14994_vm4 = vcmask 7168  }
 0x27f   : > { %6437 = vmatprep.subr.msk.mxu1 %vm2251_vm1, %v14525_v12  ;;  %6495 = vmatprep.subr.msk.mxu0 %vm2263_vm0, %v14525_v12  ;;  %v1821_v26 = vsel %vm14994_vm4, %v14993_v63, %v1727_v28  ;;  %vm14995_vm15 = vmmov %vm14994_vm4  ;;  %vm2382_vm1 = vcmp.eq.s32.totalorder %v14991_v47, %v11236_v21  ;;  %vm2379_vm0 = vcmp.eq.s32.totalorder %v14997_v59, %v11000_v14  ;;  %v15004_v47 = vunpack.i.l.bf16 %v10196_v2  ;;  %v15009_v2 = vld [vmem:[#allocation94_spill] sm:$0xff] }
 0x280   : > { %6438 = vmatpush2.msk.msra.mxu1 %vm2250_vm7, %v14525_v12  ;;  %6496 = vmatpush1.msk.msra.mxu0 %vm2262_vm8, %v14525_v12  ;;  %v1822_v23 = vsel %vm14995_vm15, %v1727_v28, %v1729_v60  ;;  %v11573_v19 = vmax.f32 %v1821_v26, %v14996_v18  ;;  %v14998_v60 = vld [vmem:[#allocation85_spill] sm:$0xff]  ;;  %vm2378_vm8 = vcmp.eq.s32.totalorder %v14997_v59, %v11236_v21  ;;  %v15001_v28 = vld [vmem:[#allocation102_spill] sm:$0xff]  ;;  %v15002_v18 = vunpack.i.h.bf16 %v11413_v53 }
 0x281   : > { %6439 = vmatprep.subr.msk.mxu1 %vm2247_vm2, %v14525_v12  ;;  %6497 = vmatprep.subr.msk.mxu0 %vm2387_vm14, %v14525_v12  ;;  %v11575_v63 = vmax.f32 %v1822_v23, %v1927_v57  ;;  %vm2239_vm7 = vcmp.eq.s32.totalorder %v14998_v60, %v11000_v14  ;;  %vm2238_vm2 = vcmp.eq.s32.totalorder %v14998_v60, %v11236_v21  ;;  %v14999_v23 = vld [vmem:[#allocation99_spill] sm:$0xff]  ;;  %v15000_v57 = vld [vmem:[#allocation88_spill] sm:$0xff] }
 0x282   : > { %6440 = vmatpush2.msk.msra.mxu1 %vm2246_vm11, %v14525_v12  ;;  %6498 = vmatpush2.msk.msra.mxu0 %vm2386_vm12, %v14525_v12  ;;  %vm2375_vm14 = vcmp.eq.s32.totalorder %v14999_v23, %v11000_v14  ;;  %vm2235_vm11 = vcmp.eq.s32.totalorder %v15000_v57, %v11000_v14  ;;  %vm2374_vm12 = vcmp.eq.s32.totalorder %v14999_v23, %v11236_v21  ;;  %v15005_v23 = vld [vmem:[#allocation91_spill] sm:$0xff] }
 0x283   : > { %6441 = vmatprep.subr.msk.mxu1 %vm2243_vm5, %v14525_v12  ;;  %6499 = vmatprep.subr.msk.mxu0 %vm2383_vm3, %v14525_v12  ;;  %v11587_v48 = vpop.permute.xlu0 %7129  ;;  %vm2234_vm5 = vcmp.eq.s32.totalorder %v15000_v57, %v11236_v21  ;;  %vm2371_vm3 = vcmp.eq.s32.totalorder %v15001_v28, %v11000_v14  ;;  %vm2231_vm15 = vcmp.eq.s32.totalorder %v15005_v23, %v11000_v14  ;;  %v15007_v57 = vmax.f32 %v15006_v36, 0.0  ;;  %v15013_v36 = vld [vmem:[#allocation98_spill] sm:$0xff] }
 0x284   : > { %6442 = vmatpush2.msk.msra.mxu1 %vm2242_vm9, %v14525_v12  ;;  %6396 = vmatprep.mubr.msk.f32.mxu1 %vm3140_vm6, %v11575_v63  ;;  %v7131_v26 = vunpack.i.l.bf16 %v11587_v48  ;;  %vm15003_vm9 = vmmov %vm14994_vm4 }
 0x285   : > { %6500 = vmatpush2.msk.msra.mxu0 %vm2382_vm1, %v14525_v12  ;;  %3600 = vmatmul.mubr.f32.gmra.mxu1 %v11573_v19  ;;  %vm2230_vm1 = vcmp.eq.s32.totalorder %v15005_v23, %v11236_v21 }
 0x286   : > { %6501 = vmatprep.subr.msk.mxu0 %vm2379_vm0, %v14525_v12  ;;  %6443 = vmatprep.subr.msk.mxu1 %vm2239_vm7, %v14525_v12  ;;  %v1813_v59 = vsel %vm15003_vm9, %v7131_v26, %v15002_v18  ;;  %v1812_v60 = vsel %vm14994_vm4, %v15004_v47, %v7131_v26  ;;  %vm2370_vm0 = vcmp.eq.s32.totalorder %v15001_v28, %v11236_v21  ;;  %v15012_v47 = vld [vmem:[#allocation108_spill] sm:$0xff]  ;;  %v15018_v28 = vunpack.i.h.bf16 %v11587_v48 }
 0x287   : > { %6502 = vmatpush2.msk.msra.mxu0 %vm2378_vm8, %v14525_v12  ;;  %6444 = vmatpush2.msk.msra.mxu1 %vm2238_vm2, %v14525_v12  ;;  %v11621_v43 = vmax.f32 %v1813_v59, %v15007_v57  ;;  %v11625_v53 = vmax.f32 %v1812_v60, %v15008_v9  ;;  %vm2227_vm7 = vcmp.eq.s32.totalorder %v15009_v2, %v11000_v14  ;;  %v15011_v9 = vld [vmem:[#allocation96_spill] sm:$0xff]  ;;  %v15014_v59 = vld [vmem:[#allocation111_spill] sm:$0xff]  ;;  %v15015_v57 = vld [vmem:[#allocation101_spill] sm:$0xff]  ;;  %v15017_v60 = vmax.f32 %v10699_v38, 0.0 }
 0x288   : > { %6503 = vmatprep.subr.msk.mxu0 %vm2375_vm14, %v14525_v12  ;;  %6445 = vmatprep.subr.msk.mxu1 %vm2235_vm11, %v14525_v12  ;;  %vm2367_vm8 = vcmp.eq.s32.totalorder %v15010_v4, %v11000_v14  ;;  %vm2226_vm2 = vcmp.eq.s32.totalorder %v15009_v2, %v11236_v21  ;;  %vm2366_vm14 = vcmp.eq.s32.totalorder %v15010_v4, %v11236_v21  ;;  %v15021_v38 = vmax.f32 %v10718_v62, 0.0 }
 0x289   : > { %6504 = vmatpush2.msk.msra.mxu0 %vm2374_vm12, %v14525_v12  ;;  %6446 = vmatpush2.msk.msra.mxu1 %vm2234_vm5, %v14525_v12  ;;  %vm2223_vm11 = vcmp.eq.s32.totalorder %v15011_v9, %v11000_v14  ;;  %vm2363_vm12 = vcmp.eq.s32.totalorder %v15012_v47, %v11000_v14  ;;  %vm2222_vm5 = vcmp.eq.s32.totalorder %v15011_v9, %v11236_v21  ;;  %v1928_v4 = vsel %vm1923_vm13, %v15017_v60, 0.0 }
 0x28a   : > { %6505 = vmatprep.subr.msk.mxu0 %vm2371_vm3, %v14525_v12  ;;  %3480 = vmatprep.mubr.f32.mxu0 %v11621_v43  ;;  %vm2362_vm3 = vcmp.eq.s32.totalorder %v15012_v47, %v11236_v21  ;;  %vm2219_vm9 = vcmp.eq.s32.totalorder %v15013_v36, %v11000_v14  ;;  %vm2359_vm4 = vcmp.eq.s32.totalorder %v15014_v59, %v11000_v14  ;;  %v15016_v47 = vld [vmem:[#allocation112_spill] sm:$0xff] }
 0x28b   : > { %6447 = vmatprep.subr.msk.mxu1 %vm2231_vm15, %v14525_v12  ;;  %3481 = vmatmul.mubr.f32.gmra.mxu0 %v11625_v53  ;;  %vm2218_vm15 = vcmp.eq.s32.totalorder %v15013_v36, %v11236_v21  ;;  %v15032_v36 = vmax.f32 %v10715_v42, 0.0  ;;  %v15035_v42 = vld [vmem:[#allocation117_spill] sm:$0xff] }
 0x28c   : > { %6448 = vmatpush2.msk.msra.mxu1 %vm2230_vm1, %v14525_v12  ;;  %6506 = vmatpush2.msk.msra.mxu0 %vm2370_vm0, %v14525_v12  ;;  %vm2358_vm1 = vcmp.eq.s32.totalorder %v15014_v59, %v11236_v21  ;;  %vm2215_vm0 = vcmp.eq.s32.totalorder %v15015_v57, %v11000_v14  ;;  %v15029_v59 = vunpack.i.l.bf16 %v10461_v7  ;;  %v15034_v7 = vld [vmem:[#allocation14_spill] sm:$0xff] }
 0x28d   : > { %6449 = vmatprep.subr.msk.mxu1 %vm2227_vm7, %v14525_v12  ;;  %6507 = vmatprep.subr.msk.mxu0 %vm2367_vm8, %v14525_v12  ;;  %vm2355_vm7 = vcmp.eq.s32.totalorder %v15016_v47, %v11000_v14  ;;  %vm2214_vm8 = vcmp.eq.s32.totalorder %v15015_v57, %v11236_v21 }
 0x28e   : > { %6450 = vmatpush2.msk.msra.mxu1 %vm2226_vm2, %v14525_v12  ;;  %6508 = vmatpush2.msk.msra.mxu0 %vm2366_vm14, %v14525_v12  ;;  %vm15019_vm2 = vcmask 7168  }
 0x28f   : > { %6451 = vmatprep.subr.msk.mxu1 %vm2223_vm11, %v14525_v12  ;;  %6509 = vmatprep.subr.msk.mxu0 %vm2363_vm12, %v14525_v12  ;;  %vm15020_vm14 = vmmov %vm15019_vm2  ;;  %vm2354_vm11 = vcmp.eq.s32.totalorder %v15016_v47, %v11236_v21 }
 0x290   : > { %v1745_v26 = vpop.permute.xlu0 %1744  ;;  %6452 = vmatpush2.msk.msra.mxu1 %vm2222_vm5, %v14525_v12  ;;  %6510 = vmatpush2.msk.msra.mxu0 %vm2362_vm3, %v14525_v12 }
 0x291   : > { %6453 = vmatprep.subr.msk.mxu1 %vm2219_vm9, %v14525_v12  ;;  %6511 = vmatprep.subr.msk.mxu0 %vm2359_vm4, %v14525_v12 }
 0x292   : > { %v1743_v18 = vpop.permute.xlu1 %1742  ;;  %6454 = vmatpush2.msk.msra.mxu1 %vm2218_vm15, %v14525_v12  ;;  %6512 = vmatpush2.msk.msra.mxu0 %vm2358_vm1, %v14525_v12 }
 0x293   : > { %v1828_v9 = vsel %vm15019_vm2, %v15018_v28, %v1743_v18  ;;  %v1829_v2 = vsel %vm15020_vm14, %v1743_v18, %v1745_v26  ;;  %6455 = vmatprep.subr.msk.mxu1 %vm2215_vm0, %v14525_v12  ;;  %v15022_v26 = vld [vmem:[#allocation30_spill] sm:$0xff]  ;;  %6513 = vmatprep.subr.msk.mxu0 %vm2355_vm7, %v14525_v12  ;;  %v15023_v18 = vld [vmem:[#allocation105_spill] sm:$0xff] }
 0x294   : > { %v11699_v60 = vmax.f32 %v1828_v9, %v15021_v38  ;;  %v11701_v28 = vmax.f32 %v1829_v2, %v1928_v4  ;;  %vm2351_vm12 = vcmp.eq.s32.totalorder %v15022_v26, %v11000_v14  ;;  %6456 = vmatpush2.msk.msra.mxu1 %vm2214_vm8, %v14525_v12  ;;  %vm2211_vm5 = vcmp.eq.s32.totalorder %v15023_v18, %v11000_v14  ;;  %v15024_v2 = vld [vmem:[#allocation113_spill] sm:$0xff]  ;;  %v15025_v9 = vld [vmem:[#allocation12_spill] sm:$0xff]  ;;  %v15026_v38 = vld [vmem:[#allocation11_spill] sm:$0xff] }
 0x295   : > { %vm2350_vm3 = vcmp.eq.s32.totalorder %v15022_v26, %v11236_v21  ;;  %6514 = vmatpush2.msk.msra.mxu0 %vm2354_vm11, %v14525_v12  ;;  %vm2210_vm9 = vcmp.eq.s32.totalorder %v15023_v18, %v11236_v21  ;;  %vm2347_vm4 = vcmp.eq.s32.totalorder %v15024_v2, %v11000_v14  ;;  %vm2207_vm15 = vcmp.eq.s32.totalorder %v15025_v9, %v11000_v14  ;;  %vm15028_vm8 = vmmov %vm15019_vm2 }
 0x296   : > { %6397 = vmatprep.mubr.msk.f32.mxu1 %vm3140_vm6, %v11701_v28  ;;  %6515 = vmatprep.subr.msk.mxu0 %vm2351_vm12, %v14525_v12  ;;  %vm2346_vm1 = vcmp.eq.s32.totalorder %v15024_v2, %v11236_v21  ;;  %vm2206_vm0 = vcmp.eq.s32.totalorder %v15025_v9, %v11236_v21  ;;  %vm2343_vm7 = vcmp.eq.s32.totalorder %v15026_v38, %v11000_v14  ;;  %v15027_v26 = vunpack.i.h.bf16 %v11444_v46  ;;  %v15030_v2 = vld [vmem:[#allocation110_spill] sm:$0xff] }
 0x297   : > { %v11713_v62 = vpop.permute.xlu1 %7134  ;;  %3606 = vmatmul.mubr.f32.gmra.mxu1 %v11699_v60  ;;  %6457 = vmatprep.subr.msk.mxu1 %vm2211_vm5, %v14525_v12  ;;  %vm2203_vm14 = vcmp.eq.s32.totalorder %v15030_v2, %v11000_v14  ;;  %v15031_v9 = vmax.f32 %v10157_v20, 0.0  ;;  %vm2202_vm11 = vcmp.eq.s32.totalorder %v15030_v2, %v11236_v21  ;;  %vm2342_vm12 = vcmp.eq.s32.totalorder %v15026_v38, %v11236_v21  ;;  %v15033_v20 = vld [vmem:[#allocation16_spill] sm:$0xff] }
 0x298   : > { %v7136_v4 = vunpack.i.l.bf16 %v11713_v62  ;;  %6516 = vmatpush2.msk.msra.mxu0 %vm2350_vm3, %v14525_v12  ;;  %6458 = vmatpush2.msk.msra.mxu1 %vm2210_vm9, %v14525_v12  ;;  %vm2199_vm5 = vcmp.eq.s32.totalorder %v15033_v20, %v11000_v14  ;;  %vm2339_vm3 = vcmp.eq.s32.totalorder %v15034_v7, %v11000_v14  ;;  %vm2198_vm9 = vcmp.eq.s32.totalorder %v15033_v20, %v11236_v21 }
 0x299   : > { %6517 = vmatprep.subr.msk.mxu0 %vm2347_vm4, %v14525_v12  ;;  %6459 = vmatprep.subr.msk.mxu1 %vm2207_vm15, %v14525_v12  ;;  %vm2338_vm4 = vcmp.eq.s32.totalorder %v15034_v7, %v11236_v21  ;;  %vm2451_vm15 = vcmp.eq.s32.totalorder %v15035_v42, %v11000_v14 }
 0x29a   : > { %v1820_v47 = vsel %vm15028_vm8, %v7136_v4, %v15027_v26  ;;  %v1819_v18 = vsel %vm15019_vm2, %v15029_v59, %v7136_v4  ;;  %6518 = vmatpush2.msk.msra.mxu0 %vm2346_vm1, %v14525_v12  ;;  %6460 = vmatpush2.msk.msra.mxu1 %vm2206_vm0, %v14525_v12  ;;  %v7137_v59 = vunpack.i.h.bf16 %v11713_v62  ;;  %v15038_v4 = vld [vmem:[#allocation21_spill] sm:$0xff] }
 0x29b   : > { %v11747_v57 = vmax.f32 %v1820_v47, %v15031_v9  ;;  %v11751_v46 = vmax.f32 %v1819_v18, %v15032_v36  ;;  %6519 = vmatprep.subr.msk.mxu0 %vm2343_vm7, %v14525_v12  ;;  %6461 = vmatprep.subr.msk.mxu1 %vm2203_vm14, %v14525_v12  ;;  %v15036_v47 = vld [vmem:[#allocation72_spill] sm:$0xff]  ;;  %v15037_v36 = vld [vmem:[#allocation46_spill] sm:$0xff]  ;;  %vm2327_vm2 = vcmp.eq.s32.totalorder %v15038_v4, %v11000_v14  ;;  %v15039_v9 = vmax.f32 %v10942_v35, 0.0  ;;  %v15043_v35 = vld [vmem:[#allocation17_spill] sm:$0xff] }
 0x29c   : > { %6462 = vmatpush2.msk.msra.mxu1 %vm2202_vm11, %v14525_v12  ;;  %6520 = vmatpush2.msk.msra.mxu0 %vm2342_vm12, %v14525_v12  ;;  %vm2335_vm1 = vcmp.eq.s32.totalorder %v15036_v47, %v11000_v14  ;;  %vm2334_vm0 = vcmp.eq.s32.totalorder %v15036_v47, %v11236_v21  ;;  %vm2331_vm7 = vcmp.eq.s32.totalorder %v15037_v36, %v11000_v14  ;;  %vm15040_vm14 = vcmask 7168  }
 0x29d   : > { %3486 = vmatprep.mubr.f32.mxu0 %v11747_v57  ;;  %6463 = vmatprep.subr.msk.mxu1 %vm2199_vm5, %v14525_v12  ;;  %vm2330_vm8 = vcmp.eq.s32.totalorder %v15037_v36, %v11236_v21  ;;  %v1929_v47 = vsel %vm1923_vm13, %v15039_v9, 0.0  ;;  %vm15041_vm11 = vmmov %vm15040_vm14  ;;  %vm2326_vm12 = vcmp.eq.s32.totalorder %v15038_v4, %v11236_v21  ;;  %v15042_v36 = vmax.f32 %v10957_v22, 0.0 }
 0x29e   : > { %3487 = vmatmul.mubr.f32.gmra.mxu0 %v11751_v46  ;;  %6521 = vmatprep.subr.msk.mxu0 %vm2339_vm3, %v14525_v12  ;;  %vm2579_vm5 = vcmp.eq.s32.totalorder %v15043_v35, %v11000_v14  ;;  %v15044_v22 = vunpack.i.h.bf16 %v11587_v48  ;;  %vm15045_vm3 = vmmov %vm15041_vm11  ;;  %v15049_v4 = vmax.f32 %v10954_v3, 0.0 }
 0x29f   : > { %6464 = vmatpush2.msk.msra.mxu1 %vm2198_vm9, %v14525_v12  ;;  %6522 = vmatpush2.msk.msra.mxu0 %vm2338_vm4, %v14525_v12  ;;  %vm15047_vm9 = vmmov %vm15045_vm3 }
 0x2a0   : > { %6529 = vmatprep.subr.msk.mxu1 %vm2451_vm15, %v14525_v12  ;;  %6523 = vmatprep.subr.msk.mxu0 %vm2335_vm1, %v14525_v12  ;;  %vm15051_vm4 = vmmov %vm15045_vm3 }
 0x2a1   : > { %v1761_v26 = vpop.permute.xlu1 %1760  ;;  %6524 = vmatpush2.msk.msra.mxu0 %vm2334_vm0, %v14525_v12  ;;  %vm15052_vm15 = vmmov %vm15045_vm3 }
 0x2a2   : > { %6525 = vmatprep.subr.msk.mxu0 %vm2331_vm7, %v14525_v12  ;;  %vm15055_vm1 = vmmov %vm15045_vm3 }
 0x2a3   : > { %v1759_v18 = vpop.permute.xlu0 %1758  ;;  %6526 = vmatpush2.msk.msra.mxu0 %vm2330_vm8, %v14525_v12  ;;  %vm15056_vm0 = vmmov %vm15055_vm1 }
 0x2a4   : > { %v1835_v7 = vsel %vm15040_vm14, %v7137_v59, %v1759_v18  ;;  %v1836_v62 = vsel %vm15041_vm11, %v1759_v18, %v1761_v26  ;;  %6527 = vmatprep.subr.msk.mxu0 %vm2327_vm2, %v14525_v12  ;;  %v15048_v18 = vmax.f32 %v10426_v29, 0.0  ;;  %vm15060_vm7 = vmmov %vm15056_vm0 }
 0x2a5   : > { %v11804_v38 = vmax.f32 %v1835_v7, %v15042_v36  ;;  %v11806_v20 = vmax.f32 %v1836_v62, %v1929_v47  ;;  %6528 = vmatpush2.msk.msra.mxu0 %vm2326_vm12, %v14525_v12  ;;  %v15046_v47 = vunpack.i.l.bf16 %v10720_v10  ;;  %vm15061_vm8 = vmmov %vm15056_vm0  ;;  %vm2450_vm12 = vcmp.eq.s32.totalorder %v15035_v42, %v11236_v21  ;;  %v15076_v42 = vld [vmem:[#allocation132_spill] sm:$0xff] }
 0x2a6   : > { %6593 = vmatprep.subr.msk.mxu0 %vm2579_vm5, %v14525_v12  ;;  %vm15062_vm2 = vmmov %vm15056_vm0 }
 0x2a7   : > { %6398 = vmatprep.mubr.msk.f32.mxu1 %vm3140_vm6, %v11806_v20  ;;  %vm15064_vm14 = vmmov %vm15056_vm0 }
 0x2a8   : > { %3612 = vmatmul.mubr.f32.gmra.mxu1 %v11804_v38  ;;  %vm15070_vm11 = vmmov %vm15056_vm0 }
 0x2a9   : > { %v7140_v9 = vpop.permute.xlu0 %7139 }
 0x2aa   : > { %v7141_v26 = vunpack.i.l.bf16 %v7140_v9  ;;  %v7142_v23 = vunpack.i.h.bf16 %v7140_v9  ;;  %v15054_v9 = vunpack.i.l.bf16 %v10959_v61 }
 0x2ac   : > { %v1827_v7 = vsel %vm15045_vm3, %v7141_v26, %v15044_v22  ;;  %v1826_v36 = vsel %vm15047_vm9, %v15046_v47, %v7141_v26  ;;  %v15050_v22 = vmax.f32 %v11084_v45, 0.0  ;;  %vm2443_vm9 = vcmp.eq.s32.totalorder %v15076_v42, %v11000_v14 }
 0x2ad   : > { %v11825_v62 = vmax.f32 %v1827_v7, %v15048_v18  ;;  %v11829_v2 = vmax.f32 %v1826_v36, %v15049_v4  ;;  %v15053_v7 = vmax.f32 %v11088_v37, 0.0  ;;  %v15058_v37 = vmax.f32 %v10689_v32, 0.0 }
 0x2ae   : > { %v1930_v10 = vsel %vm1923_vm13, %v15050_v22, 0.0 }
 0x2af   : > { %3492 = vmatprep.mubr.f32.mxu0 %v11825_v62 }
 0x2b0   : > { %3493 = vmatmul.mubr.f32.gmra.mxu0 %v11829_v2 }
 0x2b2   : > { %v1777_v48 = vpop.permute.xlu0 %1776  ;;  %v1775_v52 = vpop.permute.xlu1 %1774 }
 0x2b3   : > { %v1842_v26 = vsel %vm15051_vm4, %v7142_v23, %v1775_v52  ;;  %v1843_v29 = vsel %vm15052_vm15, %v1775_v52, %v1777_v48  ;;  %v15057_v52 = vmax.f32 %v11096_v56, 0.0  ;;  %vm2442_vm4 = vcmp.eq.s32.totalorder %v15076_v42, %v11236_v21 }
 0x2b4   : > { %v11840_v3 = vmax.f32 %v1842_v26, %v15053_v7  ;;  %v11842_v4 = vmax.f32 %v1843_v29, %v1930_v10  ;;  %v15059_v10 = vmax.f32 %v11172_v6, 0.0 }
 0x2b6   : > { %v1755_v47 = vpop.permute.xlu1 %1754  ;;  %6399 = vmatprep.mubr.msk.f32.mxu1 %vm3140_vm6, %v11842_v4 }
 0x2b7   : > { %v1833_v45 = vsel %vm15055_vm1, %v15054_v9, %v1755_v47  ;;  %v1834_v36 = vsel %vm15056_vm0, %v1755_v47, %v7137_v59  ;;  %3618 = vmatmul.mubr.f32.gmra.mxu1 %v11840_v3  ;;  %v1931_v59 = vsel %vm1923_vm13, %v15059_v10, 0.0  ;;  %vm15065_vm13 = vmmov %vm15056_vm0  ;;  %v15067_v10 = vmax.f32 %v11182_v17, 0.0  ;;  %v15072_v17 = vld [vmem:[#allocation31_spill] sm:$0xff] }
 0x2b8   : > { %v11853_v18 = vmax.f32 %v1833_v45, %v15057_v52  ;;  %v11857_v48 = vmax.f32 %v1834_v36, %v15058_v37  ;;  %v15063_v36 = vunpack.i.l.bf16 %v11090_v25  ;;  %v15066_v37 = vmax.f32 %v10930_v1, 0.0 }
 0x2b9   : > { %v15069_v25 = vunpack.i.l.bf16 %v11184_v40  ;;  %v15071_v1 = vmax.f32 %v11164_v34, 0.0  ;;  %v15074_v34 = vld [vmem:[#allocation131_spill] sm:$0xff]  ;;  %vm2578_vm1 = vcmp.eq.s32.totalorder %v15043_v35, %v11236_v21 }
 0x2ba   : > { %3498 = vmatprep.mubr.f32.mxu0 %v11857_v48  ;;  %vm2447_vm5 = vcmp.eq.s32.totalorder %v15074_v34, %v11000_v14  ;;  %vm2446_vm3 = vcmp.eq.s32.totalorder %v15074_v34, %v11236_v21  ;;  %v15087_v34 = vld [vmem:[#allocation115_spill] sm:$0xff] }
 0x2bb   : > { %3499 = vmatmul.mubr.f32.gmra.mxu0 %v11853_v18 }
 0x2bf   : > { %v1793_v22 = vpop.permute.xlu1 %1792 }
 0x2c0   : > { %v1791_v61 = vpop.permute.xlu0 %1790 }
 0x2c1   : > { %v1850_v26 = vsel %vm15060_vm7, %v1791_v61, %v1793_v22 }
 0x2c2   : > { %v11865_v29 = vmax.f32 %v1850_v26, %v1931_v59  ;;  %v15068_v26 = vmax.f32 %v11176_v24, 0.0  ;;  %v11903_v24 = vpop.f32.mrf.mxu0 }
 0x2c3   : > { %v1787_v47 = vpop.permute.xlu1 %1786 }
 0x2c4   : > { %v7145_v56 = vpop.permute.xlu0 %7144  ;;  %6400 = vmatprep.mubr.msk.f32.mxu1 %vm3140_vm6, %v11865_v29 }
 0x2c5   : > { %v7147_v32 = vunpack.i.h.bf16 %v7145_v56  ;;  %v7146_v7 = vunpack.i.l.bf16 %v7145_v56 }
 0x2c7   : > { %v1841_v9 = vsel %vm15061_vm8, %v7147_v32, %v7142_v23  ;;  %v1849_v45 = vsel %vm15062_vm2, %v7146_v7, %v1791_v61  ;;  %v1840_v6 = vsel %vm15064_vm14, %v15063_v36, %v7147_v32  ;;  %v1848_v52 = vsel %vm15065_vm13, %v1787_v47, %v7146_v7  ;;  %v11887_v23 = vpop.f32.mrf.mxu1  ;;  %v15077_v36 = vld [vmem:[#allocation103_spill] sm:$0xff] }
 0x2c8   : > { %v11877_v22 = vmax.f32 %v1841_v9, %v15066_v37  ;;  %v11881_v59 = vmax.f32 %v1849_v45, %v15067_v10  ;;  %v11885_v56 = vmax.f32 %v1840_v6, %v15068_v26  ;;  %v1847_v61 = vsel %vm15070_vm11, %v15069_v25, %v1787_v47  ;;  %v15075_v9 = vld [vmem:[#allocation75_spill] sm:$0xff]  ;;  %v15078_v6 = vld [vmem:[#allocation78_spill] sm:$0xff]  ;;  %v15080_v37 = vld [vmem:[#allocation141_spill] sm:$0xff] }
 0x2c9   : > { %v11896_v32 = vmax.f32 %v1848_v52, %v15071_v1  ;;  %v11905_v40 = vpop.f32.mrf.mxu1  ;;  %v15073_v7 = vmax.f32 %v11179_v54, 0.0  ;;  %v11924_v54 = vpop.f32.mrf.mxu0  ;;  %vm2439_vm15 = vcmp.eq.s32.totalorder %v15078_v6, %v11000_v14  ;;  %v15079_v52 = vld [vmem:[#allocation62_spill] sm:$0xff]  ;;  %vm2438_vm0 = vcmp.eq.s32.totalorder %v15078_v6, %v11236_v21  ;;  %v15081_v10 = vld [vmem:[#allocation104_spill] sm:$0xff]  ;;  %v15083_v26 = vld [vmem:[#allocation41_spill] sm:$0xff] }
 0x2ca   : > { %3504 = vmatprep.mubr.f32.mxu0 %v11877_v22  ;;  %3624 = vmatmul.mubr.f32.gmra.mxu1 %v11881_v59  ;;  %vm2575_vm7 = vcmp.eq.s32.totalorder %v15080_v37, %v11000_v14  ;;  %vm2574_vm2 = vcmp.eq.s32.totalorder %v15080_v37, %v11236_v21  ;;  %v15084_v25 = vld [vmem:[#allocation143_spill] sm:$0xff] }
 0x2cb   : > { %3505 = vmatmul.mubr.f32.gmra.mxu0 %v11885_v56  ;;  %3694 = vmatprep.mubr.f32.mxu1 %v15072_v17  ;;  %v11909_v47 = vmax.f32 %v1847_v61, %v15073_v7  ;;  %v11926_v45 = vpop.f32.mrf.mxu1  ;;  %vm2571_vm14 = vcmp.eq.s32.totalorder %v15084_v25, %v11000_v14  ;;  %v15085_v17 = vld [vmem:[#allocation135_spill] sm:$0xff]  ;;  %v15086_v7 = vld [vmem:[#allocation24_spill] sm:$0xff] }
 0x2cc   : > { %3510 = vmatprep.mubr.f32.mxu0 %v11896_v32  ;;  %vm2431_vm11 = vcmp.eq.s32.totalorder %v15085_v17, %v11000_v14 }
 0x2cd   : > { %v11950_v35 = vpop.f32.mrf.mxu1 }
 0x2ce   : > { %3695 = vmatmul.mubr.f32.vlgmr.msra.gmra.mxu1 %v15075_v9  ;;  %v15088_v9 = vld [vmem:[#allocation145_spill] sm:$0xff] }
 0x2cf   : > { %6530 = vmatpush1.msk.msra.mxu1 %vm2450_vm12, %v14525_v12  ;;  %3511 = vmatmul.mubr.f32.gmra.mxu0 %v11909_v47  ;;  %v3369_v61 = vpop.f32.mrf.mxu1  ;;  %vm2570_vm12 = vcmp.eq.s32.totalorder %v15084_v25, %v11236_v21 }
 0x2d0   : > { %3700 = vmatprep.mubr.f32.mxu1 %v10397_v50  ;;  %6531 = vmatprep.subr.msk.mxu1 %vm2447_vm5, %v14525_v12  ;;  %v11936_v50 = vpop.f32.mrf.mxu0  ;;  %vm2430_vm5 = vcmp.eq.s32.totalorder %v15085_v17, %v11236_v21  ;;  %v15094_v17 = vld [vmem:[#allocation26_spill] sm:$0xff] }
 0x2d1   : > { %3807 = vmatprep.mubr.f32.mxu0 %v15077_v36  ;;  %6532 = vmatpush1.msk.msra.mxu1 %vm2446_vm3, %v14525_v12  ;;  %vm2567_vm3 = vcmp.eq.s32.totalorder %v15088_v9, %v11000_v14  ;;  %v15089_v36 = vld [vmem:[#allocation107_spill] sm:$0xff]  ;;  %v3371_v37 = vpop.f32.mrf.mxu1 }
 0x2d2   : > { %6533 = vmatprep.subr.msk.mxu1 %vm2443_vm9, %v14525_v12  ;;  %3701 = vmatmul.mubr.f32.gmra.mxu1 %v10401_v30  ;;  %v15082_v30 = vld [vmem:[#allocation37_spill] sm:$0xff]  ;;  %v11960_v1 = vpop.f32.mrf.mxu0 }
 0x2d3   : > { %6534 = vmatpush1.msk.msra.mxu1 %vm2442_vm4, %v14525_v12  ;;  %3706 = vmatprep.mubr.f32.mxu1 %v15079_v52  ;;  %vm2435_vm8 = vcmp.eq.s32.totalorder %v15082_v30, %v11000_v14  ;;  %vm2434_vm13 = vcmp.eq.s32.totalorder %v15082_v30, %v11236_v21  ;;  %v15090_v52 = vld [vmem:[#allocation138_spill] sm:$0xff]  ;;  %vm2566_vm4 = vcmp.eq.s32.totalorder %v15088_v9, %v11236_v21  ;;  %v15092_v30 = vld [vmem:[#allocation149_spill] sm:$0xff] }
 0x2d4   : > { %3808 = vmatmul.mubr.f32.vlgmr.msra.gmra.mxu0 %v15081_v10  ;;  %6535 = vmatprep.subr.msk.mxu1 %vm2439_vm15, %v14525_v12  ;;  %vm2427_vm9 = vcmp.eq.s32.totalorder %v15090_v52, %v11000_v14  ;;  %v15091_v10 = vld [vmem:[#allocation61_spill] sm:$0xff]  ;;  %vm2563_vm15 = vcmp.eq.s32.totalorder %v15092_v30, %v11000_v14 }
 0x2d5   : > { %6594 = vmatpush1.msk.msra.mxu0 %vm2578_vm1, %v14525_v12  ;;  %3813 = vmatprep.mubr.f32.mxu0 %v15083_v26  ;;  %vm2426_vm1 = vcmp.eq.s32.totalorder %v15090_v52, %v11236_v21  ;;  %v15097_v9 = vld [vmem:[#allocation9_spill] sm:$0xff] }
 0x2d6   : > { %6536 = vmatpush1.msk.msra.mxu1 %vm2438_vm0, %v14525_v12  ;;  %6595 = vmatprep.subr.msk.mxu0 %vm2575_vm7, %v14525_v12  ;;  %vm2562_vm7 = vcmp.eq.s32.totalorder %v15092_v30, %v11236_v21  ;;  %v15100_v52 = vld [vmem:[#allocation153_spill] sm:$0xff]  ;;  %v15103_v30 = vld [vmem:[#allocation154_spill] sm:$0xff] }
 0x2d7   : > { %6537 = vmatprep.subr.msk.mxu1 %vm2435_vm8, %v14525_v12  ;;  %6596 = vmatpush1.msk.msra.mxu0 %vm2574_vm2, %v14525_v12 }
 0x2d8   : > { %3707 = vmatmul.mubr.f32.gmra.mxu1 %v15086_v7  ;;  %6597 = vmatprep.subr.msk.mxu0 %vm2571_vm14, %v14525_v12  ;;  %v15095_v7 = vld [vmem:[#allocation66_spill] sm:$0xff] }
 0x2d9   : > { %6538 = vmatpush1.msk.msra.mxu1 %vm2434_vm13, %v14525_v12  ;;  %3712 = vmatprep.mubr.f32.mxu1 %v15087_v34  ;;  %v15096_v34 = vld [vmem:[#allocation151_spill] sm:$0xff] }
 0x2da   : > { %v3256_v42 = vpop.f32.mrf.mxu0  ;;  %3814 = vmatmul.mubr.f32.gmra.mxu0 %v15089_v36  ;;  %6539 = vmatprep.subr.msk.mxu1 %vm2431_vm11, %v14525_v12  ;;  %vm2559_vm2 = vcmp.eq.s32.totalorder %v15096_v34, %v11000_v14  ;;  %vm2558_vm13 = vcmp.eq.s32.totalorder %v15096_v34, %v11236_v21  ;;  %v15099_v36 = vld [vmem:[#allocation175_spill] sm:$0xff]  ;;  %vm2555_vm11 = vcmp.eq.s32.totalorder %v15100_v52, %v11000_v14  ;;  %v15108_v34 = vld [vmem:[#allocation146_spill] sm:$0xff] }
 0x2db   : > { %v11978_v6 = vadd.f32 %v3369_v61, %v3256_v42  ;;  %6598 = vmatpush1.msk.msra.mxu0 %vm2570_vm12, %v14525_v12  ;;  %3819 = vmatprep.mubr.f32.mxu0 %v15091_v10  ;;  %v15093_v61 = vld [vmem:[#allocation139_spill] sm:$0xff]  ;;  %v15098_v42 = vld [vmem:[#allocation140_spill] sm:$0xff] }
 0x2dc   : > { %v3258_v26 = vpop.f32.mrf.mxu0  ;;  %6540 = vmatpush1.msk.msra.mxu1 %vm2430_vm5, %v14525_v12  ;;  %6599 = vmatprep.subr.msk.mxu0 %vm2567_vm3, %v14525_v12  ;;  %vm2423_vm0 = vcmp.eq.s32.totalorder %v15093_v61, %v11000_v14  ;;  %vm2422_vm8 = vcmp.eq.s32.totalorder %v15093_v61, %v11236_v21  ;;  %vm2419_vm14 = vcmp.eq.s32.totalorder %v15098_v42, %v11000_v14  ;;  %v15102_v10 = vld [vmem:[#allocation100_spill] sm:$0xff] }
 0x2dd   : > { %v11992_v25 = vadd.f32 %v3371_v37, %v3258_v26  ;;  %6541 = vmatprep.subr.msk.mxu1 %vm2427_vm9, %v14525_v12  ;;  %6600 = vmatpush1.msk.msra.mxu0 %vm2566_vm4, %v14525_v12  ;;  %vm2418_vm12 = vcmp.eq.s32.totalorder %v15098_v42, %v11236_v21  ;;  %v15101_v37 = vld [vmem:[#allocation142_spill] sm:$0xff]  ;;  %vm2554_vm3 = vcmp.eq.s32.totalorder %v15100_v52, %v11236_v21  ;;  %v15104_v26 = vld [vmem:[#allocation13_spill] sm:$0xff]  ;;  %v15105_v61 = vld [vmem:[#allocation144_spill] sm:$0xff] }
 0x2de   : > { %3713 = vmatmul.mubr.f32.gmra.mxu1 %v15094_v17  ;;  %6601 = vmatprep.subr.msk.mxu0 %vm2563_vm15, %v14525_v12  ;;  %vm2415_vm5 = vcmp.eq.s32.totalorder %v15101_v37, %v11000_v14  ;;  %vm2414_vm9 = vcmp.eq.s32.totalorder %v15101_v37, %v11236_v21  ;;  %vm2551_vm4 = vcmp.eq.s32.totalorder %v15103_v30, %v11000_v14  ;;  %v3375_v17 = vpop.f32.mrf.mxu1  ;;  %v15109_v52 = vld [vmem:[#allocation158_spill] sm:$0xff] }
 0x2df   : > { %6542 = vmatpush1.msk.msra.mxu1 %vm2426_vm1, %v14525_v12  ;;  %3718 = vmatprep.mubr.f32.mxu1 %v15095_v7  ;;  %vm2411_vm15 = vcmp.eq.s32.totalorder %v15105_v61, %v11000_v14  ;;  %vm2550_vm1 = vcmp.eq.s32.totalorder %v15103_v30, %v11236_v21  ;;  %v15107_v7 = vld [vmem:[#allocation156_spill] sm:$0xff] }
 0x2e0   : > { %3820 = vmatmul.mubr.f32.gmra.mxu0 %v15097_v9  ;;  %6543 = vmatprep.subr.msk.mxu1 %vm2423_vm0, %v14525_v12  ;;  %vm2547_vm0 = vcmp.eq.s32.totalorder %v15107_v7, %v11000_v14 }
 0x2e1   : > { %6602 = vmatpush1.msk.msra.mxu0 %vm2562_vm7, %v14525_v12  ;;  %3825 = vmatprep.mubr.f32.mxu0 %v15099_v36  ;;  %vm2410_vm7 = vcmp.eq.s32.totalorder %v15105_v61, %v11236_v21  ;;  %v3377_v36 = vpop.f32.mrf.mxu1  ;;  %v15114_v61 = vld [vmem:[#allocation155_spill] sm:$0xff] }
 0x2e2   : > { %6544 = vmatpush1.msk.msra.mxu1 %vm2422_vm8, %v14525_v12  ;;  %6603 = vmatprep.subr.msk.mxu0 %vm2559_vm2, %v14525_v12  ;;  %vm2407_vm8 = vcmp.eq.s32.totalorder %v15108_v34, %v11000_v14  ;;  %vm2546_vm2 = vcmp.eq.s32.totalorder %v15107_v7, %v11236_v21  ;;  %v15118_v7 = vld [vmem:[#allocation45_spill] sm:$0xff] }
 0x2e3   : > { %6545 = vmatprep.subr.msk.mxu1 %vm2419_vm14, %v14525_v12  ;;  %6604 = vmatpush1.msk.msra.mxu0 %vm2558_vm13, %v14525_v12  ;;  %vm2406_vm14 = vcmp.eq.s32.totalorder %v15108_v34, %v11236_v21  ;;  %vm2543_vm13 = vcmp.eq.s32.totalorder %v15109_v52, %v11000_v14  ;;  %v15120_v34 = vld [vmem:[#allocation157_spill] sm:$0xff] }
 0x2e4   : > { %3719 = vmatmul.mubr.f32.gmra.mxu1 %v15102_v10  ;;  %6605 = vmatprep.subr.msk.mxu0 %vm2555_vm11, %v14525_v12  ;;  %v15111_v10 = vld [vmem:[#allocation150_spill] sm:$0xff] }
 0x2e5   : > { %6546 = vmatpush1.msk.msra.mxu1 %vm2418_vm12, %v14525_v12  ;;  %3724 = vmatprep.mubr.f32.mxu1 %v11155_v5  ;;  %v15106_v5 = vld [vmem:[#allocation184_spill] sm:$0xff]  ;;  %vm2403_vm11 = vcmp.eq.s32.totalorder %v15111_v10, %v11000_v14  ;;  %vm2542_vm12 = vcmp.eq.s32.totalorder %v15109_v52, %v11236_v21  ;;  %v15122_v52 = vld [vmem:[#allocation163_spill] sm:$0xff] }
 0x2e6   : > { %3826 = vmatmul.mubr.f32.gmra.mxu0 %v15104_v26  ;;  %6547 = vmatprep.subr.msk.mxu1 %vm2415_vm5, %v14525_v12  ;;  %v15113_v26 = vld [vmem:[#allocation159_spill] sm:$0xff] }
 0x2e7   : > { %6606 = vmatpush1.msk.msra.mxu0 %vm2554_vm3, %v14525_v12  ;;  %3831 = vmatprep.mubr.f32.mxu0 %v15106_v5  ;;  %vm2539_vm5 = vcmp.eq.s32.totalorder %v15113_v26, %v11000_v14  ;;  %vm2402_vm3 = vcmp.eq.s32.totalorder %v15111_v10, %v11236_v21  ;;  %v15116_v5 = vld [vmem:[#allocation118_spill] sm:$0xff] }
 0x2e8   : > { %6548 = vmatpush1.msk.msra.mxu1 %vm2414_vm9, %v14525_v12  ;;  %6607 = vmatprep.subr.msk.mxu0 %vm2551_vm4, %v14525_v12  ;;  %vm2399_vm9 = vcmp.eq.s32.totalorder %v15114_v61, %v11000_v14  ;;  %vm2538_vm4 = vcmp.eq.s32.totalorder %v15113_v26, %v11236_v21 }
 0x2e9   : > { %6549 = vmatprep.subr.msk.mxu1 %vm2411_vm15, %v14525_v12  ;;  %6608 = vmatpush1.msk.msra.mxu0 %vm2550_vm1, %v14525_v12  ;;  %vm2398_vm15 = vcmp.eq.s32.totalorder %v15114_v61, %v11236_v21  ;;  %v15127_v61 = vld [vmem:[#allocation86_spill] sm:$0xff] }
 0x2ea   : > { %3725 = vmatmul.mubr.f32.gmra.mxu1 %v11159_v44  ;;  %6609 = vmatprep.subr.msk.mxu0 %vm2547_vm0, %v14525_v12  ;;  %v15110_v44 = vld [vmem:[#allocation15_spill] sm:$0xff] }
 0x2eb   : > { %6550 = vmatpush1.msk.msra.mxu1 %vm2410_vm7, %v14525_v12  ;;  %3730 = vmatprep.mubr.f32.mxu1 %v11169_v8  ;;  %v15112_v8 = vld [vmem:[#allocation18_spill] sm:$0xff] }
 0x2ec   : > { %3832 = vmatmul.mubr.f32.gmra.mxu0 %v15110_v44  ;;  %6551 = vmatprep.subr.msk.mxu1 %vm2407_vm8, %v14525_v12 }
 0x2ed   : > { %v3262_v9 = vpop.f32.mrf.mxu0  ;;  %6610 = vmatpush1.msk.msra.mxu0 %vm2546_vm2, %v14525_v12  ;;  %3837 = vmatprep.mubr.f32.mxu0 %v15112_v8 }
 0x2ee   : > { %v12058_v42 = vadd.f32 %v3375_v17, %v3262_v9  ;;  %6552 = vmatpush1.msk.msra.mxu1 %vm2406_vm14, %v14525_v12  ;;  %6611 = vmatprep.subr.msk.mxu0 %vm2543_vm13, %v14525_v12  ;;  %v15115_v17 = vld [vmem:[#allocation53_spill] sm:$0xff]  ;;  %vm2391_vm14 = vcmp.eq.s32.totalorder %v15120_v34, %v11000_v14  ;;  %v3381_v9 = vpop.f32.mrf.mxu1 }
 0x2ef   : > { %v3264_v37 = vpop.f32.mrf.mxu0  ;;  %6553 = vmatprep.subr.msk.mxu1 %vm2403_vm11, %v14525_v12  ;;  %6612 = vmatpush1.msk.msra.mxu0 %vm2542_vm12, %v14525_v12  ;;  %vm2535_vm1 = vcmp.eq.s32.totalorder %v15115_v17, %v11000_v14  ;;  %vm2534_vm7 = vcmp.eq.s32.totalorder %v15115_v17, %v11236_v21  ;;  %vm2390_vm11 = vcmp.eq.s32.totalorder %v15120_v34, %v11236_v21  ;;  %v15130_v34 = vld [vmem:[#allocation57_spill] sm:$0xff] }
 0x2f0   : > { %v12072_v30 = vadd.f32 %v3377_v36, %v3264_v37  ;;  %3731 = vmatmul.mubr.f32.gmra.mxu1 %v11189_v0  ;;  %6613 = vmatprep.subr.msk.mxu0 %vm2539_vm5, %v14525_v12  ;;  %v15117_v0 = vld [vmem:[#allocation10_spill] sm:$0xff]  ;;  %v15121_v36 = vld [vmem:[#allocation29_spill] sm:$0xff]  ;;  %vm2527_vm12 = vcmp.eq.s32.totalorder %v15122_v52, %v11000_v14  ;;  %v3383_v8 = vpop.f32.mrf.mxu1 }
 0x2f1   : > { %6554 = vmatpush1.msk.msra.mxu1 %vm2402_vm3, %v14525_v12  ;;  %3736 = vmatprep.mubr.f32.mxu1 %v11248_v11  ;;  %vm2395_vm0 = vcmp.eq.s32.totalorder %v15117_v0, %v11000_v14  ;;  %v15119_v11 = vld [vmem:[#allocation162_spill] sm:$0xff]  ;;  %vm2394_vm2 = vcmp.eq.s32.totalorder %v15117_v0, %v11236_v21  ;;  %vm2526_vm3 = vcmp.eq.s32.totalorder %v15122_v52, %v11236_v21  ;;  %v15124_v37 = vld [vmem:[#allocation165_spill] sm:$0xff] }
 0x2f2   : > { %3838 = vmatmul.mubr.f32.gmra.mxu0 %v15116_v5  ;;  %6555 = vmatprep.subr.msk.mxu1 %vm2399_vm9, %v14525_v12  ;;  %vm2531_vm8 = vcmp.eq.s32.totalorder %v15119_v11, %v11000_v14  ;;  %vm2530_vm13 = vcmp.eq.s32.totalorder %v15119_v11, %v11236_v21  ;;  %v15128_v5 = vld [vmem:[#allocation167_spill] sm:$0xff]  ;;  %v15136_v52 = vld [vmem:[#allocation114_spill] sm:$0xff] }
 0x2f3   : > { %6614 = vmatpush1.msk.msra.mxu0 %vm2538_vm4, %v14525_v12  ;;  %3843 = vmatprep.mubr.f32.mxu0 %v15118_v7  ;;  %vm2523_vm4 = vcmp.eq.s32.totalorder %v15124_v37, %v11000_v14  ;;  %v7169_v0 = vld [vmem:[#allocation2] sm:$0xff] }
 0x2f4   : > { %6556 = vmatpush1.msk.msra.mxu1 %vm2398_vm15, %v14525_v12  ;;  %6615 = vmatprep.subr.msk.mxu0 %vm2535_vm1, %v14525_v12  ;;  %vm2522_vm1 = vcmp.eq.s32.totalorder %v15124_v37, %v11236_v21  ;;  %v15137_v37 = vld [vmem:[#allocation173_spill] sm:$0xff] }
 0x2f5   : > { %6557 = vmatprep.subr.msk.mxu1 %vm2395_vm0, %v14525_v12  ;;  %6616 = vmatpush1.msk.msra.mxu0 %vm2534_vm7, %v14525_v12 }
 0x2f6   : > { %3737 = vmatmul.mubr.f32.gmra.mxu1 %v11252_v49  ;;  %6617 = vmatprep.subr.msk.mxu0 %vm2531_vm8, %v14525_v12  ;;  %v15123_v49 = vld [vmem:[#allocation160_spill] sm:$0xff]  ;;  %vm2519_vm8 = vcmp.eq.s32.totalorder %v15127_v61, %v11000_v14 }
 0x2f7   : > { %6558 = vmatpush1.msk.msra.mxu1 %vm2394_vm2, %v14525_v12  ;;  %3844 = vmatmul.mubr.f32.gmra.mxu0 %v15121_v36  ;;  %vm2515_vm5 = vcmp.eq.s32.totalorder %v15123_v49, %v11000_v14  ;;  %vm2514_vm9 = vcmp.eq.s32.totalorder %v15123_v49, %v11236_v21  ;;  %v15135_v36 = vld [vmem:[#allocation170_spill] sm:$0xff]  ;;  %v3387_v49 = vpop.f32.mrf.mxu1 }
 0x2f8   : > { %6559 = vmatprep.subr.msk.mxu1 %vm2391_vm14, %v14525_v12  ;;  %3920 = vmatprep.mubr.f32.mxu1 %v11265_v33  ;;  %v15125_v33 = vld [vmem:[#allocation161_spill] sm:$0xff]  ;;  %vm2507_vm14 = vcmp.eq.s32.totalorder %v15128_v5, %v11000_v14 }
 0x2f9   : > { %6618 = vmatpush1.msk.msra.mxu0 %vm2530_vm13, %v14525_v12  ;;  %3849 = vmatprep.mubr.f32.mxu0 %v11210_v55  ;;  %vm2511_vm15 = vcmp.eq.s32.totalorder %v15125_v33, %v11000_v14  ;;  %vm2510_vm0 = vcmp.eq.s32.totalorder %v15125_v33, %v11236_v21  ;;  %v15126_v55 = vld [vmem:[#allocation166_spill] sm:$0xff]  ;;  %vm2518_vm13 = vcmp.eq.s32.totalorder %v15127_v61, %v11236_v21  ;;  %v15139_v33 = vld [vmem:[#allocation176_spill] sm:$0xff] }
 0x2fa   : > { %6560 = vmatpush1.msk.msra.mxu1 %vm2390_vm11, %v14525_v12  ;;  %6619 = vmatprep.subr.msk.mxu0 %vm2527_vm12, %v14525_v12  ;;  %vm2635_vm7 = vcmp.eq.s32.totalorder %v15126_v55, %v11000_v14  ;;  %vm2634_vm2 = vcmp.eq.s32.totalorder %v15126_v55, %v11236_v21  ;;  %vm2506_vm11 = vcmp.eq.s32.totalorder %v15128_v5, %v11236_v21  ;;  %v3389_v55 = vpop.f32.mrf.mxu1  ;;  %v15142_v5 = vld [vmem:[#allocation174_spill] sm:$0xff] }
 0x2fb   : > { %6561 = vmatprep.subr.msk.mxu1 %vm2515_vm5, %v14525_v12  ;;  %6620 = vmatpush1.msk.msra.mxu0 %vm2526_vm3, %v14525_v12  ;;  %v3139_v7 = vsel %vm2635_vm7, 1.0, %v7169_v0  ;;  %v3138_v11 = vsel %vm2634_vm2, 1.0, %v7169_v0  ;;  %vm2631_vm3 = vcmp.eq.s32.totalorder %v15130_v34, %v11000_v14 }
 0x2fc   : > { %v3268_v44 = vpop.f32.mrf.mxu0  ;;  %6562 = vmatpush2.msk.msra.mxu1 %vm2514_vm9, %v14525_v12  ;;  %6621 = vmatprep.subr.msk.mxu0 %vm2523_vm4, %v14525_v12  ;;  %vm15131_vm9 = vcmask 1042432  }
 0x2fd   : > { %v12140_v10 = vadd.f32 %v3381_v9, %v3268_v44  ;;  %3850 = vmatmul.mubr.f32.gmra.mxu0 %v11214_v27  ;;  %6563 = vmatprep.subr.msk.mxu1 %vm2511_vm15, %v14525_v12  ;;  %v15129_v27 = vld [vmem:[#allocation168_spill] sm:$0xff]  ;;  %vm2630_vm15 = vcmp.eq.s32.totalorder %v15130_v34, %v11236_v21  ;;  %v15134_v9 = vld [vmem:[#allocation89_spill] sm:$0xff]  ;;  %v15138_v44 = vld [vmem:[#allocation171_spill] sm:$0xff] }
 0x2fe   : > { %v3270_v26 = vpop.f32.mrf.mxu0  ;;  %6622 = vmatpush1.msk.msra.mxu0 %vm2522_vm1, %v14525_v12  ;;  %6564 = vmatpush2.msk.msra.mxu1 %vm2510_vm0, %v14525_v12  ;;  %vm2503_vm12 = vcmp.eq.s32.totalorder %v15129_v27, %v11000_v14  ;;  %vm2502_vm5 = vcmp.eq.s32.totalorder %v15129_v27, %v11236_v21  ;;  %vm15133_vm1 = vmmov %vm15131_vm9  ;;  %vm2627_vm7 = vcmp.eq.s32.totalorder %v15134_v9, %v11000_v14  ;;  %v15144_v34 = vld [vmem:[#allocation69_spill] sm:$0xff] }
 0x2ff   : > { %v12156_v17 = vadd.f32 %v3383_v8, %v3270_v26  ;;  %6623 = vmatprep.subr.msk.mxu0 %vm2519_vm8, %v14525_v12  ;;  %6653 = vmatprep.mubr.msk.f32.mxu0 %vm3140_vm6, %v11222_v39  ;;  %v15132_v39 = vld [vmem:[#allocation169_spill] sm:$0xff]  ;;  %vm2495_vm8 = vcmp.eq.s32.totalorder %v15135_v36, %v11000_v14  ;;  %vm2626_vm2 = vcmp.eq.s32.totalorder %v15134_v9, %v11236_v21  ;;  %v15140_v8 = vld [vmem:[#allocation172_spill] sm:$0xff] }
 0x300   : > { %6565 = vmatprep.subr.msk.mxu1 %vm2507_vm14, %v14525_v12  ;;  %6624 = vmatpush1.msk.msra.mxu0 %vm2518_vm13, %v14525_v12  ;;  %vm2499_vm4 = vcmp.eq.s32.totalorder %v15132_v39, %v11000_v14  ;;  %vm2498_vm0 = vcmp.eq.s32.totalorder %v15132_v39, %v11236_v21  ;;  %vm2494_vm14 = vcmp.eq.s32.totalorder %v15135_v36, %v11236_v21  ;;  %v15141_v26 = vld [vmem:[#allocation80_spill] sm:$0xff]  ;;  %v15145_v9 = vld [vmem:[#allocation181_spill] sm:$0xff] }
 0x301   : > { %6566 = vmatpush2.msk.msra.mxu1 %vm2506_vm11, %v14525_v12  ;;  %6625 = vmatprep.subr.msk.mxu0 %vm15131_vm9, %v3139_v7  ;;  %vm2623_vm13 = vcmp.eq.s32.totalorder %v15136_v52, %v11000_v14  ;;  %vm2491_vm11 = vcmp.eq.s32.totalorder %v15137_v37, %v11000_v14  ;;  %vm2487_vm9 = vcmp.eq.s32.totalorder %v15139_v33, %v11000_v14  ;;  %v15143_v7 = vld [vmem:[#allocation178_spill] sm:$0xff] }
 0x302   : > { %6567 = vmatprep.subr.msk.mxu1 %vm2503_vm12, %v14525_v12  ;;  %6626 = vmatpush2.msk.msra.mxu0 %vm15133_vm1, %v3138_v11  ;;  %vm2622_vm12 = vcmp.eq.s32.totalorder %v15136_v52, %v11236_v21  ;;  %vm2615_vm1 = vcmp.eq.s32.totalorder %v15140_v8, %v11000_v14  ;;  %v15146_v52 = vld [vmem:[#allocation177_spill] sm:$0xff] }
 0x303   : > { %6568 = vmatpush2.msk.msra.mxu1 %vm2502_vm5, %v14525_v12  ;;  %6627 = vmatprep.subr.msk.mxu0 %vm2631_vm3, %v14525_v12  ;;  %vm2490_vm5 = vcmp.eq.s32.totalorder %v15137_v37, %v11236_v21  ;;  %vm2619_vm3 = vcmp.eq.s32.totalorder %v15138_v44, %v11000_v14  ;;  %v3393_v27 = vpop.f32.mrf.mxu1 }
 0x304   : > { %6569 = vmatprep.subr.msk.mxu1 %vm2499_vm4, %v14525_v12  ;;  %6628 = vmatpush2.msk.msra.mxu0 %vm2630_vm15, %v14525_v12  ;;  %vm2618_vm4 = vcmp.eq.s32.totalorder %v15138_v44, %v11236_v21  ;;  %vm2486_vm15 = vcmp.eq.s32.totalorder %v15139_v33, %v11236_v21  ;;  %v15147_v44 = vld [vmem:[#allocation183_spill] sm:$0xff] }
 0x305   : > { %6570 = vmatpush2.msk.msra.mxu1 %vm2498_vm0, %v14525_v12  ;;  %6629 = vmatprep.subr.msk.mxu0 %vm2627_vm7, %v14525_v12  ;;  %vm2483_vm0 = vcmp.eq.s32.totalorder %v15141_v26, %v11000_v14  ;;  %vm2614_vm7 = vcmp.eq.s32.totalorder %v15140_v8, %v11236_v21  ;;  %v3395_v37 = vpop.f32.mrf.mxu1  ;;  %v15148_v8 = vld [vmem:[#allocation179_spill] sm:$0xff] }
 0x306   : > { %6571 = vmatprep.subr.msk.mxu1 %vm2495_vm8, %v14525_v12  ;;  %6630 = vmatpush2.msk.msra.mxu0 %vm2626_vm2, %v14525_v12  ;;  %vm2482_vm8 = vcmp.eq.s32.totalorder %v15141_v26, %v11236_v21  ;;  %vm2611_vm2 = vcmp.eq.s32.totalorder %v15142_v5, %v11000_v14  ;;  %v15149_v26 = vld [vmem:[#allocation93_spill] sm:$0xff] }
 0x307   : > { %6572 = vmatpush2.msk.msra.mxu1 %vm2494_vm14, %v14525_v12  ;;  %6631 = vmatprep.subr.msk.mxu0 %vm2623_vm13, %v14525_v12  ;;  %vm2479_vm14 = vcmp.eq.s32.totalorder %v15143_v7, %v11000_v14  ;;  %vm2610_vm13 = vcmp.eq.s32.totalorder %v15142_v5, %v11236_v21  ;;  %v15151_v5 = vld [vmem:[#allocation186_spill] sm:$0xff] }
 0x308   : > { %6573 = vmatprep.subr.msk.mxu1 %vm2491_vm11, %v14525_v12  ;;  %6632 = vmatpush2.msk.msra.mxu0 %vm2622_vm12, %v14525_v12  ;;  %vm2478_vm11 = vcmp.eq.s32.totalorder %v15143_v7, %v11236_v21  ;;  %vm2607_vm12 = vcmp.eq.s32.totalorder %v15144_v34, %v11000_v14  ;;  %v15152_v7 = vld [vmem:[#allocation182_spill] sm:$0xff] }
 0x309   : > { %6574 = vmatpush2.msk.msra.mxu1 %vm2490_vm5, %v14525_v12  ;;  %6633 = vmatprep.subr.msk.mxu0 %vm2619_vm3, %v14525_v12  ;;  %vm2475_vm5 = vcmp.eq.s32.totalorder %v15145_v9, %v11000_v14  ;;  %vm2606_vm3 = vcmp.eq.s32.totalorder %v15144_v34, %v11236_v21  ;;  %v15155_v34 = vld [vmem:[#allocation32_spill] sm:$0xff] }
 0x30a   : > { %v3274_v61 = vpop.f32.mrf.mxu0  ;;  %6575 = vmatprep.subr.msk.mxu1 %vm2487_vm9, %v14525_v12  ;;  %6634 = vmatpush2.msk.msra.mxu0 %vm2618_vm4, %v14525_v12  ;;  %vm2474_vm9 = vcmp.eq.s32.totalorder %v15145_v9, %v11236_v21  ;;  %vm2603_vm4 = vcmp.eq.s32.totalorder %v15146_v52, %v11000_v14 }
 0x30b   : > { %v12239_v0 = vadd.f32 %v3387_v49, %v3274_v61  ;;  %6576 = vmatpush2.msk.msra.mxu1 %vm2486_vm15, %v14525_v12  ;;  %6635 = vmatprep.subr.msk.mxu0 %vm2615_vm1, %v14525_v12  ;;  %vm2471_vm15 = vcmp.eq.s32.totalorder %v15147_v44, %v11000_v14  ;;  %vm2602_vm1 = vcmp.eq.s32.totalorder %v15146_v52, %v11236_v21  ;;  %v15150_v61 = vld [vmem:[#allocation180_spill] sm:$0xff] }
 0x30c   : > { %v3276_v11 = vpop.f32.mrf.mxu0  ;;  %6577 = vmatprep.subr.msk.mxu1 %vm2483_vm0, %v14525_v12  ;;  %6636 = vmatpush2.msk.msra.mxu0 %vm2614_vm7, %v14525_v12  ;;  %vm2470_vm0 = vcmp.eq.s32.totalorder %v15147_v44, %v11236_v21  ;;  %vm2599_vm7 = vcmp.eq.s32.totalorder %v15148_v8, %v11000_v14 }
 0x30d   : > { %v12253_v39 = vadd.f32 %v3389_v55, %v3276_v11  ;;  %6578 = vmatpush2.msk.msra.mxu1 %vm2482_vm8, %v14525_v12  ;;  %6637 = vmatprep.subr.msk.mxu0 %vm2611_vm2, %v14525_v12  ;;  %vm2467_vm8 = vcmp.eq.s32.totalorder %v15149_v26, %v11000_v14  ;;  %vm2598_vm2 = vcmp.eq.s32.totalorder %v15148_v8, %v11236_v21  ;;  %v15154_v11 = vld [vmem:[#allocation185_spill] sm:$0xff] }
 0x30e   : > { %v3280_v36 = vpop.f32.mrf.mxu0  ;;  %6579 = vmatprep.subr.msk.mxu1 %vm2479_vm14, %v14525_v12  ;;  %6638 = vmatpush2.msk.msra.mxu0 %vm2610_vm13, %v14525_v12  ;;  %vm2466_vm14 = vcmp.eq.s32.totalorder %v15149_v26, %v11236_v21  ;;  %vm2595_vm13 = vcmp.eq.s32.totalorder %v15150_v61, %v11000_v14  ;;  %v3360_v26 = vadd.f32 %v11905_v40, %v11924_v54 }
 0x30f   : > { %v12267_v49 = vadd.f32 %v3393_v27, %v3280_v36  ;;  %6580 = vmatpush2.msk.msra.mxu1 %vm2478_vm11, %v14525_v12  ;;  %6639 = vmatprep.subr.msk.mxu0 %vm2607_vm12, %v14525_v12  ;;  %vm2463_vm11 = vcmp.eq.s32.totalorder %v15151_v5, %v11000_v14  ;;  %vm2594_vm12 = vcmp.eq.s32.totalorder %v15150_v61, %v11236_v21  ;;  %v15153_v27 = vld [vmem:[#allocation187_spill] sm:$0xff]  ;;  %v15156_v36 = vld [vmem:[#allocation109_spill] sm:$0xff]  ;;  %v15157_v61 = vld [vmem:[#allocation8_spill] sm:$0xff] }
 0x310   : > { %v3282_v33 = vpop.f32.mrf.mxu0  ;;  %6581 = vmatprep.subr.msk.mxu1 %vm2475_vm5, %v14525_v12  ;;  %6640 = vmatpush2.msk.msra.mxu0 %vm2606_vm3, %v14525_v12  ;;  %vm2462_vm5 = vcmp.eq.s32.totalorder %v15151_v5, %v11236_v21  ;;  %vm2591_vm3 = vcmp.eq.s32.totalorder %v15152_v7, %v11000_v14 }
 0x311   : > { %v12281_v55 = vadd.f32 %v3395_v37, %v3282_v33  ;;  %6582 = vmatpush2.msk.msra.mxu1 %vm2474_vm9, %v14525_v12  ;;  %6641 = vmatprep.subr.msk.mxu0 %vm2603_vm4, %v14525_v12  ;;  %vm2459_vm9 = vcmp.eq.s32.totalorder %v15153_v27, %v11000_v14  ;;  %vm2590_vm4 = vcmp.eq.s32.totalorder %v15152_v7, %v11236_v21  ;;  %v3399_v9 = vpop.f32.mrf.mxu1 }
 0x312   : > { %6583 = vmatprep.subr.msk.mxu1 %vm2471_vm15, %v14525_v12  ;;  %6642 = vmatpush2.msk.msra.mxu0 %vm2602_vm1, %v14525_v12  ;;  %vm2458_vm15 = vcmp.eq.s32.totalorder %v15153_v27, %v11236_v21  ;;  %vm2587_vm1 = vcmp.eq.s32.totalorder %v15154_v11, %v11000_v14  ;;  %v3358_v33 = vadd.f32 %v11887_v23, %v11903_v24 }
 0x313   : > { %6584 = vmatpush2.msk.msra.mxu1 %vm2470_vm0, %v14525_v12  ;;  %6643 = vmatprep.subr.msk.mxu0 %vm2599_vm7, %v14525_v12  ;;  %vm2455_vm0 = vcmp.eq.s32.totalorder %v15155_v34, %v11000_v14  ;;  %vm2586_vm7 = vcmp.eq.s32.totalorder %v15154_v11, %v11236_v21  ;;  %v3401_v44 = vpop.f32.mrf.mxu1 }
 0x314   : > { %6585 = vmatprep.subr.msk.mxu1 %vm2467_vm8, %v14525_v12  ;;  %6644 = vmatpush2.msk.msra.mxu0 %vm2598_vm2, %v14525_v12  ;;  %vm2454_vm8 = vcmp.eq.s32.totalorder %v15155_v34, %v11236_v21  ;;  %vm2583_vm2 = vcmp.eq.s32.totalorder %v15156_v36, %v11000_v14 }
 0x315   : > { %6586 = vmatpush2.msk.msra.mxu1 %vm2466_vm14, %v14525_v12  ;;  %6645 = vmatprep.subr.msk.mxu0 %vm2595_vm13, %v14525_v12  ;;  %vm2582_vm14 = vcmp.eq.s32.totalorder %v15156_v36, %v11236_v21  ;;  %vm4386_vm13 = vcmask 523264  }
 0x316   : > { %6587 = vmatprep.subr.msk.mxu1 %vm2463_vm11, %v14525_v12  ;;  %6646 = vmatpush2.msk.msra.mxu0 %vm2594_vm12, %v14525_v12 }
 0x317   : > { %6588 = vmatpush2.msk.msra.mxu1 %vm2462_vm5, %v14525_v12  ;;  %6647 = vmatprep.subr.msk.mxu0 %vm2591_vm3, %v14525_v12 }
 0x318   : > { %6589 = vmatprep.subr.msk.mxu1 %vm2459_vm9, %v14525_v12  ;;  %6648 = vmatpush2.msk.msra.mxu0 %vm2590_vm4, %v14525_v12  ;;  %v3583_v7 = vpop.f32.mrf.mxu1 }
 0x319   : > { %6590 = vmatpush2.msk.msra.mxu1 %vm2458_vm15, %v14525_v12  ;;  %6649 = vmatprep.subr.msk.mxu0 %vm2587_vm1, %v14525_v12  ;;  %v3286_v52 = vpop.f32.mrf.mxu0 }
 0x31a   : > { %6591 = vmatprep.subr.msk.mxu1 %vm2455_vm0, %v14525_v12  ;;  %6650 = vmatpush2.msk.msra.mxu0 %vm2586_vm7, %v14525_v12  ;;  %v12337_v37 = vadd.f32 %v3399_v9, %v3286_v52 }
 0x31b   : > { %6592 = vmatpush2.msk.msra.mxu1 %vm2454_vm8, %v14525_v12  ;;  %6651 = vmatprep.subr.msk.mxu0 %vm2583_vm2, %v14525_v12  ;;  %v3288_v14 = vpop.f32.mrf.mxu0 }
 0x31c   : > { %3921 = vmatmul.mubr.f32.vlgmr.msra.gmra.mxu1 %v11279_v58  ;;  %6652 = vmatpush2.msk.msra.mxu0 %vm2582_vm14, %v14525_v12  ;;  %v12345_v21 = vadd.f32 %v3401_v44, %v3288_v14 }
 0x31d   : > { %3926 = vmatprep.mubr.f32.mxu1 %v11494_v16  ;;  %4034 = vmatmul.mubr.f32.vlgmr.msra.gmra.mxu0 %v11244_v15  ;;  %v3585_v16 = vpop.f32.mrf.mxu1 }
 0x31e   : > { %v3470_v8 = vpop.f32.mrf.mxu0  ;;  %6654 = vmatprep.mubr.msk.f32.mxu0 %vm3140_vm6, %v15157_v61 }
 0x31f   : > { %v3471_v5 = vadd.f32 %v3470_v8, %v3358_v33 }
 0x320   : > { %v3472_v23 = vpop.f32.mrf.mxu0  ;;  %3927 = vmatmul.mubr.f32.gmra.mxu1 %v11502_v13 }
 0x321   : > { %v12354_v58 = vadd.f32 %v3583_v7, %v3471_v5  ;;  %v3473_v24 = vadd.f32 %v3472_v23, %v3360_v26  ;;  %3932 = vmatprep.mubr.f32.mxu1 %v11621_v43  ;;  %4040 = vmatmul.mubr.f32.gmra.mxu0 %v11448_v31  ;;  %v3364_v31 = vadd.f32 %v11926_v45, %v11936_v50 }
 0x322   : > { %6655 = vmatprep.mubr.msk.f32.mxu0 %vm3140_vm6, %v11471_v41  ;;  %v3366_v41 = vadd.f32 %v11950_v35, %v11960_v1 }
 0x323   : > { %15158 = vst [vmem:[#allocation44_spill] sm:$0xff] %v12354_v58  ;;  %4114 = vrot.lane.b32.xlu0 %v12354_v58, %s7278_s24  ;;  %v12363_v15 = vadd.f32 %v3585_v16, %v3473_v24 }
 0x324   : > { %3933 = vmatmul.mubr.f32.gmra.mxu1 %v11625_v53 }
 0x325   : > { %3938 = vmatprep.mubr.f32.mxu1 %v11747_v57  ;;  %4046 = vmatmul.mubr.f32.gmra.mxu0 %v11498_v51 }
 0x326   : > { %6656 = vmatprep.mubr.msk.f32.mxu0 %vm3140_vm6, %v11575_v63 }
 0x327   : > { %4116 = vrot.lane.b32.xlu0 %v12363_v15, %s7278_s24 }
 0x328   : > { %3939 = vmatmul.mubr.f32.gmra.mxu1 %v11751_v46 }
 0x329   : > { %3944 = vmatprep.mubr.f32.mxu1 %v11825_v62  ;;  %4052 = vmatmul.mubr.f32.gmra.mxu0 %v11573_v19 }
 0x32a   : > { %6657 = vmatprep.mubr.msk.f32.mxu0 %vm3140_vm6, %v11701_v28 }
 0x32c   : > { %3945 = vmatmul.mubr.f32.gmra.mxu1 %v11829_v2 }
 0x32d   : > { %3950 = vmatprep.mubr.f32.mxu1 %v11857_v48  ;;  %4058 = vmatmul.mubr.f32.gmra.mxu0 %v11699_v60 }
 0x32e   : > { %6658 = vmatprep.mubr.msk.f32.mxu0 %vm3140_vm6, %v11806_v20 }
 0x330   : > { %3951 = vmatmul.mubr.f32.gmra.mxu1 %v11853_v18 }
 0x331   : > { %3956 = vmatprep.mubr.f32.mxu1 %v11877_v22  ;;  %4064 = vmatmul.mubr.f32.gmra.mxu0 %v11804_v38 }
 0x332   : > { %6659 = vmatprep.mubr.msk.f32.mxu0 %vm3140_vm6, %v11842_v4 }
 0x334   : > { %3957 = vmatmul.mubr.f32.gmra.mxu1 %v11885_v56 }
 0x335   : > { %3962 = vmatprep.mubr.f32.mxu1 %v11896_v32  ;;  %4070 = vmatmul.mubr.f32.gmra.mxu0 %v11840_v3 }
 0x336   : > { %6660 = vmatprep.mubr.msk.f32.mxu0 %vm3140_vm6, %v11865_v29  ;;  %vm15159_vm6 = vcmask 1039360  }
 0x337   : > { %v3589_v43 = vpop.f32.mrf.mxu1  ;;  %vm15170_vm11 = vmmov %vm15159_vm6 }
 0x338   : > { %3963 = vmatmul.mubr.f32.gmra.mxu1 %v11909_v47  ;;  %vm15178_vm12 = vmmov %vm15159_vm6 }
 0x339   : > { %4076 = vmatmul.mubr.f32.gmra.mxu0 %v11881_v59  ;;  %v3591_v57 = vpop.f32.mrf.mxu1  ;;  %vm15179_vm5 = vmmov %vm15159_vm6 }
 0x33a   : > { %vm15180_vm3 = vmmov %vm15179_vm5 }
 0x33b   : > { %v3476_v51 = vpop.f32.mrf.mxu0  ;;  %v3595_v38 = vpop.f32.mrf.mxu1  ;;  %vm15181_vm9 = vmmov %vm15180_vm3 }
 0x33c   : > { %v3477_v13 = vadd.f32 %v3476_v51, %v3364_v31  ;;  %vm15182_vm4 = vmmov %vm15180_vm3 }
 0x33d   : > { %v3478_v19 = vpop.f32.mrf.mxu0  ;;  %v3597_v3 = vpop.f32.mrf.mxu1  ;;  %vm15183_vm15 = vmmov %vm15180_vm3 }
 0x33e   : > { %v12397_v63 = vadd.f32 %v3589_v43, %v3477_v13  ;;  %v3479_v53 = vadd.f32 %v3478_v19, %v3366_v41  ;;  %vm15184_vm1 = vmmov %vm15180_vm3 }
 0x33f   : > { %vm15185_vm0 = vmmov %vm15184_vm1 }
 0x340   : > { %4122 = vrot.lane.b32.xlu0 %v12397_v63, %s7278_s24  ;;  %v12401_v60 = vadd.f32 %v3591_v57, %v3479_v53  ;;  %vm15186_vm7 = vmmov %vm15185_vm0 }
 0x341   : > { %vm15187_vm8 = vmmov %vm15185_vm0 }
 0x342   : > { %vm15188_vm2 = vmmov %vm15185_vm0 }
 0x343   : > { %vm15189_vm14 = vmmov %vm15185_vm0 }
 0x344   : > { %4124 = vrot.lane.b32.xlu0 %v12401_v60, %s7278_s24 }
 0x345   : > { %v3601_v29 = vpop.f32.mrf.mxu1 }
 0x347   : > { %v3603_v32 = vpop.f32.mrf.mxu1 }
 0x34b   : > { %v3482_v28 = vpop.f32.mrf.mxu0 }
 0x34c   : > { %v3483_v2 = vadd.f32 %v3482_v28, %v11978_v6 }
 0x34d   : > { %v3484_v46 = vpop.f32.mrf.mxu0 }
 0x34e   : > { %v12406_v20 = vadd.f32 %v3595_v38, %v3483_v2  ;;  %v3485_v62 = vadd.f32 %v3484_v46, %v11992_v25 }
 0x350   : > { %4130 = vrot.lane.b32.xlu0 %v12406_v20, %s7278_s24  ;;  %v12411_v4 = vadd.f32 %v3597_v3, %v3485_v62 }
 0x354   : > { %4132 = vrot.lane.b32.xlu0 %v12411_v4, %s7278_s24 }
 0x357   : > { %v3607_v45 = vpop.f32.mrf.mxu1 }
 0x359   : > { %v3609_v6 = vpop.f32.mrf.mxu1 }
 0x35e   : > { %v3488_v18 = vpop.f32.mrf.mxu0 }
 0x35f   : > { %v3489_v48 = vadd.f32 %v3488_v18, %v12058_v42 }
 0x360   : > { %v3490_v22 = vpop.f32.mrf.mxu0 }
 0x361   : > { %v12416_v59 = vadd.f32 %v3601_v29, %v3489_v48  ;;  %v3491_v56 = vadd.f32 %v3490_v22, %v12072_v30 }
 0x363   : > { %4138 = vrot.lane.b32.xlu0 %v12416_v59, %s7278_s24  ;;  %v12421_v40 = vadd.f32 %v3603_v32, %v3491_v56 }
 0x367   : > { %4140 = vrot.lane.b32.xlu0 %v12421_v40, %s7278_s24 }
 0x368   : > { %v3613_v27 = vpop.f32.mrf.mxu1 }
 0x370   : > { %v3494_v47 = vpop.f32.mrf.mxu0 }
 0x371   : > { %v3495_v54 = vadd.f32 %v3494_v47, %v12140_v10 }
 0x372   : > { %v3496_v50 = vpop.f32.mrf.mxu0 }
 0x373   : > { %v12426_v35 = vadd.f32 %v3607_v45, %v3495_v54  ;;  %v3497_v1 = vadd.f32 %v3496_v50, %v12156_v17  ;;  %v3615_v17 = vpop.f32.mrf.mxu1 }
 0x375   : > { %4146 = vrot.lane.b32.xlu0 %v12426_v35, %s7278_s24  ;;  %v12431_v25 = vadd.f32 %v3609_v6, %v3497_v1 }
 0x377   : > { %v3619_v36 = vpop.f32.mrf.mxu1 }
 0x379   : > { %4148 = vrot.lane.b32.xlu0 %v12431_v25, %s7278_s24 }
 0x37b   : > { %v3500_v42 = vpop.f32.mrf.mxu0 }
 0x37c   : > { %v3501_v30 = vadd.f32 %v3500_v42, %v12239_v0  ;;  %v3621_v0 = vpop.f32.mrf.mxu1 }
 0x37d   : > { %v3502_v10 = vpop.f32.mrf.mxu0 }
 0x37e   : > { %v12436_v11 = vadd.f32 %v3613_v27, %v3501_v30  ;;  %v3503_v34 = vadd.f32 %v3502_v10, %v12253_v39 }
 0x380   : > { %4154 = vrot.lane.b32.xlu0 %v12436_v11, %s7278_s24  ;;  %v12441_v9 = vadd.f32 %v3615_v17, %v3503_v34 }
 0x384   : > { %4156 = vrot.lane.b32.xlu0 %v12441_v9, %s7278_s24 }
 0x388   : > { %4276 = vrot.lane.b32.xlu0 %v12441_v9, %s7279_s25 }
 0x38a   : > { %v3625_v52 = vpop.f32.mrf.mxu1 }
 0x38b   : > { %v3506_v44 = vpop.f32.mrf.mxu0 }
 0x38c   : > { %v3507_v14 = vadd.f32 %v3506_v44, %v12267_v49  ;;  %v3627_v33 = vpop.f32.mrf.mxu1 }
 0x38d   : > { %v3508_v39 = vpop.f32.mrf.mxu0 }
 0x38e   : > { %v12448_v8 = vadd.f32 %v3619_v36, %v3507_v14  ;;  %v12450_v26 = vpop.f32.mrf.mxu1  ;;  %v3509_v23 = vadd.f32 %v3508_v39, %v12281_v55  ;;  %v4362_v39 = vld [vmem:[%s13826_s4] sm:$0xff] }
 0x38f   : > { %v3512_v61 = vpop.f32.mrf.mxu0 }
 0x390   : > { %v12452_v5 = vpop.f32.mrf.mxu1  ;;  %4162 = vrot.lane.b32.xlu0 %v12448_v8, %s7278_s24  ;;  %v12463_v49 = vadd.f32 %v3621_v0, %v3509_v23  ;;  %v3513_v13 = vadd.f32 %v3512_v61, %v12337_v37 }
 0x391   : > { %v3514_v7 = vpop.f32.mrf.mxu0 }
 0x392   : > { %v12457_v24 = vpop.f32.mrf.mxu1  ;;  %v12478_v53 = vadd.f32 %v3625_v52, %v3513_v13  ;;  %v3515_v37 = vadd.f32 %v3514_v7, %v12345_v21 }
 0x394   : > { %v3809_v16 = vpop.f32.mrf.mxu0  ;;  %v12459_v31 = vpop.f32.mrf.mxu1  ;;  %4282 = vrot.lane.b32.xlu0 %v12448_v8, %s7279_s25  ;;  %v12495_v62 = vadd.f32 %v3627_v33, %v3515_v37 }
 0x395   : > { %v12511_v22 = vpop.permute.xlu0 %4114  ;;  %v3810_v61 = vadd.f32 %v3809_v16, %v12450_v26 }
 0x396   : > { %v3811_v51 = vpop.f32.mrf.mxu0 }
 0x397   : > { %v3812_v23 = vadd.f32 %v3811_v51, %v12452_v5 }
 0x398   : > { %v12465_v41 = vpop.f32.mrf.mxu1  ;;  %4164 = vrot.lane.b32.xlu0 %v12463_v49, %s7278_s24 }
 0x399   : > { %v12523_v45 = vpop.permute.xlu0 %4116 }
 0x39a   : > { %v12470_v43 = vpop.f32.mrf.mxu0  ;;  %v12472_v55 = vpop.f32.mrf.mxu1 }
 0x39b   : > { %v3816_v26 = vadd.f32 %v12470_v43, %v12457_v24 }
 0x39c   : > { %v12474_v19 = vpop.f32.mrf.mxu0  ;;  %4284 = vrot.lane.b32.xlu0 %v12463_v49, %s7279_s25 }
 0x39e   : > { %v12480_v57 = vpop.f32.mrf.mxu1 }
 0x3a0   : > { %v12482_v28 = vpop.f32.mrf.mxu0  ;;  %v12484_v2 = vpop.f32.mrf.mxu1  ;;  %4170 = vrot.lane.b32.xlu0 %v12478_v53, %s7278_s24 }
 0x3a1   : > { %v3822_v24 = vadd.f32 %v12482_v28, %v12465_v41 }
 0x3a2   : > { %v12489_v38 = vpop.f32.mrf.mxu0 }
 0x3a4   : > { %v12491_v46 = vpop.f32.mrf.mxu1  ;;  %4290 = vrot.lane.b32.xlu0 %v12478_v53, %s7279_s25 }
 0x3a6   : > { %v12497_v3 = vpop.f32.mrf.mxu0  ;;  %v12499_v18 = vpop.f32.mrf.mxu1 }
 0x3a7   : > { %v3828_v41 = vadd.f32 %v12497_v3, %v12480_v57 }
 0x3a8   : > { %v12501_v48 = vpop.f32.mrf.mxu0  ;;  %4172 = vrot.lane.b32.xlu0 %v12495_v62, %s7278_s24 }
 0x3aa   : > { %v12505_v29 = vpop.f32.mrf.mxu1 }
 0x3ac   : > { %v12507_v21 = vpop.f32.mrf.mxu0  ;;  %4274 = vrot.lane.b32.xlu0 %v12436_v11, %s7279_s25  ;;  %v12515_v32 = vpop.f32.mrf.mxu1 }
 0x3ad   : > { %v3834_v57 = vadd.f32 %v12507_v21, %v12491_v46 }
 0x3ae   : > { %v12513_v56 = vpop.f32.mrf.mxu0 }
 0x3b0   : > { %4292 = vrot.lane.b32.xlu0 %v12495_v62, %s7279_s25  ;;  %v12521_v54 = vpop.f32.mrf.mxu1 }
 0x3b2   : > { %v12519_v47 = vpop.f32.mrf.mxu0  ;;  %v12529_v1 = vpop.f32.mrf.mxu1 }
 0x3b3   : > { %v12533_v42 = vpop.permute.xlu0 %4122  ;;  %v3840_v46 = vadd.f32 %v12519_v47, %v12505_v29 }
 0x3b4   : > { %v12525_v50 = vpop.f32.mrf.mxu0  ;;  %4268 = vrot.lane.b32.xlu0 %v12431_v25, %s7279_s25 }
 0x3b6   : > { %v3738_v27 = vpop.f32.mrf.mxu1 }
 0x3b7   : > { %v12531_v6 = vpop.f32.mrf.mxu0  ;;  %v12543_v17 = vpop.permute.xlu0 %4124 }
 0x3b8   : > { %4266 = vrot.lane.b32.xlu0 %v12426_v35, %s7279_s25  ;;  %v3740_v36 = vpop.f32.mrf.mxu1 }
 0x3b9   : > { %v12537_v30 = vpop.f32.mrf.mxu0 }
 0x3bc   : > { %4260 = vrot.lane.b32.xlu0 %v12421_v40, %s7279_s25 }
 0x3bd   : > { %v3851_v10 = vpop.f32.mrf.mxu0 }
 0x3be   : > { %v12541_v34 = vadd.f32 %v3851_v10, %v3738_v27  ;;  %v4364_v27 = vld [vmem:[%s13826_s4 + $0x10] sm:$0xff] }
 0x3bf   : > { %v3853_v0 = vpop.f32.mrf.mxu0 }
 0x3c0   : > { %v12545_v52 = vadd.f32 %v3853_v0, %v3740_v36  ;;  %4258 = vrot.lane.b32.xlu0 %v12416_v59, %s7279_s25 }
 0x3c2   : > { %v4131_v44 = vpop.permute.xlu0 %4130 }
 0x3c4   : > { %4252 = vrot.lane.b32.xlu0 %v12411_v4, %s7279_s25 }
 0x3c6   : > { %v12551_v14 = vpop.permute.xlu0 %4132 }
 0x3c7   : > { %v12555_v33 = vsel %vm15159_vm6, %v4131_v44, %v12551_v14  ;;  %vm15190_vm6 = vmmov %vm15185_vm0 }
 0x3c8   : > { %4250 = vrot.lane.b32.xlu0 %v12406_v20, %s7279_s25 }
 0x3cc   : > { %4244 = vrot.lane.b32.xlu0 %v12401_v60, %s7279_s25 }
 0x3d0   : > { %4242 = vrot.lane.b32.xlu0 %v12397_v63, %s7279_s25 }
 0x3d4   : > { %4236 = vrot.lane.b32.xlu0 %v12363_v15, %s7279_s25 }
 0x3d8   : > { %4234 = vrot.lane.b32.xlu0 %v12354_v58, %s7279_s25 }
 0x3dc   : > { %v3922_v7 = vpop.f32.mrf.mxu1  ;;  %4368 = vperm.xlu0 %7037, %v4362_v39  }
 0x3dd   : > { %v3923_v13 = vadd.f32 %v3922_v7, %v3810_v61  ;;  %v4035_v37 = vpop.f32.mrf.mxu0  ;;  %v3818_v61 = vadd.f32 %v12474_v19, %v12459_v31  ;;  %v3824_v31 = vadd.f32 %v12489_v38, %v12472_v55  ;;  %v3830_v55 = vadd.f32 %v12501_v48, %v12484_v2 }
 0x3de   : > { %v3924_v10 = vpop.f32.mrf.mxu1  ;;  %v3836_v2 = vadd.f32 %v12513_v56, %v12499_v18 }
 0x3df   : > { %v12575_v36 = vadd.f32 %v4035_v37, %v3923_v13  ;;  %v3925_v0 = vadd.f32 %v3924_v10, %v3812_v23  ;;  %v4037_v44 = vpop.f32.mrf.mxu0 }
 0x3e0   : > { %v3928_v12 = vpop.f32.mrf.mxu1  ;;  %4378 = vperm.xlu0 %7037, %v4364_v27  }
 0x3e1   : > { %15160 = vst [vmem:[#allocation27_spill] sm:$0xff] %v12575_v36  ;;  %4118 = vrot.lane.b32.xlu1 %v12575_v36, %s7278_s24  ;;  %v12581_v5 = vadd.f32 %v4037_v44, %v3925_v0  ;;  %v3929_v16 = vadd.f32 %v3928_v12, %v3816_v26  ;;  %v4041_v51 = vpop.f32.mrf.mxu0 }
 0x3e2   : > { %v3930_v39 = vpop.f32.mrf.mxu1 }
 0x3e3   : > { %15161 = vst [vmem:[#allocation116_spill] sm:$0xff] %v12581_v5  ;;  %v12587_v7 = vadd.f32 %v4041_v51, %v3929_v16  ;;  %v3931_v23 = vadd.f32 %v3930_v39, %v3818_v61  ;;  %v4043_v13 = vpop.f32.mrf.mxu0 }
 0x3e4   : > { %v3934_v37 = vpop.f32.mrf.mxu1 }
 0x3e5   : > { %4120 = vrot.lane.b32.xlu1 %v12581_v5, %s7278_s24  ;;  %15162 = vst [vmem:[#allocation28_spill] sm:$0xff] %v12587_v7  ;;  %v12593_v12 = vadd.f32 %v4043_v13, %v3931_v23  ;;  %v3935_v43 = vadd.f32 %v3934_v37, %v3822_v24  ;;  %v4047_v27 = vpop.f32.mrf.mxu0 }
 0x3e6   : > { %v3936_v10 = vpop.f32.mrf.mxu1 }
 0x3e7   : > { %15163 = vst [vmem:[#allocation123_spill] sm:$0xff] %v12593_v12  ;;  %v12599_v19 = vadd.f32 %v4047_v27, %v3935_v43  ;;  %v3937_v0 = vadd.f32 %v3936_v10, %v3824_v31  ;;  %v4049_v44 = vpop.f32.mrf.mxu0 }
 0x3e8   : > { %v3940_v26 = vpop.f32.mrf.mxu1 }
 0x3e9   : > { %4126 = vrot.lane.b32.xlu1 %v12587_v7, %s7278_s24  ;;  %15164 = vst [vmem:[#allocation122_spill] sm:$0xff] %v12599_v19  ;;  %v12605_v28 = vadd.f32 %v4049_v44, %v3937_v0  ;;  %v3941_v16 = vadd.f32 %v3940_v26, %v3828_v41  ;;  %v4053_v51 = vpop.f32.mrf.mxu0  ;;  %v3842_v26 = vadd.f32 %v12525_v50, %v12515_v32 }
 0x3ea   : > { %v3942_v39 = vpop.f32.mrf.mxu1 }
 0x3eb   : > { %15165 = vst [vmem:[#allocation25_spill] sm:$0xff] %v12605_v28  ;;  %v12611_v38 = vadd.f32 %v4053_v51, %v3941_v16  ;;  %v3943_v61 = vadd.f32 %v3942_v39, %v3830_v55  ;;  %v4055_v23 = vpop.f32.mrf.mxu0  ;;  %v3846_v16 = vadd.f32 %v12531_v6, %v12521_v54 }
 0x3ec   : > { %v3946_v13 = vpop.f32.mrf.mxu1 }
 0x3ed   : > { %4128 = vrot.lane.b32.xlu1 %v12593_v12, %s7278_s24  ;;  %15166 = vst [vmem:[#allocation23_spill] sm:$0xff] %v12611_v38  ;;  %v12617_v3 = vadd.f32 %v4055_v23, %v3943_v61  ;;  %v3947_v37 = vadd.f32 %v3946_v13, %v3834_v57  ;;  %v4059_v24 = vpop.f32.mrf.mxu0  ;;  %v3848_v61 = vadd.f32 %v12537_v30, %v12529_v1 }
 0x3ee   : > { %v3948_v43 = vpop.f32.mrf.mxu1 }
 0x3ef   : > { %15167 = vst [vmem:[#allocation47_spill] sm:$0xff] %v12617_v3  ;;  %v12623_v48 = vadd.f32 %v4059_v24, %v3947_v37  ;;  %v3949_v27 = vadd.f32 %v3948_v43, %v3836_v2  ;;  %v4061_v10 = vpop.f32.mrf.mxu0 }
 0x3f0   : > { %v3952_v31 = vpop.f32.mrf.mxu1 }
 0x3f1   : > { %4134 = vrot.lane.b32.xlu1 %v12599_v19, %s7278_s24  ;;  %v12629_v21 = vadd.f32 %v4061_v10, %v3949_v27  ;;  %v3953_v0 = vadd.f32 %v3952_v31, %v3840_v46  ;;  %v4065_v44 = vpop.f32.mrf.mxu0  ;;  %v4355_v46 = vld [vmem:[%s13825_s3 + $0x8] sm:$0xff] }
 0x3f2   : > { %v3954_v56 = vpop.f32.mrf.mxu1  ;;  %6661 = vmatprep.mubr.msk.f32.mxu0 %vm4386_vm13, %v4355_v46  ;;  %6665 = vmatprep.mubr.msk.f32.mxu1 %vm4386_vm13, %v4355_v46 }
 0x3f3   : > { %v12633_v18 = vadd.f32 %v4065_v44, %v3953_v0  ;;  %v3955_v29 = vadd.f32 %v3954_v56, %v3842_v26  ;;  %v4067_v47 = vpop.f32.mrf.mxu0 }
 0x3f4   : > { %v3958_v41 = vpop.f32.mrf.mxu1 }
 0x3f5   : > { %4136 = vrot.lane.b32.xlu1 %v12605_v28, %s7278_s24  ;;  %v12643_v51 = vadd.f32 %v4067_v47, %v3955_v29  ;;  %v3959_v39 = vadd.f32 %v3958_v41, %v3846_v16  ;;  %v4071_v55 = vpop.f32.mrf.mxu0  ;;  %v4363_v41 = vld [vmem:[%s13826_s4 + $0x8] sm:$0xff] }
 0x3f6   : > { %v3960_v50 = vpop.f32.mrf.mxu1 }
 0x3f7   : > { %v12647_v32 = vadd.f32 %v4071_v55, %v3959_v39  ;;  %v3961_v54 = vadd.f32 %v3960_v50, %v3848_v61  ;;  %v4073_v6 = vpop.f32.mrf.mxu0  ;;  %v4365_v39 = vld [vmem:[%s13826_s4 + $0x18] sm:$0xff] }
 0x3f8   : > { %v3964_v13 = vpop.f32.mrf.mxu1 }
 0x3f9   : > { %4142 = vrot.lane.b32.xlu1 %v12611_v38, %s7278_s24  ;;  %v12655_v23 = vadd.f32 %v4073_v6, %v3961_v54  ;;  %v3965_v57 = vadd.f32 %v3964_v13, %v12541_v34  ;;  %v4077_v37 = vpop.f32.mrf.mxu0  ;;  %v12679_v34 = vpop.permute.xlu0 %4138 }
 0x3fa   : > { %v3966_v30 = vpop.f32.mrf.mxu1 }
 0x3fb   : > { %v12662_v1 = vadd.f32 %v4077_v37, %v3965_v57  ;;  %v3967_v24 = vadd.f32 %v3966_v30, %v12545_v52  ;;  %v4079_v43 = vpop.f32.mrf.mxu0 }
 0x3fd   : > { %4144 = vrot.lane.b32.xlu1 %v12617_v3, %s7278_s24  ;;  %v12669_v2 = vadd.f32 %v4079_v43, %v3967_v24  ;;  %v12683_v52 = vpop.permute.xlu0 %4140 }
 0x401   : > { %4150 = vrot.lane.b32.xlu1 %v12623_v48, %s7278_s24  ;;  %v12687_v27 = vpop.permute.xlu0 %4146 }
 0x405   : > { %4152 = vrot.lane.b32.xlu1 %v12629_v21, %s7278_s24  ;;  %v4149_v10 = vpop.permute.xlu0 %4148 }
 0x409   : > { %4158 = vrot.lane.b32.xlu1 %v12633_v18, %s7278_s24  ;;  %v4155_v31 = vpop.permute.xlu0 %4154 }
 0x40d   : > { %4278 = vrot.lane.b32.xlu1 %v12633_v18, %s7279_s25  ;;  %v4157_v44 = vpop.permute.xlu0 %4156 }
 0x411   : > { %4160 = vrot.lane.b32.xlu1 %v12643_v51, %s7278_s24  ;;  %v12710_v26 = vpop.permute.xlu0 %4276 }
 0x412   : > { %15168 = vst [vmem:[#allocation120_spill] sm:$0xff] %v12710_v26 }
 0x415   : > { %4166 = vrot.lane.b32.xlu1 %v12647_v32, %s7278_s24  ;;  %v4163_v47 = vpop.permute.xlu0 %4162 }
 0x419   : > { %4286 = vrot.lane.b32.xlu1 %v12647_v32, %s7279_s25  ;;  %v12724_v50 = vpop.permute.xlu0 %4282 }
 0x41a   : > { %15169 = vst [vmem:[#allocation124_spill] sm:$0xff] %v12724_v50 }
 0x41d   : > { %4168 = vrot.lane.b32.xlu1 %v12655_v23, %s7278_s24  ;;  %v4165_v6 = vpop.permute.xlu0 %4164 }
 0x421   : > { %4288 = vrot.lane.b32.xlu1 %v12655_v23, %s7279_s25  ;;  %v12736_v37 = vpop.permute.xlu0 %4284 }
 0x422   : > { %15171 = vst [vmem:[#allocation121_spill] sm:$0xff] %v12736_v37 }
 0x425   : > { %4174 = vrot.lane.b32.xlu1 %v12662_v1, %s7278_s24  ;;  %v4171_v24 = vpop.permute.xlu0 %4170 }
 0x429   : > { %4294 = vrot.lane.b32.xlu1 %v12662_v1, %s7279_s25 }
 0x42d   : > { %4176 = vrot.lane.b32.xlu1 %v12669_v2, %s7278_s24 }
 0x431   : > { %4280 = vrot.lane.b32.xlu1 %v12643_v51, %s7279_s25 }
 0x435   : > { %4270 = vrot.lane.b32.xlu1 %v12623_v48, %s7279_s25 }
 0x439   : > { %4272 = vrot.lane.b32.xlu1 %v12629_v21, %s7279_s25 }
 0x43d   : > { %4262 = vrot.lane.b32.xlu1 %v12611_v38, %s7279_s25 }
 0x441   : > { %4264 = vrot.lane.b32.xlu1 %v12617_v3, %s7279_s25 }
 0x445   : > { %4254 = vrot.lane.b32.xlu1 %v12599_v19, %s7279_s25 }
 0x449   : > { %4256 = vrot.lane.b32.xlu1 %v12605_v28, %s7279_s25 }
 0x44d   : > { %4296 = vrot.lane.b32.xlu1 %v12669_v2, %s7279_s25 }
 0x451   : > { %4246 = vrot.lane.b32.xlu1 %v12587_v7, %s7279_s25 }
 0x453   : > { %v12702_v0 = vpop.permute.xlu1 %4118 }
 0x455   : > { %4248 = vrot.lane.b32.xlu1 %v12593_v12, %s7279_s25 }
 0x457   : > { %v12706_v56 = vpop.permute.xlu1 %4120 }
 0x459   : > { %4238 = vrot.lane.b32.xlu1 %v12575_v36, %s7279_s25 }
 0x45b   : > { %v12712_v29 = vpop.permute.xlu1 %4126 }
 0x45d   : > { %4240 = vrot.lane.b32.xlu1 %v12581_v5, %s7279_s25 }
 0x45f   : > { %v12719_v16 = vpop.permute.xlu1 %4128 }
 0x461   : > { %4373 = vperm.xlu1 %7036, %v4363_v41   ;;  %v12738_v41 = vpop.permute.xlu0 %4290 }
 0x462   : > { %15172 = vst [vmem:[#allocation119_spill] sm:$0xff] %v12738_v41 }
 0x463   : > { %v4135_v55 = vpop.permute.xlu1 %4134 }
 0x465   : > { %4383 = vperm.xlu1 %7036, %v4365_v39   ;;  %v4173_v36 = vpop.permute.xlu0 %4172 }
 0x466   : > { %v4199_v41 = vsel %vm15179_vm5, %v4171_v24, %v4173_v36  ;;  %vm15193_vm5 = vmmov %vm15185_vm0 }
 0x467   : > { %v12726_v61 = vpop.permute.xlu1 %4136 }
 0x468   : > { %v12730_v54 = vsel %vm15170_vm11, %v4135_v55, %v12726_v61  ;;  %vm15191_vm11 = vmmov %vm15185_vm0 }
 0x469   : > { %v12742_v26 = vpop.permute.xlu0 %4274 }
 0x46a   : > { %15174 = vst [vmem:[#allocation126_spill] sm:$0xff] %v12742_v26 }
 0x46b   : > { %v12732_v13 = vpop.permute.xlu1 %4142 }
 0x46d   : > { %v12746_v19 = vpop.permute.xlu0 %4292 }
 0x46f   : > { %v12734_v57 = vpop.permute.xlu1 %4144 }
 0x471   : > { %v12750_v37 = vpop.permute.xlu0 %4268 }
 0x472   : > { %15177 = vst [vmem:[#allocation130_spill] sm:$0xff] %v12750_v37  ;;  %v4193_v37 = vsel %vm15183_vm15, %v4155_v31, %v4157_v44  ;;  %vm15197_vm15 = vmmov %vm15185_vm0 }
 0x473   : > { %v4151_v30 = vpop.permute.xlu1 %4150 }
 0x477   : > { %v4153_v43 = vpop.permute.xlu1 %4152 }
 0x47b   : > { %v4159_v46 = vpop.permute.xlu1 %4158 }
 0x47f   : > { %v12740_v39 = vpop.permute.xlu1 %4278 }
 0x480   : > { %15173 = vst [vmem:[#allocation127_spill] sm:$0xff] %v12740_v39  ;;  %v12754_v39 = vpop.permute.xlu0 %4266 }
 0x483   : > { %v4161_v5 = vpop.permute.xlu1 %4160 }
 0x484   : > { %v4195_v31 = vsel %vm15191_vm11, %v4159_v46, %v4161_v5 }
 0x487   : > { %v4167_v7 = vpop.permute.xlu1 %4166 }
 0x488   : > { %v4197_v26 = vsel %vm15180_vm3, %v4165_v6, %v4167_v7  ;;  %vm15194_vm3 = vmmov %vm15185_vm0 }
 0x48b   : > { %v12744_v12 = vpop.permute.xlu1 %4286 }
 0x48c   : > { %15175 = vst [vmem:[#allocation125_spill] sm:$0xff] %v12744_v12  ;;  %v4196_v12 = vsel %vm15181_vm9, %v4163_v47, %v4165_v6  ;;  %vm15195_vm9 = vmmov %vm15185_vm0 }
 0x48f   : > { %v4169_v50 = vpop.permute.xlu1 %4168 }
 0x493   : > { %v12748_v28 = vpop.permute.xlu1 %4288 }
 0x494   : > { %15176 = vst [vmem:[#allocation128_spill] sm:$0xff] %v12748_v28  ;;  %v4194_v28 = vsel %vm15182_vm4, %v4157_v44, %v4159_v46  ;;  %vm15196_vm4 = vmmov %vm15185_vm0 }
 0x497   : > { %v4175_v38 = vpop.permute.xlu1 %4174 }
 0x498   : > { %v4200_v3 = vsel %vm15178_vm12, %v4173_v36, %v4175_v38  ;;  %v4191_v36 = vsel %vm15184_vm1, %v4149_v10, %v4151_v30  ;;  %vm15192_vm12 = vmmov %vm15185_vm0 }
 0x499   : > { %4399 = vmatprep.subr.mxu0 %v4200_v3  ;;  %v4190_v3 = vsel %vm15185_vm0, %v12687_v27, %v4149_v10  ;;  %v4198_v27 = vsel %vm15189_vm14, %v4167_v7, %v4169_v50  ;;  %v4185_v10 = vsel %vm15190_vm6, %v12551_v14, %v4135_v55  ;;  %v4181_v7 = vsel %vm15193_vm5, %v12533_v42, %v12543_v17  ;;  %vm15198_vm1 = vmmov %vm15185_vm0  ;;  %v15214_v55 = vld [vmem:[#allocation130_spill] sm:$0xff] }
 0x49a   : > { %4400 = vmatpush1.msra.mxu0 %v4199_v41  ;;  %v12765_v41 = vpop.permute.xlu0 %4260  ;;  %v4189_v42 = vsel %vm15197_vm15, %v12732_v13, %v12734_v57 }
 0x49b   : > { %v12758_v58 = vpop.permute.xlu1 %4294  ;;  %4401 = vmatprep.subr.mxu0 %v4197_v26  ;;  %v15212_v26 = vld [vmem:[#allocation28_spill] sm:$0xff] }
 0x49c   : > { %4402 = vmatpush1.msra.mxu0 %v4196_v12  ;;  %v4188_v12 = vsel %vm15187_vm8, %v12683_v52, %v12732_v13 }
 0x49d   : > { %4403 = vmatprep.subr.mxu0 %v4194_v28  ;;  %v4187_v28 = vsel %vm15188_vm2, %v12679_v34, %v12683_v52  ;;  %v4182_v34 = vsel %vm15192_vm12, %v12543_v17, %v12712_v29  ;;  %v4192_v52 = vsel %vm15194_vm3, %v4151_v30, %v4153_v43  ;;  %v4183_v17 = vsel %vm15198_vm1, %v12712_v29, %v12719_v16  ;;  %v15216_v30 = vld [vmem:[#allocation128_spill] sm:$0xff] }
 0x49e   : > { %4404 = vmatpush1.msra.mxu0 %v4193_v37  ;;  %v12787_v14 = vpop.permute.xlu0 %4258 }
 0x49f   : > { %v4177_v24 = vpop.permute.xlu1 %4176  ;;  %4405 = vmatprep.subr.mxu0 %v4191_v36  ;;  %v4307_v37 = vsel %vm1241_vm10, %v12787_v14, %v12765_v41 }
 0x4a0   : > { %v4201_v47 = vsel %vm15186_vm7, %v4175_v38, %v4177_v24  ;;  %4406 = vmatpush1.msra.mxu0 %v4190_v3  ;;  %4488 = vmatprep.subr.mxu1 %v4177_v24 }
 0x4a1   : > { %4407 = vmatprep.subr.mxu0 %v4188_v12  ;;  %4489 = vmatpush1.msra.mxu1 %v4201_v47 }
 0x4a2   : > { %4408 = vmatpush1.msra.mxu0 %v4187_v28  ;;  %4490 = vmatprep.subr.mxu1 %v4169_v50 }
 0x4a3   : > { %4491 = vmatpush1.msra.mxu1 %v4198_v27  ;;  %v12777_v38 = vpop.permute.xlu1 %4280  ;;  %4409 = vmatprep.subr.mxu0 %v4185_v10 }
 0x4a4   : > { %4410 = vmatpush1.msra.mxu0 %v12555_v33  ;;  %4492 = vmatprep.subr.mxu1 %v4161_v5  ;;  %v4179_v33 = vsel %vm15195_vm9, %v12523_v45, %v12702_v0  ;;  %v4178_v5 = vsel %vm15196_vm4, %v12511_v22, %v12523_v45  ;;  %v12809_v45 = vpop.permute.xlu0 %4252 }
 0x4a5   : > { %4411 = vmatprep.subr.mxu0 %v4182_v34  ;;  %4493 = vmatpush1.msra.mxu1 %v4195_v31 }
 0x4a6   : > { %4412 = vmatpush1.msra.mxu0 %v4181_v7  ;;  %4494 = vmatprep.subr.mxu1 %v4153_v43  ;;  %v4354_v7 = vld [vmem:[%s13825_s3] sm:$0xff] }
 0x4a7   : > { %4495 = vmatpush1.msra.mxu1 %v4192_v52  ;;  %v12796_v44 = vpop.permute.xlu1 %4270  ;;  %4413 = vmatprep.subr.mxu0 %v4179_v33  ;;  %v4357_v52 = vld [vmem:[%s13825_s3 + $0x18] sm:$0xff] }
 0x4a8   : > { %4414 = vmatpush1.msra.mxu0 %v4178_v5  ;;  %4496 = vmatprep.subr.mxu1 %v12734_v57  ;;  %v4311_v50 = vsel %vm1241_vm10, %v15214_v55, %v12796_v44  ;;  %v15217_v5 = vmov 1.0  }
 0x4a9   : > { %4415 = vmatprep.subr.mxu0 %v12495_v62  ;;  %4497 = vmatpush1.msra.mxu1 %v4189_v42  ;;  %v15205_v62 = vld [vmem:[#allocation121_spill] sm:$0xff]  ;;  %v15219_v42 = vld [vmem:[#allocation36_spill] sm:$0xff] }
 0x4aa   : > { %4416 = vmatpush1.msra.mxu0 %v12478_v53  ;;  %4498 = vmatprep.subr.mxu1 %v12726_v61  ;;  %v4180_v53 = vsel %vm15185_vm0, %v12702_v0, %v12706_v56  ;;  %v15211_v0 = vld [vmem:[#allocation126_spill] sm:$0xff]  ;;  %v4310_v61 = vsel %vm1241_vm10, %v12754_v39, %v15214_v55  ;;  %v15297_v55 = vld [vmem:[#allocation67_spill] sm:$0xff] }
 0x4ab   : > { %4499 = vmatpush1.msra.mxu1 %v12730_v54  ;;  %v12806_v22 = vpop.permute.xlu1 %4272  ;;  %4417 = vmatprep.subr.mxu0 %v12463_v49  ;;  %v15215_v54 = vld [vmem:[#allocation27_spill] sm:$0xff] }
 0x4ac   : > { %4418 = vmatpush1.msra.mxu0 %v12448_v8  ;;  %4500 = vmatprep.subr.mxu1 %v12719_v16  ;;  %v15203_v8 = vld [vmem:[#allocation25_spill] sm:$0xff]  ;;  %v15213_v16 = vld [vmem:[#allocation116_spill] sm:$0xff]  ;;  %v4312_v47 = vsel %vm1241_vm10, %v12796_v44, %v12806_v22 }
 0x4ad   : > { %4419 = vmatprep.subr.mxu0 %v12441_v9  ;;  %4501 = vmatpush1.msra.mxu1 %v4183_v17  ;;  %v4251_v9 = vpop.permute.xlu0 %4250  ;;  %v15218_v44 = vld [vmem:[#allocation33_spill] sm:$0xff]  ;;  %v4359_v17 = vld [vmem:[%s13825_s3 + $0x28] sm:$0xff] }
 0x4ae   : > { %4420 = vmatpush1.msra.mxu0 %v12436_v11  ;;  %4502 = vmatprep.subr.mxu1 %v12706_v56  ;;  %v4304_v46 = vsel %vm1241_vm10, %v4251_v9, %v12809_v45  ;;  %vm15220_vm7 = vcmp.eq.s32.totalorder %v15218_v44, %v15219_v42  ;;  %v4358_v9 = vld [vmem:[%s13825_s3 + $0x20] sm:$0xff] }
 0x4af   : > { %4503 = vmatpush1.msra.mxu1 %v4180_v53  ;;  %v12822_v49 = vpop.permute.xlu1 %4262  ;;  %4421 = vmatprep.subr.mxu0 %v12431_v25  ;;  %v15202_v25 = vld [vmem:[#allocation23_spill] sm:$0xff]  ;;  %v15221_v53 = vld [vmem:[#allocation34_spill] sm:$0xff] }
 0x4b0   : > { %4422 = vmatpush1.msra.mxu0 %v12426_v35  ;;  %4504 = vmatprep.subr.mxu1 %v12669_v2  ;;  %v15201_v35 = vld [vmem:[#allocation119_spill] sm:$0xff]  ;;  %v4308_v57 = vsel %vm1241_vm10, %v12765_v41, %v12822_v49  ;;  %vm15222_vm8 = vcmp.eq.s32.totalorder %v15218_v44, %v15221_v53  ;;  %v15376_v44 = vld [vmem:[#allocation106_spill] sm:$0xff] }
 0x4b1   : > { %4423 = vmatprep.subr.mxu0 %v12421_v40  ;;  %4505 = vmatpush1.msra.mxu1 %v12662_v1  ;;  %v4245_v40 = vpop.permute.xlu0 %4244  ;;  %v15210_v1 = vld [vmem:[#allocation120_spill] sm:$0xff] }
 0x4b2   : > { %4424 = vmatpush1.msra.mxu0 %v12416_v59  ;;  %4506 = vmatprep.subr.mxu1 %v12655_v23  ;;  %v15209_v23 = vld [vmem:[#allocation127_spill] sm:$0xff]  ;;  %v4313_v56 = vsel %vm1241_vm10, %v15211_v0, %v15210_v1  ;;  %v15283_v0 = vld [vmem:[#allocation74_spill] sm:$0xff] }
 0x4b3   : > { %4507 = vmatpush1.msra.mxu1 %v12647_v32  ;;  %v12832_v11 = vpop.permute.xlu1 %4264  ;;  %4425 = vmatprep.subr.mxu0 %v12411_v4  ;;  %v15199_v4 = vld [vmem:[#allocation44_spill] sm:$0xff]  ;;  %v4314_v2 = vsel %vm1241_vm10, %v15210_v1, %v15209_v23  ;;  %v4315_v3 = vsel %vm1241_vm10, %v15209_v23, %v12777_v38  ;;  %v15273_v23 = vld [vmem:[#allocation54_spill] sm:$0xff] }
 0x4b4   : > { %4426 = vmatpush1.msra.mxu0 %v12406_v20  ;;  %4508 = vmatprep.subr.mxu1 %v12643_v51  ;;  %v15200_v20 = vld [vmem:[#allocation47_spill] sm:$0xff]  ;;  %v15207_v51 = vld [vmem:[#allocation122_spill] sm:$0xff]  ;;  %v4309_v28 = vsel %vm1241_vm10, %v12822_v49, %v12832_v11 }
 0x4b5   : > { %4427 = vmatprep.subr.mxu0 %v12401_v60  ;;  %4509 = vmatpush1.msra.mxu1 %v12633_v18  ;;  %v4320_v60 = vsel %vm1241_vm10, %v12746_v19, %v12758_v58  ;;  %v4243_v29 = vpop.permute.xlu0 %4242  ;;  %v15223_v49 = vld [vmem:[#allocation35_spill] sm:$0xff]  ;;  %v15277_v1 = vld [vmem:[#allocation70_spill] sm:$0xff] }
 0x4b6   : > { %4428 = vmatpush1.msra.mxu0 %v12397_v63  ;;  %4510 = vmatprep.subr.mxu1 %v12629_v21  ;;  %v4319_v63 = vsel %vm1241_vm10, %v15201_v35, %v12746_v19  ;;  %v15206_v21 = vld [vmem:[#allocation124_spill] sm:$0xff]  ;;  %v15208_v19 = vld [vmem:[#allocation123_spill] sm:$0xff]  ;;  %v4301_v41 = vsel %vm1241_vm10, %v4243_v29, %v4245_v40  ;;  %vm15225_vm2 = vcmp.eq.s32.totalorder %v15223_v49, %v15221_v53 }
 0x4b7   : > { %4511 = vmatpush1.msra.mxu1 %v12623_v48  ;;  %v12842_v59 = vpop.permute.xlu1 %4254  ;;  %4429 = vmatprep.subr.mxu0 %v12363_v15  ;;  %v15204_v15 = vld [vmem:[#allocation125_spill] sm:$0xff]  ;;  %v4316_v18 = vsel %vm1241_vm10, %v15206_v21, %v15205_v62  ;;  %v15238_v35 = vld [vmem:[#allocation40_spill] sm:$0xff]  ;;  %v15259_v21 = vld [vmem:[#allocation63_spill] sm:$0xff] }
 0x4b8   : > { %4430 = vmatpush1.msra.mxu0 %v15199_v4  ;;  %4512 = vmatprep.subr.mxu1 %v15200_v20  ;;  %v4317_v48 = vsel %vm1241_vm10, %v15205_v62, %v15204_v15  ;;  %v4318_v43 = vsel %vm1241_vm10, %v15204_v15, %v15216_v30  ;;  %v4360_v4 = vld [vmem:[%s13825_s3 + $0x30] sm:$0xff]  ;;  %v15232_v20 = vld [vmem:[#allocation39_spill] sm:$0xff]  ;;  %vm15239_vm15 = vcmp.eq.s32.totalorder %v15238_v35, %v15219_v42 }
 0x4b9   : > { %4447 = vmatprep.subr.mxu0 %v4320_v60  ;;  %4513 = vmatpush1.msra.mxu1 %v15202_v25  ;;  %v4237_v36 = vpop.permute.xlu0 %4236  ;;  %vm15233_vm5 = vcmp.eq.s32.totalorder %v15232_v20, %v15219_v42  ;;  %v15234_v60 = vld [vmem:[#allocation52_spill] sm:$0xff]  ;;  %vm15236_vm9 = vcmp.eq.s32.totalorder %v15232_v20, %v15221_v53  ;;  %vm15242_vm0 = vcmp.eq.s32.totalorder %v15238_v35, %v15221_v53  ;;  %v15243_v25 = vld [vmem:[#allocation42_spill] sm:$0xff]  ;;  %v15249_v15 = vld [vmem:[#allocation43_spill] sm:$0xff] }
 0x4ba   : > { %4448 = vmatpush2.msra.mxu0 %v4319_v63  ;;  %4514 = vmatprep.subr.mxu1 %v15203_v8  ;;  %vm15235_vm3 = vcmp.eq.s32.totalorder %v15234_v60, %v15219_v42  ;;  %vm15237_vm4 = vcmp.eq.s32.totalorder %v15234_v60, %v15221_v53  ;;  %v15240_v63 = vld [vmem:[#allocation55_spill] sm:$0xff]  ;;  %v15247_v8 = vld [vmem:[#allocation56_spill] sm:$0xff]  ;;  %v15406_v20 = vld [vmem:[#allocation21_spill] sm:$0xff] }
 0x4bb   : > { %4515 = vmatpush1.msra.mxu1 %v15207_v51  ;;  %v4257_v32 = vpop.permute.xlu1 %4256  ;;  %4449 = vmatprep.subr.mxu0 %v4317_v48  ;;  %vm15241_vm1 = vcmp.eq.s32.totalorder %v15240_v63, %v15219_v42  ;;  %v15253_v62 = vld [vmem:[#allocation59_spill] sm:$0xff]  ;;  %v15255_v48 = vld [vmem:[#allocation48_spill] sm:$0xff]  ;;  %v15265_v51 = vld [vmem:[#allocation65_spill] sm:$0xff] }
 0x4bc   : > { %4450 = vmatpush2.msra.mxu0 %v4316_v18  ;;  %4516 = vmatprep.subr.mxu1 %v15208_v19  ;;  %v4306_v10 = vsel %vm1241_vm10, %v12842_v59, %v4257_v32  ;;  %v15261_v18 = vld [vmem:[#allocation50_spill] sm:$0xff]  ;;  %v15271_v19 = vld [vmem:[#allocation68_spill] sm:$0xff] }
 0x4bd   : > { %4451 = vmatprep.subr.mxu0 %v4314_v2  ;;  %4517 = vmatpush1.msra.mxu1 %v15212_v26  ;;  %v4235_v27 = vpop.permute.xlu0 %4234  ;;  %v15279_v2 = vld [vmem:[#allocation58_spill] sm:$0xff]  ;;  %v15289_v26 = vld [vmem:[#allocation77_spill] sm:$0xff]  ;;  %v15291_v29 = vld [vmem:[#allocation64_spill] sm:$0xff] }
 0x4be   : > { %4452 = vmatpush2.msra.mxu0 %v4313_v56  ;;  %4518 = vmatprep.subr.mxu1 %v15213_v16  ;;  %v4298_v14 = vsel %vm1241_vm10, %v4235_v27, %v4237_v36  ;;  %v15285_v56 = vld [vmem:[#allocation60_spill] sm:$0xff]  ;;  %v15295_v16 = vld [vmem:[#allocation79_spill] sm:$0xff]  ;;  %v15358_v27 = vld [vmem:[#allocation110_spill] sm:$0xff] }
 0x4bf   : > { %4519 = vmatpush1.msra.mxu1 %v15215_v54  ;;  %v4297_v6 = vpop.permute.xlu1 %4296  ;;  %4453 = vmatprep.subr.mxu0 %v4311_v50  ;;  %v15301_v50 = vld [vmem:[#allocation82_spill] sm:$0xff]  ;;  %v15307_v54 = vld [vmem:[#allocation84_spill] sm:$0xff] }
 0x4c0   : > { %v4321_v13 = vsel %vm1241_vm10, %v12758_v58, %v4297_v6  ;;  %4454 = vmatpush2.msra.mxu0 %v4310_v61  ;;  %4536 = vmatprep.subr.mxu1 %v4297_v6  ;;  %v4305_v58 = vsel %vm1241_vm10, %v12809_v45, %v12842_v59  ;;  %v4356_v45 = vld [vmem:[%s13825_s3 + $0x10] sm:$0xff]  ;;  %v15226_v59 = vld [vmem:[#allocation38_spill] sm:$0xff]  ;;  %v15303_v61 = vld [vmem:[#allocation7_spill] sm:$0xff] }
 0x4c1   : > { %4455 = vmatprep.subr.mxu0 %v4308_v57  ;;  %4537 = vmatpush2.msra.mxu1 %v4321_v13  ;;  %vm15227_vm14 = vcmp.eq.s32.totalorder %v15226_v59, %v15219_v42  ;;  %vm15230_vm11 = vcmp.eq.s32.totalorder %v15226_v59, %v15221_v53  ;;  %v15309_v6 = vld [vmem:[#allocation71_spill] sm:$0xff]  ;;  %v15315_v57 = vld [vmem:[#allocation73_spill] sm:$0xff]  ;;  %v15397_v59 = vld [vmem:[#allocation14_spill] sm:$0xff]  ;;  %v4369_v60 = vpop.permute.xlu0 %4368 }
 0x4c2   : > { %4456 = vmatpush2.msra.mxu0 %v4307_v37  ;;  %4538 = vmatprep.subr.mxu1 %v15216_v30  ;;  %v15313_v13 = vld [vmem:[#allocation87_spill] sm:$0xff]  ;;  %v15319_v37 = vld [vmem:[#allocation90_spill] sm:$0xff]  ;;  %v15321_v30 = vld [vmem:[#allocation76_spill] sm:$0xff] }
 0x4c3   : > { %4539 = vmatpush2.msra.mxu1 %v4318_v43  ;;  %v4247_v39 = vpop.permute.xlu1 %4246  ;;  %4457 = vmatprep.subr.mxu0 %v4305_v58  ;;  %v15325_v43 = vld [vmem:[#allocation81_spill] sm:$0xff]  ;;  %v15328_v58 = vld [vmem:[#allocation83_spill] sm:$0xff] }
 0x4c4   : > { %4458 = vmatpush2.msra.mxu0 %v4304_v46  ;;  %4540 = vmatprep.subr.mxu1 %v12777_v38  ;;  %v4302_v24 = vsel %vm1241_vm10, %v4245_v40, %v4247_v39  ;;  %v15228_v40 = vld [vmem:[#allocation49_spill] sm:$0xff] }
 0x4c5   : > { %4459 = vmatprep.subr.mxu0 %v4302_v24  ;;  %4541 = vmatpush2.msra.mxu1 %v4315_v3  ;;  %vm15229_vm6 = vcmp.eq.s32.totalorder %v15228_v40, %v15219_v42  ;;  %vm15231_vm12 = vcmp.eq.s32.totalorder %v15228_v40, %v15221_v53  ;;  %v15331_v46 = vld [vmem:[#allocation85_spill] sm:$0xff]  ;;  %v15340_v3 = vld [vmem:[#allocation94_spill] sm:$0xff]  ;;  %v15343_v24 = vld [vmem:[#allocation96_spill] sm:$0xff] }
 0x4c6   : > { %4460 = vmatpush2.msra.mxu0 %v4301_v41  ;;  %4542 = vmatprep.subr.mxu1 %v12806_v22  ;;  %v15346_v41 = vld [vmem:[#allocation98_spill] sm:$0xff]  ;;  %v15400_v40 = vld [vmem:[#allocation72_spill] sm:$0xff] }
 0x4c7   : > { %4543 = vmatpush2.msra.mxu1 %v4312_v47  ;;  %v4249_v12 = vpop.permute.xlu1 %4248  ;;  %v15349_v47 = vld [vmem:[#allocation101_spill] sm:$0xff] }
 0x4c8   : > { %4544 = vmatprep.subr.mxu1 %v12832_v11  ;;  %v4303_v31 = vsel %vm1241_vm10, %v4247_v39, %v4249_v12  ;;  %v4361_v11 = vld [vmem:[%s13825_s3 + $0x38] sm:$0xff]  ;;  %v15334_v39 = vld [vmem:[#allocation88_spill] sm:$0xff] }
 0x4c9   : > { %4545 = vmatpush2.msra.mxu1 %v4309_v28  ;;  %v15355_v28 = vld [vmem:[#allocation12_spill] sm:$0xff] }
 0x4ca   : > { %4546 = vmatprep.subr.mxu1 %v4257_v32  ;;  %v15267_v32 = vld [vmem:[#allocation51_spill] sm:$0xff] }
 0x4cb   : > { %4547 = vmatpush2.msra.mxu1 %v4306_v10  ;;  %v4239_v38 = vpop.permute.xlu1 %4238  ;;  %v15361_v10 = vld [vmem:[#allocation16_spill] sm:$0xff] }
 0x4cc   : > { %4548 = vmatprep.subr.mxu1 %v4249_v12  ;;  %v4299_v34 = vsel %vm1241_vm10, %v4237_v36, %v4239_v38  ;;  %v15337_v36 = vld [vmem:[#allocation91_spill] sm:$0xff]  ;;  %v15352_v12 = vld [vmem:[#allocation105_spill] sm:$0xff] }
 0x4cd   : > { %4461 = vmatprep.subr.mxu0 %v4299_v34  ;;  %4549 = vmatpush2.msra.mxu1 %v4303_v31  ;;  %v15364_v31 = vld [vmem:[#allocation95_spill] sm:$0xff] }
 0x4ce   : > { %4462 = vmatpush2.msra.mxu0 %v4298_v14  ;;  %v15367_v14 = vld [vmem:[#allocation97_spill] sm:$0xff] }
 0x4cf   : > { %v4241_v33 = vpop.permute.xlu1 %4240  ;;  %4464 = vmatmul.mubr.f32.vlgmr.msra.gmra.mxu0 %v4354_v7  ;;  %6669 = vmatprep.subr.msk.mxu0 %vm15220_vm7, %v15217_v5  ;;  %vm15245_vm7 = vcmp.eq.s32.totalorder %v15240_v63, %v15221_v53 }
 0x4d0   : > { %v4300_v22 = vsel %vm1241_vm10, %v4239_v38, %v4241_v33  ;;  %4550 = vmatprep.subr.mxu1 %v4241_v33  ;;  %6662 = vmatprep.mubr.msk.f32.mxu0 %vm4386_vm13, %v4357_v52  ;;  %vm15224_vm10 = vcmp.eq.s32.totalorder %v15223_v49, %v15219_v42  ;;  %v7170_v38 = vld [vmem:[#allocation2] sm:$0xff] }
 0x4d1   : > { %4551 = vmatpush2.msra.mxu1 %v4300_v22  ;;  %6670 = vmatpush1.msk.msra.mxu0 %vm15222_vm8, %v15217_v5  ;;  %vm15246_vm8 = vcmp.eq.s32.totalorder %v15243_v25, %v15221_v53  ;;  %v15373_v33 = vld [vmem:[#allocation102_spill] sm:$0xff]  ;;  %v15379_v22 = vld [vmem:[#allocation108_spill] sm:$0xff] }
 0x4d2   : > { %4553 = vmatmul.mubr.f32.vlgmr.msra.gmra.mxu1 %v4354_v7  ;;  %6671 = vmatprep.subr.msk.mxu0 %vm15224_vm10, %v15217_v5  ;;  %vm15248_vm10 = vcmp.eq.s32.totalorder %v15247_v8, %v15219_v42  ;;  %v15388_v49 = vld [vmem:[#allocation30_spill] sm:$0xff] }
 0x4d3   : > { %4470 = vmatmul.mubr.f32.gmra.mxu0 %v4356_v45  ;;  %6666 = vmatprep.mubr.msk.f32.mxu1 %vm4386_vm13, %v4357_v52  ;;  %v15370_v52 = vld [vmem:[#allocation99_spill] sm:$0xff] }
 0x4d4   : > { %6663 = vmatprep.mubr.msk.f32.mxu0 %vm4386_vm13, %v4359_v17  ;;  %6672 = vmatpush1.msk.msra.mxu0 %vm15225_vm2, %v15217_v5  ;;  %vm15250_vm2 = vcmp.eq.s32.totalorder %v15249_v15, %v15219_v42 }
 0x4d5   : > { %6673 = vmatprep.subr.msk.mxu0 %vm15227_vm14, %v15217_v5  ;;  %6733 = vmatprep.subr.msk.mxu1 %vm15229_vm6, %v15217_v5  ;;  %vm15251_vm14 = vcmp.eq.s32.totalorder %v15247_v8, %v15221_v53  ;;  %vm15252_vm6 = vcmp.eq.s32.totalorder %v15249_v15, %v15221_v53 }
 0x4d6   : > { %4559 = vmatmul.mubr.f32.gmra.mxu1 %v4356_v45  ;;  %6674 = vmatpush1.msk.msra.mxu0 %vm15230_vm11, %v15217_v5  ;;  %vm15254_vm11 = vcmp.eq.s32.totalorder %v15253_v62, %v15219_v42  ;;  %v15382_v45 = vld [vmem:[#allocation111_spill] sm:$0xff] }
 0x4d7   : > { %4476 = vmatmul.mubr.f32.gmra.mxu0 %v4358_v9  ;;  %6667 = vmatprep.mubr.msk.f32.mxu1 %vm4386_vm13, %v4359_v17  ;;  %v15385_v17 = vld [vmem:[#allocation112_spill] sm:$0xff] }
 0x4d8   : > { %6664 = vmatprep.mubr.msk.f32.mxu0 %vm4386_vm13, %v4361_v11  ;;  %6734 = vmatpush1.msk.msra.mxu1 %vm15231_vm12, %v15217_v5  ;;  %vm15256_vm12 = vcmp.eq.s32.totalorder %v15255_v48, %v15219_v42 }
 0x4d9   : > { %6675 = vmatprep.subr.msk.mxu0 %vm15233_vm5, %v15217_v5  ;;  %6735 = vmatprep.subr.msk.mxu1 %vm15235_vm3, %v15217_v5  ;;  %vm15257_vm5 = vcmp.eq.s32.totalorder %v15253_v62, %v15221_v53  ;;  %vm15258_vm3 = vcmp.eq.s32.totalorder %v15255_v48, %v15221_v53 }
 0x4da   : > { %4565 = vmatmul.mubr.f32.gmra.mxu1 %v4358_v9  ;;  %6676 = vmatpush1.msk.msra.mxu0 %vm15236_vm9, %v15217_v5  ;;  %vm15260_vm9 = vcmp.eq.s32.totalorder %v15259_v21, %v15219_v42  ;;  %v15391_v9 = vld [vmem:[#allocation113_spill] sm:$0xff] }
 0x4db   : > { %4482 = vmatmul.mubr.f32.gmra.mxu0 %v4360_v4  ;;  %6668 = vmatprep.mubr.msk.f32.mxu1 %vm4386_vm13, %v4361_v11  ;;  %vm15244_vm13 = vcmp.eq.s32.totalorder %v15243_v25, %v15219_v42  ;;  %v15394_v11 = vld [vmem:[#allocation11_spill] sm:$0xff] }
 0x4dc   : > { %6736 = vmatpush1.msk.msra.mxu1 %vm15237_vm4, %v15217_v5  ;;  %6677 = vmatprep.subr.msk.mxu0 %vm15239_vm15, %v15217_v5  ;;  %vm15262_vm4 = vcmp.eq.s32.totalorder %v15261_v18, %v15219_v42  ;;  %vm15263_vm15 = vcmp.eq.s32.totalorder %v15259_v21, %v15221_v53  ;;  %v4374_v62 = vpop.permute.xlu1 %4373 }
 0x4dd   : > { %6737 = vmatprep.subr.msk.mxu1 %vm15241_vm1, %v15217_v5  ;;  %6678 = vmatpush1.msk.msra.mxu0 %vm15242_vm0, %v15217_v5  ;;  %vm15264_vm1 = vcmp.eq.s32.totalorder %v15261_v18, %v15221_v53  ;;  %vm15266_vm0 = vcmp.eq.s32.totalorder %v15265_v51, %v15219_v42 }
 0x4de   : > { %4571 = vmatmul.mubr.f32.gmra.mxu1 %v4360_v4  ;;  %6679 = vmatprep.subr.msk.mxu0 %vm15244_vm13, %v15217_v5  ;;  %vm15268_vm13 = vcmp.eq.s32.totalorder %v15267_v32, %v15219_v42  ;;  %v15403_v4 = vld [vmem:[#allocation46_spill] sm:$0xff] }
 0x4df   : > { %6738 = vmatpush1.msk.msra.mxu1 %vm15245_vm7, %v15217_v5  ;;  %6680 = vmatpush1.msk.msra.mxu0 %vm15246_vm8, %v15217_v5  ;;  %vm15269_vm7 = vcmp.eq.s32.totalorder %v15265_v51, %v15221_v53  ;;  %vm15270_vm8 = vcmp.eq.s32.totalorder %v15267_v32, %v15221_v53 }
 0x4e0   : > { %6739 = vmatprep.subr.msk.mxu1 %vm15248_vm10, %v15217_v5  ;;  %6681 = vmatprep.subr.msk.mxu0 %vm15250_vm2, %v15217_v5  ;;  %vm15272_vm10 = vcmp.eq.s32.totalorder %v15271_v19, %v15219_v42  ;;  %vm15274_vm2 = vcmp.eq.s32.totalorder %v15273_v23, %v15219_v42 }
 0x4e1   : > { %6740 = vmatpush1.msk.msra.mxu1 %vm15251_vm14, %v15217_v5  ;;  %6682 = vmatpush1.msk.msra.mxu0 %vm15252_vm6, %v15217_v5  ;;  %vm15275_vm14 = vcmp.eq.s32.totalorder %v15271_v19, %v15221_v53  ;;  %vm15276_vm6 = vcmp.eq.s32.totalorder %v15273_v23, %v15221_v53 }
 0x4e2   : > { %6741 = vmatprep.subr.msk.mxu1 %vm15254_vm11, %v15217_v5  ;;  %6683 = vmatprep.subr.msk.mxu0 %vm15256_vm12, %v15217_v5  ;;  %vm15278_vm11 = vcmp.eq.s32.totalorder %v15277_v1, %v15219_v42  ;;  %vm15280_vm12 = vcmp.eq.s32.totalorder %v15279_v2, %v15219_v42 }
 0x4e3   : > { %6742 = vmatpush1.msk.msra.mxu1 %vm15257_vm5, %v15217_v5  ;;  %6684 = vmatpush1.msk.msra.mxu0 %vm15258_vm3, %v15217_v5  ;;  %vm15281_vm5 = vcmp.eq.s32.totalorder %v15277_v1, %v15221_v53  ;;  %vm15282_vm3 = vcmp.eq.s32.totalorder %v15279_v2, %v15221_v53 }
 0x4e4   : > { %6743 = vmatprep.subr.msk.mxu1 %vm15260_vm9, %v15217_v5  ;;  %6685 = vmatprep.subr.msk.mxu0 %vm15262_vm4, %v15217_v5  ;;  %vm15284_vm9 = vcmp.eq.s32.totalorder %v15283_v0, %v15219_v42  ;;  %vm15286_vm4 = vcmp.eq.s32.totalorder %v15285_v56, %v15219_v42 }
 0x4e5   : > { %6744 = vmatpush1.msk.msra.mxu1 %vm15263_vm15, %v15217_v5  ;;  %6686 = vmatpush1.msk.msra.mxu0 %vm15264_vm1, %v15217_v5  ;;  %vm15287_vm15 = vcmp.eq.s32.totalorder %v15283_v0, %v15221_v53  ;;  %vm15288_vm1 = vcmp.eq.s32.totalorder %v15285_v56, %v15221_v53 }
 0x4e6   : > { %6745 = vmatprep.subr.msk.mxu1 %vm15266_vm0, %v15217_v5  ;;  %6687 = vmatprep.subr.msk.mxu0 %vm15268_vm13, %v15217_v5  ;;  %vm15290_vm0 = vcmp.eq.s32.totalorder %v15289_v26, %v15219_v42  ;;  %vm15292_vm13 = vcmp.eq.s32.totalorder %v15291_v29, %v15219_v42 }
 0x4e7   : > { %6746 = vmatpush1.msk.msra.mxu1 %vm15269_vm7, %v15217_v5  ;;  %6688 = vmatpush1.msk.msra.mxu0 %vm15270_vm8, %v15217_v5  ;;  %vm15293_vm7 = vcmp.eq.s32.totalorder %v15289_v26, %v15221_v53  ;;  %vm15294_vm8 = vcmp.eq.s32.totalorder %v15291_v29, %v15221_v53 }
 0x4e8   : > { %6747 = vmatprep.subr.msk.mxu1 %vm15272_vm10, %v15217_v5  ;;  %6689 = vmatprep.subr.msk.mxu0 %vm15274_vm2, %v15217_v5  ;;  %vm15296_vm10 = vcmp.eq.s32.totalorder %v15295_v16, %v15219_v42  ;;  %vm15298_vm2 = vcmp.eq.s32.totalorder %v15297_v55, %v15219_v42 }
 0x4e9   : > { %6748 = vmatpush1.msk.msra.mxu1 %vm15275_vm14, %v15217_v5  ;;  %6690 = vmatpush1.msk.msra.mxu0 %vm15276_vm6, %v15217_v5  ;;  %vm15299_vm14 = vcmp.eq.s32.totalorder %v15295_v16, %v15221_v53  ;;  %vm15300_vm6 = vcmp.eq.s32.totalorder %v15297_v55, %v15221_v53  ;;  %v4379_v16 = vpop.permute.xlu0 %4378 }
 0x4ea   : > { %6749 = vmatprep.subr.msk.mxu1 %vm15278_vm11, %v15217_v5  ;;  %6691 = vmatprep.subr.msk.mxu0 %vm15280_vm12, %v15217_v5  ;;  %vm15302_vm11 = vcmp.eq.s32.totalorder %v15301_v50, %v15219_v42  ;;  %vm15304_vm12 = vcmp.eq.s32.totalorder %v15303_v61, %v15219_v42 }
 0x4eb   : > { %6750 = vmatpush1.msk.msra.mxu1 %vm15281_vm5, %v15217_v5  ;;  %6692 = vmatpush1.msk.msra.mxu0 %vm15282_vm3, %v15217_v5  ;;  %vm15305_vm5 = vcmp.eq.s32.totalorder %v15301_v50, %v15221_v53  ;;  %vm15306_vm3 = vcmp.eq.s32.totalorder %v15303_v61, %v15221_v53 }
 0x4ec   : > { %6751 = vmatprep.subr.msk.mxu1 %vm15284_vm9, %v15217_v5  ;;  %6693 = vmatprep.subr.msk.mxu0 %vm15286_vm4, %v15217_v5  ;;  %vm15308_vm9 = vcmp.eq.s32.totalorder %v15307_v54, %v15219_v42  ;;  %vm15310_vm4 = vcmp.eq.s32.totalorder %v15309_v6, %v15219_v42 }
 0x4ed   : > { %6752 = vmatpush1.msk.msra.mxu1 %vm15287_vm15, %v15217_v5  ;;  %6694 = vmatpush1.msk.msra.mxu0 %vm15288_vm1, %v15217_v5  ;;  %vm15311_vm15 = vcmp.eq.s32.totalorder %v15307_v54, %v15221_v53  ;;  %vm15312_vm1 = vcmp.eq.s32.totalorder %v15309_v6, %v15221_v53 }
 0x4ee   : > { %6753 = vmatprep.subr.msk.mxu1 %vm15290_vm0, %v15217_v5  ;;  %6695 = vmatprep.subr.msk.mxu0 %vm15292_vm13, %v15217_v5  ;;  %vm15314_vm0 = vcmp.eq.s32.totalorder %v15313_v13, %v15219_v42  ;;  %vm15316_vm13 = vcmp.eq.s32.totalorder %v15315_v57, %v15219_v42 }
 0x4ef   : > { %6754 = vmatpush1.msk.msra.mxu1 %vm15293_vm7, %v15217_v5  ;;  %6696 = vmatpush1.msk.msra.mxu0 %vm15294_vm8, %v15217_v5  ;;  %vm15317_vm7 = vcmp.eq.s32.totalorder %v15313_v13, %v15221_v53  ;;  %vm15318_vm8 = vcmp.eq.s32.totalorder %v15315_v57, %v15221_v53 }
 0x4f0   : > { %6755 = vmatprep.subr.msk.mxu1 %vm15296_vm10, %v15217_v5  ;;  %6697 = vmatprep.subr.msk.mxu0 %vm15298_vm2, %v15217_v5  ;;  %vm15320_vm10 = vcmp.eq.s32.totalorder %v15319_v37, %v15219_v42  ;;  %vm15322_vm2 = vcmp.eq.s32.totalorder %v15321_v30, %v15219_v42 }
 0x4f1   : > { %6756 = vmatpush1.msk.msra.mxu1 %vm15299_vm14, %v15217_v5  ;;  %6698 = vmatpush1.msk.msra.mxu0 %vm15300_vm6, %v15217_v5  ;;  %vm15323_vm14 = vcmp.eq.s32.totalorder %v15319_v37, %v15221_v53  ;;  %vm15324_vm6 = vcmp.eq.s32.totalorder %v15321_v30, %v15221_v53 }
 0x4f2   : > { %6757 = vmatprep.subr.msk.mxu1 %vm15302_vm11, %v15217_v5  ;;  %6699 = vmatprep.subr.msk.mxu0 %vm15304_vm12, %v15217_v5  ;;  %vm15326_vm11 = vcmp.eq.s32.totalorder %v15325_v43, %v15219_v42  ;;  %vm15327_vm12 = vcmp.eq.s32.totalorder %v15325_v43, %v15221_v53 }
 0x4f3   : > { %6758 = vmatpush1.msk.msra.mxu1 %vm15305_vm5, %v15217_v5  ;;  %6700 = vmatpush1.msk.msra.mxu0 %vm15306_vm3, %v15217_v5  ;;  %vm15329_vm5 = vcmp.eq.s32.totalorder %v15328_v58, %v15219_v42  ;;  %vm15330_vm3 = vcmp.eq.s32.totalorder %v15328_v58, %v15221_v53 }
 0x4f4   : > { %6759 = vmatprep.subr.msk.mxu1 %vm15308_vm9, %v15217_v5  ;;  %6701 = vmatprep.subr.msk.mxu0 %vm15310_vm4, %v15217_v5  ;;  %vm15332_vm9 = vcmp.eq.s32.totalorder %v15331_v46, %v15219_v42  ;;  %vm15333_vm4 = vcmp.eq.s32.totalorder %v15331_v46, %v15221_v53  ;;  %v4384_v46 = vpop.permute.xlu1 %4383 }
 0x4f5   : > { %6760 = vmatpush1.msk.msra.mxu1 %vm15311_vm15, %v15217_v5  ;;  %6702 = vmatpush2.msk.msra.mxu0 %vm15312_vm1, %v15217_v5  ;;  %vm15335_vm15 = vcmp.eq.s32.totalorder %v15334_v39, %v15219_v42  ;;  %vm15336_vm1 = vcmp.eq.s32.totalorder %v15334_v39, %v15221_v53 }
 0x4f6   : > { %6761 = vmatprep.subr.msk.mxu1 %vm15314_vm0, %v15217_v5  ;;  %6703 = vmatprep.subr.msk.mxu0 %vm15316_vm13, %v15217_v5  ;;  %vm15338_vm0 = vcmp.eq.s32.totalorder %v15337_v36, %v15219_v42  ;;  %vm15339_vm13 = vcmp.eq.s32.totalorder %v15337_v36, %v15221_v53 }
 0x4f7   : > { %6762 = vmatpush1.msk.msra.mxu1 %vm15317_vm7, %v15217_v5  ;;  %6704 = vmatpush2.msk.msra.mxu0 %vm15318_vm8, %v15217_v5  ;;  %vm15341_vm7 = vcmp.eq.s32.totalorder %v15340_v3, %v15219_v42  ;;  %vm15342_vm8 = vcmp.eq.s32.totalorder %v15340_v3, %v15221_v53 }
 0x4f8   : > { %6763 = vmatprep.subr.msk.mxu1 %vm15320_vm10, %v15217_v5  ;;  %6705 = vmatprep.subr.msk.mxu0 %vm15322_vm2, %v15217_v5  ;;  %vm15344_vm10 = vcmp.eq.s32.totalorder %v15343_v24, %v15219_v42  ;;  %vm15345_vm2 = vcmp.eq.s32.totalorder %v15343_v24, %v15221_v53 }
 0x4f9   : > { %6764 = vmatpush1.msk.msra.mxu1 %vm15323_vm14, %v15217_v5  ;;  %6706 = vmatpush2.msk.msra.mxu0 %vm15324_vm6, %v15217_v5  ;;  %vm15347_vm14 = vcmp.eq.s32.totalorder %v15346_v41, %v15219_v42  ;;  %vm15348_vm6 = vcmp.eq.s32.totalorder %v15346_v41, %v15221_v53 }
 0x4fa   : > { %6707 = vmatprep.subr.msk.mxu0 %vm15326_vm11, %v15217_v5  ;;  %vm15350_vm11 = vcmp.eq.s32.totalorder %v15349_v47, %v15219_v42 }
 0x4fb   : > { %6708 = vmatpush2.msk.msra.mxu0 %vm15327_vm12, %v15217_v5  ;;  %vm15351_vm12 = vcmp.eq.s32.totalorder %v15349_v47, %v15221_v53 }
 0x4fc   : > { %6709 = vmatprep.subr.msk.mxu0 %vm15329_vm5, %v15217_v5  ;;  %vm15353_vm5 = vcmp.eq.s32.totalorder %v15352_v12, %v15219_v42 }
 0x4fd   : > { %6710 = vmatpush2.msk.msra.mxu0 %vm15330_vm3, %v15217_v5  ;;  %vm15354_vm3 = vcmp.eq.s32.totalorder %v15352_v12, %v15221_v53 }
 0x4fe   : > { %6711 = vmatprep.subr.msk.mxu0 %vm15332_vm9, %v15217_v5  ;;  %vm15356_vm9 = vcmp.eq.s32.totalorder %v15355_v28, %v15219_v42 }
 0x4ff   : > { %6712 = vmatpush2.msk.msra.mxu0 %vm15333_vm4, %v15217_v5  ;;  %vm15357_vm4 = vcmp.eq.s32.totalorder %v15355_v28, %v15221_v53 }
 0x500   : > { %6713 = vmatprep.subr.msk.mxu0 %vm15335_vm15, %v15217_v5  ;;  %vm15359_vm15 = vcmp.eq.s32.totalorder %v15358_v27, %v15219_v42 }
 0x501   : > { %6714 = vmatpush2.msk.msra.mxu0 %vm15336_vm1, %v15217_v5  ;;  %vm15360_vm1 = vcmp.eq.s32.totalorder %v15358_v27, %v15221_v53 }
 0x502   : > { %6715 = vmatprep.subr.msk.mxu0 %vm15338_vm0, %v15217_v5  ;;  %vm15362_vm0 = vcmp.eq.s32.totalorder %v15361_v10, %v15219_v42 }
 0x503   : > { %6716 = vmatpush2.msk.msra.mxu0 %vm15339_vm13, %v15217_v5  ;;  %vm15363_vm13 = vcmp.eq.s32.totalorder %v15361_v10, %v15221_v53 }
 0x504   : > { %6717 = vmatprep.subr.msk.mxu0 %vm15341_vm7, %v15217_v5  ;;  %vm15365_vm7 = vcmp.eq.s32.totalorder %v15364_v31, %v15221_v53 }
 0x505   : > { %6718 = vmatpush2.msk.msra.mxu0 %vm15342_vm8, %v15217_v5  ;;  %v2884_v34 = vsel %vm15365_vm7, 1.0, %v7170_v38  ;;  %vm15366_vm8 = vcmp.eq.s32.totalorder %v15364_v31, %v15219_v42  ;;  %vm15386_vm7 = vcmp.eq.s32.totalorder %v15385_v17, %v15219_v42 }
 0x506   : > { %6719 = vmatprep.subr.msk.mxu0 %vm15344_vm10, %v15217_v5  ;;  %v2885_v7 = vsel %vm15366_vm8, 1.0, %v7170_v38  ;;  %vm4707_vm10 = vcmask 1044480   ;;  %vm15387_vm8 = vcmp.eq.s32.totalorder %v15385_v17, %v15221_v53 }
 0x507   : > { %6720 = vmatpush2.msk.msra.mxu0 %vm15345_vm2, %v15217_v5  ;;  %vm5239_vm2 = vcmask 811008   ;;  %6765 = vmatprep.subr.msk.mxu1 %vm4707_vm10, %v2885_v7 }
 0x508   : > { %6721 = vmatprep.subr.msk.mxu0 %vm15347_vm14, %v15217_v5  ;;  %5240 = vst.msk [vmem:[#allocation3] sm:$0x1] %vm5239_vm2, %v7170_v38  ;;  %6766 = vmatpush2.msk.msra.mxu1 %vm4707_vm10, %v2884_v34  ;;  %vm15368_vm14 = vcmp.eq.s32.totalorder %v15367_v14, %v15219_v42  ;;  %vm15389_vm10 = vcmp.eq.s32.totalorder %v15388_v49, %v15219_v42 }
 0x509   : > { %6722 = vmatpush2.msk.msra.mxu0 %vm15348_vm6, %v15217_v5  ;;  %6767 = vmatprep.subr.msk.mxu1 %vm15368_vm14, %v15217_v5  ;;  %vm15369_vm6 = vcmp.eq.s32.totalorder %v15367_v14, %v15221_v53  ;;  %vm15390_vm2 = vcmp.eq.s32.totalorder %v15388_v49, %v15221_v53  ;;  %vm15392_vm14 = vcmp.eq.s32.totalorder %v15391_v9, %v15219_v42 }
 0x50a   : > { %6723 = vmatprep.subr.msk.mxu0 %vm15350_vm11, %v15217_v5  ;;  %6768 = vmatpush2.msk.msra.mxu1 %vm15369_vm6, %v15217_v5  ;;  %vm15371_vm11 = vcmp.eq.s32.totalorder %v15370_v52, %v15219_v42  ;;  %vm15393_vm6 = vcmp.eq.s32.totalorder %v15391_v9, %v15221_v53 }
 0x50b   : > { %6724 = vmatpush2.msk.msra.mxu0 %vm15351_vm12, %v15217_v5  ;;  %6769 = vmatprep.subr.msk.mxu1 %vm15371_vm11, %v15217_v5  ;;  %vm15372_vm12 = vcmp.eq.s32.totalorder %v15370_v52, %v15221_v53  ;;  %vm15395_vm11 = vcmp.eq.s32.totalorder %v15394_v11, %v15219_v42 }
 0x50c   : > { %6725 = vmatprep.subr.msk.mxu0 %vm15353_vm5, %v15217_v5  ;;  %6770 = vmatpush2.msk.msra.mxu1 %vm15372_vm12, %v15217_v5  ;;  %vm15374_vm5 = vcmp.eq.s32.totalorder %v15373_v33, %v15219_v42  ;;  %vm15396_vm12 = vcmp.eq.s32.totalorder %v15394_v11, %v15221_v53 }
 0x50d   : > { %6726 = vmatpush2.msk.msra.mxu0 %vm15354_vm3, %v15217_v5  ;;  %6771 = vmatprep.subr.msk.mxu1 %vm15374_vm5, %v15217_v5  ;;  %vm15375_vm3 = vcmp.eq.s32.totalorder %v15373_v33, %v15221_v53  ;;  %vm15398_vm5 = vcmp.eq.s32.totalorder %v15397_v59, %v15219_v42 }
 0x50e   : > { %6727 = vmatprep.subr.msk.mxu0 %vm15356_vm9, %v15217_v5  ;;  %6772 = vmatpush2.msk.msra.mxu1 %vm15375_vm3, %v15217_v5  ;;  %vm15377_vm9 = vcmp.eq.s32.totalorder %v15376_v44, %v15219_v42  ;;  %vm15399_vm3 = vcmp.eq.s32.totalorder %v15397_v59, %v15221_v53 }
 0x50f   : > { %6728 = vmatpush2.msk.msra.mxu0 %vm15357_vm4, %v15217_v5  ;;  %6773 = vmatprep.subr.msk.mxu1 %vm15377_vm9, %v15217_v5  ;;  %vm15378_vm4 = vcmp.eq.s32.totalorder %v15376_v44, %v15221_v53  ;;  %vm15401_vm9 = vcmp.eq.s32.totalorder %v15400_v40, %v15219_v42 }
 0x510   : > { %6729 = vmatprep.subr.msk.mxu0 %vm15359_vm15, %v15217_v5  ;;  %6774 = vmatpush2.msk.msra.mxu1 %vm15378_vm4, %v15217_v5  ;;  %vm15380_vm15 = vcmp.eq.s32.totalorder %v15379_v22, %v15219_v42  ;;  %vm15402_vm4 = vcmp.eq.s32.totalorder %v15400_v40, %v15221_v53 }
 0x511   : > { %6730 = vmatpush2.msk.msra.mxu0 %vm15360_vm1, %v15217_v5  ;;  %6775 = vmatprep.subr.msk.mxu1 %vm15380_vm15, %v15217_v5  ;;  %vm15381_vm1 = vcmp.eq.s32.totalorder %v15379_v22, %v15221_v53  ;;  %vm15404_vm15 = vcmp.eq.s32.totalorder %v15403_v4, %v15219_v42 }
 0x512   : > { %6731 = vmatprep.subr.msk.mxu0 %vm15362_vm0, %v15217_v5  ;;  %6776 = vmatpush2.msk.msra.mxu1 %vm15381_vm1, %v15217_v5  ;;  %vm15383_vm0 = vcmp.eq.s32.totalorder %v15382_v45, %v15219_v42  ;;  %vm15405_vm1 = vcmp.eq.s32.totalorder %v15403_v4, %v15221_v53 }
 0x513   : > { %6732 = vmatpush2.msk.msra.mxu0 %vm15363_vm13, %v15217_v5  ;;  %6777 = vmatprep.subr.msk.mxu1 %vm15383_vm0, %v15217_v5  ;;  %vm15384_vm13 = vcmp.eq.s32.totalorder %v15382_v45, %v15221_v53  ;;  %vm15407_vm0 = vcmp.eq.s32.totalorder %v15406_v20, %v15219_v42 }
 0x514   : > { %6778 = vmatpush2.msk.msra.mxu1 %vm15384_vm13, %v15217_v5  ;;  %vm15408_vm13 = vcmp.eq.s32.totalorder %v15406_v20, %v15221_v53 }
 0x515   : > { %6779 = vmatprep.subr.msk.mxu1 %vm15386_vm7, %v15217_v5  ;;  %vm4673_vm7 = vcmask 949248  }
 0x516   : > { %6780 = vmatpush2.msk.msra.mxu1 %vm15387_vm8, %v15217_v5  ;;  %vm15409_vm8 = vcmask 7168  }
 0x517   : > { %6781 = vmatprep.subr.msk.mxu1 %vm15389_vm10, %v15217_v5  ;;  %vm15410_vm10 = vmmov %vm15409_vm8 }
 0x518   : > { %6782 = vmatpush2.msk.msra.mxu1 %vm15390_vm2, %v15217_v5  ;;  %vm15411_vm2 = vmmov %vm15409_vm8 }
 0x519   : > { %6783 = vmatprep.subr.msk.mxu1 %vm15392_vm14, %v15217_v5  ;;  %vm4694_vm14 = vcmask 957440  }
 0x51a   : > { %6784 = vmatpush2.msk.msra.mxu1 %vm15393_vm6, %v15217_v5  ;;  %vm15412_vm6 = vmmov %vm15411_vm2 }
 0x51b   : > { %6785 = vmatprep.subr.msk.mxu1 %vm15395_vm11, %v15217_v5  ;;  %vm15413_vm11 = vmmov %vm15411_vm2 }
 0x51c   : > { %6786 = vmatpush2.msk.msra.mxu1 %vm15396_vm12, %v15217_v5  ;;  %vm15414_vm12 = vmmov %vm15411_vm2 }
 0x51d   : > { %6787 = vmatprep.subr.msk.mxu1 %vm15398_vm5, %v15217_v5  ;;  %vm15415_vm5 = vmmov %vm15411_vm2 }
 0x51e   : > { %6788 = vmatpush2.msk.msra.mxu1 %vm15399_vm3, %v15217_v5  ;;  %vm15416_vm3 = vmmov %vm15411_vm2 }
 0x51f   : > { %6789 = vmatprep.subr.msk.mxu1 %vm15401_vm9, %v15217_v5  ;;  %vm15417_vm9 = vmmov %vm15411_vm2 }
 0x520   : > { %6790 = vmatpush2.msk.msra.mxu1 %vm15402_vm4, %v15217_v5  ;;  %vm15418_vm4 = vmmov %vm15411_vm2 }
 0x521   : > { %6791 = vmatprep.subr.msk.mxu1 %vm15404_vm15, %v15217_v5  ;;  %vm15419_vm15 = vmmov %vm15411_vm2 }
 0x522   : > { %6792 = vmatpush2.msk.msra.mxu1 %vm15405_vm1, %v15217_v5  ;;  %vm15420_vm1 = vmmov %vm15411_vm2 }
 0x523   : > { %6793 = vmatprep.subr.msk.mxu1 %vm15407_vm0, %v15217_v5  ;;  %vm15421_vm0 = vmmov %vm15420_vm1 }
 0x524   : > { %6794 = vmatpush2.msk.msra.mxu1 %vm15408_vm13, %v15217_v5  ;;  %vm15422_vm13 = vmmov %vm15421_vm0 }
 0x58f   : > { %v4465_v35 = vpop.f32.mrf.mxu0 }
 0x590   : > { %v13444_v63 = vadd.f32 %v4465_v35, %v4369_v60 }
 0x591   : > { %v4467_v25 = vpop.f32.mrf.mxu0 }
 0x592   : > { %v13446_v8 = vadd.f32 %v4467_v25, %v4369_v60  ;;  %v4554_v15 = vpop.f32.mrf.mxu1  ;;  %v4577_v42 = vmax.f32 %v13444_v63, 0.0 }
 0x593   : > { %v13448_v48 = vadd.f32 %v4554_v15, %v4369_v60  ;;  %v4471_v21 = vpop.f32.mrf.mxu0 }
 0x594   : > { %v4578_v18 = vmax.f32 %v13446_v8, 0.0  ;;  %v13452_v51 = vadd.f32 %v4471_v21, %v4374_v62  ;;  %v4556_v53 = vpop.f32.mrf.mxu1 }
 0x595   : > { %v4579_v5 = vmax.f32 %v13448_v48, 0.0  ;;  %v4473_v32 = vpop.f32.mrf.mxu0  ;;  %v13459_v23 = vadd.f32 %v4556_v53, %v4369_v60 }
 0x596   : > { %v7148_v19 = vpack.i.bf16 %v4578_v18, %v4577_v42  ;;  %v13461_v1 = vadd.f32 %v4473_v32, %v4374_v62  ;;  %v4560_v2 = vpop.f32.mrf.mxu1  ;;  %v4581_v56 = vmax.f32 %v13452_v51, 0.0 }
 0x597   : > { %v4477_v0 = vpop.f32.mrf.mxu0  ;;  %4613 = vrot.lane.b32.xlu1 %v4579_v5, %s7281_s16  ;;  %v13469_v55 = vadd.f32 %v4560_v2, %v4374_v62  ;;  %v4580_v54 = vmax.f32 %v13459_v23, 0.0 }
 0x598   : > { %v4582_v26 = vmax.f32 %v13461_v1, 0.0  ;;  %v4562_v29 = vpop.f32.mrf.mxu1  ;;  %7149 = vrot.lane.b32.xlu0 %v7148_v19, %s7281_s16  ;;  %v13480_v43 = vadd.f32 %v4477_v0, %v4379_v16 }
 0x599   : > { %v4479_v50 = vpop.f32.mrf.mxu0  ;;  %v13476_v13 = vadd.f32 %v4562_v29, %v4374_v62  ;;  %v4583_v39 = vmax.f32 %v13469_v55, 0.0  ;;  %v4674_v62 = vsel %vm4673_vm7, %v4580_v54, 0.0 }
 0x59a   : > { %v7153_v6 = vpack.i.bf16 %v4582_v26, %v4581_v56  ;;  %v13478_v57 = vadd.f32 %v4479_v50, %v4379_v16  ;;  %v4566_v37 = vpop.f32.mrf.mxu1  ;;  %v4585_v28 = vmax.f32 %v13480_v43, 0.0 }
 0x59b   : > { %v4483_v30 = vpop.f32.mrf.mxu0  ;;  %v4584_v3 = vmax.f32 %v13476_v13, 0.0  ;;  %v13487_v41 = vadd.f32 %v4566_v37, %v4379_v16 }
 0x59c   : > { %v4568_v58 = vpop.f32.mrf.mxu1  ;;  %7154 = vrot.lane.b32.xlu1 %v7153_v6, %s7281_s16  ;;  %4615 = vrot.lane.b32.xlu0 %v4580_v54, %s7281_s16  ;;  %v4586_v24 = vmax.f32 %v13478_v57, 0.0  ;;  %v13492_v27 = vadd.f32 %v4483_v30, %v4384_v46 }
 0x59d   : > { %v4485_v36 = vpop.f32.mrf.mxu0  ;;  %v4587_v38 = vmax.f32 %v13487_v41, 0.0  ;;  %v13501_v31 = vadd.f32 %v4568_v58, %v4379_v16  ;;  %v4675_v29 = vsel %vm4673_vm7, %v4584_v3, 0.0 }
 0x59e   : > { %v13489_v47 = vadd.f32 %v4485_v36, %v4384_v46  ;;  %v4572_v12 = vpop.f32.mrf.mxu1  ;;  %v7158_v10 = vpack.i.bf16 %v4586_v24, %v4585_v28  ;;  %v4589_v14 = vmax.f32 %v13492_v27, 0.0 }
 0x59f   : > { %v4588_v52 = vmax.f32 %v13501_v31, 0.0  ;;  %v13514_v44 = vadd.f32 %v4572_v12, %v4384_v46 }
 0x5a0   : > { %4623 = vrot.lane.b32.xlu1 %v4584_v3, %s7281_s16  ;;  %4621 = vrot.lane.b32.xlu0 %v4583_v39, %s7281_s16  ;;  %v4590_v34 = vmax.f32 %v13489_v47, 0.0  ;;  %v4574_v7 = vpop.f32.mrf.mxu1  ;;  %v7283_v47 = vmov 1966171168  }
 0x5a1   : > { %v13516_v22 = vadd.f32 %v4574_v7, %v4384_v46  ;;  %v4591_v45 = vmax.f32 %v13514_v44, 0.0  ;;  %v4676_v46 = vsel %vm4673_vm7, %v4588_v52, 0.0  ;;  %v4904_v27 = vunpack.c.l.s4 %v7283_v47 }
 0x5a2   : > { %v7163_v33 = vpack.i.bf16 %v4590_v34, %v4589_v14 }
 0x5a3   : > { %v4592_v17 = vmax.f32 %v13516_v22, 0.0 }
 0x5a4   : > { %4629 = vrot.lane.b32.xlu1 %v4587_v38, %s7281_s16  ;;  %7159 = vrot.lane.b32.xlu0 %v7158_v10, %s7281_s16 }
 0x5a8   : > { %7164 = vrot.lane.b32.xlu1 %v7163_v33, %s7281_s16  ;;  %4631 = vrot.lane.b32.xlu0 %v4588_v52, %s7281_s16  ;;  %v4677_v52 = vsel %vm4673_vm7, %v4592_v17, 0.0 }
 0x5ac   : > { %4639 = vrot.lane.b32.xlu1 %v4592_v17, %s7281_s16  ;;  %4637 = vrot.lane.b32.xlu0 %v4591_v45, %s7281_s16 }
 0x609   : > { %v4614_v49 = vpop.permute.xlu1 %4613 }
 0x60a   : > { %v7150_v9 = vpop.permute.xlu0 %7149 }
 0x60b   : > { %v7152_v11 = vunpack.i.h.bf16 %v7150_v9  ;;  %v7151_v59 = vunpack.i.l.bf16 %v7150_v9 }
 0x60d   : > { %v4669_v40 = vsel %vm15409_vm8, 0.0, %v7151_v59  ;;  %v4641_v4 = vsel %vm15410_vm10, %v7151_v59, %v7152_v11  ;;  %v4642_v20 = vsel %vm15411_vm2, %v7152_v11, %v4614_v49  ;;  %vm15423_vm8 = vmmov %vm15421_vm0 }
 0x60e   : > { %v4678_v60 = vmax.f32 %v4669_v40, %v4577_v42  ;;  %v7155_v35 = vpop.permute.xlu1 %7154  ;;  %v4616_v25 = vpop.permute.xlu0 %4615  ;;  %v4679_v15 = vmax.f32 %v4641_v4, %v4578_v18  ;;  %v4680_v23 = vmax.f32 %v4642_v20, %v4579_v5  ;;  %vm15424_vm10 = vmmov %vm15421_vm0 }
 0x60f   : > { %v7157_v21 = vunpack.i.h.bf16 %v7155_v35  ;;  %v7156_v53 = vunpack.i.l.bf16 %v7155_v35  ;;  %v4643_v32 = vsel %vm15412_vm6, %v4614_v49, %v4616_v25 }
 0x610   : > { %v4681_v19 = vmax.f32 %v4643_v32, %v4674_v62  ;;  %4778 = vmatprep.mubr.f32.mxu0 %v4679_v15 }
 0x611   : > { %v4670_v63 = vsel %vm15413_vm11, 0.0, %v7156_v53  ;;  %4779 = vmatmul.mubr.f32.vlgmr.msra.gmra.mxu0 %v4678_v60  ;;  %v4644_v42 = vsel %vm15414_vm12, %v7156_v53, %v7157_v21 }
 0x612   : > { %v4624_v2 = vpop.permute.xlu1 %4623  ;;  %6795 = vmatprep.mubr.msk.f32.mxu1 %vm4694_vm14, %v4681_v19  ;;  %v4622_v8 = vpop.permute.xlu0 %4621  ;;  %v4683_v18 = vmax.f32 %v4644_v42, %v4582_v26  ;;  %v4682_v0 = vmax.f32 %v4670_v63, %v4581_v56 }
 0x613   : > { %v4645_v48 = vsel %vm15415_vm5, %v7157_v21, %v4622_v8  ;;  %v4646_v5 = vsel %vm15416_vm3, %v4622_v8, %v4624_v2  ;;  %4868 = vmatmul.mubr.f32.vlgmr.msra.gmra.mxu1 %v4680_v23  ;;  %v15425_v21 = vlaneseq }
 0x614   : > { %v4684_v16 = vmax.f32 %v4645_v48, %v4583_v39  ;;  %v4685_v55 = vmax.f32 %v4646_v5, %v4675_v29  ;;  %4784 = vmatprep.mubr.f32.mxu0 %v4683_v18 }
 0x615   : > { %4785 = vmatmul.mubr.f32.gmra.mxu0 %v4682_v0  ;;  %vm13582_vm7 = vcmp.lt.s32.totalorder %v15425_v21, 251 }
 0x616   : > { %v4630_v50 = vpop.permute.xlu1 %4629  ;;  %v7160_v54 = vpop.permute.xlu0 %7159  ;;  %6796 = vmatprep.mubr.msk.f32.mxu1 %vm4694_vm14, %v4685_v55 }
 0x617   : > { %v7162_v1 = vunpack.i.h.bf16 %v7160_v54  ;;  %v7161_v26 = vunpack.i.l.bf16 %v7160_v54  ;;  %4874 = vmatmul.mubr.f32.gmra.mxu1 %v4684_v16 }
 0x619   : > { %v4671_v51 = vsel %vm15417_vm9, 0.0, %v7161_v26  ;;  %v4647_v56 = vsel %vm15418_vm4, %v7161_v26, %v7162_v1  ;;  %v4648_v58 = vsel %vm15419_vm15, %v7162_v1, %v4630_v50 }
 0x61a   : > { %v7165_v6 = vpop.permute.xlu1 %7164  ;;  %v4632_v13 = vpop.permute.xlu0 %4631  ;;  %v4687_v37 = vmax.f32 %v4647_v56, %v4586_v24  ;;  %v4686_v30 = vmax.f32 %v4671_v51, %v4585_v28  ;;  %v4688_v57 = vmax.f32 %v4648_v58, %v4587_v38 }
 0x61b   : > { %v7167_v39 = vunpack.i.h.bf16 %v7165_v6  ;;  %v7166_v36 = vunpack.i.l.bf16 %v7165_v6  ;;  %v4649_v3 = vsel %vm15420_vm1, %v4630_v50, %v4632_v13 }
 0x61c   : > { %v4689_v12 = vmax.f32 %v4649_v3, %v4676_v46  ;;  %4790 = vmatprep.mubr.f32.mxu0 %v4687_v37 }
 0x61d   : > { %v4672_v10 = vsel %vm15421_vm0, 0.0, %v7166_v36  ;;  %4791 = vmatmul.mubr.f32.gmra.mxu0 %v4686_v30  ;;  %v4650_v24 = vsel %vm15422_vm13, %v7166_v36, %v7167_v39 }
 0x61e   : > { %v4640_v43 = vpop.permute.xlu1 %4639  ;;  %v4638_v28 = vpop.permute.xlu0 %4637  ;;  %6797 = vmatprep.mubr.msk.f32.mxu1 %vm4694_vm14, %v4689_v12  ;;  %v4691_v31 = vmax.f32 %v4650_v24, %v4590_v34  ;;  %v4690_v7 = vmax.f32 %v4672_v10, %v4589_v14  ;;  %v4905_v14 = vunpack.c.0.s8 %v4904_v27 }
 0x61f   : > { %v4651_v33 = vsel %vm15423_vm8, %v7167_v39, %v4638_v28  ;;  %v4652_v41 = vsel %vm15424_vm10, %v4638_v28, %v4640_v43  ;;  %4880 = vmatmul.mubr.f32.gmra.mxu1 %v4688_v57 }
 0x620   : > { %v4692_v38 = vmax.f32 %v4651_v33, %v4591_v45  ;;  %v4693_v49 = vmax.f32 %v4652_v41, %v4677_v52  ;;  %4796 = vmatprep.mubr.f32.mxu0 %v4691_v31  ;;  %v13577_v4 = vsub.s32 %v4905_v14, %v15303_v61 }
 0x621   : > { %4797 = vmatmul.mubr.f32.gmra.mxu0 %v4690_v7 }
 0x622   : > { %6798 = vmatprep.mubr.msk.f32.mxu1 %vm4694_vm14, %v4693_v49 }
 0x623   : > { %4886 = vmatmul.mubr.f32.gmra.mxu1 %v4692_v38 }
 0x6d1   : > { %v4780_v34 = vpop.f32.mrf.mxu0 }
 0x6d3   : > { %v4782_v22 = vpop.f32.mrf.mxu0  ;;  %v4869_v17 = vpop.f32.mrf.mxu1 }
 0x6d4   : > { %v4870_v59 = vadd.f32 %v4869_v17, %v4780_v34 }
 0x6d5   : > { %v4786_v9 = vpop.f32.mrf.mxu0  ;;  %v4871_v11 = vpop.f32.mrf.mxu1 }
 0x6d6   : > { %v4872_v40 = vadd.f32 %v4871_v11, %v4782_v22 }
 0x6d7   : > { %v4875_v44 = vpop.f32.mrf.mxu1  ;;  %v4788_v60 = vpop.f32.mrf.mxu0 }
 0x6d8   : > { %v4902_v45 = vcombine.low %v4870_v59, %v4872_v40  ;;  %v4946_v20 = vcombine.high %v4870_v59, %v4872_v40  ;;  %v4876_v32 = vadd.f32 %v4875_v44, %v4786_v9 }
 0x6d9   : > { %v4877_v35 = vpop.f32.mrf.mxu1 }
 0x6da   : > { %v4909_v25 = vrot.slane %v4902_v45, %v13577_v4  ;;  %v4953_v15 = vrot.slane %v4946_v20, %v13577_v4  ;;  %v4878_v62 = vadd.f32 %v4877_v35, %v4788_v60 }
 0x6dc   : > { %v4916_v19 = vrot.slane %v4909_v25, %v13577_v4  ;;  %v4924_v61 = vcombine.high %v4909_v25, %v4909_v25  ;;  %v4960_v23 = vrot.slane %v4953_v15, %v13577_v4  ;;  %v4965_v63 = vcombine.high %v4953_v15, %v4953_v15 }
 0x6dd   : > { %v4989_v42 = vcombine.low %v4876_v32, %v4878_v62  ;;  %v5030_v2 = vcombine.high %v4876_v32, %v4878_v62  ;;  %v4792_v8 = vpop.f32.mrf.mxu0 }
 0x6de   : > { %4922 = vst.msk [vmem:[#allocation2] ss:$8 sm:$0x3] %vm13582_vm7, %v4916_v19  ;;  %v4931_v18 = vrot.slane %v4924_v61, %v13577_v4  ;;  %v4936_v0 = vcombine.high %v4916_v19, %v4916_v19  ;;  %4963 = vst.msk [vmem:[#allocation2 + $0x1] ss:$8 sm:$0x3] %vm13582_vm7, %v4960_v23  ;;  %v4972_v29 = vrot.slane %v4965_v63, %v13577_v4 }
 0x6df   : > { %v4977_v48 = vcombine.high %v4960_v23, %v4960_v23  ;;  %v4996_v5 = vrot.slane %v4989_v42, %v13577_v4  ;;  %v5037_v16 = vrot.slane %v5030_v2, %v13577_v4  ;;  %v4794_v55 = vpop.f32.mrf.mxu0  ;;  %v4881_v50 = vpop.f32.mrf.mxu1 }
 0x6e0   : > { %4934 = vst.msk [vmem:[#allocation2 + $0x10] ss:$8 sm:$0x3] %vm13582_vm7, %v4931_v18  ;;  %4939 = vst.msk [vmem:[#allocation2 + $0x20] ss:$8 sm:$0x3] %vm13582_vm7, %v4936_v0  ;;  %v4941_v54 = vcombine.high %v4931_v18, %v4931_v18  ;;  %v4982_v1 = vcombine.high %v4972_v29, %v4972_v29  ;;  %v4882_v30 = vadd.f32 %v4881_v50, %v4792_v8 }
 0x6e1   : > { %4975 = vst.msk [vmem:[#allocation2 + $0x11] ss:$8 sm:$0x3] %vm13582_vm7, %v4972_v29  ;;  %4980 = vst.msk [vmem:[#allocation2 + $0x21] ss:$8 sm:$0x3] %vm13582_vm7, %v4977_v48  ;;  %v5003_v26 = vrot.slane %v4996_v5, %v13577_v4  ;;  %v5008_v51 = vcombine.high %v4996_v5, %v4996_v5  ;;  %v5044_v56 = vrot.slane %v5037_v16, %v13577_v4  ;;  %v4798_v13 = vpop.f32.mrf.mxu0  ;;  %v4883_v37 = vpop.f32.mrf.mxu1 }
 0x6e2   : > { %v5049_v6 = vcombine.high %v5037_v16, %v5037_v16  ;;  %4944 = vst.msk [vmem:[#allocation2 + $0x30] ss:$8 sm:$0x3] %vm13582_vm7, %v4941_v54  ;;  %4985 = vst.msk [vmem:[#allocation2 + $0x31] ss:$8 sm:$0x3] %vm13582_vm7, %v4982_v1  ;;  %v4884_v58 = vadd.f32 %v4883_v37, %v4794_v55 }
 0x6e3   : > { %5006 = vst.msk [vmem:[#allocation2 + $0x2] ss:$8 sm:$0x3] %vm13582_vm7, %v5003_v26  ;;  %v5015_v46 = vrot.slane %v5008_v51, %v13577_v4  ;;  %v5020_v39 = vcombine.high %v5003_v26, %v5003_v26  ;;  %5047 = vst.msk [vmem:[#allocation2 + $0x3] ss:$8 sm:$0x3] %vm13582_vm7, %v5044_v56  ;;  %v5061_v3 = vcombine.high %v5044_v56, %v5044_v56  ;;  %v4887_v12 = vpop.f32.mrf.mxu1  ;;  %v4800_v28 = vpop.f32.mrf.mxu0 }
 0x6e4   : > { %v5056_v36 = vrot.slane %v5049_v6, %v13577_v4  ;;  %v5073_v10 = vcombine.low %v4882_v30, %v4884_v58  ;;  %v5114_v57 = vcombine.high %v4882_v30, %v4884_v58  ;;  %v4888_v41 = vadd.f32 %v4887_v12, %v4798_v13 }
 0x6e5   : > { %5018 = vst.msk [vmem:[#allocation2 + $0x12] ss:$8 sm:$0x3] %vm13582_vm7, %v5015_v46  ;;  %5023 = vst.msk [vmem:[#allocation2 + $0x22] ss:$8 sm:$0x3] %vm13582_vm7, %v5020_v39  ;;  %v5025_v24 = vcombine.high %v5015_v46, %v5015_v46  ;;  %v4889_v31 = vpop.f32.mrf.mxu1 }
 0x6e6   : > { %5059 = vst.msk [vmem:[#allocation2 + $0x13] ss:$8 sm:$0x3] %vm13582_vm7, %v5056_v36  ;;  %5064 = vst.msk [vmem:[#allocation2 + $0x23] ss:$8 sm:$0x3] %vm13582_vm7, %v5061_v3  ;;  %v5066_v43 = vcombine.high %v5056_v36, %v5056_v36  ;;  %v5080_v7 = vrot.slane %v5073_v10, %v13577_v4  ;;  %v5121_v52 = vrot.slane %v5114_v57, %v13577_v4 }
 0x6e7   : > { %v4890_v33 = vadd.f32 %v4889_v31, %v4800_v28  ;;  %5028 = vst.msk [vmem:[#allocation2 + $0x32] ss:$8 sm:$0x3] %vm13582_vm7, %v5025_v24 }
 0x6e8   : > { %5069 = vst.msk [vmem:[#allocation2 + $0x33] ss:$8 sm:$0x3] %vm13582_vm7, %v5066_v43  ;;  %v5087_v38 = vrot.slane %v5080_v7, %v13577_v4  ;;  %v5092_v49 = vcombine.high %v5080_v7, %v5080_v7  ;;  %v5128_v47 = vrot.slane %v5121_v52, %v13577_v4  ;;  %v5133_v27 = vcombine.high %v5121_v52, %v5121_v52 }
 0x6e9   : > { %v5157_v34 = vcombine.low %v4888_v41, %v4890_v33  ;;  %v5198_v14 = vcombine.high %v4888_v41, %v4890_v33 }
 0x6ea   : > { %5090 = vst.msk [vmem:[#allocation2 + $0x4] ss:$8 sm:$0x3] %vm13582_vm7, %v5087_v38  ;;  %v5099_v22 = vrot.slane %v5092_v49, %v13577_v4  ;;  %v5104_v17 = vcombine.high %v5087_v38, %v5087_v38  ;;  %5131 = vst.msk [vmem:[#allocation2 + $0x5] ss:$8 sm:$0x3] %vm13582_vm7, %v5128_v47  ;;  %v5140_v9 = vrot.slane %v5133_v27, %v13577_v4 }
 0x6eb   : > { %v5145_v11 = vcombine.high %v5128_v47, %v5128_v47  ;;  %v5164_v59 = vrot.slane %v5157_v34, %v13577_v4  ;;  %v5205_v40 = vrot.slane %v5198_v14, %v13577_v4 }
 0x6ec   : > { %5102 = vst.msk [vmem:[#allocation2 + $0x14] ss:$8 sm:$0x3] %vm13582_vm7, %v5099_v22  ;;  %5107 = vst.msk [vmem:[#allocation2 + $0x24] ss:$8 sm:$0x3] %vm13582_vm7, %v5104_v17  ;;  %v5109_v44 = vcombine.high %v5099_v22, %v5099_v22  ;;  %v5150_v45 = vcombine.high %v5140_v9, %v5140_v9 }
 0x6ed   : > { %5143 = vst.msk [vmem:[#allocation2 + $0x15] ss:$8 sm:$0x3] %vm13582_vm7, %v5140_v9  ;;  %5148 = vst.msk [vmem:[#allocation2 + $0x25] ss:$8 sm:$0x3] %vm13582_vm7, %v5145_v11  ;;  %v5171_v20 = vrot.slane %v5164_v59, %v13577_v4  ;;  %v5176_v60 = vcombine.high %v5164_v59, %v5164_v59  ;;  %v5212_v35 = vrot.slane %v5205_v40, %v13577_v4 }
 0x6ee   : > { %v5217_v25 = vcombine.high %v5205_v40, %v5205_v40  ;;  %5112 = vst.msk [vmem:[#allocation2 + $0x34] ss:$8 sm:$0x3] %vm13582_vm7, %v5109_v44  ;;  %5153 = vst.msk [vmem:[#allocation2 + $0x35] ss:$8 sm:$0x3] %vm13582_vm7, %v5150_v45 }
 0x6ef   : > { %5174 = vst.msk [vmem:[#allocation2 + $0x6] ss:$8 sm:$0x3] %vm13582_vm7, %v5171_v20  ;;  %v5183_v15 = vrot.slane %v5176_v60, %v13577_v4  ;;  %v5188_v62 = vcombine.high %v5171_v20, %v5171_v20  ;;  %5215 = vst.msk [vmem:[#allocation2 + $0x7] ss:$8 sm:$0x3] %vm13582_vm7, %v5212_v35  ;;  %v5229_v32 = vcombine.high %v5212_v35, %v5212_v35 }
 0x6f0   : > { %v5224_v21 = vrot.slane %v5217_v25, %v13577_v4 }
 0x6f1   : > { %5186 = vst.msk [vmem:[#allocation2 + $0x16] ss:$8 sm:$0x3] %vm13582_vm7, %v5183_v15  ;;  %5191 = vst.msk [vmem:[#allocation2 + $0x26] ss:$8 sm:$0x3] %vm13582_vm7, %v5188_v62  ;;  %v5193_v19 = vcombine.high %v5183_v15, %v5183_v15 }
 0x6f2   : > { %5227 = vst.msk [vmem:[#allocation2 + $0x17] ss:$8 sm:$0x3] %vm13582_vm7, %v5224_v21  ;;  %5232 = vst.msk [vmem:[#allocation2 + $0x27] ss:$8 sm:$0x3] %vm13582_vm7, %v5229_v32  ;;  %v5234_v61 = vcombine.high %v5224_v21, %v5224_v21 }
 0x6f3   : > { %5196 = vst.msk [vmem:[#allocation2 + $0x36] ss:$8 sm:$0x3] %vm13582_vm7, %v5193_v19 }
 0x6f4   : > { %5237 = vst.msk [vmem:[#allocation2 + $0x37] ss:$8 sm:$0x3] %vm13582_vm7, %v5234_v61 }
 0x6f5 PF: > { %v7171_v4 = vld [vmem:[%s7351_s15 + $0x78] sm:$0xff]   ;;  %v7175_v53 = vld [vmem:[%s7351_s15 + $0x70] sm:$0xff]   ;;  %v7179_v0 = vld [vmem:[%s7351_s15 + $0x68] sm:$0xff]   ;;  %s5241_s16 = sshra.s32 %s7343_s10, 3  ;;  %s5244_s24 = sand.u32 7, %s7343_s10  ;;  %v5253_v56 = vlaneseq  ;;  %vm5975_vm2 = vcmask 811008  }
 0x6f6   : > { %v7172_v23 = vld [vmem:[%s7351_s15 + $0xf8] sm:$0xff]   ;;  %6874 = vmatprep.subr.bf16.mxu0 %v7171_v4  ;;  %v7176_v2 = vld [vmem:[%s7351_s15 + $0xf0] sm:$0xff]   ;;  %v7180_v29 = vld [vmem:[%s7351_s15 + $0xe8] sm:$0xff]   ;;  %s6873_s26 = sshll.u32 %s5241_s16, 6  ;;  %p6865_p5 = scmp.ne.s32.totalorder %s7343_s10, 7 }
 0x6f7   : > { %v7173_v63 = vld [vmem:[%s7351_s15 + $0x38] sm:$0xff]   ;;  %6896 = vmatprep.subr.bf16.mxu1 %v7172_v23  ;;  %v7177_v8 = vld [vmem:[%s7351_s15 + $0x30] sm:$0xff]   ;;  %v7181_v48 = vld [vmem:[%s7351_s15 + $0x28] sm:$0xff]   ;;  %s13697_s27 = sadd.s32 %s6873_s26, %s5244_s24  ;;  %v13699_v58 = vshrl.u32 %v5253_v56, 7 }
 0x6f8   : > { %v7174_v42 = vld [vmem:[%s7351_s15 + $0xb8] sm:$0xff]   ;;  %6875 = vmatpush3.bf16.msra.mxu0 %v7173_v63  ;;  %v7178_v18 = vld [vmem:[%s7351_s15 + $0xb0] sm:$0xff]   ;;  %v7182_v5 = vld [vmem:[%s7351_s15 + $0xa8] sm:$0xff]   ;;  %s5248_s25 = scalar_lea.vmem [#allocation2], %s13697_s27 }
 0x6f9   : > { %6897 = vmatpush3.bf16.msra.mxu1 %v7174_v42  ;;  %6876 = vmatprep.subr.bf16.mxu0 %v7175_v53  ;;  %v7183_v16 = vld [vmem:[%s7351_s15 + $0x60] sm:$0xff]   ;;  %v7187_v1 = vld [vmem:[%s7351_s15 + $0x58] sm:$0xff]   ;;  %v7191_v13 = vld [vmem:[%s7351_s15 + $0x50] sm:$0xff]   ;;  %v5259_v12 = vsub.s32 1, %v13699_v58  ;;  %v5267_v57 = vsub.s32 3, %v13699_v58  ;;  %v5255_v43 = vsub.s32 0, %v13699_v58 }
 0x6fa   : > { %6898 = vmatprep.subr.bf16.mxu1 %v7176_v2  ;;  %v7184_v55 = vld [vmem:[%s7351_s15 + $0xe0] sm:$0xff]   ;;  %v7188_v26 = vld [vmem:[%s7351_s15 + $0xd8] sm:$0xff]   ;;  %v7192_v37 = vld [vmem:[%s7351_s15 + $0xd0] sm:$0xff]   ;;  %v5263_v31 = vsub.s32 2, %v13699_v58  ;;  %v5275_v52 = vsub.s32 5, %v13699_v58  ;;  %v5283_v41 = vsub.s32 7, %v13699_v58 }
 0x6fb   : > { %v7185_v50 = vld [vmem:[%s7351_s15 + $0x20] sm:$0xff]   ;;  %v7189_v51 = vld [vmem:[%s7351_s15 + $0x18] sm:$0xff]   ;;  %v7193_v30 = vld [vmem:[%s7351_s15 + $0x10] sm:$0xff]  }
 0x6fc   : > { %6877 = vmatpush3.bf16.msra.mxu0 %v7177_v8  ;;  %v7186_v54 = vld [vmem:[%s7351_s15 + $0xa0] sm:$0xff]   ;;  %v7190_v6 = vld [vmem:[%s7351_s15 + $0x98] sm:$0xff]   ;;  %v7194_v46 = vld [vmem:[%s7351_s15 + $0x90] sm:$0xff]  }
 0x6fd   : > { %6899 = vmatpush3.bf16.msra.mxu1 %v7178_v18  ;;  %6878 = vmatprep.subr.bf16.mxu0 %v7179_v0  ;;  %v7195_v39 = vld [vmem:[%s7351_s15 + $0x48] sm:$0xff]   ;;  %v7199_v24 = vld [vmem:[%s7351_s15 + $0x40] sm:$0xff]   ;;  %v7203_v27 = vld [vmem:[%s7351_s15 + $0x178] sm:$0xff]  }
 0x6fe   : > { %6900 = vmatprep.subr.bf16.mxu1 %v7180_v29  ;;  %v7196_v36 = vld [vmem:[%s7351_s15 + $0xc8] sm:$0xff]   ;;  %v7200_v28 = vld [vmem:[%s7351_s15 + $0xc0] sm:$0xff]   ;;  %v7204_v34 = vld [vmem:[%s7351_s15 + $0x1f8] sm:$0xff]  }
 0x6ff   : > { %v7197_v3 = vld [vmem:[%s7351_s15 + $0x8] sm:$0xff]   ;;  %v7201_v7 = vld [vmem:[%s7351_s15] sm:$0xff]   ;;  %v7205_v11 = vld [vmem:[%s7351_s15 + $0x138] sm:$0xff]  }
 0x700   : > { %6879 = vmatpush3.bf16.msra.mxu0 %v7181_v48  ;;  %v7198_v10 = vld [vmem:[%s7351_s15 + $0x88] sm:$0xff]   ;;  %v7202_v33 = vld [vmem:[%s7351_s15 + $0x80] sm:$0xff]   ;;  %v7206_v59 = vld [vmem:[%s7351_s15 + $0x1b8] sm:$0xff]  }
 0x701   : > { %6901 = vmatpush3.bf16.msra.mxu1 %v7182_v5  ;;  %6880 = vmatprep.subr.bf16.mxu0 %v7183_v16  ;;  %v5249_v38 = vld [vmem:[%s5248_s25] ss:$8 sm:$0xf] }
 0x702   : > { %6902 = vmatprep.subr.bf16.mxu1 %v7184_v55  ;;  %v5250_v49 = vld [vmem:[%s5248_s25] ss:$8 sm:$0xf0] }
 0x703   : > { %v13717_v47 = vor.u32 %v5250_v49, %v5249_v38  ;;  %v7207_v25 = vld [vmem:[%s7351_s15 + $0x170] sm:$0xff]   ;;  %v7211_v61 = vld [vmem:[%s7351_s15 + $0x168] sm:$0xff]   ;;  %v7215_v42 = vld [vmem:[%s7351_s15 + $0x160] sm:$0xff]  }
 0x704   : > { %6881 = vmatpush3.bf16.msra.mxu0 %v7185_v50  ;;  %v7208_v15 = vld [vmem:[%s7351_s15 + $0x1f0] sm:$0xff]   ;;  %v7212_v4 = vld [vmem:[%s7351_s15 + $0x1e8] sm:$0xff]   ;;  %v7216_v53 = vld [vmem:[%s7351_s15 + $0x1e0] sm:$0xff]  }
 0x705   : > { %6903 = vmatpush3.bf16.msra.mxu1 %v7186_v54  ;;  %6882 = vmatprep.subr.bf16.mxu0 %v7187_v1  ;;  %v5260_v14 = vrot.slane %v13717_v47, %v5259_v12  ;;  %v5268_v22 = vrot.slane %v13717_v47, %v5267_v57  ;;  %v5256_v17 = vrot.slane %v13717_v47, %v5255_v43  ;;  %v7209_v62 = vld [vmem:[%s7351_s15 + $0x130] sm:$0xff]   ;;  %v7213_v23 = vld [vmem:[%s7351_s15 + $0x128] sm:$0xff]   ;;  %v7217_v2 = vld [vmem:[%s7351_s15 + $0x120] sm:$0xff]  }
 0x706   : > { %6904 = vmatprep.subr.bf16.mxu1 %v7188_v26  ;;  %v5264_v9 = vrot.slane %v13717_v47, %v5263_v31  ;;  %v5276_v40 = vrot.slane %v13717_v47, %v5275_v52  ;;  %v5284_v44 = vrot.slane %v13717_v47, %v5283_v41  ;;  %v7210_v19 = vld [vmem:[%s7351_s15 + $0x1b0] sm:$0xff]   ;;  %v7214_v63 = vld [vmem:[%s7351_s15 + $0x1a8] sm:$0xff]   ;;  %v7218_v8 = vld [vmem:[%s7351_s15 + $0x1a0] sm:$0xff]  }
 0x707   : > { %v5294_v45 = vpack.c.bf16 %v5260_v14, %v5260_v14  ;;  %v5296_v20 = vpack.c.bf16 %v5268_v22, %v5268_v22  ;;  %v5293_v60 = vpack.c.bf16 %v5256_v17, %v5256_v17  ;;  %v7219_v18 = vld [vmem:[%s7351_s15 + $0x158] sm:$0xff]   ;;  %v7223_v5 = vld [vmem:[%s7351_s15 + $0x150] sm:$0xff]   ;;  %v7227_v54 = vld [vmem:[%s7351_s15 + $0x148] sm:$0xff]  }
 0x708   : > { %6883 = vmatpush3.bf16.msra.mxu0 %v7189_v51  ;;  %v5295_v35 = vpack.c.bf16 %v5264_v9, %v5264_v9  ;;  %v5298_v21 = vpack.c.bf16 %v5276_v40, %v5276_v40  ;;  %v5300_v32 = vpack.c.bf16 %v5284_v44, %v5284_v44  ;;  %v7220_v0 = vld [vmem:[%s7351_s15 + $0x1d8] sm:$0xff]   ;;  %v7224_v16 = vld [vmem:[%s7351_s15 + $0x1d0] sm:$0xff]   ;;  %v7228_v1 = vld [vmem:[%s7351_s15 + $0x1c8] sm:$0xff]   ;;  %v5271_v51 = vsub.s32 4, %v13699_v58 }
 0x709   : > { %6905 = vmatpush3.bf16.msra.mxu1 %v7190_v6  ;;  %6884 = vmatprep.subr.bf16.mxu0 %v7191_v13  ;;  %v7221_v29 = vld [vmem:[%s7351_s15 + $0x118] sm:$0xff]   ;;  %v7225_v55 = vld [vmem:[%s7351_s15 + $0x110] sm:$0xff]   ;;  %v7229_v26 = vld [vmem:[%s7351_s15 + $0x108] sm:$0xff]   ;;  %v5279_v6 = vsub.s32 6, %v13699_v58 }
 0x70a   : > { %6906 = vmatprep.subr.bf16.mxu1 %v7192_v37  ;;  %5846 = vmatprep.mubr.bf16.mxu0 %v5294_v45  ;;  %v7222_v48 = vld [vmem:[%s7351_s15 + $0x198] sm:$0xff]   ;;  %v7226_v50 = vld [vmem:[%s7351_s15 + $0x190] sm:$0xff]   ;;  %v7230_v56 = vld [vmem:[%s7351_s15 + $0x188] sm:$0xff]  }
 0x70b   : > { %5886 = vmatprep.mubr.bf16.mxu1 %v5296_v20  ;;  %v7231_v13 = vld [vmem:[%s7351_s15 + $0x140] sm:$0xff]  }
 0x70c   : > { %6885 = vmatpush3.bf16.msra.mxu0 %v7193_v30  ;;  %v7232_v37 = vld [vmem:[%s7351_s15 + $0x1c0] sm:$0xff]   ;;  %v5272_v30 = vrot.slane %v13717_v47, %v5271_v51 }
 0x70d   : > { %6907 = vmatpush3.bf16.msra.mxu1 %v7194_v46  ;;  %6886 = vmatprep.subr.bf16.mxu0 %v7195_v39  ;;  %v5280_v46 = vrot.slane %v13717_v47, %v5279_v6  ;;  %v7233_v39 = vld [vmem:[%s7351_s15 + $0x100] sm:$0xff]  }
 0x70e   : > { %6908 = vmatprep.subr.bf16.mxu1 %v7196_v36  ;;  %v7234_v36 = vld [vmem:[%s7351_s15 + $0x180] sm:$0xff]  }
 0x70f   : > { %v5299_v12 = vpack.c.bf16 %v5280_v46, %v5280_v46 }
 0x710   : > { %6887 = vmatpush3.bf16.msra.mxu0 %v7197_v3  ;;  %v5297_v3 = vpack.c.bf16 %v5272_v30, %v5272_v30 }
 0x711   : > { %6909 = vmatpush3.bf16.msra.mxu1 %v7198_v10  ;;  %6888 = vmatprep.subr.bf16.mxu0 %v7199_v24 }
 0x712   : > { %6910 = vmatprep.subr.bf16.mxu1 %v7200_v28 }
 0x714   : > { %6889 = vmatpush3.bf16.msra.mxu0 %v7201_v7 }
 0x715   : > { %6911 = vmatpush3.bf16.msra.mxu1 %v7202_v33  ;;  %6918 = vmatprep.subr.bf16.mxu0 %v7203_v27 }
 0x716   : > { %6940 = vmatprep.subr.bf16.mxu1 %v7204_v34 }
 0x717   : > { %5847 = vmatmul.mubr.bf16.vlgmr.msra.gmra.mxu0 %v5293_v60 }
 0x718   : > { %5887 = vmatmul.mubr.bf16.vlgmr.msra.gmra.mxu1 %v5295_v35  ;;  %6919 = vmatpush3.bf16.msra.mxu0 %v7205_v11  ;;  %v5301_v11 = vld [vmem:[#allocation3] sm:$0x1] }
 0x719   : > { %6941 = vmatpush3.bf16.msra.mxu1 %v7206_v59  ;;  %6920 = vmatprep.subr.bf16.mxu0 %v7207_v25 }
 0x71a   : > { %6942 = vmatprep.subr.bf16.mxu1 %v7208_v15  ;;  %5926 = vmatprep.mubr.bf16.mxu0 %v5298_v21 }
 0x71b   : > { %5966 = vmatprep.mubr.bf16.mxu1 %v5300_v32 }
 0x71c   : > { %6921 = vmatpush3.bf16.msra.mxu0 %v7209_v62 }
 0x71d   : > { %6943 = vmatpush3.bf16.msra.mxu1 %v7210_v19  ;;  %6922 = vmatprep.subr.bf16.mxu0 %v7211_v61 }
 0x71e   : > { %6944 = vmatprep.subr.bf16.mxu1 %v7212_v4 }
 0x720   : > { %6923 = vmatpush3.bf16.msra.mxu0 %v7213_v23 }
 0x721   : > { %6945 = vmatpush3.bf16.msra.mxu1 %v7214_v63  ;;  %6924 = vmatprep.subr.bf16.mxu0 %v7215_v42 }
 0x722   : > { %6946 = vmatprep.subr.bf16.mxu1 %v7216_v53 }
 0x724   : > { %6925 = vmatpush3.bf16.msra.mxu0 %v7217_v2 }
 0x725   : > { %6947 = vmatpush3.bf16.msra.mxu1 %v7218_v8  ;;  %6926 = vmatprep.subr.bf16.mxu0 %v7219_v18 }
 0x726   : > { %6948 = vmatprep.subr.bf16.mxu1 %v7220_v0 }
 0x728   : > { %6927 = vmatpush3.bf16.msra.mxu0 %v7221_v29 }
 0x729   : > { %6949 = vmatpush3.bf16.msra.mxu1 %v7222_v48  ;;  %6928 = vmatprep.subr.bf16.mxu0 %v7223_v5 }
 0x72a   : > { %6950 = vmatprep.subr.bf16.mxu1 %v7224_v16 }
 0x72c   : > { %6929 = vmatpush3.bf16.msra.mxu0 %v7225_v55 }
 0x72d   : > { %6951 = vmatpush3.bf16.msra.mxu1 %v7226_v50  ;;  %6930 = vmatprep.subr.bf16.mxu0 %v7227_v54 }
 0x72e   : > { %6952 = vmatprep.subr.bf16.mxu1 %v7228_v1 }
 0x730   : > { %6931 = vmatpush3.bf16.msra.mxu0 %v7229_v26 }
 0x731   : > { %6953 = vmatpush3.bf16.msra.mxu1 %v7230_v56  ;;  %6932 = vmatprep.subr.bf16.mxu0 %v7231_v13 }
 0x732   : > { %6954 = vmatprep.subr.bf16.mxu1 %v7232_v37 }
 0x734   : > { %6933 = vmatpush3.bf16.msra.mxu0 %v7233_v39 }
 0x735   : > { %6955 = vmatpush3.bf16.msra.mxu1 %v7234_v36 }
 0x737   : > { %5927 = vmatmul.mubr.bf16.vlgmr.msra.gmra.mxu0 %v5297_v3 }
 0x738   : > { %5967 = vmatmul.mubr.bf16.vlgmr.msra.gmra.mxu1 %v5299_v12 }
 0x7d7   : > { %v6890_v58 = vpop.f32.mrf.mxu0 }
 0x7d8   : > { %v6912_v10 = vpop.f32.mrf.mxu1 }
 0x7d9   : > { %v6891_v57 = vpop.f32.mrf.mxu0 }
 0x7da   : > { %v6913_v24 = vpop.f32.mrf.mxu1  ;;  %v6892_v52 = vadd.f32 %v6891_v57, %v6890_v58 }
 0x7db   : > { %v6893_v43 = vpop.f32.mrf.mxu0  ;;  %v6914_v33 = vadd.f32 %v6913_v24, %v6912_v10 }
 0x7dc   : > { %v6915_v28 = vpop.f32.mrf.mxu1 }
 0x7dd   : > { %v6894_v31 = vpop.f32.mrf.mxu0  ;;  %v5889_v27 = vadd.f32 %v6914_v33, %v6892_v52 }
 0x7de   : > { %v6916_v7 = vpop.f32.mrf.mxu1 }
 0x7f7   : > { %v6934_v41 = vpop.f32.mrf.mxu0 }
 0x7f8   : > { %v6956_v38 = vpop.f32.mrf.mxu1 }
 0x7f9   : > { %v6935_v49 = vpop.f32.mrf.mxu0 }
 0x7fa   : > { %v6957_v47 = vpop.f32.mrf.mxu1  ;;  %v6936_v34 = vadd.f32 %v6935_v49, %v6934_v41 }
 0x7fb   : > { %v6937_v14 = vpop.f32.mrf.mxu0  ;;  %v6958_v9 = vadd.f32 %v6957_v47, %v6956_v38 }
 0x7fc   : > { %v6959_v22 = vpop.f32.mrf.mxu1  ;;  %v5929_v17 = vadd.f32 %v6936_v34, %v5889_v27 }
 0x7fd   : > { %v6938_v59 = vpop.f32.mrf.mxu0 }
 0x7fe   : > { %v6960_v40 = vpop.f32.mrf.mxu1  ;;  %v5969_v44 = vadd.f32 %v6958_v9, %v5929_v17  ;;  %5980 = sbr.rel (%p6865_p5) target bundleno = 2306 (0x902), region = 64 }
 0x800   : > { %v5974_v45 = vadd.f32 %v5969_v44, %v5301_v11 }
 0x802   : > { %5976 = vst.msk [vmem:[#allocation3] sm:$0x1] %vm5975_vm2, %v5974_v45 }
 0x803   : > { %v5997_v20 = vld [vmem:[%s13829_s7 + $0x60] sm:$0xf]  ;;  %vm6003_vm14 = vcmask 1043456   ;;  %v7284_v60 = vmov 0.0   ;;  %v5996_v35 = vld [vmem:[%s13829_s7 + $0x58] sm:$0xff]  ;;  %vm7285_vm6 = vmmov 0  }
 0x804   : > { %6976 = vmatprep.subr.mxu0 %v7284_v60  ;;  %7002 = vmatprep.mubr.msk.f32.mxu0 %vm7285_vm6, %v7284_v60  ;;  %v5995_v25 = vld [vmem:[%s13829_s7 + $0x50] sm:$0xff]  ;;  %v5994_v15 = vld [vmem:[%s13829_s7 + $0x48] sm:$0xff]  ;;  %v5993_v62 = vld [vmem:[%s13829_s7 + $0x40] sm:$0xff]  ;;  %vm5999_vm11 = vcmask 818176   ;;  %vm6083_vm12 = vcmask 8192  }
 0x805   : > { %6977 = vmatpush3.msk.msra.mxu0 %vm6003_vm14, %v5997_v20  ;;  %v5992_v21 = vld [vmem:[%s13829_s7 + $0x38] sm:$0xff]  ;;  %v5991_v32 = vld [vmem:[%s13829_s7 + $0x30] sm:$0xff]  ;;  %v5990_v19 = vld [vmem:[%s13829_s7 + $0x28] sm:$0xff] }
 0x806   : > { %6978 = vmatprep.subr.mxu0 %v7284_v60  ;;  %v5989_v61 = vld [vmem:[%s13829_s7 + $0x20] sm:$0xff]  ;;  %v5988_v63 = vld [vmem:[%s13829_s7 + $0x18] sm:$0xff]  ;;  %v5987_v42 = vld [vmem:[%s13829_s7 + $0x10] sm:$0xff] }
 0x807   : > { %6979 = vmatpush3.msra.mxu0 %v5996_v35  ;;  %v5982_v23 = vld [vmem:[%s13828_s6] sm:$0x1]  ;;  %v5986_v2 = vld [vmem:[%s13829_s7 + $0x8] sm:$0xff] }
 0x808   : > { %6980 = vmatprep.subr.mxu0 %v7284_v60  ;;  %v5985_v8 = vld [vmem:[%s13829_s7] sm:$0xff] }
 0x809   : > { %6981 = vmatpush3.msra.mxu0 %v5995_v25  ;;  %v5981_v4 = vld [vmem:[#allocation3] sm:$0x1] }
 0x80a   : > { %6982 = vmatprep.subr.mxu0 %v7284_v60  ;;  %v5983_v53 = vadd.f32 %v5982_v23, %v5981_v4  ;;  %v5998_v0 = vld [vmem:[%s13830_s8] sm:$0x1] }
 0x80b   : > { %6983 = vmatpush3.msra.mxu0 %v5994_v15 }
 0x80c   : > { %6984 = vmatprep.subr.mxu0 %v7284_v60  ;;  %v5984_v18 = vmax.f32 %v5983_v53, 0.0 }
 0x80d   : > { %6985 = vmatpush3.msra.mxu0 %v5993_v62 }
 0x80e   : > { %6986 = vmatprep.subr.mxu0 %v7284_v60 }
 0x80f   : > { %6987 = vmatpush3.msra.mxu0 %v5992_v21 }
 0x810   : > { %6988 = vmatprep.subr.mxu0 %v7284_v60 }
 0x811   : > { %6989 = vmatpush3.msra.mxu0 %v5991_v32 }
 0x812   : > { %6990 = vmatprep.subr.mxu0 %v7284_v60 }
 0x813   : > { %6991 = vmatpush3.msra.mxu0 %v5990_v19 }
 0x814   : > { %6992 = vmatprep.subr.mxu0 %v7284_v60 }
 0x815   : > { %6993 = vmatpush3.msra.mxu0 %v5989_v61 }
 0x816   : > { %6994 = vmatprep.subr.mxu0 %v7284_v60 }
 0x817   : > { %6995 = vmatpush3.msra.mxu0 %v5988_v63 }
 0x818   : > { %6996 = vmatprep.subr.mxu0 %v7284_v60 }
 0x819   : > { %6997 = vmatpush3.msra.mxu0 %v5987_v42 }
 0x81a   : > { %6998 = vmatprep.subr.mxu0 %v7284_v60 }
 0x81b   : > { %6999 = vmatpush3.msra.mxu0 %v5986_v2 }
 0x81c   : > { %7000 = vmatprep.subr.mxu0 %v7284_v60 }
 0x81d   : > { %7001 = vmatpush3.msra.mxu0 %v5985_v8 }
 0x81e   : > { %7003 = vmatmul.mubr.msk.f32.vlgmr.msra.gmra.mxu0 %vm5999_vm11, %v5984_v18 }
 0x8de   : > { %v6073_v29 = vpop.f32.mrf.mxu0 }
 0x8df   : > { %v6074_v48 = vadd.f32 %v6073_v29, %v5998_v0 }
 0x8e0   : > { %v7004_v5 = vpop.f32.mrf.mxu0 }
 0x8e1   : > { %v6868_v16 = vmul.f32 -1.442695, %v6074_v48 }
 0x8e3   : > { %7235 = vpow2.f32 %v6868_v16 }
 0x8f0   : > { %v7236_v55 = vpop.eup %7235 }
 0x8f1   : > { %v6080_v50 = vadd.f32 1.0, %v7236_v55 }
 0x8f3   : > { %7237 = vrcp.f32 %v6080_v50 }
 0x900   : > { %v7238_v54 = vpop.eup %7237 }
 0x901   : > { %6084 = vst.msk [vmem:[#allocation4] sm:$0x1] %vm6083_vm12, %v7238_v54 }
 0x902 PF: > { %p7009_p6 = scmp.eq.s32.totalorder %s7343_s10, 7  ;;  %s7286_s21 = smov [#allocation4]  }
 0x903   : > { %s6092_s22 = sshll.u32 %s7286_s21, 4  ;;  %s6093_s22 = int_to_ptr.vmem [resolvable:$true] %s6092_s22 }
 0x904   : > { %s7239_s23 = scalar_lea.vmem %s6093_s22, 16  ;;  %s7245_s16 = scalar_lea.vmem %s6093_s22, 32 }
 0x905   : > { %p7240_p7 = scmp.ne.s32.totalorder %s6093_s22, %s7239_s23  ;;  %p7246_p10 = scmp.lt.s32.totalorder %s6093_s22, %s6093_s22 }
 0x906   : > { %p7247_p11 = scmp.lt.s32.totalorder %s7245_s16, %s7239_s23 }
 0x907   : > { %p7241_p8 = pnand %p7240_p7, %p7009_p6 }
 0x908   : > { %p7248_p12 = por %p7247_p11, %p7246_p10 }
 0x909   : > { %p7242_p9 = pneg %p7241_p8 }
 0x90b   : > { %p7249_p13 = pnand %p7248_p12, %p7242_p9 }
 0x90d   : > { %7252 = shalt.err (!%p7249_p13)
}
 0x90e   : > { %7006 = dma.vmem_to_hbm [thread:$0]  (%p7009_p6), %s6093_s22, 16, %s13831_s9, [#allocation5]  }
 0x90f   : > { %7268 = dma.done.wait (%p7009_p6), [#allocation5], 16  }
 0x910   : > { %7270 = vsyncadd (%p7009_p6), [#allocation5], 4294967280 }
 0x911 PF: > { %s20_s30 = sadd.s32 1, %s7273_s30  }
 0x912   : > { %p17_p0 = scmp.ge.s32.totalorder %s20_s30, 10  }
 0x914   :  { %19 = sbr.rel (!%p17_p0) target bundleno = 1 (0x1), region = 123 }
 0x919   :  { %6105 = vsyncpa [#allocation5], 1 }
 0x91a   :  { %6107 = vsyncpa [#allocation5 + $0x1], 1 }

</bundles_post_ra>
